<compile_context>
chip_gen: v7x
topology: tpu7x:2x2x1
jax: 0.10.0
libtpu: 0.0.40
codegen_flags: <defaults>
</compile_context>

<pallas_src>
import functools

import jax
import jax.numpy as jnp
from jax.experimental import pallas as pl
from jax.experimental.pallas import tpu as pltpu

# Set to jnp.bfloat16 on v6e/v7x for ~2x MXU throughput and ~half the DMA
# bytes on the conv matmuls (accumulation stays float32 inside the kernel).
# Kept float32 by default to match the fp32 PyTorch reference numerics.
# TODO(synk): flip to bf16 after validating tolerance vs the torch reference.
MXU_INPUT_DTYPE = jnp.float32


def _round_up(x, m):
    return (x + m - 1) // m * m


def _pick_tile_m(m):
    if m >= 2048:
        return 512
    if m >= 512:
        return 256
    return 128


# ----------------------------------------------------------------------------
# Pallas kernels
# ----------------------------------------------------------------------------
def _gconv_matmul_kernel(a_ref, w_ref, b_ref, o_ref, *, act):
    # a_ref: (1, TM, K), w_ref: (1, K, TN), b_ref: (1, 1, TN), o_ref: (TM, TN)
    acc = jnp.dot(a_ref[0], w_ref[0], preferred_element_type=jnp.float32)
    acc = acc + b_ref[0]
    if act == "relu":
        acc = jnp.maximum(acc, 0.0)
    elif act == "sigmoid":
        acc = jax.nn.sigmoid(acc)
    o_ref[...] = acc.astype(o_ref.dtype)


def _maxpool_kernel(w_ref, o_ref, *, kk):
    # w_ref: (KK, TM, C) -> running max over KK with plain VPU maxima.
    m = w_ref[0]
    for t in range(1, kk):
        m = jnp.maximum(m, w_ref[t])
    o_ref[...] = m


def _lrn_kernel(x_ref, o_ref, *, size, alpha, beta, k):
    # x_ref: (TM, C).  Channel-window sum via a banded (C, C) matmul on the
    # MXU; band zeros outside [c - size//2, c + (size-1)//2] reproduce
    # F.local_response_norm's zero channel padding exactly.
    x = x_ref[...]
    c = x.shape[-1]
    sq = x * x
    row = jax.lax.broadcasted_iota(jnp.int32, (c, c), 0)   # source channel j
    col = jax.lax.broadcasted_iota(jnp.int32, (c, c), 1)   # output channel
    d = row - col
    band = ((d >= -(size // 2)) & (d <= (size - 1) // 2)).astype(jnp.float32)
    s = jnp.dot(sq, band, preferred_element_type=jnp.float32)
    denom = k + (alpha / size) * s
    o_ref[...] = (x * jnp.exp(-beta * jnp.log(denom))).astype(o_ref.dtype)


# ----------------------------------------------------------------------------
# Plain-JAX glue: shifted/strided spatial views and layout plumbing
# ----------------------------------------------------------------------------
def _extract_windows(x, kh, kw, stride, pad):
    """x: [N, H, W, C] -> list of kh*kw shifted strided views [N, oh, ow, C]."""
    if pad > 0:
        x = jnp.pad(x, ((0, 0), (pad, pad), (pad, pad), (0, 0)))
    n, h, w, c = x.shape
    oh = (h - kh) // stride + 1
    ow = (w - kw) // stride + 1
    cols = []
    for i in range(kh):
        for j in range(kw):
            cols.append(
                x[:, i:i + stride * (oh - 1) + 1:stride,
                     j:j + stride * (ow - 1) + 1:stride, :])
    return cols, oh, ow


def conv2d_grouped(x, wk, b, *, kh, kw, stride, pad, act, cin_per_group):
    """x: [N,H,W,C] NHWC.  wk: [G, kh*kw*cin_pg, TN] pre-transposed (and Cout
    padded) weights, b: [G, 1, TN].  Returns [N, oh, ow, G*TN]."""
    g, kdim, tn = wk.shape
    assert kdim == kh * kw * cin_per_group
    n = x.shape[0]

    # TODO(synk): fuse im2col into the matmul kernel (grid axis over kh*kw with
    # a VMEM accumulator) to avoid materializing the kh*kw-duplicated patch
    # tensor in HBM; at realistic resolutions this is the remaining HBM win.
    cols, oh, ow = _extract_windows(x[..., :g * cin_per_group], kh, kw, stride, pad)
    patches = jnp.stack(cols, axis=3)                  # [N, oh, ow, KK, Cin]
    m = n * oh * ow
    patches = patches.reshape(m, kh * kw, g * cin_per_group)
    a = jnp.stack(
        [patches[:, :, gi * cin_per_group:(gi + 1) * cin_per_group]
             .reshape(m, kdim) for gi in range(g)],
        axis=0)                                        # [G, M, K] (kh,kw,cin order)
    a = a.astype(wk.dtype)

    tm = _pick_tile_m(m)
    mp = _round_up(m, tm)
    if mp != m:
        a = jnp.pad(a, ((0, 0), (0, mp - m), (0, 0)))

    out = pl.pallas_call(
        functools.partial(_gconv_matmul_kernel, act=act),
        out_shape=jax.ShapeDtypeStruct((mp, g * tn), jnp.float32),
        grid=(g, mp // tm),
        in_specs=[
            pl.BlockSpec((1, tm, kdim), lambda gi, mi: (gi, mi, 0)),
            pl.BlockSpec((1, kdim, tn), lambda gi, mi: (gi, 0, 0)),
            pl.BlockSpec((1, 1, tn), lambda gi, mi: (gi, 0, 0)),
        ],
        out_specs=pl.BlockSpec((tm, tn), lambda gi, mi: (mi, gi)),
        compiler_params=pltpu.CompilerParams(
            dimension_semantics=("parallel", "parallel")),
    )(a, wk, b)
    return out[:m].reshape(n, oh, ow, g * tn)


def maxpool2d(x, k, stride):
    n, h, w, c = x.shape
    cols, oh, ow = _extract_windows(x, k, k, stride, 0)
    m = n * oh * ow
    # [KK, M, C]: KK on a major dim (no sublane waste), C dense on lanes.
    windows = jnp.stack(cols, axis=0).reshape(k * k, m, c)
    tm = _pick_tile_m(m)
    mp = _round_up(m, tm)
    if mp != m:
        windows = jnp.pad(windows, ((0, 0), (0, mp - m), (0, 0)))
    out = pl.pallas_call(
        functools.partial(_maxpool_kernel, kk=k * k),
        out_shape=jax.ShapeDtypeStruct((mp, c), jnp.float32),
        grid=(mp // tm,),
        in_specs=[pl.BlockSpec((k * k, tm, c), lambda mi: (0, mi, 0))],
        out_specs=pl.BlockSpec((tm, c), lambda mi: (mi, 0)),
        compiler_params=pltpu.CompilerParams(dimension_semantics=("parallel",)),
    )(windows)
    return out[:m].reshape(n, oh, ow, c)


def lrn_nhwc(x, size=5, alpha=1e-4, beta=0.75, k=1.0):
    n, h, w, c = x.shape
    m = n * h * w
    x2 = x.reshape(m, c)
    tm = _pick_tile_m(m)
    mp = _round_up(m, tm)
    if mp != m:
        x2 = jnp.pad(x2, ((0, mp - m), (0, 0)))
    out = pl.pallas_call(
        functools.partial(_lrn_kernel, size=size, alpha=alpha, beta=beta, k=k),
        out_shape=jax.ShapeDtypeStruct((mp, c), jnp.float32),
        grid=(mp // tm,),
        in_specs=[pl.BlockSpec((tm, c), lambda mi: (mi, 0))],
        out_specs=pl.BlockSpec((tm, c), lambda mi: (mi, 0)),
        compiler_params=pltpu.CompilerParams(dimension_semantics=("parallel",)),
    )(x2)
    return out[:m].reshape(n, h, w, c)


# ----------------------------------------------------------------------------
# Parameters (raw PyTorch layout) + one-time hoisted layout prep
# ----------------------------------------------------------------------------
def init_params(key):
    k1, k2, k3, k4, k5, k6 = jax.random.split(key, 6)
    return {
        "w1": jax.random.normal(k1, (96, 3, 11, 11), jnp.float32) * 0.02,
        "b1": jax.random.normal(k2, (96,), jnp.float32) * 0.02,
        "w2": jax.random.normal(k3, (256, 48, 5, 5), jnp.float32) * 0.02,  # groups=2
        "b2": jax.random.normal(k4, (256,), jnp.float32) * 0.02,
        "w3": jax.random.normal(k5, (384, 256, 3, 3), jnp.float32) * 0.02,
        "b3": jax.random.normal(k6, (384,), jnp.float32) * 0.02,
    }


def _prep_weight(w, cout_pad=None):
    cout, cin, kh, kw = w.shape
    wk = jnp.transpose(w, (2, 3, 1, 0)).reshape(kh * kw * cin, cout)
    if cout_pad is not None and cout_pad > cout:
        wk = jnp.pad(wk, ((0, 0), (0, cout_pad - cout)))
    return wk.astype(MXU_INPUT_DTYPE)


def prepare_params(p):
    """One-time weight layout prep: transpose/reshape, pad Cout 96->128 for
    conv1 (lane-dense stores), stack the two conv2 groups, cast for the MXU."""
    wk1 = _prep_weight(p["w1"], cout_pad=128)[None]                 # [1, 363, 128]
    b1 = jnp.pad(p["b1"], (0, 128 - 96)).reshape(1, 1, 128)
    wk2 = jnp.stack([_prep_weight(p["w2"][g * 128:(g + 1) * 128])
                     for g in range(2)], axis=0)                    # [2, 1200, 128]
    b2 = p["b2"].reshape(2, 1, 128)
    wk3 = _prep_weight(p["w3"])[None]                               # [1, 2304, 384]
    b3 = p["b3"].reshape(1, 1, 384)
    return {"wk1": wk1, "b1": b1, "wk2": wk2, "b2": b2, "wk3": wk3, "b3": b3}


# ----------------------------------------------------------------------------
# feature_extractor forward
# ----------------------------------------------------------------------------
def feature_extractor_forward(x_nchw, pp):
    # NCHW -> NHWC (channels -> lanes)
    x = jnp.transpose(x_nchw, (0, 2, 3, 1)).astype(jnp.float32)

    # Conv2d(3, 96, k=11, stride=4) + ReLU  (Cout zero-padded to 128 lanes)
    x = conv2d_grouped(x, pp["wk1"], pp["b1"], kh=11, kw=11, stride=4, pad=0,
                       act="relu", cin_per_group=3)
    # MaxPool2d(3, stride=2)
    x = maxpool2d(x, 3, 2)
    # LocalResponseNorm(size=5, alpha=1e-4, beta=0.75, k=1)
    x = lrn_nhwc(x, size=5, alpha=1e-4, beta=0.75, k=1.0)

    # Conv2d(96, 256, k=5, padding=2, groups=2) + ReLU — single pallas_call,
    # group grid axis, both halves written into one output buffer.
    x = conv2d_grouped(x, pp["wk2"], pp["b2"], kh=5, kw=5, stride=1, pad=2,
                       act="relu", cin_per_group=48)
    # TODO(synk): fuse pool/LRN into the conv epilogue so activations stay in
    # VMEM across stages (everything fits VMEM on v5e/v6e/v7x at these sizes).
    x = maxpool2d(x, 3, 2)
    x = lrn_nhwc(x, size=5, alpha=1e-4, beta=0.75, k=1.0)

    # Conv2d(256, 384, k=3, padding=1) + Sigmoid
    x = conv2d_grouped(x, pp["wk3"], pp["b3"], kh=3, kw=3, stride=1, pad=1,
                       act="sigmoid", cin_per_group=256)

    # NHWC -> NCHW (match PyTorch output layout)
    return jnp.transpose(x, (0, 3, 1, 2))


if __name__ == "__main__":
    key = jax.random.PRNGKey(0)
    kx, kp = jax.random.split(key)
    # 67 -> conv(11,s4): 15 -> pool(3,s2): 7 -> conv(5,p2): 7 -> pool: 3 -> conv(3,p1): 3
    x = jax.random.normal(kx, (2, 3, 67, 67), jnp.float32)
    params = init_params(kp)
    pp = prepare_params(params)      # hoisted, one-time weight layout prep

    fwd = jax.jit(feature_extractor_forward)
    out = jax.block_until_ready(fwd(x, pp))
    assert out.shape == (2, 384, 3, 3), out.shape
    assert bool(jnp.all(jnp.isfinite(out)))
    print("KERNEL_OK")
</pallas_src>

<mosaic_0001>
module attributes {stable_mosaic.version = 11 : i64} {
  func.func @_gconv_matmul_kernel(%arg0: i32, %arg1: i32, %arg2: memref<1x128x363xf32, #tpu.memory_space<vmem>>, %arg3: memref<1x363x128xf32, #tpu.memory_space<vmem>>, %arg4: memref<1x1x128xf32, #tpu.memory_space<vmem>>, %arg5: memref<128x128xf32, #tpu.memory_space<vmem>>) attributes {dimension_semantics = [#tpu.dimension_semantics<parallel>, #tpu.dimension_semantics<parallel>], iteration_bounds = array<i64: 1, 4>, scalar_prefetch = 0 : i64, scratch_operands = 0 : i64, tpu.core_type = #tpu.core_type<tc>, window_params = [{transform_indices = @transform_0, window_bounds = array<i64: 1, 128, 363>}, {transform_indices = @transform_1, window_bounds = array<i64: 1, 363, 128>}, {transform_indices = @transform_2, window_bounds = array<i64: 1, 1, 128>}, {transform_indices = @transform_3, window_bounds = array<i64: 128, 128>}]} {
    %c0 = arith.constant 0 : index
    %c0_0 = arith.constant 0 : index
    %c0_1 = arith.constant 0 : index
    %0 = vector.load %arg2[%c0, %c0_0, %c0_1] : memref<1x128x363xf32, #tpu.memory_space<vmem>>, vector<1x128x363xf32>
    %1 = vector.shape_cast %0 : vector<1x128x363xf32> to vector<128x363xf32>
    %c0_2 = arith.constant 0 : index
    %c0_3 = arith.constant 0 : index
    %c0_4 = arith.constant 0 : index
    %2 = vector.load %arg3[%c0_2, %c0_3, %c0_4] : memref<1x363x128xf32, #tpu.memory_space<vmem>>, vector<1x363x128xf32>
    %3 = vector.shape_cast %2 : vector<1x363x128xf32> to vector<363x128xf32>
    %cst = arith.constant dense<0.000000e+00> : vector<128x128xf32>
    %4 = tpu.matmul %1, %3, %cst {dimension_numbers = #tpu.dot_dimension_numbers<[1], [0], [0], [1], [0, 0, 1, 1], [], []>} : vector<128x363xf32>, vector<363x128xf32>, vector<128x128xf32> -> vector<128x128xf32>
    %c0_5 = arith.constant 0 : index
    %c0_6 = arith.constant 0 : index
    %c0_7 = arith.constant 0 : index
    %5 = vector.load %arg4[%c0_5, %c0_6, %c0_7] : memref<1x1x128xf32, #tpu.memory_space<vmem>>, vector<1x1x128xf32>
    %6 = vector.shape_cast %5 : vector<1x1x128xf32> to vector<1x128xf32>
    %7 = vector.broadcast %6 : vector<1x128xf32> to vector<128x128xf32>
    %8 = arith.addf %4, %7 : vector<128x128xf32>
    %cst_8 = arith.constant 0.000000e+00 : f32
    %9 = vector.broadcast %cst_8 : f32 to vector<128x128xf32>
    %10 = arith.maximumf %8, %9 : vector<128x128xf32>
    %c0_9 = arith.constant 0 : index
    %c0_10 = arith.constant 0 : index
    %11 = vector.load %arg5[%c0_9, %c0_10] : memref<128x128xf32, #tpu.memory_space<vmem>>, vector<128x128xf32>
    tpu.vector_store %arg5[%c0_9, %c0_10], %10 {strides = array<i32>} : memref<128x128xf32, #tpu.memory_space<vmem>>, vector<128x128xf32>,
    return
  }
  func.func @transform_0(%arg0: i32, %arg1: i32) -> (i32, i32, i32) {
    %c0_i32 = arith.constant 0 : i32
    %c0_i32_0 = arith.constant 0 : i32
    return %arg0, %arg1, %c0_i32 : i32, i32, i32
  }
  func.func @transform_1(%arg0: i32, %arg1: i32) -> (i32, i32, i32) {
    %c0_i32 = arith.constant 0 : i32
    %c0_i32_0 = arith.constant 0 : i32
    %c0_i32_1 = arith.constant 0 : i32
    return %arg0, %c0_i32, %c0_i32_0 : i32, i32, i32
  }
  func.func @transform_2(%arg0: i32, %arg1: i32) -> (i32, i32, i32) {
    %c0_i32 = arith.constant 0 : i32
    %c0_i32_0 = arith.constant 0 : i32
    %c0_i32_1 = arith.constant 0 : i32
    return %arg0, %c0_i32, %c0_i32_0 : i32, i32, i32
  }
  func.func @transform_3(%arg0: i32, %arg1: i32) -> (i32, i32) {
    %c0_i32 = arith.constant 0 : i32
    return %arg1, %arg0 : i32, i32
  }
}

module attributes {stable_mosaic.version = 11 : i64} {
  func.func @_maxpool_kernel(%arg0: i32, %arg1: memref<9x128x128xf32, #tpu.memory_space<vmem>>, %arg2: memref<128x128xf32, #tpu.memory_space<vmem>>) attributes {dimension_semantics = [#tpu.dimension_semantics<parallel>], iteration_bounds = array<i64: 1>, scalar_prefetch = 0 : i64, scratch_operands = 0 : i64, tpu.core_type = #tpu.core_type<tc>, window_params = [{transform_indices = @transform_0, window_bounds = array<i64: 9, 128, 128>}, {transform_indices = @transform_1, window_bounds = array<i64: 128, 128>}]} {
    %c0 = arith.constant 0 : index
    %c0_0 = arith.constant 0 : index
    %c0_1 = arith.constant 0 : index
    %0 = vector.load %arg1[%c0, %c0_0, %c0_1] : memref<9x128x128xf32, #tpu.memory_space<vmem>>, vector<1x128x128xf32>
    %1 = vector.shape_cast %0 : vector<1x128x128xf32> to vector<128x128xf32>
    %c1 = arith.constant 1 : index
    %c0_2 = arith.constant 0 : index
    %c0_3 = arith.constant 0 : index
    %2 = vector.load %arg1[%c1, %c0_2, %c0_3] : memref<9x128x128xf32, #tpu.memory_space<vmem>>, vector<1x128x128xf32>
    %3 = vector.shape_cast %2 : vector<1x128x128xf32> to vector<128x128xf32>
    %4 = arith.maximumf %1, %3 : vector<128x128xf32>
    %c2 = arith.constant 2 : index
    %c0_4 = arith.constant 0 : index
    %c0_5 = arith.constant 0 : index
    %5 = vector.load %arg1[%c2, %c0_4, %c0_5] : memref<9x128x128xf32, #tpu.memory_space<vmem>>, vector<1x128x128xf32>
    %6 = vector.shape_cast %5 : vector<1x128x128xf32> to vector<128x128xf32>
    %7 = arith.maximumf %4, %6 : vector<128x128xf32>
    %c3 = arith.constant 3 : index
    %c0_6 = arith.constant 0 : index
    %c0_7 = arith.constant 0 : index
    %8 = vector.load %arg1[%c3, %c0_6, %c0_7] : memref<9x128x128xf32, #tpu.memory_space<vmem>>, vector<1x128x128xf32>
    %9 = vector.shape_cast %8 : vector<1x128x128xf32> to vector<128x128xf32>
    %10 = arith.maximumf %7, %9 : vector<128x128xf32>
    %c4 = arith.constant 4 : index
    %c0_8 = arith.constant 0 : index
    %c0_9 = arith.constant 0 : index
    %11 = vector.load %arg1[%c4, %c0_8, %c0_9] : memref<9x128x128xf32, #tpu.memory_space<vmem>>, vector<1x128x128xf32>
    %12 = vector.shape_cast %11 : vector<1x128x128xf32> to vector<128x128xf32>
    %13 = arith.maximumf %10, %12 : vector<128x128xf32>
    %c5 = arith.constant 5 : index
    %c0_10 = arith.constant 0 : index
    %c0_11 = arith.constant 0 : index
    %14 = vector.load %arg1[%c5, %c0_10, %c0_11] : memref<9x128x128xf32, #tpu.memory_space<vmem>>, vector<1x128x128xf32>
    %15 = vector.shape_cast %14 : vector<1x128x128xf32> to vector<128x128xf32>
    %16 = arith.maximumf %13, %15 : vector<128x128xf32>
    %c6 = arith.constant 6 : index
    %c0_12 = arith.constant 0 : index
    %c0_13 = arith.constant 0 : index
    %17 = vector.load %arg1[%c6, %c0_12, %c0_13] : memref<9x128x128xf32, #tpu.memory_space<vmem>>, vector<1x128x128xf32>
    %18 = vector.shape_cast %17 : vector<1x128x128xf32> to vector<128x128xf32>
    %19 = arith.maximumf %16, %18 : vector<128x128xf32>
    %c7 = arith.constant 7 : index
    %c0_14 = arith.constant 0 : index
    %c0_15 = arith.constant 0 : index
    %20 = vector.load %arg1[%c7, %c0_14, %c0_15] : memref<9x128x128xf32, #tpu.memory_space<vmem>>, vector<1x128x128xf32>
    %21 = vector.shape_cast %20 : vector<1x128x128xf32> to vector<128x128xf32>
    %22 = arith.maximumf %19, %21 : vector<128x128xf32>
    %c8 = arith.constant 8 : index
    %c0_16 = arith.constant 0 : index
    %c0_17 = arith.constant 0 : index
    %23 = vector.load %arg1[%c8, %c0_16, %c0_17] : memref<9x128x128xf32, #tpu.memory_space<vmem>>, vector<1x128x128xf32>
    %24 = vector.shape_cast %23 : vector<1x128x128xf32> to vector<128x128xf32>
    %25 = arith.maximumf %22, %24 : vector<128x128xf32>
    %c0_18 = arith.constant 0 : index
    %c0_19 = arith.constant 0 : index
    %26 = vector.load %arg2[%c0_18, %c0_19] : memref<128x128xf32, #tpu.memory_space<vmem>>, vector<128x128xf32>
    tpu.vector_store %arg2[%c0_18, %c0_19], %25 {strides = array<i32>} : memref<128x128xf32, #tpu.memory_space<vmem>>, vector<128x128xf32>,
    return
  }
  func.func @transform_0(%arg0: i32) -> (i32, i32, i32) {
    %c0_i32 = arith.constant 0 : i32
    %c0_i32_0 = arith.constant 0 : i32
    %c0_i32_1 = arith.constant 0 : i32
    return %c0_i32, %arg0, %c0_i32_0 : i32, i32, i32
  }
  func.func @transform_1(%arg0: i32) -> (i32, i32) {
    %c0_i32 = arith.constant 0 : i32
    %c0_i32_0 = arith.constant 0 : i32
    return %arg0, %c0_i32 : i32, i32
  }
}

module attributes {stable_mosaic.version = 11 : i64} {
  func.func @_lrn_kernel(%arg0: i32, %arg1: memref<128x128xf32, #tpu.memory_space<vmem>>, %arg2: memref<128x128xf32, #tpu.memory_space<vmem>>) attributes {dimension_semantics = [#tpu.dimension_semantics<parallel>], iteration_bounds = array<i64: 1>, scalar_prefetch = 0 : i64, scratch_operands = 0 : i64, tpu.core_type = #tpu.core_type<tc>, window_params = [{transform_indices = @transform_0, window_bounds = array<i64: 128, 128>}, {transform_indices = @transform_1, window_bounds = array<i64: 128, 128>}]} {
    %c0 = arith.constant 0 : index
    %c0_0 = arith.constant 0 : index
    %0 = vector.load %arg1[%c0, %c0_0] : memref<128x128xf32, #tpu.memory_space<vmem>>, vector<128x128xf32>
    %1 = arith.mulf %0, %0 : vector<128x128xf32>
    %2 = tpu.iota {dimensions = array<i32: 0>} : vector<128x128xi32>
    %3 = tpu.iota {dimensions = array<i32: 1>} : vector<128x128xi32>
    %4 = arith.subi %2, %3 : vector<128x128xi32>
    %c-2_i32 = arith.constant -2 : i32
    %5 = vector.broadcast %c-2_i32 : i32 to vector<128x128xi32>
    %6 = arith.cmpi sge, %4, %5 : vector<128x128xi32>
    %c2_i32 = arith.constant 2 : i32
    %7 = vector.broadcast %c2_i32 : i32 to vector<128x128xi32>
    %8 = arith.cmpi sle, %4, %7 : vector<128x128xi32>
    %9 = arith.andi %6, %8 : vector<128x128xi1>
    %10 = arith.extui %9 : vector<128x128xi1> to vector<128x128xi32>
    %11 = arith.sitofp %10 : vector<128x128xi32> to vector<128x128xf32>
    %cst = arith.constant dense<0.000000e+00> : vector<128x128xf32>
    %12 = tpu.matmul %1, %11, %cst {dimension_numbers = #tpu.dot_dimension_numbers<[1], [0], [0], [1], [0, 0, 1, 1], [], []>} : vector<128x128xf32>, vector<128x128xf32>, vector<128x128xf32> -> vector<128x128xf32>
    %cst_1 = arith.constant 2.000000e-05 : f32
    %13 = vector.broadcast %cst_1 : f32 to vector<128x128xf32>
    %14 = arith.mulf %13, %12 : vector<128x128xf32>
    %cst_2 = arith.constant 1.000000e+00 : f32
    %15 = vector.broadcast %cst_2 : f32 to vector<128x128xf32>
    %16 = arith.addf %15, %14 : vector<128x128xf32>
    %17 = math.log %16 : vector<128x128xf32>
    %cst_3 = arith.constant -7.500000e-01 : f32
    %18 = vector.broadcast %cst_3 : f32 to vector<128x128xf32>
    %19 = arith.mulf %18, %17 : vector<128x128xf32>
    %20 = math.exp %19 : vector<128x128xf32>
    %21 = arith.mulf %0, %20 : vector<128x128xf32>
    %c0_4 = arith.constant 0 : index
    %c0_5 = arith.constant 0 : index
    %22 = vector.load %arg2[%c0_4, %c0_5] : memref<128x128xf32, #tpu.memory_space<vmem>>, vector<128x128xf32>
    tpu.vector_store %arg2[%c0_4, %c0_5], %21 {strides = array<i32>} : memref<128x128xf32, #tpu.memory_space<vmem>>, vector<128x128xf32>,
    return
  }
  func.func @transform_0(%arg0: i32) -> (i32, i32) {
    %c0_i32 = arith.constant 0 : i32
    %c0_i32_0 = arith.constant 0 : i32
    return %arg0, %c0_i32 : i32, i32
  }
  func.func @transform_1(%arg0: i32) -> (i32, i32) {
    %c0_i32 = arith.constant 0 : i32
    %c0_i32_0 = arith.constant 0 : i32
    return %arg0, %c0_i32 : i32, i32
  }
}

module attributes {stable_mosaic.version = 11 : i64} {
  func.func @_gconv_matmul_kernel(%arg0: i32, %arg1: i32, %arg2: memref<1x128x1200xf32, #tpu.memory_space<vmem>>, %arg3: memref<1x1200x128xf32, #tpu.memory_space<vmem>>, %arg4: memref<1x1x128xf32, #tpu.memory_space<vmem>>, %arg5: memref<128x128xf32, #tpu.memory_space<vmem>>) attributes {dimension_semantics = [#tpu.dimension_semantics<parallel>, #tpu.dimension_semantics<parallel>], iteration_bounds = array<i64: 2, 1>, scalar_prefetch = 0 : i64, scratch_operands = 0 : i64, tpu.core_type = #tpu.core_type<tc>, window_params = [{transform_indices = @transform_0, window_bounds = array<i64: 1, 128, 1200>}, {transform_indices = @transform_1, window_bounds = array<i64: 1, 1200, 128>}, {transform_indices = @transform_2, window_bounds = array<i64: 1, 1, 128>}, {transform_indices = @transform_3, window_bounds = array<i64: 128, 128>}]} {
    %c0 = arith.constant 0 : index
    %c0_0 = arith.constant 0 : index
    %c0_1 = arith.constant 0 : index
    %0 = vector.load %arg2[%c0, %c0_0, %c0_1] : memref<1x128x1200xf32, #tpu.memory_space<vmem>>, vector<1x128x1200xf32>
    %1 = vector.shape_cast %0 : vector<1x128x1200xf32> to vector<128x1200xf32>
    %c0_2 = arith.constant 0 : index
    %c0_3 = arith.constant 0 : index
    %c0_4 = arith.constant 0 : index
    %2 = vector.load %arg3[%c0_2, %c0_3, %c0_4] : memref<1x1200x128xf32, #tpu.memory_space<vmem>>, vector<1x1200x128xf32>
    %3 = vector.shape_cast %2 : vector<1x1200x128xf32> to vector<1200x128xf32>
    %cst = arith.constant dense<0.000000e+00> : vector<128x128xf32>
    %4 = tpu.matmul %1, %3, %cst {dimension_numbers = #tpu.dot_dimension_numbers<[1], [0], [0], [1], [0, 0, 1, 1], [], []>} : vector<128x1200xf32>, vector<1200x128xf32>, vector<128x128xf32> -> vector<128x128xf32>
    %c0_5 = arith.constant 0 : index
    %c0_6 = arith.constant 0 : index
    %c0_7 = arith.constant 0 : index
    %5 = vector.load %arg4[%c0_5, %c0_6, %c0_7] : memref<1x1x128xf32, #tpu.memory_space<vmem>>, vector<1x1x128xf32>
    %6 = vector.shape_cast %5 : vector<1x1x128xf32> to vector<1x128xf32>
    %7 = vector.broadcast %6 : vector<1x128xf32> to vector<128x128xf32>
    %8 = arith.addf %4, %7 : vector<128x128xf32>
    %cst_8 = arith.constant 0.000000e+00 : f32
    %9 = vector.broadcast %cst_8 : f32 to vector<128x128xf32>
    %10 = arith.maximumf %8, %9 : vector<128x128xf32>
    %c0_9 = arith.constant 0 : index
    %c0_10 = arith.constant 0 : index
    %11 = vector.load %arg5[%c0_9, %c0_10] : memref<128x128xf32, #tpu.memory_space<vmem>>, vector<128x128xf32>
    tpu.vector_store %arg5[%c0_9, %c0_10], %10 {strides = array<i32>} : memref<128x128xf32, #tpu.memory_space<vmem>>, vector<128x128xf32>,
    return
  }
  func.func @transform_0(%arg0: i32, %arg1: i32) -> (i32, i32, i32) {
    %c0_i32 = arith.constant 0 : i32
    %c0_i32_0 = arith.constant 0 : i32
    return %arg0, %arg1, %c0_i32 : i32, i32, i32
  }
  func.func @transform_1(%arg0: i32, %arg1: i32) -> (i32, i32, i32) {
    %c0_i32 = arith.constant 0 : i32
    %c0_i32_0 = arith.constant 0 : i32
    %c0_i32_1 = arith.constant 0 : i32
    return %arg0, %c0_i32, %c0_i32_0 : i32, i32, i32
  }
  func.func @transform_2(%arg0: i32, %arg1: i32) -> (i32, i32, i32) {
    %c0_i32 = arith.constant 0 : i32
    %c0_i32_0 = arith.constant 0 : i32
    %c0_i32_1 = arith.constant 0 : i32
    return %arg0, %c0_i32, %c0_i32_0 : i32, i32, i32
  }
  func.func @transform_3(%arg0: i32, %arg1: i32) -> (i32, i32) {
    %c0_i32 = arith.constant 0 : i32
    return %arg1, %arg0 : i32, i32
  }
}

module attributes {stable_mosaic.version = 11 : i64} {
  func.func @_maxpool_kernel(%arg0: i32, %arg1: memref<9x128x256xf32, #tpu.memory_space<vmem>>, %arg2: memref<128x256xf32, #tpu.memory_space<vmem>>) attributes {dimension_semantics = [#tpu.dimension_semantics<parallel>], iteration_bounds = array<i64: 1>, scalar_prefetch = 0 : i64, scratch_operands = 0 : i64, tpu.core_type = #tpu.core_type<tc>, window_params = [{transform_indices = @transform_0, window_bounds = array<i64: 9, 128, 256>}, {transform_indices = @transform_1, window_bounds = array<i64: 128, 256>}]} {
    %c0 = arith.constant 0 : index
    %c0_0 = arith.constant 0 : index
    %c0_1 = arith.constant 0 : index
    %0 = vector.load %arg1[%c0, %c0_0, %c0_1] : memref<9x128x256xf32, #tpu.memory_space<vmem>>, vector<1x128x256xf32>
    %1 = vector.shape_cast %0 : vector<1x128x256xf32> to vector<128x256xf32>
    %c1 = arith.constant 1 : index
    %c0_2 = arith.constant 0 : index
    %c0_3 = arith.constant 0 : index
    %2 = vector.load %arg1[%c1, %c0_2, %c0_3] : memref<9x128x256xf32, #tpu.memory_space<vmem>>, vector<1x128x256xf32>
    %3 = vector.shape_cast %2 : vector<1x128x256xf32> to vector<128x256xf32>
    %4 = arith.maximumf %1, %3 : vector<128x256xf32>
    %c2 = arith.constant 2 : index
    %c0_4 = arith.constant 0 : index
    %c0_5 = arith.constant 0 : index
    %5 = vector.load %arg1[%c2, %c0_4, %c0_5] : memref<9x128x256xf32, #tpu.memory_space<vmem>>, vector<1x128x256xf32>
    %6 = vector.shape_cast %5 : vector<1x128x256xf32> to vector<128x256xf32>
    %7 = arith.maximumf %4, %6 : vector<128x256xf32>
    %c3 = arith.constant 3 : index
    %c0_6 = arith.constant 0 : index
    %c0_7 = arith.constant 0 : index
    %8 = vector.load %arg1[%c3, %c0_6, %c0_7] : memref<9x128x256xf32, #tpu.memory_space<vmem>>, vector<1x128x256xf32>
    %9 = vector.shape_cast %8 : vector<1x128x256xf32> to vector<128x256xf32>
    %10 = arith.maximumf %7, %9 : vector<128x256xf32>
    %c4 = arith.constant 4 : index
    %c0_8 = arith.constant 0 : index
    %c0_9 = arith.constant 0 : index
    %11 = vector.load %arg1[%c4, %c0_8, %c0_9] : memref<9x128x256xf32, #tpu.memory_space<vmem>>, vector<1x128x256xf32>
    %12 = vector.shape_cast %11 : vector<1x128x256xf32> to vector<128x256xf32>
    %13 = arith.maximumf %10, %12 : vector<128x256xf32>
    %c5 = arith.constant 5 : index
    %c0_10 = arith.constant 0 : index
    %c0_11 = arith.constant 0 : index
    %14 = vector.load %arg1[%c5, %c0_10, %c0_11] : memref<9x128x256xf32, #tpu.memory_space<vmem>>, vector<1x128x256xf32>
    %15 = vector.shape_cast %14 : vector<1x128x256xf32> to vector<128x256xf32>
    %16 = arith.maximumf %13, %15 : vector<128x256xf32>
    %c6 = arith.constant 6 : index
    %c0_12 = arith.constant 0 : index
    %c0_13 = arith.constant 0 : index
    %17 = vector.load %arg1[%c6, %c0_12, %c0_13] : memref<9x128x256xf32, #tpu.memory_space<vmem>>, vector<1x128x256xf32>
    %18 = vector.shape_cast %17 : vector<1x128x256xf32> to vector<128x256xf32>
    %19 = arith.maximumf %16, %18 : vector<128x256xf32>
    %c7 = arith.constant 7 : index
    %c0_14 = arith.constant 0 : index
    %c0_15 = arith.constant 0 : index
    %20 = vector.load %arg1[%c7, %c0_14, %c0_15] : memref<9x128x256xf32, #tpu.memory_space<vmem>>, vector<1x128x256xf32>
    %21 = vector.shape_cast %20 : vector<1x128x256xf32> to vector<128x256xf32>
    %22 = arith.maximumf %19, %21 : vector<128x256xf32>
    %c8 = arith.constant 8 : index
    %c0_16 = arith.constant 0 : index
    %c0_17 = arith.constant 0 : index
    %23 = vector.load %arg1[%c8, %c0_16, %c0_17] : memref<9x128x256xf32, #tpu.memory_space<vmem>>, vector<1x128x256xf32>
    %24 = vector.shape_cast %23 : vector<1x128x256xf32> to vector<128x256xf32>
    %25 = arith.maximumf %22, %24 : vector<128x256xf32>
    %c0_18 = arith.constant 0 : index
    %c0_19 = arith.constant 0 : index
    %26 = vector.load %arg2[%c0_18, %c0_19] : memref<128x256xf32, #tpu.memory_space<vmem>>, vector<128x256xf32>
    tpu.vector_store %arg2[%c0_18, %c0_19], %25 {strides = array<i32>} : memref<128x256xf32, #tpu.memory_space<vmem>>, vector<128x256xf32>,
    return
  }
  func.func @transform_0(%arg0: i32) -> (i32, i32, i32) {
    %c0_i32 = arith.constant 0 : i32
    %c0_i32_0 = arith.constant 0 : i32
    %c0_i32_1 = arith.constant 0 : i32
    return %c0_i32, %arg0, %c0_i32_0 : i32, i32, i32
  }
  func.func @transform_1(%arg0: i32) -> (i32, i32) {
    %c0_i32 = arith.constant 0 : i32
    %c0_i32_0 = arith.constant 0 : i32
    return %arg0, %c0_i32 : i32, i32
  }
}

module attributes {stable_mosaic.version = 11 : i64} {
  func.func @_lrn_kernel(%arg0: i32, %arg1: memref<128x256xf32, #tpu.memory_space<vmem>>, %arg2: memref<128x256xf32, #tpu.memory_space<vmem>>) attributes {dimension_semantics = [#tpu.dimension_semantics<parallel>], iteration_bounds = array<i64: 1>, scalar_prefetch = 0 : i64, scratch_operands = 0 : i64, tpu.core_type = #tpu.core_type<tc>, window_params = [{transform_indices = @transform_0, window_bounds = array<i64: 128, 256>}, {transform_indices = @transform_1, window_bounds = array<i64: 128, 256>}]} {
    %c0 = arith.constant 0 : index
    %c0_0 = arith.constant 0 : index
    %0 = vector.load %arg1[%c0, %c0_0] : memref<128x256xf32, #tpu.memory_space<vmem>>, vector<128x256xf32>
    %1 = arith.mulf %0, %0 : vector<128x256xf32>
    %2 = tpu.iota {dimensions = array<i32: 0>} : vector<256x256xi32>
    %3 = tpu.iota {dimensions = array<i32: 1>} : vector<256x256xi32>
    %4 = arith.subi %2, %3 : vector<256x256xi32>
    %c-2_i32 = arith.constant -2 : i32
    %5 = vector.broadcast %c-2_i32 : i32 to vector<256x256xi32>
    %6 = arith.cmpi sge, %4, %5 : vector<256x256xi32>
    %c2_i32 = arith.constant 2 : i32
    %7 = vector.broadcast %c2_i32 : i32 to vector<256x256xi32>
    %8 = arith.cmpi sle, %4, %7 : vector<256x256xi32>
    %9 = arith.andi %6, %8 : vector<256x256xi1>
    %10 = arith.extui %9 : vector<256x256xi1> to vector<256x256xi32>
    %11 = arith.sitofp %10 : vector<256x256xi32> to vector<256x256xf32>
    %cst = arith.constant dense<0.000000e+00> : vector<128x256xf32>
    %12 = tpu.matmul %1, %11, %cst {dimension_numbers = #tpu.dot_dimension_numbers<[1], [0], [0], [1], [0, 0, 1, 1], [], []>} : vector<128x256xf32>, vector<256x256xf32>, vector<128x256xf32> -> vector<128x256xf32>
    %cst_1 = arith.constant 2.000000e-05 : f32
    %13 = vector.broadcast %cst_1 : f32 to vector<128x256xf32>
    %14 = arith.mulf %13, %12 : vector<128x256xf32>
    %cst_2 = arith.constant 1.000000e+00 : f32
    %15 = vector.broadcast %cst_2 : f32 to vector<128x256xf32>
    %16 = arith.addf %15, %14 : vector<128x256xf32>
    %17 = math.log %16 : vector<128x256xf32>
    %cst_3 = arith.constant -7.500000e-01 : f32
    %18 = vector.broadcast %cst_3 : f32 to vector<128x256xf32>
    %19 = arith.mulf %18, %17 : vector<128x256xf32>
    %20 = math.exp %19 : vector<128x256xf32>
    %21 = arith.mulf %0, %20 : vector<128x256xf32>
    %c0_4 = arith.constant 0 : index
    %c0_5 = arith.constant 0 : index
    %22 = vector.load %arg2[%c0_4, %c0_5] : memref<128x256xf32, #tpu.memory_space<vmem>>, vector<128x256xf32>
    tpu.vector_store %arg2[%c0_4, %c0_5], %21 {strides = array<i32>} : memref<128x256xf32, #tpu.memory_space<vmem>>, vector<128x256xf32>,
    return
  }
  func.func @transform_0(%arg0: i32) -> (i32, i32) {
    %c0_i32 = arith.constant 0 : i32
    %c0_i32_0 = arith.constant 0 : i32
    return %arg0, %c0_i32 : i32, i32
  }
  func.func @transform_1(%arg0: i32) -> (i32, i32) {
    %c0_i32 = arith.constant 0 : i32
    %c0_i32_0 = arith.constant 0 : i32
    return %arg0, %c0_i32 : i32, i32
  }
}

module attributes {stable_mosaic.version = 11 : i64} {
  func.func @_gconv_matmul_kernel(%arg0: i32, %arg1: i32, %arg2: memref<1x128x2304xf32, #tpu.memory_space<vmem>>, %arg3: memref<1x2304x384xf32, #tpu.memory_space<vmem>>, %arg4: memref<1x1x384xf32, #tpu.memory_space<vmem>>, %arg5: memref<128x384xf32, #tpu.memory_space<vmem>>) attributes {dimension_semantics = [#tpu.dimension_semantics<parallel>, #tpu.dimension_semantics<parallel>], iteration_bounds = array<i64: 1, 1>, scalar_prefetch = 0 : i64, scratch_operands = 0 : i64, tpu.core_type = #tpu.core_type<tc>, window_params = [{transform_indices = @transform_0, window_bounds = array<i64: 1, 128, 2304>}, {transform_indices = @transform_1, window_bounds = array<i64: 1, 2304, 384>}, {transform_indices = @transform_2, window_bounds = array<i64: 1, 1, 384>}, {transform_indices = @transform_3, window_bounds = array<i64: 128, 384>}]} {
    %c0 = arith.constant 0 : index
    %c0_0 = arith.constant 0 : index
    %c0_1 = arith.constant 0 : index
    %0 = vector.load %arg2[%c0, %c0_0, %c0_1] : memref<1x128x2304xf32, #tpu.memory_space<vmem>>, vector<1x128x2304xf32>
    %1 = vector.shape_cast %0 : vector<1x128x2304xf32> to vector<128x2304xf32>
    %c0_2 = arith.constant 0 : index
    %c0_3 = arith.constant 0 : index
    %c0_4 = arith.constant 0 : index
    %2 = vector.load %arg3[%c0_2, %c0_3, %c0_4] : memref<1x2304x384xf32, #tpu.memory_space<vmem>>, vector<1x2304x384xf32>
    %3 = vector.shape_cast %2 : vector<1x2304x384xf32> to vector<2304x384xf32>
    %cst = arith.constant dense<0.000000e+00> : vector<128x384xf32>
    %4 = tpu.matmul %1, %3, %cst {dimension_numbers = #tpu.dot_dimension_numbers<[1], [0], [0], [1], [0, 0, 1, 1], [], []>} : vector<128x2304xf32>, vector<2304x384xf32>, vector<128x384xf32> -> vector<128x384xf32>
    %c0_5 = arith.constant 0 : index
    %c0_6 = arith.constant 0 : index
    %c0_7 = arith.constant 0 : index
    %5 = vector.load %arg4[%c0_5, %c0_6, %c0_7] : memref<1x1x384xf32, #tpu.memory_space<vmem>>, vector<1x1x384xf32>
    %6 = vector.shape_cast %5 : vector<1x1x384xf32> to vector<1x384xf32>
    %7 = vector.broadcast %6 : vector<1x384xf32> to vector<128x384xf32>
    %8 = arith.addf %4, %7 : vector<128x384xf32>
    %9 = arith.negf %8 : vector<128x384xf32>
    %10 = math.exp %9 : vector<128x384xf32>
    %cst_8 = arith.constant 1.000000e+00 : f32
    %11 = vector.broadcast %cst_8 : f32 to vector<128x384xf32>
    %12 = arith.addf %11, %10 : vector<128x384xf32>
    %13 = arith.divf %11, %12 : vector<128x384xf32>
    %c0_9 = arith.constant 0 : index
    %c0_10 = arith.constant 0 : index
    %14 = vector.load %arg5[%c0_9, %c0_10] : memref<128x384xf32, #tpu.memory_space<vmem>>, vector<128x384xf32>
    tpu.vector_store %arg5[%c0_9, %c0_10], %13 {strides = array<i32>} : memref<128x384xf32, #tpu.memory_space<vmem>>, vector<128x384xf32>,
    return
  }
  func.func @transform_0(%arg0: i32, %arg1: i32) -> (i32, i32, i32) {
    %c0_i32 = arith.constant 0 : i32
    %c0_i32_0 = arith.constant 0 : i32
    return %arg0, %arg1, %c0_i32 : i32, i32, i32
  }
  func.func @transform_1(%arg0: i32, %arg1: i32) -> (i32, i32, i32) {
    %c0_i32 = arith.constant 0 : i32
    %c0_i32_0 = arith.constant 0 : i32
    %c0_i32_1 = arith.constant 0 : i32
    return %arg0, %c0_i32, %c0_i32_0 : i32, i32, i32
  }
  func.func @transform_2(%arg0: i32, %arg1: i32) -> (i32, i32, i32) {
    %c0_i32 = arith.constant 0 : i32
    %c0_i32_0 = arith.constant 0 : i32
    %c0_i32_1 = arith.constant 0 : i32
    return %arg0, %c0_i32, %c0_i32_0 : i32, i32, i32
  }
  func.func @transform_3(%arg0: i32, %arg1: i32) -> (i32, i32) {
    %c0_i32 = arith.constant 0 : i32
    return %arg1, %arg0 : i32, i32
  }
}

</mosaic_0001>

<bundles_post_ra>
// kernel: feature_extractor_forward.7
= control target key start
LH: loop header
LB: loop body
LE: loop exit
PB: predicated region body
PF: predicated region fallthrough
CT: control target
= control target key end

     0   :  { %s1158_s12 = smov 0   ;;  %s1160_s13 = smov 0   ;;  %s1444_s0 = inlined_call_operand.vmem [shape: f32[1,512,363], index: 0, kind: input, shape index: {}]   ;;  %s1445_s1 = inlined_call_operand.vmem [shape: f32[1,363,128], index: 1, kind: input, shape index: {}]   ;;  %s1446_s2 = inlined_call_operand.vmem [shape: f32[1,1,128], index: 2, kind: input, shape index: {}]   ;;  %s1447_s3 = inlined_call_operand.vmem [shape: f32[512,128], index: 3, kind: output, shape index: {}]  }
   0x1   :  { %s1162_s14 = smov 0  }
   0x2 LB: > { %s22_s15 = sadd.s32 1, %s1131_s13  ;;  %p838_p0 = scmp.ge.s32.totalorder %s1135_s14, 1  ;;  %s1135_s14 = sphi %s1162_s14, %s13_s14   ;;  %s1131_s13 = sphi %s1160_s13, %s1449_s13   ;;  %s1127_s12 = sphi %s1158_s12, %s1448_s12  }
   0x3   : > { %p23_p1 = scmp.ge.s32.totalorder %s22_s15, 4  ;;  %p177_p2 = scmp.lt.s32.totalorder %s1135_s14, 5 }
   0x5   : > { %s1451_s15 = smov (%p23_p1, %s22_s15), 0  ;;  %p178_p3 = pnand %p838_p0, %p177_p2 }
   0x6   : > { %v309_v0 = vld [vmem:[%s1445_s1 + $0x80] sm:$0xff] (!%p178_p3)  ;;  %v310_v1 = vld [vmem:[%s1445_s1 + $0x88] sm:$0xff] (!%p178_p3)  ;;  %s839_s22 = sshll.u32 (!%p178_p3), %s1127_s12, 4  ;;  %v311_v5 = vld [vmem:[%s1445_s1 + $0x90] sm:$0xff] (!%p178_p3)  ;;  %vm346_vm0 = vcmask (!%p178_p3), 875520   ;;  %vm395_vm1 = vcmask (!%p178_p3), 1042432  }
   0x7   : > { %181 = sbr.rel (%p178_p3) target bundleno = 323 (0x143), region = 32  ;;  %v293_v2 = vld [vmem:[%s1445_s1] sm:$0xff] (!%p178_p3)  ;;  %v1025_v3 = vpack.c.bf16 (!%p178_p3), %v310_v1, %v309_v0  ;;  %v294_v4 = vld [vmem:[%s1445_s1 + $0x8] sm:$0xff] (!%p178_p3)  ;;  %v312_v6 = vld [vmem:[%s1445_s1 + $0x98] sm:$0xff] (!%p178_p3)  ;;  %p220_p4 = scmp.lt.s32.totalorder (!%p178_p3), %s839_s22, 63  ;;  %vm1137_vm2 = vmmov (!%p178_p3), 1  }
   0x8   : > { %v1027_v7 = vpack.c.bf16 (!%p178_p3), %v294_v4, %v293_v2  ;;  %v1029_v8 = vpack.c.bf16 (!%p178_p3), %v312_v6, %v311_v5  ;;  %v295_v9 = vld [vmem:[%s1445_s1 + $0x10] sm:$0xff] (!%p178_p3)  ;;  %v296_v10 = vld [vmem:[%s1445_s1 + $0x18] sm:$0xff] (!%p178_p3)  ;;  %v313_v11 = vld [vmem:[%s1445_s1 + $0xa0] sm:$0xff] (!%p178_p3) }
   0x9   : > { %1026 = vmatprep.subr.bf16.mxu0 (!%p178_p3), %v1025_v3  ;;  %v314_v12 = vld [vmem:[%s1445_s1 + $0xa8] sm:$0xff] (!%p178_p3)  ;;  %v325_v13 = vld [vmem:[%s1445_s1 + $0x100] sm:$0xff] (!%p178_p3)  ;;  %v1031_v15 = vpack.c.bf16 (!%p178_p3), %v296_v10, %v295_v9  ;;  %v327_v20 = vld [vmem:[%s1445_s1 + $0x110] sm:$0xff] (!%p178_p3) }
   0xa   : > { %v326_v14 = vld [vmem:[%s1445_s1 + $0x108] sm:$0xff] (!%p178_p3)  ;;  %1028 = vmatpush3.bf16.msra.mxu0 (!%p178_p3), %v1027_v7  ;;  %v297_v17 = vld [vmem:[%s1445_s1 + $0x20] sm:$0xff] (!%p178_p3)  ;;  %v1033_v18 = vpack.c.bf16 (!%p178_p3), %v314_v12, %v313_v11  ;;  %v328_v21 = vld [vmem:[%s1445_s1 + $0x118] sm:$0xff] (!%p178_p3) }
   0xb   : > { %v1057_v16 = vpack.c.bf16 (!%p178_p3), %v326_v14, %v325_v13  ;;  %1030 = vmatprep.subr.bf16.mxu0 (!%p178_p3), %v1029_v8  ;;  %v298_v19 = vld [vmem:[%s1445_s1 + $0x28] sm:$0xff] (!%p178_p3)  ;;  %v315_v22 = vld [vmem:[%s1445_s1 + $0xb0] sm:$0xff] (!%p178_p3)  ;;  %v316_v23 = vld [vmem:[%s1445_s1 + $0xb8] sm:$0xff] (!%p178_p3)  ;;  %v1061_v24 = vpack.c.bf16 (!%p178_p3), %v328_v21, %v327_v20 }
   0xc   : > { %v329_v25 = vld [vmem:[%s1445_s1 + $0x120] sm:$0xff] (!%p178_p3)  ;;  %v330_v26 = vld [vmem:[%s1445_s1 + $0x128] sm:$0xff] (!%p178_p3)  ;;  %v1035_v27 = vpack.c.bf16 (!%p178_p3), %v298_v19, %v297_v17  ;;  %v299_v28 = vld [vmem:[%s1445_s1 + $0x30] sm:$0xff] (!%p178_p3)  ;;  %v1037_v30 = vpack.c.bf16 (!%p178_p3), %v316_v23, %v315_v22 }
   0xd   : > { %1058 = vmatprep.subr.bf16.mxu1 (!%p178_p3), %v1057_v16  ;;  %v1065_v29 = vpack.c.bf16 (!%p178_p3), %v330_v26, %v329_v25  ;;  %v300_v31 = vld [vmem:[%s1445_s1 + $0x38] sm:$0xff] (!%p178_p3)  ;;  %v331_v32 = vld [vmem:[%s1445_s1 + $0x130] sm:$0xff] (!%p178_p3)  ;;  %v317_v34 = vld [vmem:[%s1445_s1 + $0xc0] sm:$0xff] (!%p178_p3) }
   0xe   : > { %s1453_s22 = smov (!%p220_p4, %s839_s22), 63  ;;  %1060 = vmatpush3.bf16.msra.mxu1 %v1057_v16  ;;  %1032 = vmatpush3.bf16.msra.mxu0 %v1031_v15  ;;  %v332_v33 = vld [vmem:[%s1445_s1 + $0x138] sm:$0xff]  ;;  %v318_v35 = vld [vmem:[%s1445_s1 + $0xc8] sm:$0xff]  ;;  %v1039_v36 = vpack.c.bf16 %v300_v31, %v299_v28  ;;  %v301_v37 = vld [vmem:[%s1445_s1 + $0x40] sm:$0xff] }
   0xf   : > { %s1087_s7 = smul.u32 24, %s1453_s22  ;;  %1062 = vmatprep.subr.bf16.mxu1 %v1061_v24  ;;  %1034 = vmatprep.subr.bf16.mxu0 %v1033_v18  ;;  %v1069_v38 = vpack.c.bf16 %v332_v33, %v331_v32  ;;  %v1041_v39 = vpack.c.bf16 %v318_v35, %v317_v34  ;;  %v302_v40 = vld [vmem:[%s1445_s1 + $0x48] sm:$0xff]  ;;  %v333_v41 = vld [vmem:[%s1445_s1 + $0x140] sm:$0xff]  ;;  %v319_v43 = vld [vmem:[%s1445_s1 + $0xd0] sm:$0xff]  ;;  %s842_s24 = sshll.u32 %s1453_s22, 3 }
  0x10   : > { %v334_v42 = vld [vmem:[%s1445_s1 + $0x148] sm:$0xff]  ;;  %v320_v44 = vld [vmem:[%s1445_s1 + $0xd8] sm:$0xff]  ;;  %v1043_v46 = vpack.c.bf16 %v302_v40, %v301_v37  ;;  %v303_v47 = vld [vmem:[%s1445_s1 + $0x50] sm:$0xff]  ;;  %s1396_s27 = scalar_lea.vmem %s1447_s3, %s842_s24 }
  0x11   : > { %s1260_s26 = scalar_lea.vmem %s1444_s0, %s1087_s7  ;;  %v1073_v48 = vpack.c.bf16 %v334_v42, %v333_v41  ;;  %v1045_v50 = vpack.c.bf16 %v320_v44, %v319_v43  ;;  %v304_v51 = vld [vmem:[%s1445_s1 + $0x58] sm:$0xff]  ;;  %v335_v52 = vld [vmem:[%s1445_s1 + $0x150] sm:$0xff]  ;;  %v321_v54 = vld [vmem:[%s1445_s1 + $0xe0] sm:$0xff] }
  0x12   : > { %1064 = vmatpush3.bf16.msra.mxu1 %v1061_v24  ;;  %1036 = vmatpush3.bf16.msra.mxu0 %v1035_v27  ;;  %v246_v45 = vld [vmem:[%s1260_s26 + $0x8] sm:$0xff]  ;;  %v247_v49 = vld [vmem:[%s1260_s26 + $0x10] sm:$0xff]  ;;  %v336_v53 = vld [vmem:[%s1445_s1 + $0x158] sm:$0xff]  ;;  %v1047_v56 = vpack.c.bf16 %v304_v51, %v303_v47 }
  0x13   : > { %1066 = vmatprep.subr.bf16.mxu1 %v1065_v29  ;;  %1038 = vmatprep.subr.bf16.mxu0 %v1037_v30  ;;  %v322_v55 = vld [vmem:[%s1445_s1 + $0xe8] sm:$0xff]  ;;  %v305_v57 = vld [vmem:[%s1445_s1 + $0x60] sm:$0xff]  ;;  %v1077_v58 = vpack.c.bf16 %v336_v53, %v335_v52  ;;  %v323_v63 = vld [vmem:[%s1445_s1 + $0xf0] sm:$0xff] }
  0x14   : > { %463 = vmatprep.mubr.f32.mxu0 %v246_v45  ;;  %1001 = vmatprep.mubr.msk.f32.mxu1 %vm346_vm0, %v247_v49  ;;  %v1049_v59 = vpack.c.bf16 %v322_v55, %v321_v54  ;;  %v306_v60 = vld [vmem:[%s1445_s1 + $0x68] sm:$0xff]  ;;  %v337_v61 = vld [vmem:[%s1445_s1 + $0x160] sm:$0xff]  ;;  %v324_v0 = vld [vmem:[%s1445_s1 + $0xf8] sm:$0xff] }
  0x15   : > { %v338_v62 = vld [vmem:[%s1445_s1 + $0x168] sm:$0x7]  ;;  %v1051_v1 = vpack.c.bf16 %v306_v60, %v305_v57  ;;  %v1053_v3 = vpack.c.bf16 %v324_v0, %v323_v63  ;;  %v307_v4 = vld [vmem:[%s1445_s1 + $0x70] sm:$0xff]  ;;  %v308_v5 = vld [vmem:[%s1445_s1 + $0x78] sm:$0xff] }
  0x16   : > { %1068 = vmatpush3.bf16.msra.mxu1 %v1065_v29  ;;  %1040 = vmatpush3.bf16.msra.mxu0 %v1039_v36  ;;  %v1081_v2 = vpack.c.bf16 %v338_v62, %v337_v61  ;;  %vm1082_vm3 = vmpackc.low %vm395_vm1, %vm1137_vm2  ;;  %v1055_v6 = vpack.c.bf16 %v308_v5, %v307_v4  ;;  %v250_v7 = vld [vmem:[%s1260_s26 + $0x28] sm:$0xff]  ;;  %v245_v8 = vld [vmem:[%s1260_s26] sm:$0xff] }
  0x17   : > { %1070 = vmatprep.subr.bf16.mxu1 %v1069_v38  ;;  %1042 = vmatprep.subr.bf16.mxu0 %v1041_v39  ;;  %v253_v9 = vld [vmem:[%s1260_s26 + $0x40] sm:$0xff]  ;;  %v256_v11 = vld [vmem:[%s1260_s26 + $0x58] sm:$0xff]  ;;  %v259_v13 = vld [vmem:[%s1260_s26 + $0x70] sm:$0xff] }
  0x18   : > { %v249_v10 = vld [vmem:[%s1260_s26 + $0x20] sm:$0xff]  ;;  %v248_v12 = vld [vmem:[%s1260_s26 + $0x18] sm:$0xff]  ;;  %v262_v15 = vld [vmem:[%s1260_s26 + $0x88] sm:$0xff] }
  0x19   : > { %v252_v14 = vld [vmem:[%s1260_s26 + $0x38] sm:$0xff]  ;;  %v251_v16 = vld [vmem:[%s1260_s26 + $0x30] sm:$0xff]  ;;  %v265_v17 = vld [vmem:[%s1260_s26 + $0xa0] sm:$0xff] }
  0x1a   : > { %1072 = vmatpush3.bf16.msra.mxu1 %v1069_v38  ;;  %1044 = vmatpush3.bf16.msra.mxu0 %v1043_v46  ;;  %v255_v18 = vld [vmem:[%s1260_s26 + $0x50] sm:$0xff]  ;;  %v268_v19 = vld [vmem:[%s1260_s26 + $0xb8] sm:$0xff]  ;;  %v254_v20 = vld [vmem:[%s1260_s26 + $0x48] sm:$0xff] }
  0x1b   : > { %1074 = vmatprep.subr.bf16.mxu1 %v1073_v48  ;;  %1046 = vmatprep.subr.bf16.mxu0 %v1045_v50  ;;  %v271_v21 = vld [vmem:[%s1260_s26 + $0xd0] sm:$0xff]  ;;  %v258_v22 = vld [vmem:[%s1260_s26 + $0x68] sm:$0xff]  ;;  %v257_v24 = vld [vmem:[%s1260_s26 + $0x60] sm:$0xff] }
  0x1c   : > { %v274_v23 = vld [vmem:[%s1260_s26 + $0xe8] sm:$0xff]  ;;  %v277_v25 = vld [vmem:[%s1260_s26 + $0x100] sm:$0xff]  ;;  %v280_v27 = vld [vmem:[%s1260_s26 + $0x118] sm:$0xff] }
  0x1d   : > { %v261_v26 = vld [vmem:[%s1260_s26 + $0x80] sm:$0xff]  ;;  %v260_v28 = vld [vmem:[%s1260_s26 + $0x78] sm:$0xff]  ;;  %v283_v29 = vld [vmem:[%s1260_s26 + $0x130] sm:$0xff] }
  0x1e   : > { %1076 = vmatpush3.bf16.msra.mxu1 %v1073_v48  ;;  %1048 = vmatpush3.bf16.msra.mxu0 %v1047_v56  ;;  %v264_v30 = vld [vmem:[%s1260_s26 + $0x98] sm:$0xff]  ;;  %v286_v31 = vld [vmem:[%s1260_s26 + $0x148] sm:$0xff]  ;;  %v263_v32 = vld [vmem:[%s1260_s26 + $0x90] sm:$0xff] }
  0x1f   : > { %1078 = vmatprep.subr.bf16.mxu1 %v1077_v58  ;;  %1050 = vmatprep.subr.bf16.mxu0 %v1049_v59  ;;  %v289_v33 = vld [vmem:[%s1260_s26 + $0x160] sm:$0xff]  ;;  %v267_v34 = vld [vmem:[%s1260_s26 + $0xb0] sm:$0xff]  ;;  %v292_v35 = vld [vmem:[%s1260_s26 + $0x178] sm:$0xff] }
  0x20   : > { %v266_v36 = vld [vmem:[%s1260_s26 + $0xa8] sm:$0xff]  ;;  %v269_v38 = vld [vmem:[%s1260_s26 + $0xc0] sm:$0xff]  ;;  %v272_v40 = vld [vmem:[%s1260_s26 + $0xd8] sm:$0xff] }
  0x21   : > { %v270_v37 = vld [vmem:[%s1260_s26 + $0xc8] sm:$0xff]  ;;  %v273_v39 = vld [vmem:[%s1260_s26 + $0xe0] sm:$0xff]  ;;  %v276_v41 = vld [vmem:[%s1260_s26 + $0xf8] sm:$0xff] }
  0x22   : > { %1080 = vmatpush3.bf16.msra.mxu1 %v1077_v58  ;;  %1052 = vmatpush3.bf16.msra.mxu0 %v1051_v1  ;;  %v275_v42 = vld [vmem:[%s1260_s26 + $0xf0] sm:$0xff]  ;;  %v278_v44 = vld [vmem:[%s1260_s26 + $0x108] sm:$0xff]  ;;  %v281_v46 = vld [vmem:[%s1260_s26 + $0x120] sm:$0xff] }
  0x23   : > { %1083 = vmatprep.subr.msk.bf16.mxu1 %vm1082_vm3, %v1081_v2  ;;  %1054 = vmatprep.subr.bf16.mxu0 %v1053_v3  ;;  %v279_v43 = vld [vmem:[%s1260_s26 + $0x110] sm:$0xff]  ;;  %v282_v45 = vld [vmem:[%s1260_s26 + $0x128] sm:$0xff]  ;;  %v285_v47 = vld [vmem:[%s1260_s26 + $0x140] sm:$0xff] }
  0x24   : > { %v284_v48 = vld [vmem:[%s1260_s26 + $0x138] sm:$0xff]  ;;  %v287_v50 = vld [vmem:[%s1260_s26 + $0x150] sm:$0xff]  ;;  %v290_v52 = vld [vmem:[%s1260_s26 + $0x168] sm:$0xff] }
  0x25   : > { %v288_v49 = vld [vmem:[%s1260_s26 + $0x158] sm:$0xff]  ;;  %v291_v51 = vld [vmem:[%s1260_s26 + $0x170] sm:$0xff]  ;;  %v1389_v57 = vld [vmem:[%s1446_s2] ss:$0 sm:$0xff] }
  0x26   : > { %1086 = vmatpush3.bf16.msk.msra.mxu1 %vm1082_vm3, %v1081_v2  ;;  %1056 = vmatpush3.bf16.msra.mxu0 %v1055_v6 }
  0x29   : > { %1002 = vmatmul.mubr.msk.f32.vlgmr.msra.gmra.mrb[0].mxu1 %vm346_vm0, %v250_v7  ;;  %464 = vmatmul.mubr.f32.vlgmr.msra.gmra.mrb[0].mxu0 %v245_v8 }
  0x2a   : > { %1004 = vmatprep.mubr.msk.f32.mxu1 %vm346_vm0, %v253_v9  ;;  %468 = vmatprep.mubr.f32.mxu0 %v249_v10 }
  0x2d   : > { %1005 = vmatmul.mubr.msk.f32.gmra.mrb[2].mxu1 %vm346_vm0, %v256_v11  ;;  %469 = vmatmul.mubr.f32.gmra.mrb[2].mxu0 %v248_v12 }
  0x2e   : > { %1007 = vmatprep.mubr.msk.f32.mxu1 %vm346_vm0, %v259_v13  ;;  %473 = vmatprep.mubr.f32.mxu0 %v252_v14 }
  0x31   : > { %1008 = vmatmul.mubr.msk.f32.gmra.mrb[4].mxu1 %vm346_vm0, %v262_v15  ;;  %474 = vmatmul.mubr.f32.gmra.mrb[4].mxu0 %v251_v16 }
  0x32   : > { %1010 = vmatprep.mubr.msk.f32.mxu1 %vm346_vm0, %v265_v17  ;;  %478 = vmatprep.mubr.f32.mxu0 %v255_v18 }
  0x35   : > { %1011 = vmatmul.mubr.msk.f32.gmra.mrb[6].mxu1 %vm346_vm0, %v268_v19  ;;  %479 = vmatmul.mubr.f32.gmra.mrb[6].mxu0 %v254_v20 }
  0x36   : > { %1013 = vmatprep.mubr.msk.f32.mxu1 %vm346_vm0, %v271_v21  ;;  %483 = vmatprep.mubr.f32.mxu0 %v258_v22 }
  0x39   : > { %1014 = vmatmul.mubr.msk.f32.gmra.mrb[8].mxu1 %vm346_vm0, %v274_v23  ;;  %484 = vmatmul.mubr.f32.gmra.mrb[8].mxu0 %v257_v24 }
  0x3a   : > { %1016 = vmatprep.mubr.msk.f32.mxu1 %vm346_vm0, %v277_v25  ;;  %488 = vmatprep.mubr.f32.mxu0 %v261_v26 }
  0x3d   : > { %1017 = vmatmul.mubr.msk.f32.gmra.mrb[10].mxu1 %vm346_vm0, %v280_v27  ;;  %489 = vmatmul.mubr.f32.gmra.mrb[10].mxu0 %v260_v28 }
  0x3e   : > { %1019 = vmatprep.mubr.msk.f32.mxu1 %vm346_vm0, %v283_v29  ;;  %493 = vmatprep.mubr.f32.mxu0 %v264_v30 }
  0x41   : > { %1020 = vmatmul.mubr.msk.f32.gmra.mrb[12].mxu1 %vm346_vm0, %v286_v31  ;;  %494 = vmatmul.mubr.f32.gmra.mrb[12].mxu0 %v263_v32 }
  0x42   : > { %1022 = vmatprep.mubr.msk.f32.mxu1 %vm346_vm0, %v289_v33  ;;  %498 = vmatprep.mubr.f32.mxu0 %v267_v34 }
  0x45   : > { %1023 = vmatmul.mubr.msk.f32.gmra.mrb[14].mxu1 %vm346_vm0, %v292_v35  ;;  %499 = vmatmul.mubr.f32.gmra.mrb[14].mxu0 %v266_v36 }
  0x46   : > { %503 = vmatprep.mubr.f32.mxu0 %v270_v37 }
  0x49   : > { %504 = vmatmul.mubr.f32.gmra.mrb[16].mxu0 %v269_v38 }
  0x4a   : > { %508 = vmatprep.mubr.f32.mxu0 %v273_v39 }
  0x4d   : > { %509 = vmatmul.mubr.f32.gmra.mrb[18].mxu0 %v272_v40 }
  0x4e   : > { %513 = vmatprep.mubr.f32.mxu0 %v276_v41 }
  0x51   : > { %514 = vmatmul.mubr.f32.gmra.mrb[20].mxu0 %v275_v42 }
  0x52   : > { %518 = vmatprep.mubr.f32.mxu0 %v279_v43 }
  0x55   : > { %519 = vmatmul.mubr.f32.gmra.mrb[22].mxu0 %v278_v44 }
  0x56   : > { %523 = vmatprep.mubr.f32.mxu0 %v282_v45 }
  0x59   : > { %524 = vmatmul.mubr.f32.gmra.mrb[24].mxu0 %v281_v46 }
  0x5a   : > { %528 = vmatprep.mubr.f32.mxu0 %v285_v47 }
  0x5d   : > { %529 = vmatmul.mubr.f32.gmra.mrb[26].mxu0 %v284_v48 }
  0x5e   : > { %533 = vmatprep.mubr.f32.mxu0 %v288_v49 }
  0x61   : > { %534 = vmatmul.mubr.f32.gmra.mrb[28].mxu0 %v287_v50 }
  0x62   : > { %538 = vmatprep.mubr.f32.mxu0 %v291_v51 }
  0x65   : > { %539 = vmatmul.mubr.f32.gmra.mrb[30].mxu0 %v290_v52 }
  0xfc   : > { %v1003_v53 = vpop.f32.mrb[0].mxu1  ;;  %v895_v54 = vpop.f32.mrb[0].mxu0 }
  0xfd   : > { %v610_v55 = vpop.f32.mrb[1].mxu1  ;;  %v896_v56 = vpop.f32.mrb[1].mxu0 }
  0xfe   : > { %v897_v58 = vadd.f32 %v896_v56, %v895_v54 }
 0x100   : > { %v1006_v59 = vpop.f32.mrb[2].mxu1  ;;  %v898_v60 = vpop.f32.mrb[2].mxu0  ;;  %v466_v61 = vadd.f32 %v897_v58, %v1389_v57 }
 0x101   : > { %v620_v62 = vpop.f32.mrb[3].mxu1  ;;  %v899_v63 = vpop.f32.mrb[3].mxu0 }
 0x102   : > { %v900_v0 = vadd.f32 %v899_v63, %v898_v60  ;;  %v611_v1 = vadd.f32 %v610_v55, %v466_v61 }
 0x104   : > { %v1009_v2 = vpop.f32.mrb[4].mxu1  ;;  %v471_v3 = vadd.f32 %v900_v0, %v1389_v57  ;;  %v689_v4 = vmax.f32 %v611_v1, 0.0  ;;  %v901_v5 = vpop.f32.mrb[4].mxu0 }
 0x105   : > { %v630_v6 = vpop.f32.mrb[5].mxu1  ;;  %v902_v7 = vpop.f32.mrb[5].mxu0 }
 0x106   : > { %v616_v8 = vadd.f32 %v1003_v53, %v471_v3  ;;  %705 = vst [vmem:[%s1396_s27] sm:$0xff] %v689_v4  ;;  %v903_v9 = vadd.f32 %v902_v7, %v901_v5 }
 0x108   : > { %v1012_v10 = vpop.f32.mrb[6].mxu1  ;;  %v690_v11 = vmax.f32 %v616_v8, 0.0  ;;  %v904_v12 = vpop.f32.mrb[6].mxu0  ;;  %v476_v13 = vadd.f32 %v903_v9, %v1389_v57 }
 0x109   : > { %v640_v14 = vpop.f32.mrb[7].mxu1  ;;  %v905_v15 = vpop.f32.mrb[7].mxu0 }
 0x10a   : > { %706 = vst [vmem:[%s1396_s27 + $0x8] sm:$0xff] %v690_v11  ;;  %v906_v16 = vadd.f32 %v905_v15, %v904_v12  ;;  %v621_v17 = vadd.f32 %v620_v62, %v476_v13 }
 0x10c   : > { %v1015_v18 = vpop.f32.mrb[8].mxu1  ;;  %v481_v19 = vadd.f32 %v906_v16, %v1389_v57  ;;  %v691_v20 = vmax.f32 %v621_v17, 0.0  ;;  %v907_v21 = vpop.f32.mrb[8].mxu0 }
 0x10d   : > { %v650_v22 = vpop.f32.mrb[9].mxu1  ;;  %v908_v23 = vpop.f32.mrb[9].mxu0 }
 0x10e   : > { %v626_v24 = vadd.f32 %v1006_v59, %v481_v19  ;;  %707 = vst [vmem:[%s1396_s27 + $0x10] sm:$0xff] %v691_v20  ;;  %v909_v25 = vadd.f32 %v908_v23, %v907_v21 }
 0x110   : > { %v1018_v26 = vpop.f32.mrb[10].mxu1  ;;  %v692_v27 = vmax.f32 %v626_v24, 0.0  ;;  %v910_v28 = vpop.f32.mrb[10].mxu0  ;;  %v486_v29 = vadd.f32 %v909_v25, %v1389_v57 }
 0x111   : > { %v660_v30 = vpop.f32.mrb[11].mxu1  ;;  %v911_v31 = vpop.f32.mrb[11].mxu0 }
 0x112   : > { %708 = vst [vmem:[%s1396_s27 + $0x18] sm:$0xff] %v692_v27  ;;  %v912_v32 = vadd.f32 %v911_v31, %v910_v28  ;;  %v631_v33 = vadd.f32 %v630_v6, %v486_v29 }
 0x114   : > { %v1406_v34 = vpop.f32.mrb[12].mxu1  ;;  %v491_v35 = vadd.f32 %v912_v32, %v1389_v57  ;;  %v693_v36 = vmax.f32 %v631_v33, 0.0  ;;  %v913_v37 = vpop.f32.mrb[12].mxu0 }
 0x115   : > { %v670_v38 = vpop.f32.mrb[13].mxu1  ;;  %v914_v39 = vpop.f32.mrb[13].mxu0 }
 0x116   : > { %v636_v40 = vadd.f32 %v1009_v2, %v491_v35  ;;  %709 = vst [vmem:[%s1396_s27 + $0x20] sm:$0xff] %v693_v36  ;;  %v915_v41 = vadd.f32 %v914_v39, %v913_v37 }
 0x118   : > { %v1410_v42 = vpop.f32.mrb[14].mxu1  ;;  %v694_v43 = vmax.f32 %v636_v40, 0.0  ;;  %v916_v44 = vpop.f32.mrb[14].mxu0  ;;  %v496_v45 = vadd.f32 %v915_v41, %v1389_v57 }
 0x119   : > { %v680_v46 = vpop.f32.mrb[15].mxu1  ;;  %v917_v47 = vpop.f32.mrb[15].mxu0 }
 0x11a   : > { %710 = vst [vmem:[%s1396_s27 + $0x28] sm:$0xff] %v694_v43  ;;  %v918_v48 = vadd.f32 %v917_v47, %v916_v44  ;;  %v641_v49 = vadd.f32 %v640_v14, %v496_v45 }
 0x11c   : > { %v501_v50 = vadd.f32 %v918_v48, %v1389_v57  ;;  %v695_v51 = vmax.f32 %v641_v49, 0.0  ;;  %v919_v52 = vpop.f32.mrb[16].mxu0 }
 0x11d   : > { %v920_v53 = vpop.f32.mrb[17].mxu0 }
 0x11e   : > { %v646_v54 = vadd.f32 %v1012_v10, %v501_v50  ;;  %711 = vst [vmem:[%s1396_s27 + $0x30] sm:$0xff] %v695_v51  ;;  %v921_v55 = vadd.f32 %v920_v53, %v919_v52 }
 0x120   : > { %v696_v56 = vmax.f32 %v646_v54, 0.0  ;;  %v922_v58 = vpop.f32.mrb[18].mxu0  ;;  %v506_v59 = vadd.f32 %v921_v55, %v1389_v57 }
 0x121   : > { %v923_v60 = vpop.f32.mrb[19].mxu0 }
 0x122   : > { %712 = vst [vmem:[%s1396_s27 + $0x38] sm:$0xff] %v696_v56  ;;  %v924_v61 = vadd.f32 %v923_v60, %v922_v58  ;;  %v651_v62 = vadd.f32 %v650_v22, %v506_v59 }
 0x124   : > { %v511_v63 = vadd.f32 %v924_v61, %v1389_v57  ;;  %v697_v0 = vmax.f32 %v651_v62, 0.0  ;;  %v925_v1 = vpop.f32.mrb[20].mxu0 }
 0x125   : > { %v926_v2 = vpop.f32.mrb[21].mxu0 }
 0x126   : > { %v656_v3 = vadd.f32 %v1015_v18, %v511_v63  ;;  %713 = vst [vmem:[%s1396_s27 + $0x40] sm:$0xff] %v697_v0  ;;  %v927_v4 = vadd.f32 %v926_v2, %v925_v1 }
 0x128   : > { %v698_v5 = vmax.f32 %v656_v3, 0.0  ;;  %v928_v6 = vpop.f32.mrb[22].mxu0  ;;  %v516_v7 = vadd.f32 %v927_v4, %v1389_v57 }
 0x129   : > { %v929_v8 = vpop.f32.mrb[23].mxu0 }
 0x12a   : > { %714 = vst [vmem:[%s1396_s27 + $0x48] sm:$0xff] %v698_v5  ;;  %v930_v9 = vadd.f32 %v929_v8, %v928_v6  ;;  %v661_v10 = vadd.f32 %v660_v30, %v516_v7 }
 0x12c   : > { %v521_v11 = vadd.f32 %v930_v9, %v1389_v57  ;;  %v699_v12 = vmax.f32 %v661_v10, 0.0  ;;  %v931_v13 = vpop.f32.mrb[24].mxu0 }
 0x12d   : > { %v932_v14 = vpop.f32.mrb[25].mxu0 }
 0x12e   : > { %v666_v15 = vadd.f32 %v1018_v26, %v521_v11  ;;  %715 = vst [vmem:[%s1396_s27 + $0x50] sm:$0xff] %v699_v12  ;;  %v933_v16 = vadd.f32 %v932_v14, %v931_v13 }
 0x130   : > { %v700_v17 = vmax.f32 %v666_v15, 0.0  ;;  %v934_v18 = vpop.f32.mrb[26].mxu0  ;;  %v526_v19 = vadd.f32 %v933_v16, %v1389_v57 }
 0x131   : > { %v935_v20 = vpop.f32.mrb[27].mxu0 }
 0x132   : > { %716 = vst [vmem:[%s1396_s27 + $0x58] sm:$0xff] %v700_v17  ;;  %v936_v21 = vadd.f32 %v935_v20, %v934_v18  ;;  %v671_v22 = vadd.f32 %v670_v38, %v526_v19 }
 0x134   : > { %v531_v23 = vadd.f32 %v936_v21, %v1389_v57  ;;  %v701_v24 = vmax.f32 %v671_v22, 0.0  ;;  %v937_v25 = vpop.f32.mrb[28].mxu0 }
 0x135   : > { %v938_v27 = vpop.f32.mrb[29].mxu0 }
 0x136   : > { %v676_v26 = vadd.f32 %v1406_v34, %v531_v23  ;;  %717 = vst [vmem:[%s1396_s27 + $0x60] sm:$0xff] %v701_v24  ;;  %v939_v28 = vadd.f32 %v938_v27, %v937_v25 }
 0x138   : > { %v702_v29 = vmax.f32 %v676_v26, 0.0  ;;  %v940_v30 = vpop.f32.mrb[30].mxu0  ;;  %v536_v31 = vadd.f32 %v939_v28, %v1389_v57 }
 0x139   : > { %v941_v32 = vpop.f32.mrb[31].mxu0 }
 0x13a   : > { %718 = vst [vmem:[%s1396_s27 + $0x68] sm:$0xff] %v702_v29  ;;  %v942_v33 = vadd.f32 %v941_v32, %v940_v30  ;;  %v681_v35 = vadd.f32 %v680_v46, %v536_v31 }
 0x13c   : > { %v541_v36 = vadd.f32 %v942_v33, %v1389_v57  ;;  %v703_v37 = vmax.f32 %v681_v35, 0.0 }
 0x13e   : > { %v686_v38 = vadd.f32 %v1410_v42, %v541_v36  ;;  %719 = vst [vmem:[%s1396_s27 + $0x70] sm:$0xff] %v703_v37 }
 0x140   : > { %v704_v39 = vmax.f32 %v686_v38, 0.0 }
 0x142   : > { %720 = vst [vmem:[%s1396_s27 + $0x78] sm:$0xff] %v704_v39 }
 0x143 PF: > { %s13_s14 = sadd.s32 1, %s1135_s14   ;;  %s1448_s12 = smov %s1131_s13 }
 0x144   : > { %p10_p5 = scmp.ge.s32.totalorder %s13_s14, 6   ;;  %s1449_s13 = smov %s1451_s15 }
 0x146   :  { %12 = sbr.rel (!%p10_p5) target bundleno = 2 (0x2), region = 68 }

// kernel: feature_extractor_forward.8
= control target key start
LH: loop header
LB: loop body
LE: loop exit
PB: predicated region body
PF: predicated region fallthrough
CT: control target
= control target key end

     0   :  { %s926_s0 = inlined_call_operand.vmem [shape: f32[9,128,128], index: 0, kind: input, shape index: {}]   ;;  %s927_s1 = inlined_call_operand.vmem [shape: f32[128,128], index: 1, kind: output, shape index: {}]  }
   0x1   :  { %v8_v0 = vld [vmem:[%s926_s0] sm:$0xff]  ;;  %v9_v6 = vld [vmem:[%s926_s0 + $0x8] sm:$0xff]  ;;  %v10_v15 = vld [vmem:[%s926_s0 + $0x10] sm:$0xff] }
   0x2   :  { %v308_v1 = vld [vmem:[%s926_s0 + $0x80] sm:$0xff]  ;;  %v309_v7 = vld [vmem:[%s926_s0 + $0x88] sm:$0xff]  ;;  %v310_v16 = vld [vmem:[%s926_s0 + $0x90] sm:$0xff] }
   0x3   :  { %v324_v2 = vld [vmem:[%s926_s0 + $0x100] sm:$0xff]  ;;  %v41_v3 = vmax.f32 %v8_v0, %v308_v1  ;;  %v325_v8 = vld [vmem:[%s926_s0 + $0x108] sm:$0xff]  ;;  %v42_v10 = vmax.f32 %v9_v6, %v309_v7  ;;  %v326_v17 = vld [vmem:[%s926_s0 + $0x110] sm:$0xff]  ;;  %v43_v20 = vmax.f32 %v10_v15, %v310_v16 }
   0x4   :  { %v340_v4 = vld [vmem:[%s926_s0 + $0x180] sm:$0xff]  ;;  %v341_v13 = vld [vmem:[%s926_s0 + $0x188] sm:$0xff]  ;;  %v342_v24 = vld [vmem:[%s926_s0 + $0x190] sm:$0xff] }
   0x5   :  { %v74_v5 = vmax.f32 %v41_v3, %v324_v2  ;;  %v356_v9 = vld [vmem:[%s926_s0 + $0x200] sm:$0xff]  ;;  %v75_v14 = vmax.f32 %v42_v10, %v325_v8  ;;  %v357_v19 = vld [vmem:[%s926_s0 + $0x208] sm:$0xff]  ;;  %v76_v26 = vmax.f32 %v43_v20, %v326_v17  ;;  %v11_v27 = vld [vmem:[%s926_s0 + $0x18] sm:$0xff] }
   0x6   :  { %v372_v12 = vld [vmem:[%s926_s0 + $0x280] sm:$0xff]  ;;  %v373_v23 = vld [vmem:[%s926_s0 + $0x288] sm:$0xff]  ;;  %v311_v28 = vld [vmem:[%s926_s0 + $0x98] sm:$0xff] }
   0x7   :  { %v107_v11 = vmax.f32 %v74_v5, %v340_v4  ;;  %v388_v21 = vld [vmem:[%s926_s0 + $0x300] sm:$0xff]  ;;  %v108_v22 = vmax.f32 %v75_v14, %v341_v13  ;;  %v327_v29 = vld [vmem:[%s926_s0 + $0x118] sm:$0xff]  ;;  %v358_v33 = vld [vmem:[%s926_s0 + $0x210] sm:$0xff]  ;;  %v44_v34 = vmax.f32 %v11_v27, %v311_v28  ;;  %v109_v37 = vmax.f32 %v76_v26, %v342_v24 }
   0x8   :  { %v404_v30 = vld [vmem:[%s926_s0 + $0x380] sm:$0xff]  ;;  %v389_v36 = vld [vmem:[%s926_s0 + $0x308] sm:$0xff]  ;;  %v374_v38 = vld [vmem:[%s926_s0 + $0x290] sm:$0xff] }
   0x9   :  { %v140_v18 = vmax.f32 %v107_v11, %v356_v9  ;;  %v420_v31 = vld [vmem:[%s926_s0 + $0x400] sm:$0xff]  ;;  %v141_v32 = vmax.f32 %v108_v22, %v357_v19  ;;  %v343_v39 = vld [vmem:[%s926_s0 + $0x198] sm:$0xff]  ;;  %v77_v41 = vmax.f32 %v44_v34, %v327_v29  ;;  %v405_v46 = vld [vmem:[%s926_s0 + $0x388] sm:$0xff]  ;;  %v142_v48 = vmax.f32 %v109_v37, %v358_v33 }
   0xa   :  { %v12_v42 = vld [vmem:[%s926_s0 + $0x20] sm:$0xff]  ;;  %v421_v47 = vld [vmem:[%s926_s0 + $0x408] sm:$0xff]  ;;  %v359_v49 = vld [vmem:[%s926_s0 + $0x218] sm:$0xff] }
   0xb   :  { %v173_v25 = vmax.f32 %v140_v18, %v372_v12  ;;  %v174_v40 = vmax.f32 %v141_v32, %v373_v23  ;;  %v312_v43 = vld [vmem:[%s926_s0 + $0xa0] sm:$0xff]  ;;  %v390_v52 = vld [vmem:[%s926_s0 + $0x310] sm:$0xff]  ;;  %v110_v53 = vmax.f32 %v77_v41, %v343_v39  ;;  %v375_v54 = vld [vmem:[%s926_s0 + $0x298] sm:$0xff]  ;;  %v175_v57 = vmax.f32 %v142_v48, %v374_v38 }
   0xc   :  { %v328_v44 = vld [vmem:[%s926_s0 + $0x120] sm:$0xff]  ;;  %v45_v50 = vmax.f32 %v12_v42, %v312_v43  ;;  %v13_v59 = vld [vmem:[%s926_s0 + $0x28] sm:$0xff]  ;;  %v406_v63 = vld [vmem:[%s926_s0 + $0x390] sm:$0xff] }
   0xd   :  { %v206_v35 = vmax.f32 %v173_v25, %v388_v21  ;;  %v207_v51 = vmax.f32 %v174_v40, %v389_v36  ;;  %v344_v55 = vld [vmem:[%s926_s0 + $0x1a0] sm:$0xff]  ;;  %v313_v60 = vld [vmem:[%s926_s0 + $0xa8] sm:$0xff]  ;;  %v422_v0 = vld [vmem:[%s926_s0 + $0x410] sm:$0xff]  ;;  %v143_v1 = vmax.f32 %v110_v53, %v359_v49  ;;  %v208_v4 = vmax.f32 %v175_v57, %v390_v52 }
   0xe   :  { %v78_v58 = vmax.f32 %v45_v50, %v328_v44  ;;  %v329_v61 = vld [vmem:[%s926_s0 + $0x128] sm:$0xff]  ;;  %v360_v2 = vld [vmem:[%s926_s0 + $0x220] sm:$0xff]  ;;  %v46_v3 = vmax.f32 %v13_v59, %v313_v60  ;;  %v391_v5 = vld [vmem:[%s926_s0 + $0x318] sm:$0xff] }
   0xf   :  { %v239_v45 = vmax.f32 %v206_v35, %v404_v30  ;;  %v240_v62 = vmax.f32 %v207_v51, %v405_v46  ;;  %v376_v7 = vld [vmem:[%s926_s0 + $0x2a0] sm:$0xff]  ;;  %v345_v8 = vld [vmem:[%s926_s0 + $0x1a8] sm:$0xff]  ;;  %v176_v10 = vmax.f32 %v143_v1, %v375_v54  ;;  %v14_v12 = vld [vmem:[%s926_s0 + $0x30] sm:$0xff]  ;;  %v241_v15 = vmax.f32 %v208_v4, %v406_v63 }
  0x10   :  { %v111_v6 = vmax.f32 %v78_v58, %v344_v55  ;;  %v79_v11 = vmax.f32 %v46_v3, %v329_v61  ;;  %v314_v13 = vld [vmem:[%s926_s0 + $0xb0] sm:$0xff]  ;;  %v407_v16 = vld [vmem:[%s926_s0 + $0x398] sm:$0xff]  ;;  %v361_v19 = vld [vmem:[%s926_s0 + $0x228] sm:$0xff] }
  0x11   :  { %v272_v56 = vmax.f32 %v239_v45, %v420_v31  ;;  %v273_v9 = vmax.f32 %v240_v62, %v421_v47  ;;  %v330_v14 = vld [vmem:[%s926_s0 + $0x130] sm:$0xff]  ;;  %v423_v17 = vld [vmem:[%s926_s0 + $0x418] sm:$0xff]  ;;  %v47_v20 = vmax.f32 %v14_v12, %v314_v13  ;;  %v209_v21 = vmax.f32 %v176_v10, %v391_v5  ;;  %v392_v22 = vld [vmem:[%s926_s0 + $0x320] sm:$0xff] }
  0x12   :  { %v144_v18 = vmax.f32 %v111_v6, %v360_v2  ;;  %v112_v23 = vmax.f32 %v79_v11, %v345_v8  ;;  %v377_v24 = vld [vmem:[%s926_s0 + $0x2a8] sm:$0xff]  ;;  %v346_v25 = vld [vmem:[%s926_s0 + $0x1b0] sm:$0xff]  ;;  %v274_v26 = vmax.f32 %v241_v15, %v422_v0  ;;  %v15_v29 = vld [vmem:[%s926_s0 + $0x38] sm:$0xff] }
  0x13   :  { %288 = vst [vmem:[%s927_s1] sm:$0xff] %v272_v56  ;;  %289 = vst [vmem:[%s927_s1 + $0x8] sm:$0xff] %v273_v9  ;;  %v80_v28 = vmax.f32 %v47_v20, %v330_v14  ;;  %v315_v30 = vld [vmem:[%s926_s0 + $0xb8] sm:$0xff]  ;;  %v242_v32 = vmax.f32 %v209_v21, %v407_v16  ;;  %v408_v33 = vld [vmem:[%s926_s0 + $0x3a0] sm:$0xff] }
  0x14   :  { %v177_v27 = vmax.f32 %v144_v18, %v376_v7  ;;  %v331_v31 = vld [vmem:[%s926_s0 + $0x138] sm:$0xff]  ;;  %v424_v34 = vld [vmem:[%s926_s0 + $0x420] sm:$0xff]  ;;  %v145_v35 = vmax.f32 %v112_v23, %v361_v19  ;;  %v362_v36 = vld [vmem:[%s926_s0 + $0x230] sm:$0xff]  ;;  %v48_v37 = vmax.f32 %v15_v29, %v315_v30  ;;  %290 = vst [vmem:[%s927_s1 + $0x10] sm:$0xff] %v274_v26 }
  0x15   :  { %v393_v39 = vld [vmem:[%s926_s0 + $0x328] sm:$0xff]  ;;  %v113_v40 = vmax.f32 %v80_v28, %v346_v25  ;;  %v378_v41 = vld [vmem:[%s926_s0 + $0x2b0] sm:$0xff]  ;;  %v347_v42 = vld [vmem:[%s926_s0 + $0x1b8] sm:$0xff]  ;;  %v275_v43 = vmax.f32 %v242_v32, %v423_v17 }
  0x16   :  { %v210_v38 = vmax.f32 %v177_v27, %v392_v22  ;;  %v178_v44 = vmax.f32 %v145_v35, %v377_v24  ;;  %v81_v45 = vmax.f32 %v48_v37, %v331_v31  ;;  %v16_v46 = vld [vmem:[%s926_s0 + $0x40] sm:$0xff]  ;;  %v409_v50 = vld [vmem:[%s926_s0 + $0x3a8] sm:$0xff]  ;;  %v363_v53 = vld [vmem:[%s926_s0 + $0x238] sm:$0xff] }
  0x17   :  { %v316_v47 = vld [vmem:[%s926_s0 + $0xc0] sm:$0xff]  ;;  %v425_v51 = vld [vmem:[%s926_s0 + $0x428] sm:$0xff]  ;;  %v146_v52 = vmax.f32 %v113_v40, %v362_v36  ;;  %291 = vst [vmem:[%s927_s1 + $0x18] sm:$0xff] %v275_v43  ;;  %v394_v56 = vld [vmem:[%s926_s0 + $0x330] sm:$0xff] }
  0x18   :  { %v332_v48 = vld [vmem:[%s926_s0 + $0x140] sm:$0xff]  ;;  %v243_v49 = vmax.f32 %v210_v38, %v408_v33  ;;  %v49_v54 = vmax.f32 %v16_v46, %v316_v47  ;;  %v211_v55 = vmax.f32 %v178_v44, %v393_v39  ;;  %v114_v57 = vmax.f32 %v81_v45, %v347_v42  ;;  %v379_v58 = vld [vmem:[%s926_s0 + $0x2b8] sm:$0xff]  ;;  %v17_v63 = vld [vmem:[%s926_s0 + $0x48] sm:$0xff] }
  0x19   :  { %v348_v59 = vld [vmem:[%s926_s0 + $0x1c0] sm:$0xff]  ;;  %v179_v61 = vmax.f32 %v146_v52, %v378_v41  ;;  %v317_v0 = vld [vmem:[%s926_s0 + $0xc8] sm:$0xff]  ;;  %v410_v3 = vld [vmem:[%s926_s0 + $0x3b0] sm:$0xff] }
  0x1a   :  { %v276_v60 = vmax.f32 %v243_v49, %v424_v34  ;;  %v82_v62 = vmax.f32 %v49_v54, %v332_v48  ;;  %v333_v1 = vld [vmem:[%s926_s0 + $0x148] sm:$0xff]  ;;  %v244_v2 = vmax.f32 %v211_v55, %v409_v50  ;;  %v426_v4 = vld [vmem:[%s926_s0 + $0x430] sm:$0xff]  ;;  %v147_v5 = vmax.f32 %v114_v57, %v363_v53  ;;  %v364_v6 = vld [vmem:[%s926_s0 + $0x240] sm:$0xff] }
  0x1b   :  { %v50_v7 = vmax.f32 %v17_v63, %v317_v0  ;;  %v212_v8 = vmax.f32 %v179_v61, %v394_v56  ;;  %v395_v9 = vld [vmem:[%s926_s0 + $0x338] sm:$0xff]  ;;  %v380_v11 = vld [vmem:[%s926_s0 + $0x2c0] sm:$0xff]  ;;  %v349_v12 = vld [vmem:[%s926_s0 + $0x1c8] sm:$0xff] }
  0x1c   :  { %292 = vst [vmem:[%s927_s1 + $0x20] sm:$0xff] %v276_v60  ;;  %v115_v10 = vmax.f32 %v82_v62, %v348_v59  ;;  %v277_v13 = vmax.f32 %v244_v2, %v425_v51  ;;  %v180_v14 = vmax.f32 %v147_v5, %v379_v58  ;;  %v18_v16 = vld [vmem:[%s926_s0 + $0x50] sm:$0xff]  ;;  %v411_v20 = vld [vmem:[%s926_s0 + $0x3b8] sm:$0xff]  ;;  %v365_v23 = vld [vmem:[%s926_s0 + $0x248] sm:$0xff] }
  0x1d   :  { %v83_v15 = vmax.f32 %v50_v7, %v333_v1  ;;  %v318_v17 = vld [vmem:[%s926_s0 + $0xd0] sm:$0xff]  ;;  %v245_v19 = vmax.f32 %v212_v8, %v410_v3  ;;  %v427_v21 = vld [vmem:[%s926_s0 + $0x438] sm:$0xff]  ;;  %v396_v26 = vld [vmem:[%s926_s0 + $0x340] sm:$0xff] }
  0x1e   :  { %v334_v18 = vld [vmem:[%s926_s0 + $0x150] sm:$0xff]  ;;  %v148_v22 = vmax.f32 %v115_v10, %v364_v6  ;;  %v51_v24 = vmax.f32 %v18_v16, %v318_v17  ;;  %293 = vst [vmem:[%s927_s1 + $0x28] sm:$0xff] %v277_v13  ;;  %v213_v25 = vmax.f32 %v180_v14, %v395_v9  ;;  %v381_v28 = vld [vmem:[%s926_s0 + $0x2c8] sm:$0xff]  ;;  %v19_v33 = vld [vmem:[%s926_s0 + $0x58] sm:$0xff] }
  0x1f   :  { %v116_v27 = vmax.f32 %v83_v15, %v349_v12  ;;  %v350_v29 = vld [vmem:[%s926_s0 + $0x1d0] sm:$0xff]  ;;  %v278_v30 = vmax.f32 %v245_v19, %v426_v4  ;;  %v319_v34 = vld [vmem:[%s926_s0 + $0xd8] sm:$0xff]  ;;  %v412_v37 = vld [vmem:[%s926_s0 + $0x3c0] sm:$0xff] }
  0x20   :  { %v181_v31 = vmax.f32 %v148_v22, %v380_v11  ;;  %v84_v32 = vmax.f32 %v51_v24, %v334_v18  ;;  %v335_v35 = vld [vmem:[%s926_s0 + $0x158] sm:$0xff]  ;;  %v246_v36 = vmax.f32 %v213_v25, %v411_v20  ;;  %v428_v38 = vld [vmem:[%s926_s0 + $0x440] sm:$0xff]  ;;  %v366_v40 = vld [vmem:[%s926_s0 + $0x250] sm:$0xff]  ;;  %v52_v41 = vmax.f32 %v19_v33, %v319_v34 }
  0x21   :  { %v149_v39 = vmax.f32 %v116_v27, %v365_v23  ;;  %294 = vst [vmem:[%s927_s1 + $0x30] sm:$0xff] %v278_v30  ;;  %v397_v43 = vld [vmem:[%s926_s0 + $0x348] sm:$0xff]  ;;  %v382_v45 = vld [vmem:[%s926_s0 + $0x2d0] sm:$0xff]  ;;  %v351_v46 = vld [vmem:[%s926_s0 + $0x1d8] sm:$0xff] }
  0x22   :  { %v214_v42 = vmax.f32 %v181_v31, %v396_v26  ;;  %v117_v44 = vmax.f32 %v84_v32, %v350_v29  ;;  %v279_v47 = vmax.f32 %v246_v36, %v427_v21  ;;  %v85_v49 = vmax.f32 %v52_v41, %v335_v35  ;;  %v20_v50 = vld [vmem:[%s926_s0 + $0x60] sm:$0xff]  ;;  %v413_v54 = vld [vmem:[%s926_s0 + $0x3c8] sm:$0xff]  ;;  %v367_v57 = vld [vmem:[%s926_s0 + $0x258] sm:$0xff] }
  0x23   :  { %v182_v48 = vmax.f32 %v149_v39, %v381_v28  ;;  %v320_v51 = vld [vmem:[%s926_s0 + $0xe0] sm:$0xff]  ;;  %v429_v55 = vld [vmem:[%s926_s0 + $0x448] sm:$0xff]  ;;  %v398_v60 = vld [vmem:[%s926_s0 + $0x350] sm:$0xff] }
  0x24   :  { %v336_v52 = vld [vmem:[%s926_s0 + $0x160] sm:$0xff]  ;;  %v247_v53 = vmax.f32 %v214_v42, %v412_v37  ;;  %v150_v56 = vmax.f32 %v117_v44, %v366_v40  ;;  %v53_v58 = vmax.f32 %v20_v50, %v320_v51  ;;  %295 = vst [vmem:[%s927_s1 + $0x38] sm:$0xff] %v279_v47  ;;  %v118_v61 = vmax.f32 %v85_v49, %v351_v46  ;;  %v383_v62 = vld [vmem:[%s926_s0 + $0x2d8] sm:$0xff]  ;;  %v21_v3 = vld [vmem:[%s926_s0 + $0x68] sm:$0xff] }
  0x25   :  { %v215_v59 = vmax.f32 %v182_v48, %v397_v43  ;;  %v352_v63 = vld [vmem:[%s926_s0 + $0x1e0] sm:$0xff]  ;;  %v321_v4 = vld [vmem:[%s926_s0 + $0xe8] sm:$0xff]  ;;  %v414_v7 = vld [vmem:[%s926_s0 + $0x3d0] sm:$0xff] }
  0x26   :  { %v280_v0 = vmax.f32 %v247_v53, %v428_v38  ;;  %v183_v1 = vmax.f32 %v150_v56, %v382_v45  ;;  %v86_v2 = vmax.f32 %v53_v58, %v336_v52  ;;  %v337_v5 = vld [vmem:[%s926_s0 + $0x168] sm:$0xff]  ;;  %v430_v8 = vld [vmem:[%s926_s0 + $0x450] sm:$0xff]  ;;  %v151_v9 = vmax.f32 %v118_v61, %v367_v57  ;;  %v368_v10 = vld [vmem:[%s926_s0 + $0x260] sm:$0xff] }
  0x27   :  { %v248_v6 = vmax.f32 %v215_v59, %v413_v54  ;;  %v54_v11 = vmax.f32 %v21_v3, %v321_v4  ;;  %v399_v13 = vld [vmem:[%s926_s0 + $0x358] sm:$0xff]  ;;  %v384_v15 = vld [vmem:[%s926_s0 + $0x2e0] sm:$0xff]  ;;  %v353_v16 = vld [vmem:[%s926_s0 + $0x1e8] sm:$0xff] }
  0x28   :  { %296 = vst [vmem:[%s927_s1 + $0x40] sm:$0xff] %v280_v0  ;;  %v216_v12 = vmax.f32 %v183_v1, %v398_v60  ;;  %v119_v14 = vmax.f32 %v86_v2, %v352_v63  ;;  %v184_v18 = vmax.f32 %v151_v9, %v383_v62  ;;  %v22_v20 = vld [vmem:[%s926_s0 + $0x70] sm:$0xff]  ;;  %v415_v24 = vld [vmem:[%s926_s0 + $0x3d8] sm:$0xff]  ;;  %v369_v27 = vld [vmem:[%s926_s0 + $0x268] sm:$0xff] }
  0x29   :  { %v281_v17 = vmax.f32 %v248_v6, %v429_v55  ;;  %v87_v19 = vmax.f32 %v54_v11, %v337_v5  ;;  %v322_v21 = vld [vmem:[%s926_s0 + $0xf0] sm:$0xff]  ;;  %v431_v25 = vld [vmem:[%s926_s0 + $0x458] sm:$0xff]  ;;  %v400_v30 = vld [vmem:[%s926_s0 + $0x360] sm:$0xff] }
  0x2a   :  { %v338_v22 = vld [vmem:[%s926_s0 + $0x170] sm:$0xff]  ;;  %v249_v23 = vmax.f32 %v216_v12, %v414_v7  ;;  %v152_v26 = vmax.f32 %v119_v14, %v368_v10  ;;  %v55_v28 = vmax.f32 %v22_v20, %v322_v21  ;;  %v217_v29 = vmax.f32 %v184_v18, %v399_v13  ;;  %v385_v32 = vld [vmem:[%s926_s0 + $0x2e8] sm:$0xff]  ;;  %v23_v37 = vld [vmem:[%s926_s0 + $0x78] sm:$0xff] }
  0x2b   :  { %297 = vst [vmem:[%s927_s1 + $0x48] sm:$0xff] %v281_v17  ;;  %v120_v31 = vmax.f32 %v87_v19, %v353_v16  ;;  %v354_v33 = vld [vmem:[%s926_s0 + $0x1f0] sm:$0xff]  ;;  %v323_v38 = vld [vmem:[%s926_s0 + $0xf8] sm:$0xff]  ;;  %v416_v41 = vld [vmem:[%s926_s0 + $0x3e0] sm:$0xff] }
  0x2c   :  { %v282_v34 = vmax.f32 %v249_v23, %v430_v8  ;;  %v185_v35 = vmax.f32 %v152_v26, %v384_v15  ;;  %v88_v36 = vmax.f32 %v55_v28, %v338_v22  ;;  %v339_v39 = vld [vmem:[%s926_s0 + $0x178] sm:$0xff]  ;;  %v250_v40 = vmax.f32 %v217_v29, %v415_v24  ;;  %v370_v43 = vld [vmem:[%s926_s0 + $0x270] sm:$0xff]  ;;  %v401_v46 = vld [vmem:[%s926_s0 + $0x368] sm:$0xff] }
  0x2d   :  { %v153_v42 = vmax.f32 %v120_v31, %v369_v27  ;;  %v56_v44 = vmax.f32 %v23_v37, %v323_v38  ;;  %v355_v48 = vld [vmem:[%s926_s0 + $0x1f8] sm:$0xff]  ;;  %v432_v50 = vld [vmem:[%s926_s0 + $0x460] sm:$0xff]  ;;  %v386_v52 = vld [vmem:[%s926_s0 + $0x2f0] sm:$0xff] }
  0x2e   :  { %298 = vst [vmem:[%s927_s1 + $0x50] sm:$0xff] %v282_v34  ;;  %v218_v45 = vmax.f32 %v185_v35, %v400_v30  ;;  %v121_v47 = vmax.f32 %v88_v36, %v354_v33  ;;  %v283_v49 = vmax.f32 %v250_v40, %v431_v25  ;;  %v417_v55 = vld [vmem:[%s926_s0 + $0x3e8] sm:$0xff]  ;;  %v371_v57 = vld [vmem:[%s926_s0 + $0x278] sm:$0xff]  ;;  %v402_v59 = vld [vmem:[%s926_s0 + $0x370] sm:$0xff] }
  0x2f   :  { %v186_v51 = vmax.f32 %v153_v42, %v385_v32  ;;  %v89_v53 = vmax.f32 %v56_v44, %v339_v39  ;;  %v433_v62 = vld [vmem:[%s926_s0 + $0x468] sm:$0xff]  ;;  %v387_v0 = vld [vmem:[%s926_s0 + $0x2f8] sm:$0xff]  ;;  %v418_v2 = vld [vmem:[%s926_s0 + $0x3f0] sm:$0xff] }
  0x30   :  { %v251_v54 = vmax.f32 %v218_v45, %v416_v41  ;;  %v154_v56 = vmax.f32 %v121_v47, %v370_v43  ;;  %299 = vst [vmem:[%s927_s1 + $0x58] sm:$0xff] %v283_v49  ;;  %v403_v5 = vld [vmem:[%s926_s0 + $0x378] sm:$0xff]  ;;  %v434_v7 = vld [vmem:[%s926_s0 + $0x470] sm:$0xff] }
  0x31   :  { %v219_v58 = vmax.f32 %v186_v51, %v401_v46  ;;  %v122_v60 = vmax.f32 %v89_v53, %v355_v48  ;;  %v419_v10 = vld [vmem:[%s926_s0 + $0x3f8] sm:$0xff] }
  0x32   :  { %v284_v61 = vmax.f32 %v251_v54, %v432_v50  ;;  %v187_v63 = vmax.f32 %v154_v56, %v386_v52  ;;  %v435_v13 = vld [vmem:[%s926_s0 + $0x478] sm:$0xff] }
  0x33   :  { %v252_v1 = vmax.f32 %v219_v58, %v417_v55  ;;  %v155_v3 = vmax.f32 %v122_v60, %v371_v57 }
  0x34   :  { %300 = vst [vmem:[%s927_s1 + $0x60] sm:$0xff] %v284_v61  ;;  %v220_v4 = vmax.f32 %v187_v63, %v402_v59 }
  0x35   :  { %v285_v6 = vmax.f32 %v252_v1, %v433_v62  ;;  %v188_v8 = vmax.f32 %v155_v3, %v387_v0 }
  0x36   :  { %v253_v9 = vmax.f32 %v220_v4, %v418_v2 }
  0x37   :  { %301 = vst [vmem:[%s927_s1 + $0x68] sm:$0xff] %v285_v6  ;;  %v221_v11 = vmax.f32 %v188_v8, %v403_v5 }
  0x38   :  { %v286_v12 = vmax.f32 %v253_v9, %v434_v7 }
  0x39   :  { %v254_v14 = vmax.f32 %v221_v11, %v419_v10 }
  0x3a   :  { %302 = vst [vmem:[%s927_s1 + $0x70] sm:$0xff] %v286_v12 }
  0x3b   :  { %v287_v15 = vmax.f32 %v254_v14, %v435_v13 }
  0x3d   :  { %303 = vst [vmem:[%s927_s1 + $0x78] sm:$0xff] %v287_v15 }

// kernel: feature_extractor_forward.9
= control target key start
LH: loop header
LB: loop body
LE: loop exit
PB: predicated region body
PF: predicated region fallthrough
CT: control target
= control target key end

     0   :  { %v40_v0 = vlaneseq  ;;  %v681_v21 = vmov 1.0|1.0   ;;  %s975_s0 = inlined_call_operand.vmem [shape: f32[128,128], index: 0, kind: input, shape index: {}]   ;;  %s976_s1 = inlined_call_operand.vmem [shape: f32[128,128], index: 1, kind: output, shape index: {}]  }
   0x1   :  { %v695_v1 = vld [vmem:[%s975_s0] sm:$0xff]  ;;  %v812_v42 = vld [vmem:[%s975_s0 + $0x8] sm:$0xff]  ;;  %v824_v44 = vld [vmem:[%s975_s0 + $0x10] sm:$0xff] }
   0x2   :  { %v700_v2 = vld [vmem:[%s975_s0 + $0x40] sm:$0xff]  ;;  %v702_v3 = vshrl.u32 %v40_v0, 7  ;;  %v704_v4 = vand.u32 127, %v40_v0  ;;  %v24_v5 = vmul.f32 %v695_v1, %v695_v1  ;;  %v817_v43 = vld [vmem:[%s975_s0 + $0x48] sm:$0xff]  ;;  %v829_v45 = vld [vmem:[%s975_s0 + $0x50] sm:$0xff]  ;;  %v25_v46 = vmul.f32 %v812_v42, %v812_v42 }
   0x3   :  { %v32_v6 = vmul.f32 %v700_v2, %v700_v2  ;;  %v33_v47 = vmul.f32 %v817_v43, %v817_v43  ;;  %v26_v48 = vmul.f32 %v824_v44, %v824_v44  ;;  %v34_v49 = vmul.f32 %v829_v45, %v829_v45  ;;  %v844_v50 = vld [vmem:[%s975_s0 + $0x18] sm:$0xff]  ;;  %v854_v52 = vld [vmem:[%s975_s0 + $0x20] sm:$0xff]  ;;  %v872_v58 = vld [vmem:[%s975_s0 + $0x28] sm:$0xff] }
   0x4   :  { %v42_v7 = vadd.s32 8, %v702_v3  ;;  %v59_v8 = vsub.s32 %v702_v3, %v704_v4  ;;  %v43_v9 = vadd.s32 16, %v702_v3  ;;  %v44_v10 = vadd.s32 24, %v702_v3  ;;  %544 = vmatprep.mubr.f32.mxu0 %v24_v5  ;;  %v849_v51 = vld [vmem:[%s975_s0 + $0x58] sm:$0xff]  ;;  %v859_v53 = vld [vmem:[%s975_s0 + $0x60] sm:$0xff]  ;;  %v877_v59 = vld [vmem:[%s975_s0 + $0x68] sm:$0xff] }
   0x5   :  { %556 = vmatprep.mubr.f32.mxu1 %v32_v6  ;;  %v45_v11 = vadd.s32 32, %v702_v3  ;;  %v46_v12 = vadd.s32 40, %v702_v3  ;;  %v47_v13 = vadd.s32 48, %v702_v3  ;;  %v48_v19 = vadd.s32 56, %v702_v3  ;;  %v882_v60 = vld [vmem:[%s975_s0 + $0x30] sm:$0xff]  ;;  %v905_v5 = vld [vmem:[%s975_s0 + $0x78] sm:$0xff] }
   0x6   :  { %v60_v14 = vsub.s32 %v42_v7, %v704_v4  ;;  %vm75_vm0 = vcmp.ge.s32.totalorder %v59_v8, 4294967294  ;;  %vm91_vm1 = vcmp.le.s32.totalorder %v59_v8, 2  ;;  %v61_v15 = vsub.s32 %v43_v9, %v704_v4  ;;  %v887_v61 = vld [vmem:[%s975_s0 + $0x70] sm:$0xff] }
   0x7   :  { %vm107_vm2 = vmand %vm75_vm0, %vm91_vm1  ;;  %v62_v16 = vsub.s32 %v44_v10, %v704_v4  ;;  %v63_v17 = vsub.s32 %v45_v11, %v704_v4  ;;  %v64_v18 = vsub.s32 %v46_v12, %v704_v4  ;;  %v65_v20 = vsub.s32 %v47_v13, %v704_v4 }
   0x8   :  { %vm76_vm3 = vcmp.ge.s32.totalorder %v60_v14, 4294967294  ;;  %vm92_vm4 = vcmp.le.s32.totalorder %v60_v14, 2  ;;  %vm77_vm5 = vcmp.ge.s32.totalorder %v61_v15, 4294967294  ;;  %vm93_vm6 = vcmp.le.s32.totalorder %v61_v15, 2 }
   0x9   :  { %vm108_vm7 = vmand %vm76_vm3, %vm92_vm4  ;;  %vm78_vm8 = vcmp.ge.s32.totalorder %v62_v16, 4294967294  ;;  %vm94_vm9 = vcmp.le.s32.totalorder %v62_v16, 2  ;;  %vm79_vm11 = vcmp.ge.s32.totalorder %v63_v17, 4294967294  ;;  %vm95_vm13 = vcmp.le.s32.totalorder %v63_v17, 2 }
   0xa   :  { %vm568_vm10 = vmpackc.low %vm108_vm7, %vm107_vm2  ;;  %v66_v22 = vsub.s32 %v48_v19, %v704_v4  ;;  %v49_v23 = vadd.s32 64, %v702_v3  ;;  %v50_v24 = vadd.s32 72, %v702_v3  ;;  %vm80_vm15 = vcmp.ge.s32.totalorder %v64_v18, 4294967294 }
   0xb   :  { %569 = vmatprep.subr.msk.bf16.mxu0 %vm568_vm10, %v681_v21  ;;  %600 = vmatprep.subr.msk.bf16.mxu1 %vm568_vm10, %v681_v21  ;;  %vm109_vm12 = vmand %vm77_vm5, %vm93_vm6  ;;  %vm96_vm0 = vcmp.le.s32.totalorder %v64_v18, 2  ;;  %v51_v25 = vadd.s32 80, %v702_v3  ;;  %v52_v27 = vadd.s32 88, %v702_v3  ;;  %vm81_vm3 = vcmp.ge.s32.totalorder %v65_v20, 4294967294 }
   0xc   :  { %571 = vmatpush3.bf16.msk.msra.mxu0 %vm568_vm10, %v681_v21  ;;  %608 = vmatpush3.bf16.msk.msra.mxu1 %vm568_vm10, %v681_v21  ;;  %vm110_vm14 = vmand %vm78_vm8, %vm94_vm9  ;;  %v67_v26 = vsub.s32 %v49_v23, %v704_v4  ;;  %vm97_vm4 = vcmp.le.s32.totalorder %v65_v20, 2  ;;  %v68_v28 = vsub.s32 %v50_v24, %v704_v4  ;;  %vm82_vm6 = vcmp.ge.s32.totalorder %v66_v22, 4294967294 }
   0xd   :  { %vm572_vm1 = vmpackc.low %vm110_vm14, %vm109_vm12  ;;  %vm98_vm7 = vcmp.le.s32.totalorder %v66_v22, 2  ;;  %v53_v29 = vadd.s32 96, %v702_v3  ;;  %v69_v31 = vsub.s32 %v51_v25, %v704_v4  ;;  %v54_v32 = vadd.s32 104, %v702_v3 }
   0xe   :  { %573 = vmatprep.subr.msk.bf16.mxu0 %vm572_vm1, %v681_v21  ;;  %601 = vmatprep.subr.msk.bf16.mxu1 %vm572_vm1, %v681_v21  ;;  %vm111_vm2 = vmand %vm79_vm11, %vm95_vm13  ;;  %vm83_vm10 = vcmp.ge.s32.totalorder %v67_v26, 4294967294  ;;  %vm99_vm11 = vcmp.le.s32.totalorder %v67_v26, 2  ;;  %v70_v33 = vsub.s32 %v52_v27, %v704_v4  ;;  %vm84_vm13 = vcmp.ge.s32.totalorder %v68_v28, 4294967294 }
   0xf   :  { %vm112_vm5 = vmand %vm80_vm15, %vm96_vm0  ;;  %vm100_vm14 = vcmp.le.s32.totalorder %v68_v28, 2  ;;  %v71_v35 = vsub.s32 %v53_v29, %v704_v4  ;;  %v55_v36 = vadd.s32 112, %v702_v3  ;;  %v72_v37 = vsub.s32 %v54_v32, %v704_v4 }
  0x10   :  { %575 = vmatpush3.bf16.msk.msra.mxu0 %vm572_vm1, %v681_v21  ;;  %609 = vmatpush3.bf16.msk.msra.mxu1 %vm572_vm1, %v681_v21  ;;  %vm744_vm8 = vmpackc.low %vm112_vm5, %vm111_vm2  ;;  %vm85_vm1 = vcmp.ge.s32.totalorder %v69_v31, 4294967294  ;;  %vm101_vm2 = vcmp.le.s32.totalorder %v69_v31, 2  ;;  %v56_v38 = vadd.s32 120, %v702_v3  ;;  %vm102_vm5 = vcmp.le.s32.totalorder %v70_v33, 2 }
  0x11   :  { %577 = vmatprep.subr.msk.bf16.mxu0 %vm744_vm8, %v681_v21  ;;  %602 = vmatprep.subr.msk.bf16.mxu1 %vm744_vm8, %v681_v21  ;;  %vm113_vm9 = vmand %vm81_vm3, %vm97_vm4  ;;  %vm86_vm4 = vcmp.ge.s32.totalorder %v70_v33, 4294967294  ;;  %v73_v40 = vsub.s32 %v55_v36, %v704_v4  ;;  %v27_v54 = vmul.f32 %v844_v50, %v844_v50  ;;  %v35_v55 = vmul.f32 %v849_v51, %v849_v51 }
  0x12   :  { %vm114_vm12 = vmand %vm82_vm6, %vm98_vm7  ;;  %v74_v41 = vsub.s32 %v56_v38, %v704_v4  ;;  %v28_v56 = vmul.f32 %v854_v52, %v854_v52  ;;  %v36_v57 = vmul.f32 %v859_v53, %v859_v53  ;;  %v29_v62 = vmul.f32 %v872_v58, %v872_v58  ;;  %v900_v4 = vld [vmem:[%s975_s0 + $0x38] sm:$0xff] }
  0x13   :  { %vm757_vm15 = vmpackc.low %vm114_vm12, %vm113_vm9  ;;  %vm103_vm9 = vcmp.le.s32.totalorder %v71_v35, 2  ;;  %vm104_vm12 = vcmp.le.s32.totalorder %v72_v37, 2  ;;  %v37_v63 = vmul.f32 %v877_v59, %v877_v59  ;;  %v30_v0 = vmul.f32 %v882_v60, %v882_v60 }
  0x14   :  { %579 = vmatpush3.bf16.msk.msra.mxu0 %vm744_vm8, %v681_v21  ;;  %610 = vmatpush3.bf16.msk.msra.mxu1 %vm744_vm8, %v681_v21  ;;  %vm115_vm0 = vmand %vm83_vm10, %vm99_vm11  ;;  %vm87_vm8 = vcmp.ge.s32.totalorder %v71_v35, 4294967294  ;;  %vm88_vm11 = vcmp.ge.s32.totalorder %v72_v37, 4294967294  ;;  %v38_v3 = vmul.f32 %v887_v61, %v887_v61  ;;  %v31_v6 = vmul.f32 %v900_v4, %v900_v4 }
  0x15   :  { %581 = vmatprep.subr.msk.bf16.mxu0 %vm757_vm15, %v681_v21  ;;  %603 = vmatprep.subr.msk.bf16.mxu1 %vm757_vm15, %v681_v21  ;;  %vm116_vm3 = vmand %vm84_vm13, %vm100_vm14  ;;  %v39_v7 = vmul.f32 %v905_v5, %v905_v5 }
  0x16   :  { %vm777_vm6 = vmpackc.low %vm116_vm3, %vm115_vm0  ;;  %vm106_vm3 = vcmp.le.s32.totalorder %v74_v41, 2 }
  0x17   :  { %vm117_vm7 = vmand %vm85_vm1, %vm101_vm2  ;;  %vm89_vm1 = vcmp.ge.s32.totalorder %v73_v40, 4294967294  ;;  %vm105_vm2 = vcmp.le.s32.totalorder %v73_v40, 2 }
  0x18   :  { %583 = vmatpush3.bf16.msk.msra.mxu0 %vm757_vm15, %v681_v21  ;;  %611 = vmatpush3.bf16.msk.msra.mxu1 %vm757_vm15, %v681_v21  ;;  %vm118_vm10 = vmand %vm86_vm4, %vm102_vm5  ;;  %vm90_vm15 = vcmp.ge.s32.totalorder %v74_v41, 4294967294 }
  0x19   :  { %585 = vmatprep.subr.msk.bf16.mxu0 %vm777_vm6, %v681_v21  ;;  %604 = vmatprep.subr.msk.bf16.mxu1 %vm777_vm6, %v681_v21  ;;  %vm588_vm13 = vmpackc.low %vm118_vm10, %vm117_vm7 }
  0x1a   :  { %vm119_vm14 = vmand %vm87_vm8, %vm103_vm9 }
  0x1b   :  { %vm120_vm0 = vmand %vm88_vm11, %vm104_vm12 }
  0x1c   :  { %587 = vmatpush3.bf16.msk.msra.mxu0 %vm777_vm6, %v681_v21  ;;  %612 = vmatpush3.bf16.msk.msra.mxu1 %vm777_vm6, %v681_v21  ;;  %vm592_vm4 = vmpackc.low %vm120_vm0, %vm119_vm14 }
  0x1d   :  { %589 = vmatprep.subr.msk.bf16.mxu0 %vm588_vm13, %v681_v21  ;;  %605 = vmatprep.subr.msk.bf16.mxu1 %vm588_vm13, %v681_v21  ;;  %vm121_vm5 = vmand %vm89_vm1, %vm105_vm2 }
  0x1e   :  { %vm122_vm7 = vmand %vm90_vm15, %vm106_vm3 }
  0x1f   :  { %vm596_vm8 = vmpackc.low %vm122_vm7, %vm121_vm5 }
  0x20   :  { %591 = vmatpush3.bf16.msk.msra.mxu0 %vm588_vm13, %v681_v21  ;;  %613 = vmatpush3.bf16.msk.msra.mxu1 %vm588_vm13, %v681_v21 }
  0x21   :  { %593 = vmatprep.subr.msk.bf16.mxu0 %vm592_vm4, %v681_v21  ;;  %606 = vmatprep.subr.msk.bf16.mxu1 %vm592_vm4, %v681_v21 }
  0x24   :  { %595 = vmatpush3.bf16.msk.msra.mxu0 %vm592_vm4, %v681_v21  ;;  %614 = vmatpush3.bf16.msk.msra.mxu1 %vm592_vm4, %v681_v21 }
  0x25   :  { %597 = vmatprep.subr.msk.bf16.mxu0 %vm596_vm8, %v681_v21  ;;  %607 = vmatprep.subr.msk.bf16.mxu1 %vm596_vm8, %v681_v21 }
  0x28   :  { %599 = vmatpush3.bf16.msk.msra.mxu0 %vm596_vm8, %v681_v21  ;;  %615 = vmatpush3.bf16.msk.msra.mxu1 %vm596_vm8, %v681_v21 }
  0x2b   :  { %545 = vmatmul.mubr.f32.vlgmr.msra.gmra.mrb[0].mxu0 %v25_v46  ;;  %557 = vmatmul.mubr.f32.vlgmr.msra.gmra.mrb[0].mxu1 %v33_v47 }
  0x2c   :  { %547 = vmatprep.mubr.f32.mxu0 %v26_v48  ;;  %559 = vmatprep.mubr.f32.mxu1 %v34_v49 }
  0x2f   :  { %548 = vmatmul.mubr.f32.gmra.mrb[2].mxu0 %v27_v54  ;;  %560 = vmatmul.mubr.f32.gmra.mrb[2].mxu1 %v35_v55 }
  0x30   :  { %550 = vmatprep.mubr.f32.mxu0 %v28_v56  ;;  %562 = vmatprep.mubr.f32.mxu1 %v36_v57 }
  0x33   :  { %551 = vmatmul.mubr.f32.gmra.mrb[4].mxu0 %v29_v62  ;;  %563 = vmatmul.mubr.f32.gmra.mrb[4].mxu1 %v37_v63 }
  0x34   :  { %553 = vmatprep.mubr.f32.mxu0 %v30_v0  ;;  %565 = vmatprep.mubr.f32.mxu1 %v38_v3 }
  0x37   :  { %554 = vmatmul.mubr.f32.gmra.mrb[6].mxu0 %v31_v6  ;;  %566 = vmatmul.mubr.f32.gmra.mrb[6].mxu1 %v39_v7 }
  0xfe   :  { %v546_v8 = vpop.f32.mrb[0].mxu0  ;;  %v558_v9 = vpop.f32.mrb[0].mxu1 }
  0xff   :  { %v301_v10 = vmul.f32 2e-05, %v546_v8  ;;  %v309_v11 = vmul.f32 2e-05, %v558_v9  ;;  %v221_v12 = vpop.f32.mrb[1].mxu0  ;;  %v261_v13 = vpop.f32.mrb[1].mxu1 }
 0x100   :  { %v300_v14 = vmul.f32 2e-05, %v221_v12  ;;  %v308_v15 = vmul.f32 2e-05, %v261_v13 }
 0x101   :  { %v317_v16 = vadd.f32 1.0, %v301_v10  ;;  %v325_v17 = vadd.f32 1.0, %v309_v11 }
 0x102   :  { %v316_v18 = vadd.f32 1.0, %v300_v14  ;;  %v324_v19 = vadd.f32 1.0, %v308_v15  ;;  %v549_v20 = vpop.f32.mrb[2].mxu0  ;;  %v561_v21 = vpop.f32.mrb[2].mxu1 }
 0x103   :  { %617 = vlog2.f32 %v317_v16  ;;  %v303_v22 = vmul.f32 2e-05, %v549_v20  ;;  %v311_v23 = vmul.f32 2e-05, %v561_v21  ;;  %v231_v24 = vpop.f32.mrb[3].mxu0  ;;  %v271_v25 = vpop.f32.mrb[3].mxu1 }
 0x104   :  { %619 = vlog2.f32 %v325_v17  ;;  %v302_v26 = vmul.f32 2e-05, %v231_v24  ;;  %v310_v27 = vmul.f32 2e-05, %v271_v25 }
 0x105   :  { %621 = vlog2.f32 %v316_v18  ;;  %v319_v28 = vadd.f32 1.0, %v303_v22  ;;  %v327_v29 = vadd.f32 1.0, %v311_v23 }
 0x106   :  { %623 = vlog2.f32 %v324_v19  ;;  %v318_v30 = vadd.f32 1.0, %v302_v26  ;;  %v326_v31 = vadd.f32 1.0, %v310_v27  ;;  %v552_v32 = vpop.f32.mrb[4].mxu0  ;;  %v564_v33 = vpop.f32.mrb[4].mxu1 }
 0x107   :  { %625 = vlog2.f32 %v319_v28  ;;  %v305_v34 = vmul.f32 2e-05, %v552_v32  ;;  %v313_v35 = vmul.f32 2e-05, %v564_v33  ;;  %v241_v36 = vpop.f32.mrb[5].mxu0  ;;  %v281_v37 = vpop.f32.mrb[5].mxu1 }
 0x108   :  { %627 = vlog2.f32 %v327_v29  ;;  %v304_v38 = vmul.f32 2e-05, %v241_v36  ;;  %v312_v39 = vmul.f32 2e-05, %v281_v37 }
 0x109   :  { %629 = vlog2.f32 %v318_v30  ;;  %v321_v40 = vadd.f32 1.0, %v305_v34  ;;  %v329_v41 = vadd.f32 1.0, %v313_v35 }
 0x10a   :  { %631 = vlog2.f32 %v326_v31  ;;  %v320_v46 = vadd.f32 1.0, %v304_v38  ;;  %v328_v47 = vadd.f32 1.0, %v312_v39  ;;  %v555_v48 = vpop.f32.mrb[6].mxu0  ;;  %v567_v49 = vpop.f32.mrb[6].mxu1 }
 0x10b   :  { %633 = vlog2.f32 %v321_v40  ;;  %v307_v54 = vmul.f32 2e-05, %v555_v48  ;;  %v315_v55 = vmul.f32 2e-05, %v567_v49  ;;  %v251_v56 = vpop.f32.mrb[7].mxu0  ;;  %v291_v57 = vpop.f32.mrb[7].mxu1 }
 0x10c   :  { %635 = vlog2.f32 %v329_v41  ;;  %v306_v62 = vmul.f32 2e-05, %v251_v56  ;;  %v314_v63 = vmul.f32 2e-05, %v291_v57 }
 0x10d   :  { %v618_v0 = vpop.eup %617  ;;  %637 = vlog2.f32 %v320_v46  ;;  %v323_v3 = vadd.f32 1.0, %v307_v54  ;;  %v331_v6 = vadd.f32 1.0, %v315_v55 }
 0x10e   :  { %v620_v7 = vpop.eup %619  ;;  %v335_v8 = vmul.f32 0.6931472, %v618_v0  ;;  %639 = vlog2.f32 %v328_v47  ;;  %v322_v9 = vadd.f32 1.0, %v306_v62  ;;  %v330_v10 = vadd.f32 1.0, %v314_v63 }
 0x10f   :  { %v622_v11 = vpop.eup %621  ;;  %v351_v12 = vmul.f32 0.6931472, %v620_v7  ;;  %641 = vlog2.f32 %v323_v3 }
 0x110   :  { %v624_v13 = vpop.eup %623  ;;  %v365_v14 = vmul.f32 -0.75, %v335_v8  ;;  %v333_v15 = vmul.f32 0.6931472, %v622_v11  ;;  %643 = vlog2.f32 %v331_v6 }
 0x111   :  { %v626_v16 = vpop.eup %625  ;;  %v373_v17 = vmul.f32 -0.75, %v351_v12  ;;  %v349_v18 = vmul.f32 0.6931472, %v624_v13  ;;  %645 = vlog2.f32 %v322_v9 }
 0x112   :  { %v628_v19 = vpop.eup %627  ;;  %v382_v20 = vmul.f32 1.442695, %v365_v14  ;;  %v364_v21 = vmul.f32 -0.75, %v333_v15  ;;  %v339_v22 = vmul.f32 0.6931472, %v626_v16  ;;  %647 = vlog2.f32 %v330_v10 }
 0x113   :  { %v630_v23 = vpop.eup %629  ;;  %v398_v24 = vmul.f32 1.442695, %v373_v17  ;;  %v372_v25 = vmul.f32 -0.75, %v349_v18  ;;  %v355_v26 = vmul.f32 0.6931472, %v628_v19 }
 0x114   :  { %v632_v27 = vpop.eup %631  ;;  %649 = vpow2.f32 %v382_v20  ;;  %v380_v28 = vmul.f32 1.442695, %v364_v21  ;;  %v367_v29 = vmul.f32 -0.75, %v339_v22  ;;  %v337_v30 = vmul.f32 0.6931472, %v630_v23 }
 0x115   :  { %v634_v31 = vpop.eup %633  ;;  %651 = vpow2.f32 %v398_v24  ;;  %v396_v32 = vmul.f32 1.442695, %v372_v25  ;;  %v375_v33 = vmul.f32 -0.75, %v355_v26  ;;  %v353_v34 = vmul.f32 0.6931472, %v632_v27 }
 0x116   :  { %v636_v35 = vpop.eup %635  ;;  %653 = vpow2.f32 %v380_v28  ;;  %v386_v36 = vmul.f32 1.442695, %v367_v29  ;;  %v366_v37 = vmul.f32 -0.75, %v337_v30  ;;  %v343_v38 = vmul.f32 0.6931472, %v634_v31 }
 0x117   :  { %v638_v39 = vpop.eup %637  ;;  %655 = vpow2.f32 %v396_v32  ;;  %v402_v40 = vmul.f32 1.442695, %v375_v33  ;;  %v374_v41 = vmul.f32 -0.75, %v353_v34  ;;  %v359_v46 = vmul.f32 0.6931472, %v636_v35 }
 0x118   :  { %v640_v47 = vpop.eup %639  ;;  %657 = vpow2.f32 %v386_v36  ;;  %v384_v48 = vmul.f32 1.442695, %v366_v37  ;;  %v369_v49 = vmul.f32 -0.75, %v343_v38  ;;  %v341_v54 = vmul.f32 0.6931472, %v638_v39 }
 0x119   :  { %v642_v55 = vpop.eup %641  ;;  %659 = vpow2.f32 %v402_v40  ;;  %v400_v56 = vmul.f32 1.442695, %v374_v41  ;;  %v377_v57 = vmul.f32 -0.75, %v359_v46  ;;  %v357_v62 = vmul.f32 0.6931472, %v640_v47 }
 0x11a   :  { %v644_v63 = vpop.eup %643  ;;  %661 = vpow2.f32 %v384_v48  ;;  %v390_v0 = vmul.f32 1.442695, %v369_v49  ;;  %v368_v3 = vmul.f32 -0.75, %v341_v54  ;;  %v347_v6 = vmul.f32 0.6931472, %v642_v55 }
 0x11b   :  { %v646_v7 = vpop.eup %645  ;;  %663 = vpow2.f32 %v400_v56  ;;  %v406_v8 = vmul.f32 1.442695, %v377_v57  ;;  %v376_v9 = vmul.f32 -0.75, %v357_v62  ;;  %v363_v10 = vmul.f32 0.6931472, %v644_v63 }
 0x11c   :  { %v648_v11 = vpop.eup %647  ;;  %665 = vpow2.f32 %v390_v0  ;;  %v388_v12 = vmul.f32 1.442695, %v368_v3  ;;  %v371_v13 = vmul.f32 -0.75, %v347_v6  ;;  %v345_v14 = vmul.f32 0.6931472, %v646_v7 }
 0x11d   :  { %667 = vpow2.f32 %v406_v8  ;;  %v404_v15 = vmul.f32 1.442695, %v376_v9  ;;  %v379_v16 = vmul.f32 -0.75, %v363_v10  ;;  %v361_v17 = vmul.f32 0.6931472, %v648_v11 }
 0x11e   :  { %v650_v18 = vpop.eup %649  ;;  %669 = vpow2.f32 %v388_v12  ;;  %v394_v19 = vmul.f32 1.442695, %v371_v13  ;;  %v370_v20 = vmul.f32 -0.75, %v345_v14 }
 0x11f   :  { %v652_v21 = vpop.eup %651  ;;  %v413_v22 = vmul.f32 %v650_v18, %v812_v42  ;;  %671 = vpow2.f32 %v404_v15  ;;  %v410_v23 = vmul.f32 1.442695, %v379_v16  ;;  %v378_v24 = vmul.f32 -0.75, %v361_v17 }
 0x120   :  { %v654_v25 = vpop.eup %653  ;;  %v421_v26 = vmul.f32 %v652_v21, %v817_v43  ;;  %673 = vpow2.f32 %v394_v19  ;;  %v392_v27 = vmul.f32 1.442695, %v370_v20 }
 0x121   :  { %v656_v28 = vpop.eup %655  ;;  %429 = vst [vmem:[%s976_s1 + $0x8] sm:$0xff] %v413_v22  ;;  %v412_v29 = vmul.f32 %v654_v25, %v695_v1  ;;  %675 = vpow2.f32 %v410_v23  ;;  %v408_v30 = vmul.f32 1.442695, %v378_v24 }
 0x122   :  { %v658_v31 = vpop.eup %657  ;;  %437 = vst [vmem:[%s976_s1 + $0x48] sm:$0xff] %v421_v26  ;;  %v420_v42 = vmul.f32 %v656_v28, %v700_v2  ;;  %677 = vpow2.f32 %v392_v27 }
 0x123   :  { %v660_v43 = vpop.eup %659  ;;  %428 = vst [vmem:[%s976_s1] sm:$0xff] %v412_v29  ;;  %v415_v32 = vmul.f32 %v658_v31, %v844_v50  ;;  %679 = vpow2.f32 %v408_v30 }
 0x124   :  { %v662_v33 = vpop.eup %661  ;;  %436 = vst [vmem:[%s976_s1 + $0x40] sm:$0xff] %v420_v42  ;;  %v423_v1 = vmul.f32 %v660_v43, %v849_v51 }
 0x125   :  { %v664_v34 = vpop.eup %663  ;;  %431 = vst [vmem:[%s976_s1 + $0x18] sm:$0xff] %v415_v32  ;;  %v414_v2 = vmul.f32 %v662_v33, %v824_v44 }
 0x126   :  { %v666_v35 = vpop.eup %665  ;;  %439 = vst [vmem:[%s976_s1 + $0x58] sm:$0xff] %v423_v1  ;;  %v422_v50 = vmul.f32 %v664_v34, %v829_v45 }
 0x127   :  { %v668_v36 = vpop.eup %667  ;;  %430 = vst [vmem:[%s976_s1 + $0x10] sm:$0xff] %v414_v2  ;;  %v417_v51 = vmul.f32 %v666_v35, %v872_v58 }
 0x128   :  { %v670_v37 = vpop.eup %669  ;;  %438 = vst [vmem:[%s976_s1 + $0x50] sm:$0xff] %v422_v50  ;;  %v425_v44 = vmul.f32 %v668_v36, %v877_v59 }
 0x129   :  { %v672_v38 = vpop.eup %671  ;;  %433 = vst [vmem:[%s976_s1 + $0x28] sm:$0xff] %v417_v51  ;;  %v416_v45 = vmul.f32 %v670_v37, %v854_v52 }
 0x12a   :  { %v674_v39 = vpop.eup %673  ;;  %441 = vst [vmem:[%s976_s1 + $0x68] sm:$0xff] %v425_v44  ;;  %v424_v58 = vmul.f32 %v672_v38, %v859_v53 }
 0x12b   :  { %v676_v40 = vpop.eup %675  ;;  %432 = vst [vmem:[%s976_s1 + $0x20] sm:$0xff] %v416_v45  ;;  %v419_v59 = vmul.f32 %v674_v39, %v900_v4 }
 0x12c   :  { %v678_v41 = vpop.eup %677  ;;  %440 = vst [vmem:[%s976_s1 + $0x60] sm:$0xff] %v424_v58  ;;  %v427_v52 = vmul.f32 %v676_v40, %v905_v5 }
 0x12d   :  { %v680_v46 = vpop.eup %679  ;;  %435 = vst [vmem:[%s976_s1 + $0x38] sm:$0xff] %v419_v59  ;;  %v418_v53 = vmul.f32 %v678_v41, %v882_v60 }
 0x12e   :  { %443 = vst [vmem:[%s976_s1 + $0x78] sm:$0xff] %v427_v52  ;;  %v426_v4 = vmul.f32 %v680_v46, %v887_v61 }
 0x12f   :  { %434 = vst [vmem:[%s976_s1 + $0x30] sm:$0xff] %v418_v53 }
 0x130   :  { %442 = vst [vmem:[%s976_s1 + $0x70] sm:$0xff] %v426_v4 }

// kernel: feature_extractor_forward.10
= control target key start
LH: loop header
LB: loop body
LE: loop exit
PB: predicated region body
PF: predicated region fallthrough
CT: control target
= control target key end

     0   :  { %s2181_s12 = smov 0   ;;  %s2183_s13 = smov 0   ;;  %s2733_s0 = inlined_call_operand.vmem [shape: f32[2,128,1200], index: 0, kind: input, shape index: {}]   ;;  %s2734_s1 = inlined_call_operand.vmem [shape: f32[2,1200,128], index: 1, kind: input, shape index: {}]   ;;  %s2735_s2 = inlined_call_operand.vmem [shape: f32[2,1,128], index: 2, kind: input, shape index: {}]   ;;  %s2736_s3 = inlined_call_operand.vmem [shape: f32[128,256], index: 3, kind: output, shape index: {}]  }
   0x1   :  { %s2185_s14 = smov 0   ;;  %s2187_s15 = smov 0  }
   0x2   :  { %s2189_s16 = smov 0  }
   0x3 LB: > { %s1551_s17 = sadd.s32 4294967295, %s2158_s16   ;;  %s25_s18 = sadd.s32 1, %s2154_s15  ;;  %s2158_s16 = sphi %s2189_s16, %s13_s16   ;;  %s2154_s15 = sphi %s2187_s15, %s2741_s15   ;;  %s2150_s14 = sphi %s2185_s14, %s2740_s14   ;;  %s2146_s13 = sphi %s2183_s13, %s2739_s13   ;;  %s2142_s12 = sphi %s2181_s12, %s2738_s12  }
   0x4   : > { %p27_p0 = scmp.ge.s32.totalorder %s25_s18, 2  ;;  %s114_s19 = sadd.s32 1, %s2146_s13 }
   0x5   : > { %p124_p1 = scmp.ne.s32.totalorder %s2146_s13, %s2142_s12  ;;  %p125_p2 = scmp.eq.s32.totalorder %s1551_s17, 1 }
   0x6   : > { %s2743_s18 = smov (%p27_p0, %s25_s18), 0  ;;  %p1555_p4 = scmp.ge.s32.totalorder %s2158_s16, 1 }
   0x7   : > { %p2213_p3 = por %p125_p2, %p124_p1  ;;  %s110_s21 = ssub.s32 %s2154_s15, %s2743_s18 }
   0x8   : > { %p177_p5 = scmp.lt.s32.totalorder %s2158_s16, 3  ;;  %p112_p6 = scmp.eq.s32.totalorder %s110_s21, 0 }
   0xa   : > { %p178_p7 = pnand %p1555_p4, %p177_p5 }
   0xb   : > { %s2222_s22 = scalar_select %p112_p6, %s2146_s13, %s114_s19  }
   0xc   : > { %181 = sbr.rel (%p178_p7) target bundleno = 445 (0x1bd), region = 32  ;;  %p214_p8 = scmp.lt.s32.totalorder (!%p178_p7), %s2150_s14, 1  ;;  %vm550_vm0 = vcmask (!%p178_p7), 392192  }
   0xd   : > { %s210_s8 = sand.u32 (!%p178_p7), 1, %s2142_s12  }
   0xe   : > { %s1556_s9 = sshll.u32 (!%p178_p7), %s210_s8, 7 }
   0xf   : > { %s2664_s10 = scalar_lea.vmem (!%p178_p7), [#allocation2], %s1556_s9 }
  0x13   : > { %s2226_s23 = scalar_select %p214_p8, %s2150_s14, 1 }
  0x14   : > { %s1577_s11 = sshll.u32 (%p2213_p3), %s2150_s14, 3 }
  0x15   : > { %s2078_s24 = smul.u32 1200, %s2226_s23  ;;  %s231_s7 = scalar_lea.vmem %s2735_s2, %s2226_s23 }
  0x16   : > { %s2077_s28 = smul.u32 1280, %s2226_s23  ;;  %s1367_s19 = scalar_lea.vmem (%p2213_p3), %s2736_s3, %s1577_s11 }
  0x17   : > { %s2232_s27 = scalar_lea.vmem %s2734_s1, %s2078_s24 }
  0x18   : > { %v409_v0 = vld [vmem:[%s2232_s27 + $0x80] sm:$0xff]  ;;  %v410_v1 = vld [vmem:[%s2232_s27 + $0x88] sm:$0xff]  ;;  %v411_v5 = vld [vmem:[%s2232_s27 + $0x90] sm:$0xff]  ;;  %s2252_s4 = scalar_lea.vmem %s2733_s0, %s2077_s28 }
  0x19   : > { %v393_v2 = vld [vmem:[%s2232_s27] sm:$0xff]  ;;  %v1900_v3 = vpack.c.bf16 %v410_v1, %v409_v0  ;;  %v394_v4 = vld [vmem:[%s2232_s27 + $0x8] sm:$0xff]  ;;  %v412_v6 = vld [vmem:[%s2232_s27 + $0x98] sm:$0xff] }
  0x1a   : > { %v1902_v7 = vpack.c.bf16 %v394_v4, %v393_v2  ;;  %v1904_v8 = vpack.c.bf16 %v412_v6, %v411_v5  ;;  %v395_v9 = vld [vmem:[%s2232_s27 + $0x10] sm:$0xff]  ;;  %v396_v10 = vld [vmem:[%s2232_s27 + $0x18] sm:$0xff]  ;;  %v413_v11 = vld [vmem:[%s2232_s27 + $0xa0] sm:$0xff] }
  0x1b   : > { %2061 = vmatprep.subr.bf16.mxu1 %v1900_v3  ;;  %1901 = vmatprep.subr.bf16.mxu0 %v1900_v3  ;;  %v414_v12 = vld [vmem:[%s2232_s27 + $0xa8] sm:$0xff]  ;;  %v1906_v13 = vpack.c.bf16 %v396_v10, %v395_v9  ;;  %v397_v15 = vld [vmem:[%s2232_s27 + $0x20] sm:$0xff]  ;;  %v415_v17 = vld [vmem:[%s2232_s27 + $0xb0] sm:$0xff] }
  0x1c   : > { %2069 = vmatpush3.bf16.msra.mxu1 %v1902_v7  ;;  %1903 = vmatpush3.bf16.msra.mxu0 %v1902_v7  ;;  %v1908_v14 = vpack.c.bf16 %v414_v12, %v413_v11  ;;  %v398_v16 = vld [vmem:[%s2232_s27 + $0x28] sm:$0xff]  ;;  %v416_v18 = vld [vmem:[%s2232_s27 + $0xb8] sm:$0xff]  ;;  %v399_v21 = vld [vmem:[%s2232_s27 + $0x30] sm:$0xff] }
  0x1d   : > { %2062 = vmatprep.subr.bf16.mxu1 %v1904_v8  ;;  %1905 = vmatprep.subr.bf16.mxu0 %v1904_v8  ;;  %v1910_v19 = vpack.c.bf16 %v398_v16, %v397_v15  ;;  %v1912_v20 = vpack.c.bf16 %v416_v18, %v415_v17  ;;  %v400_v22 = vld [vmem:[%s2232_s27 + $0x38] sm:$0xff]  ;;  %v417_v23 = vld [vmem:[%s2232_s27 + $0xc0] sm:$0xff]  ;;  %v418_v24 = vld [vmem:[%s2232_s27 + $0xc8] sm:$0xff] }
  0x1e   : > { %v314_v25 = vld [vmem:[%s2252_s4 + $0x288] sm:$0xff]  ;;  %v1914_v26 = vpack.c.bf16 %v400_v22, %v399_v21  ;;  %v1916_v28 = vpack.c.bf16 %v418_v24, %v417_v23  ;;  %v401_v29 = vld [vmem:[%s2232_s27 + $0x40] sm:$0xff]  ;;  %v419_v31 = vld [vmem:[%s2232_s27 + $0xd0] sm:$0xff] }
  0x1f   : > { %703 = vmatprep.mubr.f32.mxu1 %v314_v25  ;;  %v234_v27 = vld [vmem:[%s2252_s4 + $0x8] sm:$0xff]  ;;  %v420_v32 = vld [vmem:[%s2232_s27 + $0xd8] sm:$0xff]  ;;  %v403_v35 = vld [vmem:[%s2232_s27 + $0x50] sm:$0xff] }
  0x20   : > { %2070 = vmatpush3.bf16.msra.mxu1 %v1906_v13  ;;  %1907 = vmatpush3.bf16.msra.mxu0 %v1906_v13  ;;  %v402_v30 = vld [vmem:[%s2232_s27 + $0x48] sm:$0xff]  ;;  %v1920_v34 = vpack.c.bf16 %v420_v32, %v419_v31  ;;  %v404_v36 = vld [vmem:[%s2232_s27 + $0x58] sm:$0xff]  ;;  %v421_v37 = vld [vmem:[%s2232_s27 + $0xe0] sm:$0xff] }
  0x21   : > { %2063 = vmatprep.subr.bf16.mxu1 %v1908_v14  ;;  %1909 = vmatprep.subr.bf16.mxu0 %v1908_v14  ;;  %v1918_v33 = vpack.c.bf16 %v402_v30, %v401_v29  ;;  %v422_v38 = vld [vmem:[%s2232_s27 + $0xe8] sm:$0xff]  ;;  %v1922_v39 = vpack.c.bf16 %v404_v36, %v403_v35  ;;  %v405_v41 = vld [vmem:[%s2232_s27 + $0x60] sm:$0xff]  ;;  %v423_v43 = vld [vmem:[%s2232_s27 + $0xf0] sm:$0xff] }
  0x22   : > { %663 = vmatprep.mubr.f32.mxu0 %v234_v27  ;;  %v1924_v40 = vpack.c.bf16 %v422_v38, %v421_v37  ;;  %v406_v42 = vld [vmem:[%s2232_s27 + $0x68] sm:$0xff]  ;;  %v424_v44 = vld [vmem:[%s2232_s27 + $0xf8] sm:$0xff]  ;;  %v407_v47 = vld [vmem:[%s2232_s27 + $0x70] sm:$0xff] }
  0x23   : > { %v1926_v45 = vpack.c.bf16 %v406_v42, %v405_v41  ;;  %v1928_v46 = vpack.c.bf16 %v424_v44, %v423_v43  ;;  %v408_v48 = vld [vmem:[%s2232_s27 + $0x78] sm:$0xff]  ;;  %v441_v49 = vld [vmem:[%s2232_s27 + $0x180] sm:$0xff]  ;;  %v442_v50 = vld [vmem:[%s2232_s27 + $0x188] sm:$0xff] }
  0x24   : > { %2071 = vmatpush3.bf16.msra.mxu1 %v1910_v19  ;;  %1911 = vmatpush3.bf16.msra.mxu0 %v1910_v19  ;;  %v473_v51 = vld [vmem:[%s2232_s27 + $0x280] sm:$0xff]  ;;  %v474_v52 = vld [vmem:[%s2232_s27 + $0x288] sm:$0xff]  ;;  %v1930_v53 = vpack.c.bf16 %v408_v48, %v407_v47  ;;  %v1932_v54 = vpack.c.bf16 %v442_v50, %v441_v49  ;;  %v443_v60 = vld [vmem:[%s2232_s27 + $0x190] sm:$0xff] }
  0x25   : > { %2064 = vmatprep.subr.bf16.mxu1 %v1912_v20  ;;  %1913 = vmatprep.subr.bf16.mxu0 %v1912_v20  ;;  %v425_v55 = vld [vmem:[%s2232_s27 + $0x100] sm:$0xff]  ;;  %v426_v56 = vld [vmem:[%s2232_s27 + $0x108] sm:$0xff]  ;;  %v1964_v57 = vpack.c.bf16 %v474_v52, %v473_v51  ;;  %v444_v61 = vld [vmem:[%s2232_s27 + $0x198] sm:$0xff] }
  0x26   : > { %v457_v58 = vld [vmem:[%s2232_s27 + $0x200] sm:$0xff]  ;;  %v458_v59 = vld [vmem:[%s2232_s27 + $0x208] sm:$0xff]  ;;  %v475_v62 = vld [vmem:[%s2232_s27 + $0x290] sm:$0xff]  ;;  %v1934_v1 = vpack.c.bf16 %v426_v56, %v425_v55  ;;  %v1936_v5 = vpack.c.bf16 %v444_v61, %v443_v60 }
  0x27   : > { %v476_v63 = vld [vmem:[%s2232_s27 + $0x298] sm:$0xff]  ;;  %v313_v0 = vld [vmem:[%s2252_s4 + $0x280] sm:$0xff]  ;;  %v1966_v4 = vpack.c.bf16 %v458_v59, %v457_v58  ;;  %v427_v6 = vld [vmem:[%s2232_s27 + $0x110] sm:$0xff] }
  0x28   : > { %2072 = vmatpush3.bf16.msra.mxu1 %v1914_v26  ;;  %1915 = vmatpush3.bf16.msra.mxu0 %v1914_v26  ;;  %v233_v2 = vld [vmem:[%s2252_s4] sm:$0xff]  ;;  %v324_v3 = vld [vmem:[%s2252_s4 + $0x2d8] sm:$0xff]  ;;  %v459_v8 = vld [vmem:[%s2232_s27 + $0x210] sm:$0xff]  ;;  %v1968_v9 = vpack.c.bf16 %v476_v63, %v475_v62 }
  0x29   : > { %2065 = vmatprep.subr.bf16.mxu1 %v1916_v28  ;;  %1917 = vmatprep.subr.bf16.mxu0 %v1916_v28  ;;  %v428_v7 = vld [vmem:[%s2232_s27 + $0x118] sm:$0xff]  ;;  %v445_v11 = vld [vmem:[%s2232_s27 + $0x1a0] sm:$0xff]  ;;  %v446_v12 = vld [vmem:[%s2232_s27 + $0x1a8] sm:$0xff] }
  0x2a   : > { %v460_v10 = vld [vmem:[%s2232_s27 + $0x218] sm:$0xff]  ;;  %v477_v14 = vld [vmem:[%s2232_s27 + $0x2a0] sm:$0xff]  ;;  %v478_v15 = vld [vmem:[%s2232_s27 + $0x2a8] sm:$0xff]  ;;  %v1938_v17 = vpack.c.bf16 %v428_v7, %v427_v6  ;;  %v1940_v21 = vpack.c.bf16 %v446_v12, %v445_v11 }
  0x2b   : > { %v244_v13 = vld [vmem:[%s2252_s4 + $0x58] sm:$0xff]  ;;  %v323_v16 = vld [vmem:[%s2252_s4 + $0x2d0] sm:$0xff]  ;;  %v334_v19 = vld [vmem:[%s2252_s4 + $0x328] sm:$0xff]  ;;  %v1970_v20 = vpack.c.bf16 %v460_v10, %v459_v8  ;;  %v1972_v25 = vpack.c.bf16 %v478_v15, %v477_v14 }
  0x2c   : > { %2073 = vmatpush3.bf16.msra.mxu1 %v1918_v33  ;;  %1919 = vmatpush3.bf16.msra.mxu0 %v1918_v33  ;;  %v243_v18 = vld [vmem:[%s2252_s4 + $0x50] sm:$0xff]  ;;  %v429_v22 = vld [vmem:[%s2232_s27 + $0x120] sm:$0xff]  ;;  %v430_v23 = vld [vmem:[%s2232_s27 + $0x128] sm:$0xff] }
  0x2d   : > { %2066 = vmatprep.subr.bf16.mxu1 %v1920_v34  ;;  %1921 = vmatprep.subr.bf16.mxu0 %v1920_v34  ;;  %v461_v24 = vld [vmem:[%s2232_s27 + $0x220] sm:$0xff]  ;;  %v462_v26 = vld [vmem:[%s2232_s27 + $0x228] sm:$0xff]  ;;  %v447_v27 = vld [vmem:[%s2232_s27 + $0x1b0] sm:$0xff]  ;;  %v1942_v33 = vpack.c.bf16 %v430_v23, %v429_v22 }
  0x2e   : > { %v448_v28 = vld [vmem:[%s2232_s27 + $0x1b8] sm:$0xff]  ;;  %v254_v29 = vld [vmem:[%s2252_s4 + $0xa8] sm:$0xff]  ;;  %v479_v30 = vld [vmem:[%s2232_s27 + $0x2b0] sm:$0xff]  ;;  %v1974_v36 = vpack.c.bf16 %v462_v26, %v461_v24 }
  0x2f   : > { %v480_v31 = vld [vmem:[%s2232_s27 + $0x2b8] sm:$0xff]  ;;  %v333_v32 = vld [vmem:[%s2252_s4 + $0x320] sm:$0xff]  ;;  %v1944_v37 = vpack.c.bf16 %v448_v28, %v447_v27  ;;  %v431_v38 = vld [vmem:[%s2232_s27 + $0x130] sm:$0xff] }
  0x30   : > { %2074 = vmatpush3.bf16.msra.mxu1 %v1922_v39  ;;  %1923 = vmatpush3.bf16.msra.mxu0 %v1922_v39  ;;  %v253_v34 = vld [vmem:[%s2252_s4 + $0xa0] sm:$0xff]  ;;  %v344_v35 = vld [vmem:[%s2252_s4 + $0x378] sm:$0xff]  ;;  %v1976_v41 = vpack.c.bf16 %v480_v31, %v479_v30  ;;  %v450_v44 = vld [vmem:[%s2232_s27 + $0x1c8] sm:$0xff] }
  0x31   : > { %2067 = vmatprep.subr.bf16.mxu1 %v1924_v40  ;;  %1925 = vmatprep.subr.bf16.mxu0 %v1924_v40  ;;  %v432_v39 = vld [vmem:[%s2232_s27 + $0x138] sm:$0xff]  ;;  %v463_v40 = vld [vmem:[%s2232_s27 + $0x230] sm:$0xff]  ;;  %v449_v43 = vld [vmem:[%s2232_s27 + $0x1c0] sm:$0xff] }
  0x32   : > { %v464_v42 = vld [vmem:[%s2232_s27 + $0x238] sm:$0xff]  ;;  %v482_v47 = vld [vmem:[%s2232_s27 + $0x2c8] sm:$0xff]  ;;  %v343_v48 = vld [vmem:[%s2252_s4 + $0x370] sm:$0xff]  ;;  %v1946_v49 = vpack.c.bf16 %v432_v39, %v431_v38 }
  0x33   : > { %v263_v50 = vld [vmem:[%s2252_s4 + $0xf0] sm:$0xff]  ;;  %v354_v51 = vld [vmem:[%s2252_s4 + $0x3c8] sm:$0xff]  ;;  %v1978_v52 = vpack.c.bf16 %v464_v42, %v463_v40  ;;  %v465_v56 = vld [vmem:[%s2232_s27 + $0x240] sm:$0xff] }
  0x34   : > { %2075 = vmatpush3.bf16.msra.mxu1 %v1926_v45  ;;  %1927 = vmatpush3.bf16.msra.mxu0 %v1926_v45  ;;  %v264_v45 = vld [vmem:[%s2252_s4 + $0xf8] sm:$0xff]  ;;  %v434_v55 = vld [vmem:[%s2232_s27 + $0x148] sm:$0xff]  ;;  %v451_v59 = vld [vmem:[%s2232_s27 + $0x1d0] sm:$0xff] }
  0x35   : > { %2068 = vmatprep.subr.bf16.mxu1 %v1928_v46  ;;  %1929 = vmatprep.subr.bf16.mxu0 %v1928_v46  ;;  %v481_v46 = vld [vmem:[%s2232_s27 + $0x2c0] sm:$0xff]  ;;  %v466_v58 = vld [vmem:[%s2232_s27 + $0x248] sm:$0xff]  ;;  %v452_v60 = vld [vmem:[%s2232_s27 + $0x1d8] sm:$0xff] }
  0x36   : > { %v274_v61 = vld [vmem:[%s2252_s4 + $0x148] sm:$0xff]  ;;  %v483_v62 = vld [vmem:[%s2232_s27 + $0x2d0] sm:$0xff]  ;;  %v484_v63 = vld [vmem:[%s2232_s27 + $0x2d8] sm:$0xff] }
  0x37   : > { %v435_v6 = vld [vmem:[%s2232_s27 + $0x150] sm:$0xff]  ;;  %v436_v7 = vld [vmem:[%s2232_s27 + $0x158] sm:$0xff]  ;;  %v453_v11 = vld [vmem:[%s2232_s27 + $0x1e0] sm:$0xff] }
  0x38   : > { %2076 = vmatpush3.bf16.msra.mxu1 %v1930_v53  ;;  %1931 = vmatpush3.bf16.msra.mxu0 %v1930_v53  ;;  %v1948_v53 = vpack.c.bf16 %v450_v44, %v449_v43  ;;  %v467_v8 = vld [vmem:[%s2232_s27 + $0x250] sm:$0xff]  ;;  %v468_v10 = vld [vmem:[%s2232_s27 + $0x258] sm:$0xff]  ;;  %v454_v12 = vld [vmem:[%s2232_s27 + $0x1e8] sm:$0xff] }
  0x39   : > { %1933 = vmatprep.subr.bf16.mxu1 %v1932_v54  ;;  %1965 = vmatprep.subr.bf16.mxu0 %v1964_v57  ;;  %v433_v54 = vld [vmem:[%s2232_s27 + $0x140] sm:$0xff]  ;;  %v1980_v57 = vpack.c.bf16 %v482_v47, %v481_v46  ;;  %v486_v15 = vld [vmem:[%s2232_s27 + $0x2e8] sm:$0xff]  ;;  %v455_v27 = vld [vmem:[%s2232_s27 + $0x1f0] sm:$0xff] }
  0x3a   : > { %v485_v14 = vld [vmem:[%s2232_s27 + $0x2e0] sm:$0xff]  ;;  %v438_v23 = vld [vmem:[%s2232_s27 + $0x168] sm:$0xff]  ;;  %v456_v28 = vld [vmem:[%s2232_s27 + $0x1f8] sm:$0xff] }
  0x3b   : > { %704 = vmatmul.mubr.f32.vlgmr.msra.gmra.mrb[0].mxu1 %v313_v0  ;;  %664 = vmatmul.mubr.f32.vlgmr.msra.gmra.mrb[0].mxu0 %v233_v2  ;;  %v353_v0 = vld [vmem:[%s2252_s4 + $0x3c0] sm:$0xff]  ;;  %v470_v26 = vld [vmem:[%s2232_s27 + $0x268] sm:$0xff]  ;;  %v487_v30 = vld [vmem:[%s2232_s27 + $0x2f0] sm:$0xff] }
  0x3c   : > { %1935 = vmatpush3.bf16.msra.mxu1 %v1934_v1  ;;  %708 = vmatprep.mubr.f32.mxu1 %v324_v3  ;;  %v1950_v1 = vpack.c.bf16 %v434_v55, %v433_v54  ;;  %v273_v2 = vld [vmem:[%s2252_s4 + $0x140] sm:$0xff]  ;;  %v364_v3 = vld [vmem:[%s2252_s4 + $0x418] sm:$0xff]  ;;  %v439_v38 = vld [vmem:[%s2232_s27 + $0x170] sm:$0xff] }
  0x3d   : > { %1967 = vmatpush3.bf16.msra.mxu0 %v1966_v4  ;;  %1937 = vmatprep.subr.bf16.mxu1 %v1936_v5  ;;  %v1982_v4 = vpack.c.bf16 %v466_v58, %v465_v56  ;;  %v1952_v5 = vpack.c.bf16 %v452_v60, %v451_v59  ;;  %v437_v22 = vld [vmem:[%s2232_s27 + $0x160] sm:$0xff]  ;;  %v488_v31 = vld [vmem:[%s2232_s27 + $0x2f8] sm:$0xff]  ;;  %v471_v40 = vld [vmem:[%s2232_s27 + $0x270] sm:$0xff] }
  0x3e   : > { %668 = vmatprep.mubr.f32.mxu0 %v244_v13  ;;  %1969 = vmatprep.subr.bf16.mxu0 %v1968_v9  ;;  %v1984_v9 = vpack.c.bf16 %v484_v63, %v483_v62  ;;  %v284_v13 = vld [vmem:[%s2252_s4 + $0x198] sm:$0xff]  ;;  %v469_v24 = vld [vmem:[%s2232_s27 + $0x260] sm:$0xff]  ;;  %v506_v44 = vld [vmem:[%s2232_s27 + $0x388] sm:$0xff] }
  0x3f   : > { %709 = vmatmul.mubr.f32.gmra.mrb[2].mxu1 %v323_v16  ;;  %669 = vmatmul.mubr.f32.gmra.mrb[2].mxu0 %v243_v18  ;;  %v363_v16 = vld [vmem:[%s2252_s4 + $0x410] sm:$0xff]  ;;  %v440_v39 = vld [vmem:[%s2232_s27 + $0x178] sm:$0xff]  ;;  %v505_v43 = vld [vmem:[%s2232_s27 + $0x380] sm:$0xff] }
  0x40   : > { %1939 = vmatpush3.bf16.msra.mxu1 %v1938_v17  ;;  %713 = vmatprep.mubr.f32.mxu1 %v334_v19  ;;  %v1954_v17 = vpack.c.bf16 %v436_v7, %v435_v6  ;;  %v283_v18 = vld [vmem:[%s2252_s4 + $0x190] sm:$0xff]  ;;  %v374_v19 = vld [vmem:[%s2252_s4 + $0x468] sm:$0xff]  ;;  %v472_v42 = vld [vmem:[%s2232_s27 + $0x278] sm:$0xff]  ;;  %v1962_v47 = vpack.c.bf16 %v440_v39, %v439_v38 }
  0x41   : > { %1971 = vmatpush3.bf16.msra.mxu0 %v1970_v20  ;;  %1941 = vmatprep.subr.bf16.mxu1 %v1940_v21  ;;  %v1986_v20 = vpack.c.bf16 %v468_v10, %v467_v8  ;;  %v1956_v21 = vpack.c.bf16 %v454_v12, %v453_v11  ;;  %v383_v46 = vld [vmem:[%s2252_s4 + $0x4b0] sm:$0xff]  ;;  %v238_v54 = vld [vmem:[%s2252_s4 + $0x28] sm:$0xff]  ;;  %v521_v55 = vld [vmem:[%s2232_s27 + $0x400] sm:$0xff] }
  0x42   : > { %673 = vmatprep.mubr.f32.mxu0 %v254_v29  ;;  %1973 = vmatprep.subr.bf16.mxu0 %v1972_v25  ;;  %v1988_v25 = vpack.c.bf16 %v486_v15, %v485_v14  ;;  %v294_v29 = vld [vmem:[%s2252_s4 + $0x1e8] sm:$0xff]  ;;  %v508_v58 = vld [vmem:[%s2232_s27 + $0x398] sm:$0xff]  ;;  %v235_v59 = vld [vmem:[%s2252_s4 + $0x10] sm:$0xff] }
  0x43   : > { %714 = vmatmul.mubr.f32.gmra.mrb[4].mxu1 %v333_v32  ;;  %674 = vmatmul.mubr.f32.gmra.mrb[4].mxu0 %v253_v34  ;;  %v373_v32 = vld [vmem:[%s2252_s4 + $0x460] sm:$0xff]  ;;  %v522_v56 = vld [vmem:[%s2232_s27 + $0x408] sm:$0xff]  ;;  %v248_v63 = vld [vmem:[%s2252_s4 + $0x78] sm:$0xff] }
  0x44   : > { %1943 = vmatpush3.bf16.msra.mxu1 %v1942_v33  ;;  %718 = vmatprep.mubr.f32.mxu1 %v344_v35  ;;  %v1958_v33 = vpack.c.bf16 %v438_v23, %v437_v22  ;;  %v293_v34 = vld [vmem:[%s2252_s4 + $0x1e0] sm:$0xff]  ;;  %v384_v35 = vld [vmem:[%s2252_s4 + $0x4b8] sm:$0xff]  ;;  %v246_v62 = vld [vmem:[%s2252_s4 + $0x68] sm:$0xff] }
  0x45   : > { %1975 = vmatpush3.bf16.msra.mxu0 %v1974_v36  ;;  %1945 = vmatprep.subr.bf16.mxu1 %v1944_v37  ;;  %v1990_v36 = vpack.c.bf16 %v470_v26, %v469_v24  ;;  %v1960_v37 = vpack.c.bf16 %v456_v28, %v455_v27  ;;  %v524_v6 = vld [vmem:[%s2232_s27 + $0x418] sm:$0xff]  ;;  %v509_v7 = vld [vmem:[%s2232_s27 + $0x3a0] sm:$0xff]  ;;  %v510_v8 = vld [vmem:[%s2232_s27 + $0x3a8] sm:$0xff] }
  0x46   : > { %678 = vmatprep.mubr.f32.mxu0 %v264_v45  ;;  %1977 = vmatprep.subr.bf16.mxu0 %v1976_v41  ;;  %v1992_v41 = vpack.c.bf16 %v488_v31, %v487_v30  ;;  %v304_v45 = vld [vmem:[%s2252_s4 + $0x238] sm:$0xff]  ;;  %v247_v10 = vld [vmem:[%s2252_s4 + $0x70] sm:$0xff]  ;;  %v258_v12 = vld [vmem:[%s2252_s4 + $0xc8] sm:$0xff]  ;;  %v2004_v15 = vpack.c.bf16 %v510_v8, %v509_v7 }
  0x47   : > { %719 = vmatmul.mubr.f32.gmra.mrb[6].mxu1 %v343_v48  ;;  %679 = vmatmul.mubr.f32.gmra.mrb[6].mxu0 %v263_v50  ;;  %v303_v48 = vld [vmem:[%s2252_s4 + $0x230] sm:$0xff]  ;;  %v1994_v50 = vpack.c.bf16 %v472_v42, %v471_v40  ;;  %v256_v11 = vld [vmem:[%s2252_s4 + $0xb8] sm:$0xff]  ;;  %v257_v23 = vld [vmem:[%s2252_s4 + $0xc0] sm:$0xff] }
  0x48   : > { %1947 = vmatpush3.bf16.msra.mxu1 %v1946_v49  ;;  %723 = vmatprep.mubr.f32.mxu1 %v354_v51  ;;  %v236_v49 = vld [vmem:[%s2252_s4 + $0x18] sm:$0xff]  ;;  %v1996_v51 = vpack.c.bf16 %v506_v44, %v505_v43  ;;  %v255_v22 = vld [vmem:[%s2252_s4 + $0xb0] sm:$0xff]  ;;  %v266_v24 = vld [vmem:[%s2252_s4 + $0x108] sm:$0xff] }
  0x49   : > { %1979 = vmatpush3.bf16.msra.mxu0 %v1978_v52  ;;  %1949 = vmatprep.subr.bf16.mxu1 %v1948_v53  ;;  %v489_v52 = vld [vmem:[%s2232_s27 + $0x300] sm:$0xff]  ;;  %v490_v53 = vld [vmem:[%s2232_s27 + $0x308] sm:$0xff]  ;;  %v495_v30 = vld [vmem:[%s2232_s27 + $0x330] sm:$0xff] }
  0x4a   : > { %683 = vmatprep.mubr.f32.mxu0 %v274_v61  ;;  %1981 = vmatprep.subr.bf16.mxu0 %v1980_v57  ;;  %v507_v57 = vld [vmem:[%s2232_s27 + $0x390] sm:$0xff]  ;;  %v1998_v60 = vpack.c.bf16 %v490_v53, %v489_v52  ;;  %v237_v61 = vld [vmem:[%s2252_s4 + $0x20] sm:$0xff]  ;;  %v496_v31 = vld [vmem:[%s2232_s27 + $0x338] sm:$0xff] }
  0x4b   : > { %724 = vmatmul.mubr.f32.gmra.mrb[8].mxu1 %v353_v0  ;;  %684 = vmatmul.mubr.f32.gmra.mrb[8].mxu0 %v273_v2  ;;  %v2160_v0 = vmov 0.0|0.0   ;;  %v2000_v2 = vpack.c.bf16 %v508_v58, %v507_v57  ;;  %v278_v38 = vld [vmem:[%s2252_s4 + $0x168] sm:$0xff]  ;;  %v2010_v39 = vpack.c.bf16 %v496_v31, %v495_v30  ;;  %v497_v43 = vld [vmem:[%s2232_s27 + $0x340] sm:$0xff]  ;;  %v500_v57 = vld [vmem:[%s2232_s27 + $0x358] sm:$0xff] }
  0x4c   : > { %1951 = vmatpush3.bf16.msra.mxu1 %v1950_v1  ;;  %728 = vmatprep.mubr.f32.mxu1 %v364_v3  ;;  %v2029_v1 = vpack.c.bf16 %v522_v56, %v521_v55  ;;  %v491_v3 = vld [vmem:[%s2232_s27 + $0x310] sm:$0xff]  ;;  %v498_v44 = vld [vmem:[%s2232_s27 + $0x348] sm:$0xff]  ;;  %v532_v58 = vld [vmem:[%s2232_s27 + $0x458] sm:$0xff] }
  0x4d   : > { %1983 = vmatpush3.bf16.msra.mxu0 %v1982_v4  ;;  %1953 = vmatprep.subr.bf16.mxu1 %v1952_v5  ;;  %v492_v4 = vld [vmem:[%s2232_s27 + $0x318] sm:$0xff]  ;;  %v523_v5 = vld [vmem:[%s2232_s27 + $0x410] sm:$0xff]  ;;  %v2014_v52 = vpack.c.bf16 %v498_v44, %v497_v43  ;;  %v502_v7 = vld [vmem:[%s2232_s27 + $0x368] sm:$0xff] }
  0x4e   : > { %688 = vmatprep.mubr.f32.mxu0 %v284_v13  ;;  %1985 = vmatprep.subr.bf16.mxu0 %v1984_v9  ;;  %v245_v9 = vld [vmem:[%s2252_s4 + $0x60] sm:$0xff]  ;;  %v2002_v13 = vpack.c.bf16 %v492_v4, %v491_v3  ;;  %v2032_v14 = vpack.c.bf16 %v524_v6, %v523_v5  ;;  %v499_v56 = vld [vmem:[%s2232_s27 + $0x350] sm:$0xff]  ;;  %v534_v8 = vld [vmem:[%s2232_s27 + $0x468] sm:$0xff] }
  0x4f   : > { %729 = vmatmul.mubr.f32.gmra.mrb[10].mxu1 %v363_v16  ;;  %689 = vmatmul.mubr.f32.gmra.mrb[10].mxu0 %v283_v18  ;;  %v493_v16 = vld [vmem:[%s2232_s27 + $0x320] sm:$0xff]  ;;  %v315_v30 = vld [vmem:[%s2252_s4 + $0x290] sm:$0xff]  ;;  %v542_v43 = vld [vmem:[%s2232_s27 + $0x4a8] sm:$0xff] }
  0x50   : > { %1955 = vmatpush3.bf16.msra.mxu1 %v1954_v17  ;;  %733 = vmatprep.mubr.f32.mxu1 %v374_v19  ;;  %v494_v17 = vld [vmem:[%s2232_s27 + $0x328] sm:$0xff]  ;;  %v525_v18 = vld [vmem:[%s2232_s27 + $0x420] sm:$0xff]  ;;  %v335_v44 = vld [vmem:[%s2252_s4 + $0x330] sm:$0xff] }
  0x51   : > { %1987 = vmatpush3.bf16.msra.mxu0 %v1986_v20  ;;  %1957 = vmatprep.subr.bf16.mxu1 %v1956_v21  ;;  %v526_v19 = vld [vmem:[%s2232_s27 + $0x428] sm:$0xff]  ;;  %v511_v20 = vld [vmem:[%s2232_s27 + $0x3b0] sm:$0xff]  ;;  %v512_v21 = vld [vmem:[%s2232_s27 + $0x3b8] sm:$0xff]  ;;  %v2006_v26 = vpack.c.bf16 %v494_v17, %v493_v16 }
  0x52   : > { %693 = vmatprep.mubr.f32.mxu0 %v294_v29  ;;  %1989 = vmatprep.subr.bf16.mxu0 %v1988_v25  ;;  %v268_v25 = vld [vmem:[%s2252_s4 + $0x118] sm:$0xff]  ;;  %v2035_v27 = vpack.c.bf16 %v526_v19, %v525_v18  ;;  %v2008_v28 = vpack.c.bf16 %v512_v21, %v511_v20  ;;  %v527_v29 = vld [vmem:[%s2232_s27 + $0x430] sm:$0xff]  ;;  %v533_v4 = vld [vmem:[%s2232_s27 + $0x460] sm:$0xff] }
  0x53   : > { %734 = vmatmul.mubr.f32.gmra.mrb[12].mxu1 %v373_v32  ;;  %694 = vmatmul.mubr.f32.gmra.mrb[12].mxu0 %v293_v34  ;;  %v528_v32 = vld [vmem:[%s2232_s27 + $0x438] sm:$0xff]  ;;  %v514_v34 = vld [vmem:[%s2232_s27 + $0x3c8] sm:$0xff]  ;;  %v501_v6 = vld [vmem:[%s2232_s27 + $0x360] sm:$0xff]  ;;  %v2047_v16 = vpack.c.bf16 %v534_v8, %v533_v4 }
  0x54   : > { %1959 = vmatpush3.bf16.msra.mxu1 %v1958_v33  ;;  %738 = vmatprep.mubr.f32.mxu1 %v384_v35  ;;  %v513_v33 = vld [vmem:[%s2232_s27 + $0x3c0] sm:$0xff]  ;;  %v2038_v40 = vpack.c.bf16 %v528_v32, %v527_v29  ;;  %v503_v18 = vld [vmem:[%s2232_s27 + $0x370] sm:$0xff]  ;;  %v504_v19 = vld [vmem:[%s2232_s27 + $0x378] sm:$0xff] }
  0x55   : > { %1991 = vmatpush3.bf16.msra.mxu0 %v1990_v36  ;;  %1961 = vmatprep.subr.bf16.mxu1 %v1960_v37  ;;  %v265_v35 = vld [vmem:[%s2252_s4 + $0x100] sm:$0xff]  ;;  %v267_v36 = vld [vmem:[%s2252_s4 + $0x110] sm:$0xff]  ;;  %v276_v37 = vld [vmem:[%s2252_s4 + $0x158] sm:$0xff]  ;;  %v2012_v42 = vpack.c.bf16 %v514_v34, %v513_v33 }
  0x56   : > { %698 = vmatprep.mubr.f32.mxu0 %v304_v45  ;;  %1993 = vmatprep.subr.bf16.mxu0 %v1992_v41  ;;  %v529_v41 = vld [vmem:[%s2232_s27 + $0x440] sm:$0xff]  ;;  %v530_v45 = vld [vmem:[%s2232_s27 + $0x448] sm:$0xff]  ;;  %v535_v20 = vld [vmem:[%s2232_s27 + $0x470] sm:$0xff] }
  0x57   : > { %739 = vmatmul.mubr.f32.gmra.mrb[14].mxu1 %v383_v46  ;;  %699 = vmatmul.mubr.f32.gmra.mrb[14].mxu0 %v303_v48  ;;  %v515_v46 = vld [vmem:[%s2232_s27 + $0x3d0] sm:$0xff]  ;;  %v2041_v53 = vpack.c.bf16 %v530_v45, %v529_v41  ;;  %v536_v21 = vld [vmem:[%s2232_s27 + $0x478] sm:$0xff]  ;;  %v538_v29 = vld [vmem:[%s2232_s27 + $0x488] sm:$0xff] }
  0x58   : > { %1963 = vmatpush3.bf16.msra.mxu1 %v1962_v47  ;;  %808 = vmatprep.mubr.f32.mxu1 %v236_v49  ;;  %v516_v47 = vld [vmem:[%s2232_s27 + $0x3d8] sm:$0xff]  ;;  %v275_v48 = vld [vmem:[%s2252_s4 + $0x150] sm:$0xff]  ;;  %v277_v49 = vld [vmem:[%s2252_s4 + $0x160] sm:$0xff] }
  0x59   : > { %1995 = vmatpush3.bf16.msra.mxu0 %v1994_v50  ;;  %1997 = vmatprep.subr.bf16.mxu1 %v1996_v51  ;;  %v286_v50 = vld [vmem:[%s2252_s4 + $0x1a8] sm:$0xff]  ;;  %v288_v51 = vld [vmem:[%s2252_s4 + $0x1b8] sm:$0xff]  ;;  %v2016_v55 = vpack.c.bf16 %v516_v47, %v515_v46  ;;  %v317_v31 = vld [vmem:[%s2252_s4 + $0x2a0] sm:$0xff] }
  0x5a   : > { %953 = vmatprep.mubr.f32.mxu0 %v238_v54  ;;  %2028 = vmatprep.subr.bf16.mxu0 %v2160_v0  ;;  %v531_v54 = vld [vmem:[%s2232_s27 + $0x450] sm:$0xff]  ;;  %v326_v32 = vld [vmem:[%s2252_s4 + $0x2e8] sm:$0xff]  ;;  %v328_v33 = vld [vmem:[%s2252_s4 + $0x2f8] sm:$0xff] }
  0x5b   : > { %809 = vmatmul.mubr.f32.vlgmr.msra.gmra.mrb[16].mxu1 %v235_v59  ;;  %v517_v59 = vld [vmem:[%s2232_s27 + $0x3e0] sm:$0xff]  ;;  %v2044_v3 = vpack.c.bf16 %v532_v58, %v531_v54  ;;  %v346_v46 = vld [vmem:[%s2252_s4 + $0x388] sm:$0xff]  ;;  %v348_v47 = vld [vmem:[%s2252_s4 + $0x398] sm:$0xff] }
  0x5c   : > { %1999 = vmatpush3.bf16.msra.mxu1 %v1998_v60  ;;  %954 = vmatmul.mubr.f32.vlgmr.msra.gmra.mrb[16].mxu0 %v237_v61  ;;  %v518_v60 = vld [vmem:[%s2232_s27 + $0x3e8] sm:$0xff]  ;;  %v285_v61 = vld [vmem:[%s2252_s4 + $0x1a0] sm:$0xff]  ;;  %v376_v58 = vld [vmem:[%s2252_s4 + $0x478] sm:$0xff] }
  0x5d   : > { %813 = vmatprep.mubr.f32.mxu1 %v246_v62  ;;  %958 = vmatprep.mubr.f32.mxu0 %v248_v63  ;;  %v287_v62 = vld [vmem:[%s2252_s4 + $0x1b0] sm:$0xff]  ;;  %v296_v63 = vld [vmem:[%s2252_s4 + $0x1f8] sm:$0xff]  ;;  %v2020_v5 = vpack.c.bf16 %v518_v60, %v517_v59  ;;  %v337_v45 = vld [vmem:[%s2252_s4 + $0x340] sm:$0xff] }
  0x5e   : > { %2030 = vmatpush1.bf16.msra.mxu0 %v2029_v1  ;;  %2001 = vmatprep.subr.bf16.mxu1 %v2000_v2  ;;  %v298_v1 = vld [vmem:[%s2252_s4 + $0x208] sm:$0xff]  ;;  %v2018_v2 = vpack.c.bf16 %v500_v57, %v499_v56  ;;  %v365_v56 = vld [vmem:[%s2252_s4 + $0x420] sm:$0xff]  ;;  %v367_v57 = vld [vmem:[%s2252_s4 + $0x430] sm:$0xff] }
  0x5f   : > { %814 = vmatmul.mubr.f32.gmra.mrb[18].mxu1 %v245_v9  ;;  %2031 = vmatprep.subr.bf16.mxu0 %v2160_v0  ;;  %v519_v9 = vld [vmem:[%s2232_s27 + $0x3f0] sm:$0xff]  ;;  %v366_v54 = vld [vmem:[%s2252_s4 + $0x428] sm:$0xff]  ;;  %v252_v8 = vld [vmem:[%s2252_s4 + $0x98] sm:$0xff] }
  0x60   : > { %959 = vmatmul.mubr.f32.gmra.mrb[18].mxu0 %v247_v10  ;;  %818 = vmatprep.mubr.f32.mxu1 %v256_v11  ;;  %v520_v10 = vld [vmem:[%s2232_s27 + $0x3f8] sm:$0xff]  ;;  %v295_v11 = vld [vmem:[%s2252_s4 + $0x1f0] sm:$0xff]  ;;  %v378_v59 = vld [vmem:[%s2252_s4 + $0x488] sm:$0xff] }
  0x61   : > { %963 = vmatprep.mubr.f32.mxu0 %v258_v12  ;;  %2003 = vmatpush3.bf16.msra.mxu1 %v2002_v13  ;;  %v297_v12 = vld [vmem:[%s2252_s4 + $0x200] sm:$0xff]  ;;  %v306_v13 = vld [vmem:[%s2252_s4 + $0x248] sm:$0xff]  ;;  %v2024_v17 = vpack.c.bf16 %v520_v10, %v519_v9  ;;  %v375_v60 = vld [vmem:[%s2252_s4 + $0x470] sm:$0xff] }
  0x62   : > { %2033 = vmatpush1.bf16.msra.mxu0 %v2032_v14  ;;  %2005 = vmatprep.subr.bf16.mxu1 %v2004_v15  ;;  %v2022_v14 = vpack.c.bf16 %v502_v7, %v501_v6  ;;  %v308_v15 = vld [vmem:[%s2252_s4 + $0x258] sm:$0xff]  ;;  %v242_v4 = vld [vmem:[%s2252_s4 + $0x48] sm:$0xff]  ;;  %v241_v7 = vld [vmem:[%s2252_s4 + $0x40] sm:$0xff] }
  0x63   : > { %819 = vmatmul.mubr.f32.gmra.mrb[20].mxu1 %v255_v22  ;;  %2034 = vmatprep.subr.bf16.mxu0 %v2160_v0  ;;  %v305_v22 = vld [vmem:[%s2252_s4 + $0x240] sm:$0xff]  ;;  %v250_v6 = vld [vmem:[%s2252_s4 + $0x88] sm:$0xff]  ;;  %v260_v10 = vld [vmem:[%s2252_s4 + $0xd8] sm:$0xff] }
  0x64   : > { %964 = vmatmul.mubr.f32.gmra.mrb[20].mxu0 %v257_v23  ;;  %823 = vmatprep.mubr.f32.mxu1 %v266_v24  ;;  %v307_v23 = vld [vmem:[%s2252_s4 + $0x250] sm:$0xff]  ;;  %v316_v24 = vld [vmem:[%s2252_s4 + $0x298] sm:$0xff]  ;;  %v249_v9 = vld [vmem:[%s2252_s4 + $0x80] sm:$0xff] }
  0x65   : > { %968 = vmatprep.mubr.f32.mxu0 %v268_v25  ;;  %2007 = vmatpush3.bf16.msra.mxu1 %v2006_v26  ;;  %v2026_v25 = vpack.c.bf16 %v504_v19, %v503_v18  ;;  %v318_v26 = vld [vmem:[%s2252_s4 + $0x2a8] sm:$0xff]  ;;  %v280_v18 = vld [vmem:[%s2252_s4 + $0x178] sm:$0xff]  ;;  %v271_v19 = vld [vmem:[%s2252_s4 + $0x130] sm:$0xff] }
  0x66   : > { %2036 = vmatpush1.bf16.msra.mxu0 %v2035_v27  ;;  %2009 = vmatprep.subr.bf16.mxu1 %v2008_v28  ;;  %v2050_v27 = vpack.c.bf16 %v536_v21, %v535_v20  ;;  %v537_v28 = vld [vmem:[%s2232_s27 + $0x480] sm:$0xff]  ;;  %v282_v20 = vld [vmem:[%s2252_s4 + $0x188] sm:$0xff]  ;;  %v279_v21 = vld [vmem:[%s2252_s4 + $0x170] sm:$0xff] }
  0x67   : > { %824 = vmatmul.mubr.f32.gmra.mrb[22].mxu1 %v265_v35  ;;  %2037 = vmatprep.subr.bf16.mxu0 %v2160_v0  ;;  %v2053_v34 = vpack.c.bf16 %v538_v29, %v537_v28  ;;  %v539_v35 = vld [vmem:[%s2232_s27 + $0x490] sm:$0xff]  ;;  %v302_v28 = vld [vmem:[%s2252_s4 + $0x228] sm:$0xff] }
  0x68   : > { %969 = vmatmul.mubr.f32.gmra.mrb[22].mxu0 %v267_v36  ;;  %828 = vmatprep.mubr.f32.mxu1 %v276_v37  ;;  %v540_v36 = vld [vmem:[%s2232_s27 + $0x498] sm:$0xff]  ;;  %v325_v37 = vld [vmem:[%s2252_s4 + $0x2e0] sm:$0xff]  ;;  %v299_v29 = vld [vmem:[%s2252_s4 + $0x210] sm:$0xff] }
  0x69   : > { %973 = vmatprep.mubr.f32.mxu0 %v278_v38  ;;  %2011 = vmatpush3.bf16.msra.mxu1 %v2010_v39  ;;  %v327_v38 = vld [vmem:[%s2252_s4 + $0x2f0] sm:$0xff]  ;;  %v336_v39 = vld [vmem:[%s2252_s4 + $0x338] sm:$0xff]  ;;  %v2056_v41 = vpack.c.bf16 %v540_v36, %v539_v35  ;;  %v322_v36 = vld [vmem:[%s2252_s4 + $0x2c8] sm:$0xff] }
  0x6a   : > { %2039 = vmatpush1.bf16.msra.mxu0 %v2038_v40  ;;  %2013 = vmatprep.subr.bf16.mxu1 %v2012_v42  ;;  %v338_v40 = vld [vmem:[%s2252_s4 + $0x348] sm:$0xff]  ;;  %v541_v42 = vld [vmem:[%s2232_s27 + $0x4a0] sm:$0xff]  ;;  %v311_v35 = vld [vmem:[%s2252_s4 + $0x270] sm:$0xff] }
  0x6b   : > { %829 = vmatmul.mubr.f32.gmra.mrb[24].mxu1 %v275_v48  ;;  %2040 = vmatprep.subr.bf16.mxu0 %v2160_v0  ;;  %v2059_v48 = vpack.c.bf16 %v542_v43, %v541_v42  ;;  %v340_v42 = vld [vmem:[%s2252_s4 + $0x358] sm:$0xff]  ;;  %v331_v43 = vld [vmem:[%s2252_s4 + $0x310] sm:$0xff] }
  0x6c   : > { %974 = vmatmul.mubr.f32.gmra.mrb[24].mxu0 %v277_v49  ;;  %833 = vmatprep.mubr.f32.mxu1 %v286_v50  ;;  %v345_v49 = vld [vmem:[%s2252_s4 + $0x380] sm:$0xff]  ;;  %v347_v50 = vld [vmem:[%s2252_s4 + $0x390] sm:$0xff] }
  0x6d   : > { %978 = vmatprep.mubr.f32.mxu0 %v288_v51  ;;  %2015 = vmatpush3.bf16.msra.mxu1 %v2014_v52  ;;  %v356_v51 = vld [vmem:[%s2252_s4 + $0x3d8] sm:$0xff]  ;;  %v358_v52 = vld [vmem:[%s2252_s4 + $0x3e8] sm:$0xff] }
  0x6e   : > { %2042 = vmatpush1.bf16.msra.mxu0 %v2041_v53  ;;  %2017 = vmatprep.subr.bf16.mxu1 %v2016_v55  ;;  %v355_v53 = vld [vmem:[%s2252_s4 + $0x3d0] sm:$0xff]  ;;  %v368_v55 = vld [vmem:[%s2252_s4 + $0x438] sm:$0xff] }
  0x6f   : > { %834 = vmatmul.mubr.f32.gmra.mrb[26].mxu1 %v285_v61  ;;  %2043 = vmatprep.subr.bf16.mxu0 %v2160_v0  ;;  %v377_v61 = vld [vmem:[%s2252_s4 + $0x480] sm:$0xff] }
  0x70   : > { %979 = vmatmul.mubr.f32.gmra.mrb[26].mxu0 %v287_v62  ;;  %838 = vmatprep.mubr.f32.mxu1 %v296_v63  ;;  %v386_v62 = vld [vmem:[%s2252_s4 + $0x4c8] sm:$0xff]  ;;  %v388_v63 = vld [vmem:[%s2252_s4 + $0x4d8] sm:$0xff] }
  0x71   : > { %983 = vmatprep.mubr.f32.mxu0 %v298_v1  ;;  %2019 = vmatpush3.bf16.msra.mxu1 %v2018_v2  ;;  %v385_v1 = vld [vmem:[%s2252_s4 + $0x4c0] sm:$0xff]  ;;  %v387_v2 = vld [vmem:[%s2252_s4 + $0x4d0] sm:$0xff] }
  0x72   : > { %2045 = vmatpush1.bf16.msra.mxu0 %v2044_v3  ;;  %2021 = vmatprep.subr.bf16.mxu1 %v2020_v5  ;;  %v240_v3 = vld [vmem:[%s2252_s4 + $0x38] sm:$0xff]  ;;  %v239_v5 = vld [vmem:[%s2252_s4 + $0x30] sm:$0xff] }
  0x73   : > { %839 = vmatmul.mubr.f32.gmra.mrb[28].mxu1 %v295_v11  ;;  %2046 = vmatprep.subr.bf16.mxu0 %v2160_v0  ;;  %v251_v11 = vld [vmem:[%s2252_s4 + $0x90] sm:$0xff] }
  0x74   : > { %984 = vmatmul.mubr.f32.gmra.mrb[28].mxu0 %v297_v12  ;;  %843 = vmatprep.mubr.f32.mxu1 %v306_v13  ;;  %v262_v12 = vld [vmem:[%s2252_s4 + $0xe8] sm:$0xff]  ;;  %v259_v13 = vld [vmem:[%s2252_s4 + $0xd0] sm:$0xff] }
  0x75   : > { %988 = vmatprep.mubr.f32.mxu0 %v308_v15  ;;  %2023 = vmatpush3.bf16.msra.mxu1 %v2022_v14  ;;  %v270_v14 = vld [vmem:[%s2252_s4 + $0x128] sm:$0xff]  ;;  %v261_v15 = vld [vmem:[%s2252_s4 + $0xe0] sm:$0xff] }
  0x76   : > { %2048 = vmatpush1.bf16.msra.mxu0 %v2047_v16  ;;  %2025 = vmatprep.subr.bf16.mxu1 %v2024_v17  ;;  %v272_v16 = vld [vmem:[%s2252_s4 + $0x138] sm:$0xff]  ;;  %v269_v17 = vld [vmem:[%s2252_s4 + $0x120] sm:$0xff] }
  0x77   : > { %844 = vmatmul.mubr.f32.gmra.mrb[30].mxu1 %v305_v22  ;;  %2049 = vmatprep.subr.bf16.mxu0 %v2160_v0  ;;  %v290_v22 = vld [vmem:[%s2252_s4 + $0x1c8] sm:$0xff] }
  0x78   : > { %989 = vmatmul.mubr.f32.gmra.mrb[30].mxu0 %v307_v23  ;;  %848 = vmatprep.mubr.f32.mxu1 %v316_v24  ;;  %v281_v23 = vld [vmem:[%s2252_s4 + $0x180] sm:$0xff]  ;;  %v292_v24 = vld [vmem:[%s2252_s4 + $0x1d8] sm:$0xff] }
  0x79   : > { %993 = vmatprep.mubr.f32.mxu0 %v318_v26  ;;  %2027 = vmatpush3.bf16.msra.mxu1 %v2026_v25  ;;  %v289_v25 = vld [vmem:[%s2252_s4 + $0x1c0] sm:$0xff]  ;;  %v300_v26 = vld [vmem:[%s2252_s4 + $0x218] sm:$0xff] }
  0x7a   : > { %2051 = vmatpush1.bf16.msra.mxu0 %v2050_v27  ;;  %v291_v27 = vld [vmem:[%s2252_s4 + $0x1d0] sm:$0xff] }
  0x7b   : > { %849 = vmatmul.mubr.f32.gmra.mrb[32].mxu1 %v315_v30  ;;  %2052 = vmatprep.subr.bf16.mxu0 %v2160_v0  ;;  %v310_v30 = vld [vmem:[%s2252_s4 + $0x268] sm:$0xff] }
  0x7c   : > { %994 = vmatmul.mubr.f32.gmra.mrb[32].mxu0 %v317_v31  ;;  %853 = vmatprep.mubr.f32.mxu1 %v326_v32  ;;  %v301_v31 = vld [vmem:[%s2252_s4 + $0x220] sm:$0xff]  ;;  %v312_v32 = vld [vmem:[%s2252_s4 + $0x278] sm:$0xff] }
  0x7d   : > { %998 = vmatprep.mubr.f32.mxu0 %v328_v33  ;;  %v309_v33 = vld [vmem:[%s2252_s4 + $0x260] sm:$0xff] }
  0x7e   : > { %2054 = vmatpush1.bf16.msra.mxu0 %v2053_v34  ;;  %v320_v34 = vld [vmem:[%s2252_s4 + $0x2b8] sm:$0xff] }
  0x7f   : > { %854 = vmatmul.mubr.f32.gmra.mrb[34].mxu1 %v325_v37  ;;  %2055 = vmatprep.subr.bf16.mxu0 %v2160_v0  ;;  %v319_v37 = vld [vmem:[%s2252_s4 + $0x2b0] sm:$0xff] }
  0x80   : > { %999 = vmatmul.mubr.f32.gmra.mrb[34].mxu0 %v327_v38  ;;  %858 = vmatprep.mubr.f32.mxu1 %v336_v39  ;;  %v330_v38 = vld [vmem:[%s2252_s4 + $0x308] sm:$0xff]  ;;  %v321_v39 = vld [vmem:[%s2252_s4 + $0x2c0] sm:$0xff] }
  0x81   : > { %1003 = vmatprep.mubr.f32.mxu0 %v338_v40  ;;  %v332_v40 = vld [vmem:[%s2252_s4 + $0x318] sm:$0xff] }
  0x82   : > { %2057 = vmatpush1.bf16.msra.mxu0 %v2056_v41  ;;  %v329_v41 = vld [vmem:[%s2252_s4 + $0x300] sm:$0xff] }
  0x83   : > { %859 = vmatmul.mubr.f32.gmra.mrb[36].mxu1 %v335_v44  ;;  %2058 = vmatprep.subr.bf16.mxu0 %v2160_v0  ;;  %v357_v0 = vld [vmem:[%s2252_s4 + $0x3e0] sm:$0xff]  ;;  %v342_v44 = vld [vmem:[%s2252_s4 + $0x368] sm:$0xff] }
  0x84   : > { %1004 = vmatmul.mubr.f32.gmra.mrb[36].mxu0 %v337_v45  ;;  %863 = vmatprep.mubr.f32.mxu1 %v346_v46  ;;  %v339_v45 = vld [vmem:[%s2252_s4 + $0x350] sm:$0xff]  ;;  %v350_v46 = vld [vmem:[%s2252_s4 + $0x3a8] sm:$0xff] }
  0x85   : > { %1008 = vmatprep.mubr.f32.mxu0 %v348_v47  ;;  %v341_v47 = vld [vmem:[%s2252_s4 + $0x360] sm:$0xff] }
  0x86   : > { %2060 = vmatpush1.bf16.msra.mxu0 %v2059_v48  ;;  %v352_v48 = vld [vmem:[%s2252_s4 + $0x3b8] sm:$0xff] }
  0x87   : > { %864 = vmatmul.mubr.f32.gmra.mrb[38].mxu1 %v345_v49  ;;  %v349_v49 = vld [vmem:[%s2252_s4 + $0x3a0] sm:$0xff] }
  0x88   : > { %1009 = vmatmul.mubr.f32.gmra.mrb[38].mxu0 %v347_v50  ;;  %868 = vmatprep.mubr.f32.mxu1 %v356_v51  ;;  %v360_v50 = vld [vmem:[%s2252_s4 + $0x3f8] sm:$0xff]  ;;  %v351_v51 = vld [vmem:[%s2252_s4 + $0x3b0] sm:$0xff] }
  0x89   : > { %1013 = vmatprep.mubr.f32.mxu0 %v358_v52  ;;  %v362_v52 = vld [vmem:[%s2252_s4 + $0x408] sm:$0xff] }
  0x8b   : > { %869 = vmatmul.mubr.f32.gmra.mrb[40].mxu1 %v355_v53  ;;  %v359_v53 = vld [vmem:[%s2252_s4 + $0x3f0] sm:$0xff] }
  0x8c   : > { %1014 = vmatmul.mubr.f32.gmra.mrb[40].mxu0 %v357_v0  ;;  %873 = vmatprep.mubr.f32.mxu1 %v366_v54  ;;  %v370_v0 = vld [vmem:[%s2252_s4 + $0x448] sm:$0xff]  ;;  %v361_v54 = vld [vmem:[%s2252_s4 + $0x400] sm:$0xff] }
  0x8d   : > { %1018 = vmatprep.mubr.f32.mxu0 %v368_v55  ;;  %v372_v55 = vld [vmem:[%s2252_s4 + $0x458] sm:$0xff] }
  0x8f   : > { %874 = vmatmul.mubr.f32.gmra.mrb[42].mxu1 %v365_v56  ;;  %v369_v56 = vld [vmem:[%s2252_s4 + $0x440] sm:$0xff] }
  0x90   : > { %1019 = vmatmul.mubr.f32.gmra.mrb[42].mxu0 %v367_v57  ;;  %878 = vmatprep.mubr.f32.mxu1 %v376_v58  ;;  %v380_v57 = vld [vmem:[%s2252_s4 + $0x498] sm:$0xff]  ;;  %v371_v58 = vld [vmem:[%s2252_s4 + $0x450] sm:$0xff] }
  0x91   : > { %1023 = vmatprep.mubr.f32.mxu0 %v378_v59  ;;  %v382_v59 = vld [vmem:[%s2252_s4 + $0x4a8] sm:$0xff] }
  0x93   : > { %879 = vmatmul.mubr.f32.gmra.mrb[44].mxu1 %v375_v60  ;;  %v379_v60 = vld [vmem:[%s2252_s4 + $0x490] sm:$0xff] }
  0x94   : > { %1024 = vmatmul.mubr.f32.gmra.mrb[44].mxu0 %v377_v61  ;;  %883 = vmatprep.mubr.f32.mxu1 %v386_v62  ;;  %v390_v61 = vld [vmem:[%s2252_s4 + $0x4e8] sm:$0xff]  ;;  %v381_v62 = vld [vmem:[%s2252_s4 + $0x4a0] sm:$0xff] }
  0x95   : > { %1028 = vmatprep.mubr.f32.mxu0 %v388_v63  ;;  %v392_v63 = vld [vmem:[%s2252_s4 + $0x4f8] sm:$0xff] }
  0x97   : > { %884 = vmatmul.mubr.f32.gmra.mrb[46].mxu1 %v385_v1  ;;  %v389_v1 = vld [vmem:[%s2252_s4 + $0x4e0] sm:$0xff] }
  0x98   : > { %1029 = vmatmul.mubr.f32.gmra.mrb[46].mxu0 %v387_v2  ;;  %1098 = vmatprep.mubr.f32.mxu1 %v240_v3  ;;  %v391_v2 = vld [vmem:[%s2252_s4 + $0x4f0] sm:$0xff] }
  0x99   : > { %1560 = vmatprep.mubr.msk.f32.mxu0 %vm550_vm0, %v242_v4 }
  0x9b   : > { %1099 = vmatmul.mubr.f32.vlgmr.msra.gmra.mrb[48].mxu1 %v239_v5 }
  0x9c   : > { %1103 = vmatprep.mubr.f32.mxu1 %v250_v6  ;;  %1244 = vmatmul.mubr.f32.vlgmr.msra.gmra.mrb[48].mxu0 %v241_v7 }
  0x9d   : > { %1561 = vmatprep.mubr.msk.f32.mxu0 %vm550_vm0, %v252_v8 }
  0x9f   : > { %1104 = vmatmul.mubr.f32.gmra.mrb[50].mxu1 %v249_v9 }
  0xa0   : > { %1108 = vmatprep.mubr.f32.mxu1 %v260_v10  ;;  %1249 = vmatmul.mubr.f32.gmra.mrb[50].mxu0 %v251_v11 }
  0xa1   : > { %1562 = vmatprep.mubr.msk.f32.mxu0 %vm550_vm0, %v262_v12 }
  0xa3   : > { %1109 = vmatmul.mubr.f32.gmra.mrb[52].mxu1 %v259_v13 }
  0xa4   : > { %1113 = vmatprep.mubr.f32.mxu1 %v270_v14  ;;  %1254 = vmatmul.mubr.f32.gmra.mrb[52].mxu0 %v261_v15 }
  0xa5   : > { %1563 = vmatprep.mubr.msk.f32.mxu0 %vm550_vm0, %v272_v16 }
  0xa7   : > { %1114 = vmatmul.mubr.f32.gmra.mrb[54].mxu1 %v269_v17 }
  0xa8   : > { %1118 = vmatprep.mubr.f32.mxu1 %v280_v18  ;;  %1259 = vmatmul.mubr.f32.gmra.mrb[54].mxu0 %v271_v19 }
  0xa9   : > { %1564 = vmatprep.mubr.msk.f32.mxu0 %vm550_vm0, %v282_v20 }
  0xab   : > { %1119 = vmatmul.mubr.f32.gmra.mrb[56].mxu1 %v279_v21 }
  0xac   : > { %1123 = vmatprep.mubr.f32.mxu1 %v290_v22  ;;  %1264 = vmatmul.mubr.f32.gmra.mrb[56].mxu0 %v281_v23 }
  0xad   : > { %1565 = vmatprep.mubr.msk.f32.mxu0 %vm550_vm0, %v292_v24 }
  0xaf   : > { %1124 = vmatmul.mubr.f32.gmra.mrb[58].mxu1 %v289_v25 }
  0xb0   : > { %1128 = vmatprep.mubr.f32.mxu1 %v300_v26  ;;  %1269 = vmatmul.mubr.f32.gmra.mrb[58].mxu0 %v291_v27 }
  0xb1   : > { %1566 = vmatprep.mubr.msk.f32.mxu0 %vm550_vm0, %v302_v28 }
  0xb3   : > { %1129 = vmatmul.mubr.f32.gmra.mrb[60].mxu1 %v299_v29 }
  0xb4   : > { %1133 = vmatprep.mubr.f32.mxu1 %v310_v30  ;;  %1274 = vmatmul.mubr.f32.gmra.mrb[60].mxu0 %v301_v31 }
  0xb5   : > { %1567 = vmatprep.mubr.msk.f32.mxu0 %vm550_vm0, %v312_v32 }
  0xb7   : > { %1134 = vmatmul.mubr.f32.gmra.mrb[62].mxu1 %v309_v33 }
  0xb8   : > { %1138 = vmatprep.mubr.f32.mxu1 %v320_v34  ;;  %1279 = vmatmul.mubr.f32.gmra.mrb[62].mxu0 %v311_v35 }
  0xb9   : > { %1568 = vmatprep.mubr.msk.f32.mxu0 %vm550_vm0, %v322_v36 }
  0xbb   : > { %1139 = vmatmul.mubr.f32.gmra.mrb[64].mxu1 %v319_v37 }
  0xbc   : > { %1143 = vmatprep.mubr.f32.mxu1 %v330_v38  ;;  %1284 = vmatmul.mubr.f32.gmra.mrb[64].mxu0 %v321_v39 }
  0xbd   : > { %1569 = vmatprep.mubr.msk.f32.mxu0 %vm550_vm0, %v332_v40 }
  0xbf   : > { %1144 = vmatmul.mubr.f32.gmra.mrb[66].mxu1 %v329_v41 }
  0xc0   : > { %1148 = vmatprep.mubr.f32.mxu1 %v340_v42  ;;  %1289 = vmatmul.mubr.f32.gmra.mrb[66].mxu0 %v331_v43 }
  0xc1   : > { %1570 = vmatprep.mubr.msk.f32.mxu0 %vm550_vm0, %v342_v44 }
  0xc3   : > { %1149 = vmatmul.mubr.f32.gmra.mrb[68].mxu1 %v339_v45 }
  0xc4   : > { %1153 = vmatprep.mubr.f32.mxu1 %v350_v46  ;;  %1294 = vmatmul.mubr.f32.gmra.mrb[68].mxu0 %v341_v47 }
  0xc5   : > { %1571 = vmatprep.mubr.msk.f32.mxu0 %vm550_vm0, %v352_v48 }
  0xc7   : > { %1154 = vmatmul.mubr.f32.gmra.mrb[70].mxu1 %v349_v49 }
  0xc8   : > { %1158 = vmatprep.mubr.f32.mxu1 %v360_v50  ;;  %1299 = vmatmul.mubr.f32.gmra.mrb[70].mxu0 %v351_v51 }
  0xc9   : > { %1572 = vmatprep.mubr.msk.f32.mxu0 %vm550_vm0, %v362_v52  ;;  %v2601_v52 = vld [vmem:[%s231_s7] ss:$0 sm:$0xff] }
  0xcb   : > { %1159 = vmatmul.mubr.f32.gmra.mrb[72].mxu1 %v359_v53 }
  0xcc   : > { %1163 = vmatprep.mubr.f32.mxu1 %v370_v0  ;;  %1304 = vmatmul.mubr.f32.gmra.mrb[72].mxu0 %v361_v54 }
  0xcd   : > { %1573 = vmatprep.mubr.msk.f32.mxu0 %vm550_vm0, %v372_v55 }
  0xcf   : > { %1164 = vmatmul.mubr.f32.gmra.mrb[74].mxu1 %v369_v56 }
  0xd0   : > { %1168 = vmatprep.mubr.f32.mxu1 %v380_v57  ;;  %1309 = vmatmul.mubr.f32.gmra.mrb[74].mxu0 %v371_v58 }
  0xd1   : > { %1574 = vmatprep.mubr.msk.f32.mxu0 %vm550_vm0, %v382_v59 }
  0xd3   : > { %1169 = vmatmul.mubr.f32.gmra.mrb[76].mxu1 %v379_v60 }
  0xd4   : > { %1173 = vmatprep.mubr.f32.mxu1 %v390_v61  ;;  %1314 = vmatmul.mubr.f32.gmra.mrb[76].mxu0 %v381_v62 }
  0xd5   : > { %1575 = vmatprep.mubr.msk.f32.mxu0 %vm550_vm0, %v392_v63 }
  0xd7   : > { %1174 = vmatmul.mubr.f32.gmra.mrb[78].mxu1 %v389_v1 }
  0xd8   : > { %1319 = vmatmul.mubr.f32.gmra.mrb[78].mxu0 %v391_v2 }
 0x10e   : > { %v1636_v3 = vpop.f32.mrb[0].mxu1  ;;  %v1612_v4 = vpop.f32.mrb[0].mxu0 }
 0x10f   : > { %v1637_v5 = vpop.f32.mrb[1].mxu1  ;;  %v1613_v6 = vpop.f32.mrb[1].mxu0 }
 0x110   : > { %v2577_v7 = vadd.f32 %v1637_v5, %v1636_v3  ;;  %v1614_v8 = vadd.f32 %v1613_v6, %v1612_v4 }
 0x112   : > { %v1639_v9 = vpop.f32.mrb[2].mxu1  ;;  %v1615_v10 = vpop.f32.mrb[2].mxu0  ;;  %v666_v54 = vadd.f32 %v1614_v8, %v2601_v52 }
 0x113   : > { %v1640_v11 = vpop.f32.mrb[3].mxu1  ;;  %v1616_v12 = vpop.f32.mrb[3].mxu0 }
 0x114   : > { %v2579_v13 = vadd.f32 %v1640_v11, %v1639_v9  ;;  %v1617_v14 = vadd.f32 %v1616_v12, %v1615_v10 }
 0x116   : > { %v1642_v15 = vpop.f32.mrb[4].mxu1  ;;  %v1618_v16 = vpop.f32.mrb[4].mxu0  ;;  %v671_v62 = vadd.f32 %v1617_v14, %v2601_v52 }
 0x117   : > { %v1643_v17 = vpop.f32.mrb[5].mxu1  ;;  %v1619_v18 = vpop.f32.mrb[5].mxu0 }
 0x118   : > { %v2581_v19 = vadd.f32 %v1643_v17, %v1642_v15  ;;  %v1620_v20 = vadd.f32 %v1619_v18, %v1618_v16 }
 0x11a   : > { %v1645_v21 = vpop.f32.mrb[6].mxu1  ;;  %v1621_v22 = vpop.f32.mrb[6].mxu0  ;;  %v676_v8 = vadd.f32 %v1620_v20, %v2601_v52 }
 0x11b   : > { %v1646_v23 = vpop.f32.mrb[7].mxu1  ;;  %v1622_v24 = vpop.f32.mrb[7].mxu0 }
 0x11c   : > { %v2583_v25 = vadd.f32 %v1646_v23, %v1645_v21  ;;  %v1623_v26 = vadd.f32 %v1622_v24, %v1621_v22 }
 0x11e   : > { %v1648_v27 = vpop.f32.mrb[8].mxu1  ;;  %v1624_v28 = vpop.f32.mrb[8].mxu0  ;;  %v681_v21 = vadd.f32 %v1623_v26, %v2601_v52 }
 0x11f   : > { %v1649_v29 = vpop.f32.mrb[9].mxu1  ;;  %v1625_v30 = vpop.f32.mrb[9].mxu0 }
 0x120   : > { %v2585_v31 = vadd.f32 %v1649_v29, %v1648_v27  ;;  %v1626_v32 = vadd.f32 %v1625_v30, %v1624_v28 }
 0x122   : > { %v1651_v33 = vpop.f32.mrb[10].mxu1  ;;  %v1627_v34 = vpop.f32.mrb[10].mxu0 }
 0x123   : > { %v1652_v35 = vpop.f32.mrb[11].mxu1  ;;  %v1628_v36 = vpop.f32.mrb[11].mxu0 }
 0x124   : > { %v2587_v37 = vadd.f32 %v1652_v35, %v1651_v33  ;;  %v1629_v38 = vadd.f32 %v1628_v36, %v1627_v34  ;;  %v686_v33 = vadd.f32 %v1626_v32, %v2601_v52 }
 0x126   : > { %v1654_v39 = vpop.f32.mrb[12].mxu1  ;;  %v1630_v40 = vpop.f32.mrb[12].mxu0 }
 0x127   : > { %v1655_v41 = vpop.f32.mrb[13].mxu1  ;;  %v1631_v42 = vpop.f32.mrb[13].mxu0 }
 0x128   : > { %v2589_v43 = vadd.f32 %v1655_v41, %v1654_v39  ;;  %v2591_v44 = vadd.f32 %v1631_v42, %v1630_v40 }
 0x12a   : > { %v1657_v45 = vpop.f32.mrb[14].mxu1  ;;  %v1633_v46 = vpop.f32.mrb[14].mxu0 }
 0x12b   : > { %v1658_v47 = vpop.f32.mrb[15].mxu1  ;;  %v1634_v48 = vpop.f32.mrb[15].mxu0 }
 0x12c   : > { %v2597_v49 = vadd.f32 %v1658_v47, %v1657_v45  ;;  %v2599_v50 = vadd.f32 %v1634_v48, %v1633_v46  ;;  %v691_v45 = vadd.f32 %v1629_v38, %v2601_v52 }
 0x12e   : > { %v1692_v51 = vpop.f32.mrb[16].mxu1 }
 0x12f   : > { %v1693_v53 = vpop.f32.mrb[17].mxu1  ;;  %v1772_v0 = vpop.f32.mrb[16].mxu0 }
 0x130   : > { %v1694_v55 = vadd.f32 %v1693_v53, %v1692_v51  ;;  %v1773_v56 = vpop.f32.mrb[17].mxu0 }
 0x131   : > { %v1774_v57 = vadd.f32 %v1773_v56, %v1772_v0 }
 0x132   : > { %v811_v58 = vadd.f32 %v1694_v55, %v666_v54  ;;  %v1695_v59 = vpop.f32.mrb[18].mxu1  ;;  %v696_v55 = vadd.f32 %v2591_v44, %v2601_v52 }
 0x133   : > { %v1696_v60 = vpop.f32.mrb[19].mxu1  ;;  %v1775_v61 = vpop.f32.mrb[18].mxu0 }
 0x134   : > { %v2605_v63 = vadd.f32 %v1774_v57, %v811_v58  ;;  %v1697_v1 = vadd.f32 %v1696_v60, %v1695_v59  ;;  %v1776_v2 = vpop.f32.mrb[19].mxu0 }
 0x135   : > { %v1777_v3 = vadd.f32 %v1776_v2, %v1775_v61 }
 0x136   : > { %v816_v4 = vadd.f32 %v1697_v1, %v671_v62  ;;  %v1698_v5 = vpop.f32.mrb[20].mxu1  ;;  %v701_v1 = vadd.f32 %v2599_v50, %v2601_v52 }
 0x137   : > { %v1699_v6 = vpop.f32.mrb[21].mxu1  ;;  %v1778_v9 = vpop.f32.mrb[20].mxu0 }
 0x138   : > { %v2608_v10 = vadd.f32 %v1777_v3, %v816_v4  ;;  %v1700_v11 = vadd.f32 %v1699_v6, %v1698_v5  ;;  %v1779_v12 = vpop.f32.mrb[21].mxu0 }
 0x139   : > { %v1780_v15 = vadd.f32 %v1779_v12, %v1778_v9 }
 0x13a   : > { %v821_v16 = vadd.f32 %v1700_v11, %v676_v8  ;;  %v1701_v17 = vpop.f32.mrb[22].mxu1  ;;  %v706_v11 = vadd.f32 %v2577_v7, %v2601_v52 }
 0x13b   : > { %v1702_v18 = vpop.f32.mrb[23].mxu1  ;;  %v1781_v14 = vpop.f32.mrb[22].mxu0 }
 0x13c   : > { %v2611_v22 = vadd.f32 %v1780_v15, %v821_v16  ;;  %v1703_v23 = vadd.f32 %v1702_v18, %v1701_v17  ;;  %v1782_v24 = vpop.f32.mrb[23].mxu0 }
 0x13d   : > { %v1783_v27 = vadd.f32 %v1782_v24, %v1781_v14 }
 0x13e   : > { %v826_v28 = vadd.f32 %v1703_v23, %v681_v21  ;;  %v1704_v29 = vpop.f32.mrb[24].mxu1  ;;  %v711_v23 = vadd.f32 %v2579_v13, %v2601_v52 }
 0x13f   : > { %v1705_v30 = vpop.f32.mrb[25].mxu1  ;;  %v1784_v20 = vpop.f32.mrb[24].mxu0 }
 0x140   : > { %v2614_v34 = vadd.f32 %v1783_v27, %v826_v28  ;;  %v1706_v35 = vadd.f32 %v1705_v30, %v1704_v29  ;;  %v1785_v36 = vpop.f32.mrb[25].mxu0 }
 0x141   : > { %v1786_v39 = vadd.f32 %v1785_v36, %v1784_v20 }
 0x142   : > { %v831_v40 = vadd.f32 %v1706_v35, %v686_v33  ;;  %v1707_v41 = vpop.f32.mrb[26].mxu1  ;;  %v716_v35 = vadd.f32 %v2581_v19, %v2601_v52 }
 0x143   : > { %v1708_v42 = vpop.f32.mrb[27].mxu1  ;;  %v1787_v26 = vpop.f32.mrb[26].mxu0 }
 0x144   : > { %v2617_v46 = vadd.f32 %v1786_v39, %v831_v40  ;;  %v1709_v47 = vadd.f32 %v1708_v42, %v1707_v41  ;;  %v1788_v48 = vpop.f32.mrb[27].mxu0 }
 0x145   : > { %v1789_v51 = vadd.f32 %v1788_v48, %v1787_v26 }
 0x146   : > { %v836_v53 = vadd.f32 %v1709_v47, %v691_v45  ;;  %v1710_v0 = vpop.f32.mrb[28].mxu1  ;;  %v721_v47 = vadd.f32 %v2583_v25, %v2601_v52 }
 0x147   : > { %v1711_v54 = vpop.f32.mrb[29].mxu1  ;;  %v1790_v32 = vpop.f32.mrb[28].mxu0 }
 0x148   : > { %v2621_v56 = vadd.f32 %v1789_v51, %v836_v53  ;;  %v1712_v57 = vadd.f32 %v1711_v54, %v1710_v0  ;;  %v1791_v58 = vpop.f32.mrb[29].mxu0 }
 0x149   : > { %v1792_v59 = vadd.f32 %v1791_v58, %v1790_v32 }
 0x14a   : > { %v841_v60 = vadd.f32 %v1712_v57, %v696_v55  ;;  %v1713_v61 = vpop.f32.mrb[30].mxu1  ;;  %v726_v57 = vadd.f32 %v2585_v31, %v2601_v52 }
 0x14b   : > { %v1714_v38 = vpop.f32.mrb[31].mxu1  ;;  %v1793_v62 = vpop.f32.mrb[30].mxu0 }
 0x14c   : > { %v2625_v2 = vadd.f32 %v1792_v59, %v841_v60  ;;  %v1715_v3 = vadd.f32 %v1714_v38, %v1713_v61  ;;  %v1794_v4 = vpop.f32.mrb[31].mxu0 }
 0x14d   : > { %v1795_v5 = vadd.f32 %v1794_v4, %v1793_v62 }
 0x14e   : > { %v846_v6 = vadd.f32 %v1715_v3, %v701_v1  ;;  %v1716_v9 = vpop.f32.mrb[32].mxu1  ;;  %v731_v3 = vadd.f32 %v2587_v37, %v2601_v52 }
 0x14f   : > { %v1717_v44 = vpop.f32.mrb[33].mxu1  ;;  %v1796_v8 = vpop.f32.mrb[32].mxu0 }
 0x150   : > { %v2629_v12 = vadd.f32 %v1795_v5, %v846_v6  ;;  %v1718_v15 = vadd.f32 %v1717_v44, %v1716_v9  ;;  %v1797_v16 = vpop.f32.mrb[33].mxu0 }
 0x151   : > { %v1798_v17 = vadd.f32 %v1797_v16, %v1796_v8 }
 0x152   : > { %v851_v18 = vadd.f32 %v1718_v15, %v706_v11  ;;  %v1719_v14 = vpop.f32.mrb[34].mxu1  ;;  %v736_v15 = vadd.f32 %v2589_v43, %v2601_v52 }
 0x153   : > { %v1720_v50 = vpop.f32.mrb[35].mxu1  ;;  %v1799_v21 = vpop.f32.mrb[34].mxu0 }
 0x154   : > { %v2633_v24 = vadd.f32 %v1798_v17, %v851_v18  ;;  %v1721_v27 = vadd.f32 %v1720_v50, %v1719_v14  ;;  %v1800_v28 = vpop.f32.mrb[35].mxu0 }
 0x155   : > { %v1801_v29 = vadd.f32 %v1800_v28, %v1799_v21 }
 0x156   : > { %v856_v30 = vadd.f32 %v1721_v27, %v711_v23  ;;  %v1722_v20 = vpop.f32.mrb[36].mxu1  ;;  %v741_v27 = vadd.f32 %v2597_v49, %v2601_v52 }
 0x157   : > { %v1723_v7 = vpop.f32.mrb[37].mxu1  ;;  %v1802_v33 = vpop.f32.mrb[36].mxu0 }
 0x158   : > { %v2637_v36 = vadd.f32 %v1801_v29, %v856_v30  ;;  %v1724_v39 = vadd.f32 %v1723_v7, %v1722_v20  ;;  %v1803_v40 = vpop.f32.mrb[37].mxu0 }
 0x159   : > { %v1804_v41 = vadd.f32 %v1803_v40, %v1802_v33 }
 0x15a   : > { %v861_v42 = vadd.f32 %v1724_v39, %v716_v35  ;;  %v1725_v26 = vpop.f32.mrb[38].mxu1 }
 0x15b   : > { %v1726_v13 = vpop.f32.mrb[39].mxu1  ;;  %v1805_v45 = vpop.f32.mrb[38].mxu0 }
 0x15c   : > { %v2641_v48 = vadd.f32 %v1804_v41, %v861_v42  ;;  %v1727_v51 = vadd.f32 %v1726_v13, %v1725_v26  ;;  %v1806_v53 = vpop.f32.mrb[39].mxu0 }
 0x15d   : > { %v1807_v0 = vadd.f32 %v1806_v53, %v1805_v45 }
 0x15e   : > { %v866_v54 = vadd.f32 %v1727_v51, %v721_v47  ;;  %v1728_v32 = vpop.f32.mrb[40].mxu1 }
 0x15f   : > { %v1729_v19 = vpop.f32.mrb[41].mxu1  ;;  %v1808_v55 = vpop.f32.mrb[40].mxu0 }
 0x160   : > { %v2645_v58 = vadd.f32 %v1807_v0, %v866_v54  ;;  %v1730_v59 = vadd.f32 %v1729_v19, %v1728_v32  ;;  %v1809_v60 = vpop.f32.mrb[41].mxu0 }
 0x161   : > { %v1810_v61 = vadd.f32 %v1809_v60, %v1808_v55 }
 0x162   : > { %v871_v38 = vadd.f32 %v1730_v59, %v726_v57  ;;  %v1731_v62 = vpop.f32.mrb[42].mxu1 }
 0x163   : > { %v1732_v25 = vpop.f32.mrb[43].mxu1  ;;  %v1811_v1 = vpop.f32.mrb[42].mxu0 }
 0x164   : > { %v2649_v4 = vadd.f32 %v1810_v61, %v871_v38  ;;  %v1733_v5 = vadd.f32 %v1732_v25, %v1731_v62  ;;  %v1812_v6 = vpop.f32.mrb[43].mxu0 }
 0x165   : > { %v1813_v9 = vadd.f32 %v1812_v6, %v1811_v1 }
 0x166   : > { %v876_v44 = vadd.f32 %v1733_v5, %v731_v3  ;;  %v1734_v8 = vpop.f32.mrb[44].mxu1 }
 0x167   : > { %v1735_v31 = vpop.f32.mrb[45].mxu1  ;;  %v1814_v11 = vpop.f32.mrb[44].mxu0 }
 0x168   : > { %v2653_v16 = vadd.f32 %v1813_v9, %v876_v44  ;;  %v1736_v17 = vadd.f32 %v1735_v31, %v1734_v8  ;;  %v1815_v18 = vpop.f32.mrb[45].mxu0 }
 0x169   : > { %v1816_v14 = vadd.f32 %v1815_v18, %v1814_v11 }
 0x16a   : > { %v881_v50 = vadd.f32 %v1736_v17, %v736_v15  ;;  %v1737_v37 = vpop.f32.mrb[46].mxu1 }
 0x16b   : > { %v1738_v21 = vpop.f32.mrb[47].mxu1  ;;  %v1817_v23 = vpop.f32.mrb[46].mxu0 }
 0x16c   : > { %v2657_v28 = vadd.f32 %v1816_v14, %v881_v50  ;;  %v1739_v29 = vadd.f32 %v1738_v21, %v1737_v37  ;;  %v1818_v30 = vpop.f32.mrb[47].mxu0 }
 0x16d   : > { %v1819_v20 = vadd.f32 %v1818_v30, %v1817_v23 }
 0x16e   : > { %v886_v7 = vadd.f32 %v1739_v29, %v741_v27  ;;  %v1852_v43 = vpop.f32.mrb[48].mxu1 }
 0x16f   : > { %v1853_v33 = vpop.f32.mrb[49].mxu1  ;;  %v1245_v35 = vpop.f32.mrb[48].mxu0 }
 0x170   : > { %v2660_v39 = vadd.f32 %v1819_v20, %v886_v7  ;;  %v1854_v40 = vadd.f32 %v1853_v33, %v1852_v43  ;;  %v1247_v41 = vpop.f32.mrb[49].mxu0 }
 0x172   : > { %v1855_v42 = vpop.f32.mrb[50].mxu1  ;;  %v1101_v26 = vadd.f32 %v1854_v40, %v2605_v63 }
 0x173   : > { %v1856_v13 = vpop.f32.mrb[51].mxu1  ;;  %v1250_v49 = vpop.f32.mrb[50].mxu0 }
 0x174   : > { %v1857_v52 = vadd.f32 %v1856_v13, %v1855_v42  ;;  %v1246_v45 = vadd.f32 %v1245_v35, %v1101_v26  ;;  %v1252_v47 = vpop.f32.mrb[51].mxu0 }
 0x176   : > { %v1324_v51 = vmax.f32 %v1246_v45, 0.0  ;;  %v1858_v53 = vpop.f32.mrb[52].mxu1  ;;  %v1106_v0 = vadd.f32 %v1857_v52, %v2608_v10 }
 0x177   : > { %v1859_v54 = vpop.f32.mrb[53].mxu1  ;;  %v1255_v32 = vpop.f32.mrb[52].mxu0 }
 0x178   : > { %1340 = vst [vmem:[%s2664_s10] sm:$0xff] %v1324_v51  ;;  %v1860_v19 = vadd.f32 %v1859_v54, %v1858_v53  ;;  %v1251_v55 = vadd.f32 %v1250_v49, %v1106_v0  ;;  %v1257_v63 = vpop.f32.mrb[53].mxu0 }
 0x17a   : > { %v1325_v57 = vmax.f32 %v1251_v55, 0.0  ;;  %v1861_v59 = vpop.f32.mrb[54].mxu1  ;;  %v1111_v60 = vadd.f32 %v1860_v19, %v2611_v22 }
 0x17b   : > { %v1862_v61 = vpop.f32.mrb[55].mxu1  ;;  %v1260_v38 = vpop.f32.mrb[54].mxu0 }
 0x17c   : > { %1341 = vst [vmem:[%s2664_s10 + $0x8] sm:$0xff] %v1325_v57  ;;  %v1863_v62 = vadd.f32 %v1862_v61, %v1861_v59  ;;  %v1256_v10 = vadd.f32 %v1255_v32, %v1111_v60  ;;  %v1262_v25 = vpop.f32.mrb[55].mxu0 }
 0x17e   : > { %v1326_v1 = vmax.f32 %v1256_v10, 0.0  ;;  %v1864_v3 = vpop.f32.mrb[56].mxu1  ;;  %v1116_v5 = vadd.f32 %v1863_v62, %v2614_v34 }
 0x17f   : > { %v1865_v6 = vpop.f32.mrb[57].mxu1  ;;  %v1265_v9 = vpop.f32.mrb[56].mxu0 }
 0x180   : > { %1342 = vst [vmem:[%s2664_s10 + $0x10] sm:$0xff] %v1326_v1  ;;  %v1866_v44 = vadd.f32 %v1865_v6, %v1864_v3  ;;  %v1261_v8 = vadd.f32 %v1260_v38, %v1116_v5  ;;  %v1267_v31 = vpop.f32.mrb[57].mxu0 }
 0x182   : > { %v1327_v11 = vmax.f32 %v1261_v8, 0.0  ;;  %v1867_v22 = vpop.f32.mrb[58].mxu1  ;;  %v1121_v15 = vadd.f32 %v1866_v44, %v2617_v46 }
 0x183   : > { %v1868_v17 = vpop.f32.mrb[59].mxu1  ;;  %v1270_v18 = vpop.f32.mrb[58].mxu0 }
 0x184   : > { %1343 = vst [vmem:[%s2664_s10 + $0x18] sm:$0xff] %v1327_v11  ;;  %v1869_v14 = vadd.f32 %v1868_v17, %v1867_v22  ;;  %v1266_v50 = vadd.f32 %v1265_v9, %v1121_v15  ;;  %v1272_v37 = vpop.f32.mrb[59].mxu0 }
 0x186   : > { %v1328_v21 = vmax.f32 %v1266_v50, 0.0  ;;  %v1870_v34 = vpop.f32.mrb[60].mxu1  ;;  %v1126_v23 = vadd.f32 %v1869_v14, %v2621_v56 }
 0x187   : > { %v1871_v27 = vpop.f32.mrb[61].mxu1  ;;  %v1275_v29 = vpop.f32.mrb[60].mxu0 }
 0x188   : > { %1344 = vst [vmem:[%s2664_s10 + $0x20] sm:$0xff] %v1328_v21  ;;  %v1872_v30 = vadd.f32 %v1871_v27, %v1870_v34  ;;  %v1271_v20 = vadd.f32 %v1270_v18, %v1126_v23  ;;  %v1277_v7 = vpop.f32.mrb[61].mxu0 }
 0x18a   : > { %v1329_v43 = vmax.f32 %v1271_v20, 0.0  ;;  %v1873_v46 = vpop.f32.mrb[62].mxu1  ;;  %v1131_v33 = vadd.f32 %v1872_v30, %v2625_v2 }
 0x18b   : > { %v1874_v35 = vpop.f32.mrb[63].mxu1  ;;  %v1280_v40 = vpop.f32.mrb[62].mxu0 }
 0x18c   : > { %1345 = vst [vmem:[%s2664_s10 + $0x28] sm:$0xff] %v1329_v43  ;;  %v1875_v41 = vadd.f32 %v1874_v35, %v1873_v46  ;;  %v1276_v42 = vadd.f32 %v1275_v29, %v1131_v33  ;;  %v1282_v26 = vpop.f32.mrb[63].mxu0 }
 0x18e   : > { %v1330_v13 = vmax.f32 %v1276_v42, 0.0  ;;  %v1876_v56 = vpop.f32.mrb[64].mxu1  ;;  %v1136_v49 = vadd.f32 %v1875_v41, %v2629_v12 }
 0x18f   : > { %v1877_v52 = vpop.f32.mrb[65].mxu1  ;;  %v1285_v45 = vpop.f32.mrb[64].mxu0 }
 0x190   : > { %1346 = vst [vmem:[%s2664_s10 + $0x30] sm:$0xff] %v1330_v13  ;;  %v1878_v47 = vadd.f32 %v1877_v52, %v1876_v56  ;;  %v1281_v51 = vadd.f32 %v1280_v40, %v1136_v49  ;;  %v1287_v53 = vpop.f32.mrb[65].mxu0 }
 0x191   : > { %v1431_v53 = vld [vmem:[%s2664_s10 + $0x18] sm:$0xff] (%p2213_p3) }
 0x192   : > { %v1331_v0 = vmax.f32 %v1281_v51, 0.0  ;;  %v1879_v2 = vpop.f32.mrb[66].mxu1  ;;  %v1141_v54 = vadd.f32 %v1878_v47, %v2633_v24  ;;  %v1429_v51 = vld [vmem:[%s2664_s10 + $0x10] sm:$0xff] (%p2213_p3)  ;;  %1432 = vst [vmem:[%s1367_s19 + $0x30] sm:$0xff] (%p2213_p3), %v1431_v53 }
 0x193   : > { %v1880_v32 = vpop.f32.mrb[67].mxu1  ;;  %v1290_v19 = vpop.f32.mrb[66].mxu0  ;;  %1430 = vst [vmem:[%s1367_s19 + $0x20] sm:$0xff] (%p2213_p3), %v1429_v51 }
 0x194   : > { %1347 = vst [vmem:[%s2664_s10 + $0x38] sm:$0xff] %v1331_v0  ;;  %v1881_v55 = vadd.f32 %v1880_v32, %v1879_v2  ;;  %v1286_v63 = vadd.f32 %v1285_v45, %v1141_v54  ;;  %v1292_v57 = vpop.f32.mrb[67].mxu0  ;;  %v1433_v0 = vld [vmem:[%s2664_s10 + $0x20] sm:$0xff] (%p2213_p3)  ;;  %v1435_v2 = vld [vmem:[%s2664_s10 + $0x28] sm:$0xff] (%p2213_p3) }
 0x195   : > { %1434 = vst [vmem:[%s1367_s19 + $0x40] sm:$0xff] (%p2213_p3), %v1433_v0  ;;  %1436 = vst [vmem:[%s1367_s19 + $0x50] sm:$0xff] (%p2213_p3), %v1435_v2 }
 0x196   : > { %v1332_v59 = vmax.f32 %v1286_v63, 0.0  ;;  %v1882_v12 = vpop.f32.mrb[68].mxu1  ;;  %v1146_v60 = vadd.f32 %v1881_v55, %v2637_v36 }
 0x197   : > { %v1883_v61 = vpop.f32.mrb[69].mxu1  ;;  %v1295_v38 = vpop.f32.mrb[68].mxu0  ;;  %v1437_v54 = vld [vmem:[%s2664_s10 + $0x30] sm:$0xff] (%p2213_p3) }
 0x198   : > { %1348 = vst [vmem:[%s2664_s10 + $0x40] sm:$0xff] %v1332_v59  ;;  %v1884_v62 = vadd.f32 %v1883_v61, %v1882_v12  ;;  %v1291_v10 = vadd.f32 %v1290_v19, %v1146_v60  ;;  %v1297_v25 = vpop.f32.mrb[69].mxu0  ;;  %1438 = vst [vmem:[%s1367_s19 + $0x60] sm:$0xff] (%p2213_p3), %v1437_v54 }
 0x19a   : > { %v1333_v1 = vmax.f32 %v1291_v10, 0.0  ;;  %v1885_v24 = vpop.f32.mrb[70].mxu1  ;;  %v1151_v3 = vadd.f32 %v1884_v62, %v2641_v48 }
 0x19b   : > { %v1886_v5 = vpop.f32.mrb[71].mxu1  ;;  %v1300_v6 = vpop.f32.mrb[70].mxu0  ;;  %v1439_v32 = vld [vmem:[%s2664_s10 + $0x38] sm:$0xff] (%p2213_p3) }
 0x19c   : > { %1349 = vst [vmem:[%s2664_s10 + $0x48] sm:$0xff] %v1333_v1  ;;  %v1887_v9 = vadd.f32 %v1886_v5, %v1885_v24  ;;  %v1296_v44 = vadd.f32 %v1295_v38, %v1151_v3  ;;  %v1302_v8 = vpop.f32.mrb[71].mxu0  ;;  %1440 = vst [vmem:[%s1367_s19 + $0x70] sm:$0xff] (%p2213_p3), %v1439_v32 }
 0x19e   : > { %v1334_v31 = vmax.f32 %v1296_v44, 0.0  ;;  %v1888_v36 = vpop.f32.mrb[72].mxu1  ;;  %v1156_v11 = vadd.f32 %v1887_v9, %v2645_v58 }
 0x19f   : > { %v1889_v22 = vpop.f32.mrb[73].mxu1  ;;  %v1305_v15 = vpop.f32.mrb[72].mxu0  ;;  %v1441_v19 = vld [vmem:[%s2664_s10 + $0x40] sm:$0xff] (%p2213_p3) }
 0x1a0   : > { %1350 = vst [vmem:[%s2664_s10 + $0x50] sm:$0xff] %v1334_v31  ;;  %v1890_v17 = vadd.f32 %v1889_v22, %v1888_v36  ;;  %v1301_v18 = vadd.f32 %v1300_v6, %v1156_v11  ;;  %v1307_v14 = vpop.f32.mrb[73].mxu0  ;;  %1442 = vst [vmem:[%s1367_s19 + $0x80] sm:$0xff] (%p2213_p3), %v1441_v19 }
 0x1a2   : > { %v1335_v50 = vmax.f32 %v1301_v18, 0.0  ;;  %v1891_v48 = vpop.f32.mrb[74].mxu1  ;;  %v1161_v37 = vadd.f32 %v1890_v17, %v2649_v4 }
 0x1a3   : > { %v1892_v21 = vpop.f32.mrb[75].mxu1  ;;  %v1310_v34 = vpop.f32.mrb[74].mxu0  ;;  %v1443_v55 = vld [vmem:[%s2664_s10 + $0x48] sm:$0xff] (%p2213_p3) }
 0x1a4   : > { %1351 = vst [vmem:[%s2664_s10 + $0x58] sm:$0xff] %v1335_v50  ;;  %v1893_v23 = vadd.f32 %v1892_v21, %v1891_v48  ;;  %v1306_v27 = vadd.f32 %v1305_v15, %v1161_v37  ;;  %v1312_v29 = vpop.f32.mrb[75].mxu0  ;;  %1444 = vst [vmem:[%s1367_s19 + $0x90] sm:$0xff] (%p2213_p3), %v1443_v55 }
 0x1a6   : > { %v1336_v30 = vmax.f32 %v1306_v27, 0.0  ;;  %v1894_v58 = vpop.f32.mrb[76].mxu1  ;;  %v1166_v20 = vadd.f32 %v1893_v23, %v2653_v16 }
 0x1a7   : > { %v1895_v7 = vpop.f32.mrb[77].mxu1  ;;  %v1315_v43 = vpop.f32.mrb[76].mxu0  ;;  %v1445_v63 = vld [vmem:[%s2664_s10 + $0x50] sm:$0xff] (%p2213_p3) }
 0x1a8   : > { %1352 = vst [vmem:[%s2664_s10 + $0x60] sm:$0xff] %v1336_v30  ;;  %v1896_v46 = vadd.f32 %v1895_v7, %v1894_v58  ;;  %v1311_v33 = vadd.f32 %v1310_v34, %v1166_v20  ;;  %v1317_v35 = vpop.f32.mrb[77].mxu0  ;;  %1446 = vst [vmem:[%s1367_s19 + $0xa0] sm:$0xff] (%p2213_p3), %v1445_v63 }
 0x1aa   : > { %v1337_v4 = vmax.f32 %v1311_v33, 0.0  ;;  %v1897_v40 = vpop.f32.mrb[78].mxu1  ;;  %v1171_v41 = vadd.f32 %v1896_v46, %v2657_v28  ;;  %v1425_v28 = vld [vmem:[%s2664_s10] sm:$0xff] (%p2213_p3) }
 0x1ab   : > { %v1898_v42 = vpop.f32.mrb[79].mxu1  ;;  %v1320_v26 = vpop.f32.mrb[78].mxu0  ;;  %1426 = vst [vmem:[%s1367_s19] sm:$0xff] (%p2213_p3), %v1425_v28  ;;  %v1447_v57 = vld [vmem:[%s2664_s10 + $0x58] sm:$0xff] (%p2213_p3) }
 0x1ac   : > { %1353 = vst [vmem:[%s2664_s10 + $0x68] sm:$0xff] %v1337_v4  ;;  %v1899_v13 = vadd.f32 %v1898_v42, %v1897_v40  ;;  %v1316_v56 = vadd.f32 %v1315_v43, %v1171_v41  ;;  %v1322_v49 = vpop.f32.mrb[79].mxu0  ;;  %1448 = vst [vmem:[%s1367_s19 + $0xb0] sm:$0xff] (%p2213_p3), %v1447_v57 }
 0x1ae   : > { %v1338_v52 = vmax.f32 %v1316_v56, 0.0  ;;  %v1176_v16 = vadd.f32 %v1899_v13, %v2660_v39  ;;  %1362 = sbr.rel (!%p2213_p3) target bundleno = 445 (0x1bd), region = 36  ;;  %v1427_v39 = vld [vmem:[%s2664_s10 + $0x8] sm:$0xff] (%p2213_p3) }
 0x1af   : > { %1428 = vst [vmem:[%s1367_s19 + $0x10] sm:$0xff] (%p2213_p3), %v1427_v39  ;;  %v1449_v59 = vld [vmem:[%s2664_s10 + $0x60] sm:$0xff] (%p2213_p3) }
 0x1b0   : > { %1354 = vst [vmem:[%s2664_s10 + $0x70] sm:$0xff] %v1338_v52  ;;  %v1321_v45 = vadd.f32 %v1320_v26, %v1176_v16  ;;  %1450 = vst [vmem:[%s1367_s19 + $0xc0] sm:$0xff] (%p2213_p3), %v1449_v59 }
 0x1b2   : > { %v1339_v47 = vmax.f32 %v1321_v45, 0.0 }
 0x1b3   : > { %v1451_v12 = vld [vmem:[%s2664_s10 + $0x68] sm:$0xff] (%p2213_p3) }
 0x1b4   : > { %1355 = vst [vmem:[%s2664_s10 + $0x78] sm:$0xff] %v1339_v47  ;;  %1452 = vst [vmem:[%s1367_s19 + $0xd0] sm:$0xff] (%p2213_p3), %v1451_v12 }
 0x1b7   : > { %v1453_v60 = vld [vmem:[%s2664_s10 + $0x70] sm:$0xff] }
 0x1b8   : > { %1454 = vst [vmem:[%s1367_s19 + $0xe0] sm:$0xff] %v1453_v60 }
 0x1bb   : > { %v1455_v61 = vld [vmem:[%s2664_s10 + $0x78] sm:$0xff] }
 0x1bc   : > { %1456 = vst [vmem:[%s1367_s19 + $0xf0] sm:$0xff] %v1455_v61 }
 0x1bd PF: > { %s13_s16 = sadd.s32 1, %s2158_s16   ;;  %s2738_s12 = smov %s2146_s13 }
 0x1be   : > { %p10_p9 = scmp.ge.s32.totalorder %s13_s16, 4   ;;  %s2739_s13 = smov %s2222_s22 }
 0x1bf   : > { %s2740_s14 = smov %s2154_s15  ;;  %s2741_s15 = smov %s2743_s18 }
 0x1c0   :  { %12 = sbr.rel (!%p10_p9) target bundleno = 3 (0x3), region = 106 }

// kernel: feature_extractor_forward.11
= control target key start
LH: loop header
LB: loop body
LE: loop exit
PB: predicated region body
PF: predicated region fallthrough
CT: control target
= control target key end

     0   :  { %s1822_s0 = inlined_call_operand.vmem [shape: f32[9,128,256], index: 0, kind: input, shape index: {}]   ;;  %s1823_s1 = inlined_call_operand.vmem [shape: f32[128,256], index: 1, kind: output, shape index: {}]  }
   0x1   :  { %v8_v0 = vld [vmem:[%s1822_s0] sm:$0xff]  ;;  %v9_v6 = vld [vmem:[%s1822_s0 + $0x8] sm:$0xff]  ;;  %v10_v15 = vld [vmem:[%s1822_s0 + $0x10] sm:$0xff] }
   0x2   :  { %v596_v1 = vld [vmem:[%s1822_s0 + $0x100] sm:$0xff]  ;;  %v597_v7 = vld [vmem:[%s1822_s0 + $0x108] sm:$0xff]  ;;  %v598_v16 = vld [vmem:[%s1822_s0 + $0x110] sm:$0xff] }
   0x3   :  { %v628_v2 = vld [vmem:[%s1822_s0 + $0x200] sm:$0xff]  ;;  %v73_v3 = vmax.f32 %v8_v0, %v596_v1  ;;  %v629_v8 = vld [vmem:[%s1822_s0 + $0x208] sm:$0xff]  ;;  %v74_v10 = vmax.f32 %v9_v6, %v597_v7  ;;  %v630_v17 = vld [vmem:[%s1822_s0 + $0x210] sm:$0xff]  ;;  %v75_v20 = vmax.f32 %v10_v15, %v598_v16 }
   0x4   :  { %v660_v4 = vld [vmem:[%s1822_s0 + $0x300] sm:$0xff]  ;;  %v661_v13 = vld [vmem:[%s1822_s0 + $0x308] sm:$0xff]  ;;  %v662_v24 = vld [vmem:[%s1822_s0 + $0x310] sm:$0xff] }
   0x5   :  { %v138_v5 = vmax.f32 %v73_v3, %v628_v2  ;;  %v692_v9 = vld [vmem:[%s1822_s0 + $0x400] sm:$0xff]  ;;  %v139_v14 = vmax.f32 %v74_v10, %v629_v8  ;;  %v693_v19 = vld [vmem:[%s1822_s0 + $0x408] sm:$0xff]  ;;  %v140_v26 = vmax.f32 %v75_v20, %v630_v17  ;;  %v11_v27 = vld [vmem:[%s1822_s0 + $0x18] sm:$0xff] }
   0x6   :  { %v724_v12 = vld [vmem:[%s1822_s0 + $0x500] sm:$0xff]  ;;  %v725_v23 = vld [vmem:[%s1822_s0 + $0x508] sm:$0xff]  ;;  %v599_v28 = vld [vmem:[%s1822_s0 + $0x118] sm:$0xff] }
   0x7   :  { %v203_v11 = vmax.f32 %v138_v5, %v660_v4  ;;  %v756_v21 = vld [vmem:[%s1822_s0 + $0x600] sm:$0xff]  ;;  %v204_v22 = vmax.f32 %v139_v14, %v661_v13  ;;  %v631_v29 = vld [vmem:[%s1822_s0 + $0x218] sm:$0xff]  ;;  %v694_v33 = vld [vmem:[%s1822_s0 + $0x410] sm:$0xff]  ;;  %v76_v34 = vmax.f32 %v11_v27, %v599_v28  ;;  %v205_v37 = vmax.f32 %v140_v26, %v662_v24 }
   0x8   :  { %v788_v30 = vld [vmem:[%s1822_s0 + $0x700] sm:$0xff]  ;;  %v757_v36 = vld [vmem:[%s1822_s0 + $0x608] sm:$0xff]  ;;  %v726_v38 = vld [vmem:[%s1822_s0 + $0x510] sm:$0xff] }
   0x9   :  { %v268_v18 = vmax.f32 %v203_v11, %v692_v9  ;;  %v820_v31 = vld [vmem:[%s1822_s0 + $0x800] sm:$0xff]  ;;  %v269_v32 = vmax.f32 %v204_v22, %v693_v19  ;;  %v663_v39 = vld [vmem:[%s1822_s0 + $0x318] sm:$0xff]  ;;  %v141_v41 = vmax.f32 %v76_v34, %v631_v29  ;;  %v789_v46 = vld [vmem:[%s1822_s0 + $0x708] sm:$0xff]  ;;  %v270_v48 = vmax.f32 %v205_v37, %v694_v33 }
   0xa   :  { %v12_v42 = vld [vmem:[%s1822_s0 + $0x20] sm:$0xff]  ;;  %v821_v47 = vld [vmem:[%s1822_s0 + $0x808] sm:$0xff]  ;;  %v695_v49 = vld [vmem:[%s1822_s0 + $0x418] sm:$0xff] }
   0xb   :  { %v333_v25 = vmax.f32 %v268_v18, %v724_v12  ;;  %v334_v40 = vmax.f32 %v269_v32, %v725_v23  ;;  %v600_v43 = vld [vmem:[%s1822_s0 + $0x120] sm:$0xff]  ;;  %v758_v52 = vld [vmem:[%s1822_s0 + $0x610] sm:$0xff]  ;;  %v206_v53 = vmax.f32 %v141_v41, %v663_v39  ;;  %v727_v54 = vld [vmem:[%s1822_s0 + $0x518] sm:$0xff]  ;;  %v335_v57 = vmax.f32 %v270_v48, %v726_v38 }
   0xc   :  { %v632_v44 = vld [vmem:[%s1822_s0 + $0x220] sm:$0xff]  ;;  %v77_v50 = vmax.f32 %v12_v42, %v600_v43  ;;  %v13_v59 = vld [vmem:[%s1822_s0 + $0x28] sm:$0xff]  ;;  %v790_v63 = vld [vmem:[%s1822_s0 + $0x710] sm:$0xff] }
   0xd   :  { %v398_v35 = vmax.f32 %v333_v25, %v756_v21  ;;  %v399_v51 = vmax.f32 %v334_v40, %v757_v36  ;;  %v664_v55 = vld [vmem:[%s1822_s0 + $0x320] sm:$0xff]  ;;  %v601_v60 = vld [vmem:[%s1822_s0 + $0x128] sm:$0xff]  ;;  %v822_v0 = vld [vmem:[%s1822_s0 + $0x810] sm:$0xff]  ;;  %v271_v1 = vmax.f32 %v206_v53, %v695_v49  ;;  %v400_v4 = vmax.f32 %v335_v57, %v758_v52 }
   0xe   :  { %v142_v58 = vmax.f32 %v77_v50, %v632_v44  ;;  %v633_v61 = vld [vmem:[%s1822_s0 + $0x228] sm:$0xff]  ;;  %v696_v2 = vld [vmem:[%s1822_s0 + $0x420] sm:$0xff]  ;;  %v78_v3 = vmax.f32 %v13_v59, %v601_v60  ;;  %v759_v5 = vld [vmem:[%s1822_s0 + $0x618] sm:$0xff] }
   0xf   :  { %v463_v45 = vmax.f32 %v398_v35, %v788_v30  ;;  %v464_v62 = vmax.f32 %v399_v51, %v789_v46  ;;  %v728_v7 = vld [vmem:[%s1822_s0 + $0x520] sm:$0xff]  ;;  %v665_v8 = vld [vmem:[%s1822_s0 + $0x328] sm:$0xff]  ;;  %v336_v10 = vmax.f32 %v271_v1, %v727_v54  ;;  %v14_v12 = vld [vmem:[%s1822_s0 + $0x30] sm:$0xff]  ;;  %v465_v15 = vmax.f32 %v400_v4, %v790_v63 }
  0x10   :  { %v207_v6 = vmax.f32 %v142_v58, %v664_v55  ;;  %v143_v11 = vmax.f32 %v78_v3, %v633_v61  ;;  %v602_v13 = vld [vmem:[%s1822_s0 + $0x130] sm:$0xff]  ;;  %v791_v16 = vld [vmem:[%s1822_s0 + $0x718] sm:$0xff]  ;;  %v697_v19 = vld [vmem:[%s1822_s0 + $0x428] sm:$0xff] }
  0x11   :  { %v528_v56 = vmax.f32 %v463_v45, %v820_v31  ;;  %v529_v9 = vmax.f32 %v464_v62, %v821_v47  ;;  %v634_v14 = vld [vmem:[%s1822_s0 + $0x230] sm:$0xff]  ;;  %v823_v17 = vld [vmem:[%s1822_s0 + $0x818] sm:$0xff]  ;;  %v79_v20 = vmax.f32 %v14_v12, %v602_v13  ;;  %v401_v21 = vmax.f32 %v336_v10, %v759_v5  ;;  %v760_v22 = vld [vmem:[%s1822_s0 + $0x620] sm:$0xff] }
  0x12   :  { %v272_v18 = vmax.f32 %v207_v6, %v696_v2  ;;  %v208_v23 = vmax.f32 %v143_v11, %v665_v8  ;;  %v729_v24 = vld [vmem:[%s1822_s0 + $0x528] sm:$0xff]  ;;  %v666_v25 = vld [vmem:[%s1822_s0 + $0x330] sm:$0xff]  ;;  %v530_v26 = vmax.f32 %v465_v15, %v822_v0  ;;  %v15_v29 = vld [vmem:[%s1822_s0 + $0x38] sm:$0xff] }
  0x13   :  { %560 = vst [vmem:[%s1823_s1] sm:$0xff] %v528_v56  ;;  %561 = vst [vmem:[%s1823_s1 + $0x8] sm:$0xff] %v529_v9  ;;  %v144_v28 = vmax.f32 %v79_v20, %v634_v14  ;;  %v603_v30 = vld [vmem:[%s1822_s0 + $0x138] sm:$0xff]  ;;  %v466_v32 = vmax.f32 %v401_v21, %v791_v16  ;;  %v792_v33 = vld [vmem:[%s1822_s0 + $0x720] sm:$0xff] }
  0x14   :  { %v337_v27 = vmax.f32 %v272_v18, %v728_v7  ;;  %v635_v31 = vld [vmem:[%s1822_s0 + $0x238] sm:$0xff]  ;;  %v824_v34 = vld [vmem:[%s1822_s0 + $0x820] sm:$0xff]  ;;  %v273_v35 = vmax.f32 %v208_v23, %v697_v19  ;;  %v698_v36 = vld [vmem:[%s1822_s0 + $0x430] sm:$0xff]  ;;  %v80_v37 = vmax.f32 %v15_v29, %v603_v30  ;;  %562 = vst [vmem:[%s1823_s1 + $0x10] sm:$0xff] %v530_v26 }
  0x15   :  { %v761_v39 = vld [vmem:[%s1822_s0 + $0x628] sm:$0xff]  ;;  %v209_v40 = vmax.f32 %v144_v28, %v666_v25  ;;  %v730_v41 = vld [vmem:[%s1822_s0 + $0x530] sm:$0xff]  ;;  %v667_v42 = vld [vmem:[%s1822_s0 + $0x338] sm:$0xff]  ;;  %v531_v43 = vmax.f32 %v466_v32, %v823_v17 }
  0x16   :  { %v402_v38 = vmax.f32 %v337_v27, %v760_v22  ;;  %v338_v44 = vmax.f32 %v273_v35, %v729_v24  ;;  %v145_v45 = vmax.f32 %v80_v37, %v635_v31  ;;  %v16_v46 = vld [vmem:[%s1822_s0 + $0x40] sm:$0xff]  ;;  %v793_v50 = vld [vmem:[%s1822_s0 + $0x728] sm:$0xff]  ;;  %v699_v53 = vld [vmem:[%s1822_s0 + $0x438] sm:$0xff] }
  0x17   :  { %v604_v47 = vld [vmem:[%s1822_s0 + $0x140] sm:$0xff]  ;;  %v825_v51 = vld [vmem:[%s1822_s0 + $0x828] sm:$0xff]  ;;  %v274_v52 = vmax.f32 %v209_v40, %v698_v36  ;;  %563 = vst [vmem:[%s1823_s1 + $0x18] sm:$0xff] %v531_v43  ;;  %v762_v56 = vld [vmem:[%s1822_s0 + $0x630] sm:$0xff] }
  0x18   :  { %v636_v48 = vld [vmem:[%s1822_s0 + $0x240] sm:$0xff]  ;;  %v467_v49 = vmax.f32 %v402_v38, %v792_v33  ;;  %v81_v54 = vmax.f32 %v16_v46, %v604_v47  ;;  %v403_v55 = vmax.f32 %v338_v44, %v761_v39  ;;  %v210_v57 = vmax.f32 %v145_v45, %v667_v42  ;;  %v731_v58 = vld [vmem:[%s1822_s0 + $0x538] sm:$0xff]  ;;  %v17_v63 = vld [vmem:[%s1822_s0 + $0x48] sm:$0xff] }
  0x19   :  { %v668_v59 = vld [vmem:[%s1822_s0 + $0x340] sm:$0xff]  ;;  %v339_v61 = vmax.f32 %v274_v52, %v730_v41  ;;  %v605_v0 = vld [vmem:[%s1822_s0 + $0x148] sm:$0xff]  ;;  %v794_v3 = vld [vmem:[%s1822_s0 + $0x730] sm:$0xff] }
  0x1a   :  { %v532_v60 = vmax.f32 %v467_v49, %v824_v34  ;;  %v146_v62 = vmax.f32 %v81_v54, %v636_v48  ;;  %v637_v1 = vld [vmem:[%s1822_s0 + $0x248] sm:$0xff]  ;;  %v468_v2 = vmax.f32 %v403_v55, %v793_v50  ;;  %v826_v4 = vld [vmem:[%s1822_s0 + $0x830] sm:$0xff]  ;;  %v275_v5 = vmax.f32 %v210_v57, %v699_v53  ;;  %v700_v6 = vld [vmem:[%s1822_s0 + $0x440] sm:$0xff] }
  0x1b   :  { %v82_v7 = vmax.f32 %v17_v63, %v605_v0  ;;  %v404_v8 = vmax.f32 %v339_v61, %v762_v56  ;;  %v763_v9 = vld [vmem:[%s1822_s0 + $0x638] sm:$0xff]  ;;  %v732_v11 = vld [vmem:[%s1822_s0 + $0x540] sm:$0xff]  ;;  %v669_v12 = vld [vmem:[%s1822_s0 + $0x348] sm:$0xff] }
  0x1c   :  { %564 = vst [vmem:[%s1823_s1 + $0x20] sm:$0xff] %v532_v60  ;;  %v211_v10 = vmax.f32 %v146_v62, %v668_v59  ;;  %v533_v13 = vmax.f32 %v468_v2, %v825_v51  ;;  %v340_v14 = vmax.f32 %v275_v5, %v731_v58  ;;  %v18_v16 = vld [vmem:[%s1822_s0 + $0x50] sm:$0xff]  ;;  %v795_v20 = vld [vmem:[%s1822_s0 + $0x738] sm:$0xff]  ;;  %v701_v23 = vld [vmem:[%s1822_s0 + $0x448] sm:$0xff] }
  0x1d   :  { %v147_v15 = vmax.f32 %v82_v7, %v637_v1  ;;  %v606_v17 = vld [vmem:[%s1822_s0 + $0x150] sm:$0xff]  ;;  %v469_v19 = vmax.f32 %v404_v8, %v794_v3  ;;  %v827_v21 = vld [vmem:[%s1822_s0 + $0x838] sm:$0xff]  ;;  %v764_v26 = vld [vmem:[%s1822_s0 + $0x640] sm:$0xff] }
  0x1e   :  { %v638_v18 = vld [vmem:[%s1822_s0 + $0x250] sm:$0xff]  ;;  %v276_v22 = vmax.f32 %v211_v10, %v700_v6  ;;  %v83_v24 = vmax.f32 %v18_v16, %v606_v17  ;;  %565 = vst [vmem:[%s1823_s1 + $0x28] sm:$0xff] %v533_v13  ;;  %v405_v25 = vmax.f32 %v340_v14, %v763_v9  ;;  %v733_v28 = vld [vmem:[%s1822_s0 + $0x548] sm:$0xff]  ;;  %v19_v33 = vld [vmem:[%s1822_s0 + $0x58] sm:$0xff] }
  0x1f   :  { %v212_v27 = vmax.f32 %v147_v15, %v669_v12  ;;  %v670_v29 = vld [vmem:[%s1822_s0 + $0x350] sm:$0xff]  ;;  %v534_v30 = vmax.f32 %v469_v19, %v826_v4  ;;  %v607_v34 = vld [vmem:[%s1822_s0 + $0x158] sm:$0xff]  ;;  %v796_v37 = vld [vmem:[%s1822_s0 + $0x740] sm:$0xff] }
  0x20   :  { %v341_v31 = vmax.f32 %v276_v22, %v732_v11  ;;  %v148_v32 = vmax.f32 %v83_v24, %v638_v18  ;;  %v639_v35 = vld [vmem:[%s1822_s0 + $0x258] sm:$0xff]  ;;  %v470_v36 = vmax.f32 %v405_v25, %v795_v20  ;;  %v828_v38 = vld [vmem:[%s1822_s0 + $0x840] sm:$0xff]  ;;  %v702_v40 = vld [vmem:[%s1822_s0 + $0x450] sm:$0xff]  ;;  %v84_v41 = vmax.f32 %v19_v33, %v607_v34 }
  0x21   :  { %v277_v39 = vmax.f32 %v212_v27, %v701_v23  ;;  %566 = vst [vmem:[%s1823_s1 + $0x30] sm:$0xff] %v534_v30  ;;  %v765_v43 = vld [vmem:[%s1822_s0 + $0x648] sm:$0xff]  ;;  %v734_v45 = vld [vmem:[%s1822_s0 + $0x550] sm:$0xff]  ;;  %v671_v46 = vld [vmem:[%s1822_s0 + $0x358] sm:$0xff] }
  0x22   :  { %v406_v42 = vmax.f32 %v341_v31, %v764_v26  ;;  %v213_v44 = vmax.f32 %v148_v32, %v670_v29  ;;  %v535_v47 = vmax.f32 %v470_v36, %v827_v21  ;;  %v149_v49 = vmax.f32 %v84_v41, %v639_v35  ;;  %v20_v50 = vld [vmem:[%s1822_s0 + $0x60] sm:$0xff]  ;;  %v797_v54 = vld [vmem:[%s1822_s0 + $0x748] sm:$0xff]  ;;  %v703_v57 = vld [vmem:[%s1822_s0 + $0x458] sm:$0xff] }
  0x23   :  { %v342_v48 = vmax.f32 %v277_v39, %v733_v28  ;;  %v608_v51 = vld [vmem:[%s1822_s0 + $0x160] sm:$0xff]  ;;  %v829_v55 = vld [vmem:[%s1822_s0 + $0x848] sm:$0xff]  ;;  %v766_v60 = vld [vmem:[%s1822_s0 + $0x650] sm:$0xff] }
  0x24   :  { %v640_v52 = vld [vmem:[%s1822_s0 + $0x260] sm:$0xff]  ;;  %v471_v53 = vmax.f32 %v406_v42, %v796_v37  ;;  %v278_v56 = vmax.f32 %v213_v44, %v702_v40  ;;  %v85_v58 = vmax.f32 %v20_v50, %v608_v51  ;;  %567 = vst [vmem:[%s1823_s1 + $0x38] sm:$0xff] %v535_v47  ;;  %v214_v61 = vmax.f32 %v149_v49, %v671_v46  ;;  %v735_v62 = vld [vmem:[%s1822_s0 + $0x558] sm:$0xff]  ;;  %v21_v3 = vld [vmem:[%s1822_s0 + $0x68] sm:$0xff] }
  0x25   :  { %v407_v59 = vmax.f32 %v342_v48, %v765_v43  ;;  %v672_v63 = vld [vmem:[%s1822_s0 + $0x360] sm:$0xff]  ;;  %v609_v4 = vld [vmem:[%s1822_s0 + $0x168] sm:$0xff]  ;;  %v798_v7 = vld [vmem:[%s1822_s0 + $0x750] sm:$0xff] }
  0x26   :  { %v536_v0 = vmax.f32 %v471_v53, %v828_v38  ;;  %v343_v1 = vmax.f32 %v278_v56, %v734_v45  ;;  %v150_v2 = vmax.f32 %v85_v58, %v640_v52  ;;  %v641_v5 = vld [vmem:[%s1822_s0 + $0x268] sm:$0xff]  ;;  %v830_v8 = vld [vmem:[%s1822_s0 + $0x850] sm:$0xff]  ;;  %v279_v9 = vmax.f32 %v214_v61, %v703_v57  ;;  %v704_v10 = vld [vmem:[%s1822_s0 + $0x460] sm:$0xff] }
  0x27   :  { %v472_v6 = vmax.f32 %v407_v59, %v797_v54  ;;  %v86_v11 = vmax.f32 %v21_v3, %v609_v4  ;;  %v767_v13 = vld [vmem:[%s1822_s0 + $0x658] sm:$0xff]  ;;  %v736_v15 = vld [vmem:[%s1822_s0 + $0x560] sm:$0xff]  ;;  %v673_v16 = vld [vmem:[%s1822_s0 + $0x368] sm:$0xff] }
  0x28   :  { %568 = vst [vmem:[%s1823_s1 + $0x40] sm:$0xff] %v536_v0  ;;  %v408_v12 = vmax.f32 %v343_v1, %v766_v60  ;;  %v215_v14 = vmax.f32 %v150_v2, %v672_v63  ;;  %v344_v18 = vmax.f32 %v279_v9, %v735_v62  ;;  %v22_v20 = vld [vmem:[%s1822_s0 + $0x70] sm:$0xff]  ;;  %v799_v24 = vld [vmem:[%s1822_s0 + $0x758] sm:$0xff]  ;;  %v705_v27 = vld [vmem:[%s1822_s0 + $0x468] sm:$0xff] }
  0x29   :  { %v537_v17 = vmax.f32 %v472_v6, %v829_v55  ;;  %v151_v19 = vmax.f32 %v86_v11, %v641_v5  ;;  %v610_v21 = vld [vmem:[%s1822_s0 + $0x170] sm:$0xff]  ;;  %v831_v25 = vld [vmem:[%s1822_s0 + $0x858] sm:$0xff]  ;;  %v768_v30 = vld [vmem:[%s1822_s0 + $0x660] sm:$0xff] }
  0x2a   :  { %v642_v22 = vld [vmem:[%s1822_s0 + $0x270] sm:$0xff]  ;;  %v473_v23 = vmax.f32 %v408_v12, %v798_v7  ;;  %v280_v26 = vmax.f32 %v215_v14, %v704_v10  ;;  %v87_v28 = vmax.f32 %v22_v20, %v610_v21  ;;  %v409_v29 = vmax.f32 %v344_v18, %v767_v13  ;;  %v737_v32 = vld [vmem:[%s1822_s0 + $0x568] sm:$0xff]  ;;  %v23_v37 = vld [vmem:[%s1822_s0 + $0x78] sm:$0xff] }
  0x2b   :  { %569 = vst [vmem:[%s1823_s1 + $0x48] sm:$0xff] %v537_v17  ;;  %v216_v31 = vmax.f32 %v151_v19, %v673_v16  ;;  %v674_v33 = vld [vmem:[%s1822_s0 + $0x370] sm:$0xff]  ;;  %v611_v38 = vld [vmem:[%s1822_s0 + $0x178] sm:$0xff]  ;;  %v800_v41 = vld [vmem:[%s1822_s0 + $0x760] sm:$0xff] }
  0x2c   :  { %v538_v34 = vmax.f32 %v473_v23, %v830_v8  ;;  %v345_v35 = vmax.f32 %v280_v26, %v736_v15  ;;  %v152_v36 = vmax.f32 %v87_v28, %v642_v22  ;;  %v643_v39 = vld [vmem:[%s1822_s0 + $0x278] sm:$0xff]  ;;  %v474_v40 = vmax.f32 %v409_v29, %v799_v24  ;;  %v832_v42 = vld [vmem:[%s1822_s0 + $0x860] sm:$0xff]  ;;  %v706_v44 = vld [vmem:[%s1822_s0 + $0x470] sm:$0xff] }
  0x2d   :  { %v281_v43 = vmax.f32 %v216_v31, %v705_v27  ;;  %v88_v45 = vmax.f32 %v23_v37, %v611_v38  ;;  %v769_v47 = vld [vmem:[%s1822_s0 + $0x668] sm:$0xff]  ;;  %v738_v49 = vld [vmem:[%s1822_s0 + $0x570] sm:$0xff]  ;;  %v675_v50 = vld [vmem:[%s1822_s0 + $0x378] sm:$0xff] }
  0x2e   :  { %570 = vst [vmem:[%s1823_s1 + $0x50] sm:$0xff] %v538_v34  ;;  %v410_v46 = vmax.f32 %v345_v35, %v768_v30  ;;  %v217_v48 = vmax.f32 %v152_v36, %v674_v33  ;;  %v539_v51 = vmax.f32 %v474_v40, %v831_v25  ;;  %v24_v54 = vld [vmem:[%s1822_s0 + $0x80] sm:$0xff]  ;;  %v801_v58 = vld [vmem:[%s1822_s0 + $0x768] sm:$0xff]  ;;  %v707_v61 = vld [vmem:[%s1822_s0 + $0x478] sm:$0xff] }
  0x2f   :  { %v346_v52 = vmax.f32 %v281_v43, %v737_v32  ;;  %v153_v53 = vmax.f32 %v88_v45, %v643_v39  ;;  %v612_v55 = vld [vmem:[%s1822_s0 + $0x180] sm:$0xff]  ;;  %v833_v59 = vld [vmem:[%s1822_s0 + $0x868] sm:$0xff]  ;;  %v770_v0 = vld [vmem:[%s1822_s0 + $0x670] sm:$0xff] }
  0x30   :  { %v644_v56 = vld [vmem:[%s1822_s0 + $0x280] sm:$0xff]  ;;  %v475_v57 = vmax.f32 %v410_v46, %v800_v41  ;;  %v282_v60 = vmax.f32 %v217_v48, %v706_v44  ;;  %v89_v62 = vmax.f32 %v24_v54, %v612_v55  ;;  %571 = vst [vmem:[%s1823_s1 + $0x58] sm:$0xff] %v539_v51  ;;  %v739_v2 = vld [vmem:[%s1822_s0 + $0x578] sm:$0xff]  ;;  %v25_v7 = vld [vmem:[%s1822_s0 + $0x88] sm:$0xff] }
  0x31   :  { %v411_v63 = vmax.f32 %v346_v52, %v769_v47  ;;  %v218_v1 = vmax.f32 %v153_v53, %v675_v50  ;;  %v676_v3 = vld [vmem:[%s1822_s0 + $0x380] sm:$0xff]  ;;  %v613_v8 = vld [vmem:[%s1822_s0 + $0x188] sm:$0xff]  ;;  %v802_v11 = vld [vmem:[%s1822_s0 + $0x770] sm:$0xff] }
  0x32   :  { %v540_v4 = vmax.f32 %v475_v57, %v832_v42  ;;  %v347_v5 = vmax.f32 %v282_v60, %v738_v49  ;;  %v154_v6 = vmax.f32 %v89_v62, %v644_v56  ;;  %v645_v9 = vld [vmem:[%s1822_s0 + $0x288] sm:$0xff]  ;;  %v834_v12 = vld [vmem:[%s1822_s0 + $0x870] sm:$0xff]  ;;  %v708_v14 = vld [vmem:[%s1822_s0 + $0x480] sm:$0xff]  ;;  %v90_v15 = vmax.f32 %v25_v7, %v613_v8 }
  0x33   :  { %v476_v10 = vmax.f32 %v411_v63, %v801_v58  ;;  %v283_v13 = vmax.f32 %v218_v1, %v707_v61  ;;  %v771_v17 = vld [vmem:[%s1822_s0 + $0x678] sm:$0xff]  ;;  %v740_v19 = vld [vmem:[%s1822_s0 + $0x580] sm:$0xff]  ;;  %v677_v20 = vld [vmem:[%s1822_s0 + $0x388] sm:$0xff] }
  0x34   :  { %572 = vst [vmem:[%s1823_s1 + $0x60] sm:$0xff] %v540_v4  ;;  %v412_v16 = vmax.f32 %v347_v5, %v770_v0  ;;  %v219_v18 = vmax.f32 %v154_v6, %v676_v3  ;;  %v155_v23 = vmax.f32 %v90_v15, %v645_v9  ;;  %v26_v24 = vld [vmem:[%s1822_s0 + $0x90] sm:$0xff]  ;;  %v803_v28 = vld [vmem:[%s1822_s0 + $0x778] sm:$0xff]  ;;  %v709_v31 = vld [vmem:[%s1822_s0 + $0x488] sm:$0xff] }
  0x35   :  { %v541_v21 = vmax.f32 %v476_v10, %v833_v59  ;;  %v348_v22 = vmax.f32 %v283_v13, %v739_v2  ;;  %v614_v25 = vld [vmem:[%s1822_s0 + $0x190] sm:$0xff]  ;;  %v835_v29 = vld [vmem:[%s1822_s0 + $0x878] sm:$0xff]  ;;  %v772_v34 = vld [vmem:[%s1822_s0 + $0x680] sm:$0xff] }
  0x36   :  { %v646_v26 = vld [vmem:[%s1822_s0 + $0x290] sm:$0xff]  ;;  %v477_v27 = vmax.f32 %v412_v16, %v802_v11  ;;  %v284_v30 = vmax.f32 %v219_v18, %v708_v14  ;;  %v91_v32 = vmax.f32 %v26_v24, %v614_v25  ;;  %v220_v35 = vmax.f32 %v155_v23, %v677_v20  ;;  %v741_v36 = vld [vmem:[%s1822_s0 + $0x588] sm:$0xff]  ;;  %v27_v41 = vld [vmem:[%s1822_s0 + $0x98] sm:$0xff] }
  0x37   :  { %573 = vst [vmem:[%s1823_s1 + $0x68] sm:$0xff] %v541_v21  ;;  %v413_v33 = vmax.f32 %v348_v22, %v771_v17  ;;  %v678_v37 = vld [vmem:[%s1822_s0 + $0x390] sm:$0xff]  ;;  %v615_v42 = vld [vmem:[%s1822_s0 + $0x198] sm:$0xff]  ;;  %v804_v45 = vld [vmem:[%s1822_s0 + $0x780] sm:$0xff] }
  0x38   :  { %v542_v38 = vmax.f32 %v477_v27, %v834_v12  ;;  %v349_v39 = vmax.f32 %v284_v30, %v740_v19  ;;  %v156_v40 = vmax.f32 %v91_v32, %v646_v26  ;;  %v647_v43 = vld [vmem:[%s1822_s0 + $0x298] sm:$0xff]  ;;  %v836_v46 = vld [vmem:[%s1822_s0 + $0x880] sm:$0xff]  ;;  %v285_v47 = vmax.f32 %v220_v35, %v709_v31  ;;  %v710_v48 = vld [vmem:[%s1822_s0 + $0x490] sm:$0xff] }
  0x39   :  { %v478_v44 = vmax.f32 %v413_v33, %v803_v28  ;;  %v92_v49 = vmax.f32 %v27_v41, %v615_v42  ;;  %v773_v51 = vld [vmem:[%s1822_s0 + $0x688] sm:$0xff]  ;;  %v742_v53 = vld [vmem:[%s1822_s0 + $0x590] sm:$0xff]  ;;  %v679_v54 = vld [vmem:[%s1822_s0 + $0x398] sm:$0xff] }
  0x3a   :  { %574 = vst [vmem:[%s1823_s1 + $0x70] sm:$0xff] %v542_v38  ;;  %v414_v50 = vmax.f32 %v349_v39, %v772_v34  ;;  %v221_v52 = vmax.f32 %v156_v40, %v678_v37  ;;  %v350_v56 = vmax.f32 %v285_v47, %v741_v36  ;;  %v28_v58 = vld [vmem:[%s1822_s0 + $0xa0] sm:$0xff]  ;;  %v805_v62 = vld [vmem:[%s1822_s0 + $0x788] sm:$0xff]  ;;  %v711_v1 = vld [vmem:[%s1822_s0 + $0x498] sm:$0xff] }
  0x3b   :  { %v543_v55 = vmax.f32 %v478_v44, %v835_v29  ;;  %v157_v57 = vmax.f32 %v92_v49, %v647_v43  ;;  %v616_v59 = vld [vmem:[%s1822_s0 + $0x1a0] sm:$0xff]  ;;  %v837_v63 = vld [vmem:[%s1822_s0 + $0x888] sm:$0xff]  ;;  %v774_v4 = vld [vmem:[%s1822_s0 + $0x690] sm:$0xff] }
  0x3c   :  { %v648_v60 = vld [vmem:[%s1822_s0 + $0x2a0] sm:$0xff]  ;;  %v479_v61 = vmax.f32 %v414_v50, %v804_v45  ;;  %v286_v0 = vmax.f32 %v221_v52, %v710_v48  ;;  %v93_v2 = vmax.f32 %v28_v58, %v616_v59  ;;  %v415_v3 = vmax.f32 %v350_v56, %v773_v51  ;;  %v743_v6 = vld [vmem:[%s1822_s0 + $0x598] sm:$0xff]  ;;  %v29_v11 = vld [vmem:[%s1822_s0 + $0xa8] sm:$0xff] }
  0x3d   :  { %575 = vst [vmem:[%s1823_s1 + $0x78] sm:$0xff] %v543_v55  ;;  %v222_v5 = vmax.f32 %v157_v57, %v679_v54  ;;  %v680_v7 = vld [vmem:[%s1822_s0 + $0x3a0] sm:$0xff]  ;;  %v617_v12 = vld [vmem:[%s1822_s0 + $0x1a8] sm:$0xff]  ;;  %v806_v15 = vld [vmem:[%s1822_s0 + $0x790] sm:$0xff] }
  0x3e   :  { %v544_v8 = vmax.f32 %v479_v61, %v836_v46  ;;  %v351_v9 = vmax.f32 %v286_v0, %v742_v53  ;;  %v158_v10 = vmax.f32 %v93_v2, %v648_v60  ;;  %v649_v13 = vld [vmem:[%s1822_s0 + $0x2a8] sm:$0xff]  ;;  %v480_v14 = vmax.f32 %v415_v3, %v805_v62  ;;  %v838_v16 = vld [vmem:[%s1822_s0 + $0x890] sm:$0xff]  ;;  %v712_v18 = vld [vmem:[%s1822_s0 + $0x4a0] sm:$0xff] }
  0x3f   :  { %v287_v17 = vmax.f32 %v222_v5, %v711_v1  ;;  %v94_v19 = vmax.f32 %v29_v11, %v617_v12  ;;  %v775_v21 = vld [vmem:[%s1822_s0 + $0x698] sm:$0xff]  ;;  %v744_v23 = vld [vmem:[%s1822_s0 + $0x5a0] sm:$0xff]  ;;  %v681_v24 = vld [vmem:[%s1822_s0 + $0x3a8] sm:$0xff] }
  0x40   :  { %576 = vst [vmem:[%s1823_s1 + $0x80] sm:$0xff] %v544_v8  ;;  %v416_v20 = vmax.f32 %v351_v9, %v774_v4  ;;  %v223_v22 = vmax.f32 %v158_v10, %v680_v7  ;;  %v545_v25 = vmax.f32 %v480_v14, %v837_v63  ;;  %v30_v28 = vld [vmem:[%s1822_s0 + $0xb0] sm:$0xff]  ;;  %v807_v32 = vld [vmem:[%s1822_s0 + $0x798] sm:$0xff]  ;;  %v713_v35 = vld [vmem:[%s1822_s0 + $0x4a8] sm:$0xff] }
  0x41   :  { %v352_v26 = vmax.f32 %v287_v17, %v743_v6  ;;  %v159_v27 = vmax.f32 %v94_v19, %v649_v13  ;;  %v618_v29 = vld [vmem:[%s1822_s0 + $0x1b0] sm:$0xff]  ;;  %v839_v33 = vld [vmem:[%s1822_s0 + $0x898] sm:$0xff]  ;;  %v776_v38 = vld [vmem:[%s1822_s0 + $0x6a0] sm:$0xff] }
  0x42   :  { %v650_v30 = vld [vmem:[%s1822_s0 + $0x2b0] sm:$0xff]  ;;  %v481_v31 = vmax.f32 %v416_v20, %v806_v15  ;;  %v288_v34 = vmax.f32 %v223_v22, %v712_v18  ;;  %v95_v36 = vmax.f32 %v30_v28, %v618_v29  ;;  %577 = vst [vmem:[%s1823_s1 + $0x88] sm:$0xff] %v545_v25  ;;  %v745_v40 = vld [vmem:[%s1822_s0 + $0x5a8] sm:$0xff]  ;;  %v31_v45 = vld [vmem:[%s1822_s0 + $0xb8] sm:$0xff] }
  0x43   :  { %v417_v37 = vmax.f32 %v352_v26, %v775_v21  ;;  %v224_v39 = vmax.f32 %v159_v27, %v681_v24  ;;  %v682_v41 = vld [vmem:[%s1822_s0 + $0x3b0] sm:$0xff]  ;;  %v619_v46 = vld [vmem:[%s1822_s0 + $0x1b8] sm:$0xff]  ;;  %v808_v49 = vld [vmem:[%s1822_s0 + $0x7a0] sm:$0xff] }
  0x44   :  { %v546_v42 = vmax.f32 %v481_v31, %v838_v16  ;;  %v353_v43 = vmax.f32 %v288_v34, %v744_v23  ;;  %v160_v44 = vmax.f32 %v95_v36, %v650_v30  ;;  %v651_v47 = vld [vmem:[%s1822_s0 + $0x2b8] sm:$0xff]  ;;  %v840_v50 = vld [vmem:[%s1822_s0 + $0x8a0] sm:$0xff]  ;;  %v714_v52 = vld [vmem:[%s1822_s0 + $0x4b0] sm:$0xff]  ;;  %v96_v53 = vmax.f32 %v31_v45, %v619_v46 }
  0x45   :  { %v482_v48 = vmax.f32 %v417_v37, %v807_v32  ;;  %v289_v51 = vmax.f32 %v224_v39, %v713_v35  ;;  %v777_v55 = vld [vmem:[%s1822_s0 + $0x6a8] sm:$0xff]  ;;  %v746_v57 = vld [vmem:[%s1822_s0 + $0x5b0] sm:$0xff]  ;;  %v683_v58 = vld [vmem:[%s1822_s0 + $0x3b8] sm:$0xff] }
  0x46   :  { %578 = vst [vmem:[%s1823_s1 + $0x90] sm:$0xff] %v546_v42  ;;  %v418_v54 = vmax.f32 %v353_v43, %v776_v38  ;;  %v225_v56 = vmax.f32 %v160_v44, %v682_v41  ;;  %v161_v61 = vmax.f32 %v96_v53, %v651_v47  ;;  %v32_v62 = vld [vmem:[%s1822_s0 + $0xc0] sm:$0xff]  ;;  %v809_v2 = vld [vmem:[%s1822_s0 + $0x7a8] sm:$0xff]  ;;  %v715_v5 = vld [vmem:[%s1822_s0 + $0x4b8] sm:$0xff] }
  0x47   :  { %v547_v59 = vmax.f32 %v482_v48, %v839_v33  ;;  %v354_v60 = vmax.f32 %v289_v51, %v745_v40  ;;  %v620_v63 = vld [vmem:[%s1822_s0 + $0x1c0] sm:$0xff]  ;;  %v841_v3 = vld [vmem:[%s1822_s0 + $0x8a8] sm:$0xff]  ;;  %v778_v8 = vld [vmem:[%s1822_s0 + $0x6b0] sm:$0xff] }
  0x48   :  { %v652_v0 = vld [vmem:[%s1822_s0 + $0x2c0] sm:$0xff]  ;;  %v483_v1 = vmax.f32 %v418_v54, %v808_v49  ;;  %v290_v4 = vmax.f32 %v225_v56, %v714_v52  ;;  %v97_v6 = vmax.f32 %v32_v62, %v620_v63  ;;  %v226_v9 = vmax.f32 %v161_v61, %v683_v58  ;;  %v747_v10 = vld [vmem:[%s1822_s0 + $0x5b8] sm:$0xff]  ;;  %v33_v15 = vld [vmem:[%s1822_s0 + $0xc8] sm:$0xff] }
  0x49   :  { %579 = vst [vmem:[%s1823_s1 + $0x98] sm:$0xff] %v547_v59  ;;  %v419_v7 = vmax.f32 %v354_v60, %v777_v55  ;;  %v684_v11 = vld [vmem:[%s1822_s0 + $0x3c0] sm:$0xff]  ;;  %v621_v16 = vld [vmem:[%s1822_s0 + $0x1c8] sm:$0xff]  ;;  %v810_v19 = vld [vmem:[%s1822_s0 + $0x7b0] sm:$0xff] }
  0x4a   :  { %v548_v12 = vmax.f32 %v483_v1, %v840_v50  ;;  %v355_v13 = vmax.f32 %v290_v4, %v746_v57  ;;  %v162_v14 = vmax.f32 %v97_v6, %v652_v0  ;;  %v653_v17 = vld [vmem:[%s1822_s0 + $0x2c8] sm:$0xff]  ;;  %v842_v20 = vld [vmem:[%s1822_s0 + $0x8b0] sm:$0xff]  ;;  %v291_v21 = vmax.f32 %v226_v9, %v715_v5  ;;  %v716_v22 = vld [vmem:[%s1822_s0 + $0x4c0] sm:$0xff] }
  0x4b   :  { %v484_v18 = vmax.f32 %v419_v7, %v809_v2  ;;  %v98_v23 = vmax.f32 %v33_v15, %v621_v16  ;;  %v779_v25 = vld [vmem:[%s1822_s0 + $0x6b8] sm:$0xff]  ;;  %v748_v27 = vld [vmem:[%s1822_s0 + $0x5c0] sm:$0xff]  ;;  %v685_v28 = vld [vmem:[%s1822_s0 + $0x3c8] sm:$0xff] }
  0x4c   :  { %580 = vst [vmem:[%s1823_s1 + $0xa0] sm:$0xff] %v548_v12  ;;  %v420_v24 = vmax.f32 %v355_v13, %v778_v8  ;;  %v227_v26 = vmax.f32 %v162_v14, %v684_v11  ;;  %v356_v30 = vmax.f32 %v291_v21, %v747_v10  ;;  %v34_v32 = vld [vmem:[%s1822_s0 + $0xd0] sm:$0xff]  ;;  %v811_v36 = vld [vmem:[%s1822_s0 + $0x7b8] sm:$0xff]  ;;  %v717_v39 = vld [vmem:[%s1822_s0 + $0x4c8] sm:$0xff] }
  0x4d   :  { %v549_v29 = vmax.f32 %v484_v18, %v841_v3  ;;  %v163_v31 = vmax.f32 %v98_v23, %v653_v17  ;;  %v622_v33 = vld [vmem:[%s1822_s0 + $0x1d0] sm:$0xff]  ;;  %v843_v37 = vld [vmem:[%s1822_s0 + $0x8b8] sm:$0xff]  ;;  %v780_v42 = vld [vmem:[%s1822_s0 + $0x6c0] sm:$0xff] }
  0x4e   :  { %v654_v34 = vld [vmem:[%s1822_s0 + $0x2d0] sm:$0xff]  ;;  %v485_v35 = vmax.f32 %v420_v24, %v810_v19  ;;  %v292_v38 = vmax.f32 %v227_v26, %v716_v22  ;;  %v99_v40 = vmax.f32 %v34_v32, %v622_v33  ;;  %v421_v41 = vmax.f32 %v356_v30, %v779_v25  ;;  %v749_v44 = vld [vmem:[%s1822_s0 + $0x5c8] sm:$0xff]  ;;  %v35_v49 = vld [vmem:[%s1822_s0 + $0xd8] sm:$0xff] }
  0x4f   :  { %581 = vst [vmem:[%s1823_s1 + $0xa8] sm:$0xff] %v549_v29  ;;  %v228_v43 = vmax.f32 %v163_v31, %v685_v28  ;;  %v686_v45 = vld [vmem:[%s1822_s0 + $0x3d0] sm:$0xff]  ;;  %v623_v50 = vld [vmem:[%s1822_s0 + $0x1d8] sm:$0xff]  ;;  %v812_v53 = vld [vmem:[%s1822_s0 + $0x7c0] sm:$0xff] }
  0x50   :  { %v550_v46 = vmax.f32 %v485_v35, %v842_v20  ;;  %v357_v47 = vmax.f32 %v292_v38, %v748_v27  ;;  %v164_v48 = vmax.f32 %v99_v40, %v654_v34  ;;  %v655_v51 = vld [vmem:[%s1822_s0 + $0x2d8] sm:$0xff]  ;;  %v486_v52 = vmax.f32 %v421_v41, %v811_v36  ;;  %v844_v54 = vld [vmem:[%s1822_s0 + $0x8c0] sm:$0xff]  ;;  %v718_v56 = vld [vmem:[%s1822_s0 + $0x4d0] sm:$0xff] }
  0x51   :  { %v293_v55 = vmax.f32 %v228_v43, %v717_v39  ;;  %v100_v57 = vmax.f32 %v35_v49, %v623_v50  ;;  %v781_v59 = vld [vmem:[%s1822_s0 + $0x6c8] sm:$0xff]  ;;  %v750_v61 = vld [vmem:[%s1822_s0 + $0x5d0] sm:$0xff]  ;;  %v687_v62 = vld [vmem:[%s1822_s0 + $0x3d8] sm:$0xff] }
  0x52   :  { %582 = vst [vmem:[%s1823_s1 + $0xb0] sm:$0xff] %v550_v46  ;;  %v422_v58 = vmax.f32 %v357_v47, %v780_v42  ;;  %v229_v60 = vmax.f32 %v164_v48, %v686_v45  ;;  %v551_v63 = vmax.f32 %v486_v52, %v843_v37  ;;  %v36_v2 = vld [vmem:[%s1822_s0 + $0xe0] sm:$0xff]  ;;  %v813_v6 = vld [vmem:[%s1822_s0 + $0x7c8] sm:$0xff]  ;;  %v719_v9 = vld [vmem:[%s1822_s0 + $0x4d8] sm:$0xff] }
  0x53   :  { %v358_v0 = vmax.f32 %v293_v55, %v749_v44  ;;  %v165_v1 = vmax.f32 %v100_v57, %v655_v51  ;;  %v624_v3 = vld [vmem:[%s1822_s0 + $0x1e0] sm:$0xff]  ;;  %v845_v7 = vld [vmem:[%s1822_s0 + $0x8c8] sm:$0xff]  ;;  %v782_v12 = vld [vmem:[%s1822_s0 + $0x6d0] sm:$0xff] }
  0x54   :  { %v656_v4 = vld [vmem:[%s1822_s0 + $0x2e0] sm:$0xff]  ;;  %v487_v5 = vmax.f32 %v422_v58, %v812_v53  ;;  %v294_v8 = vmax.f32 %v229_v60, %v718_v56  ;;  %v101_v10 = vmax.f32 %v36_v2, %v624_v3  ;;  %583 = vst [vmem:[%s1823_s1 + $0xb8] sm:$0xff] %v551_v63  ;;  %v751_v14 = vld [vmem:[%s1822_s0 + $0x5d8] sm:$0xff]  ;;  %v37_v19 = vld [vmem:[%s1822_s0 + $0xe8] sm:$0xff] }
  0x55   :  { %v423_v11 = vmax.f32 %v358_v0, %v781_v59  ;;  %v230_v13 = vmax.f32 %v165_v1, %v687_v62  ;;  %v688_v15 = vld [vmem:[%s1822_s0 + $0x3e0] sm:$0xff]  ;;  %v625_v20 = vld [vmem:[%s1822_s0 + $0x1e8] sm:$0xff]  ;;  %v814_v23 = vld [vmem:[%s1822_s0 + $0x7d0] sm:$0xff] }
  0x56   :  { %v552_v16 = vmax.f32 %v487_v5, %v844_v54  ;;  %v359_v17 = vmax.f32 %v294_v8, %v750_v61  ;;  %v166_v18 = vmax.f32 %v101_v10, %v656_v4  ;;  %v657_v21 = vld [vmem:[%s1822_s0 + $0x2e8] sm:$0xff]  ;;  %v846_v24 = vld [vmem:[%s1822_s0 + $0x8d0] sm:$0xff]  ;;  %v720_v26 = vld [vmem:[%s1822_s0 + $0x4e0] sm:$0xff]  ;;  %v102_v27 = vmax.f32 %v37_v19, %v625_v20 }
  0x57   :  { %v488_v22 = vmax.f32 %v423_v11, %v813_v6  ;;  %v295_v25 = vmax.f32 %v230_v13, %v719_v9  ;;  %v783_v29 = vld [vmem:[%s1822_s0 + $0x6d8] sm:$0xff]  ;;  %v752_v31 = vld [vmem:[%s1822_s0 + $0x5e0] sm:$0xff]  ;;  %v689_v32 = vld [vmem:[%s1822_s0 + $0x3e8] sm:$0xff] }
  0x58   :  { %584 = vst [vmem:[%s1823_s1 + $0xc0] sm:$0xff] %v552_v16  ;;  %v424_v28 = vmax.f32 %v359_v17, %v782_v12  ;;  %v231_v30 = vmax.f32 %v166_v18, %v688_v15  ;;  %v167_v35 = vmax.f32 %v102_v27, %v657_v21  ;;  %v38_v36 = vld [vmem:[%s1822_s0 + $0xf0] sm:$0xff]  ;;  %v815_v40 = vld [vmem:[%s1822_s0 + $0x7d8] sm:$0xff]  ;;  %v721_v43 = vld [vmem:[%s1822_s0 + $0x4e8] sm:$0xff] }
  0x59   :  { %v553_v33 = vmax.f32 %v488_v22, %v845_v7  ;;  %v360_v34 = vmax.f32 %v295_v25, %v751_v14  ;;  %v626_v37 = vld [vmem:[%s1822_s0 + $0x1f0] sm:$0xff]  ;;  %v847_v41 = vld [vmem:[%s1822_s0 + $0x8d8] sm:$0xff]  ;;  %v784_v46 = vld [vmem:[%s1822_s0 + $0x6e0] sm:$0xff] }
  0x5a   :  { %v658_v38 = vld [vmem:[%s1822_s0 + $0x2f0] sm:$0xff]  ;;  %v489_v39 = vmax.f32 %v424_v28, %v814_v23  ;;  %v296_v42 = vmax.f32 %v231_v30, %v720_v26  ;;  %v103_v44 = vmax.f32 %v38_v36, %v626_v37  ;;  %v232_v47 = vmax.f32 %v167_v35, %v689_v32  ;;  %v753_v48 = vld [vmem:[%s1822_s0 + $0x5e8] sm:$0xff]  ;;  %v39_v53 = vld [vmem:[%s1822_s0 + $0xf8] sm:$0xff] }
  0x5b   :  { %585 = vst [vmem:[%s1823_s1 + $0xc8] sm:$0xff] %v553_v33  ;;  %v425_v45 = vmax.f32 %v360_v34, %v783_v29  ;;  %v690_v49 = vld [vmem:[%s1822_s0 + $0x3f0] sm:$0xff]  ;;  %v627_v54 = vld [vmem:[%s1822_s0 + $0x1f8] sm:$0xff]  ;;  %v816_v57 = vld [vmem:[%s1822_s0 + $0x7e0] sm:$0xff] }
  0x5c   :  { %v554_v50 = vmax.f32 %v489_v39, %v846_v24  ;;  %v361_v51 = vmax.f32 %v296_v42, %v752_v31  ;;  %v168_v52 = vmax.f32 %v103_v44, %v658_v38  ;;  %v659_v55 = vld [vmem:[%s1822_s0 + $0x2f8] sm:$0xff]  ;;  %v297_v58 = vmax.f32 %v232_v47, %v721_v43  ;;  %v722_v59 = vld [vmem:[%s1822_s0 + $0x4f0] sm:$0xff]  ;;  %v785_v62 = vld [vmem:[%s1822_s0 + $0x6e8] sm:$0xff] }
  0x5d   :  { %v490_v56 = vmax.f32 %v425_v45, %v815_v40  ;;  %v104_v60 = vmax.f32 %v39_v53, %v627_v54  ;;  %v691_v0 = vld [vmem:[%s1822_s0 + $0x3f8] sm:$0xff]  ;;  %v848_v2 = vld [vmem:[%s1822_s0 + $0x8e0] sm:$0xff]  ;;  %v754_v4 = vld [vmem:[%s1822_s0 + $0x5f0] sm:$0xff] }
  0x5e   :  { %586 = vst [vmem:[%s1823_s1 + $0xd0] sm:$0xff] %v554_v50  ;;  %v426_v61 = vmax.f32 %v361_v51, %v784_v46  ;;  %v233_v63 = vmax.f32 %v168_v52, %v690_v49  ;;  %v362_v3 = vmax.f32 %v297_v58, %v753_v48  ;;  %v817_v7 = vld [vmem:[%s1822_s0 + $0x7e8] sm:$0xff]  ;;  %v723_v9 = vld [vmem:[%s1822_s0 + $0x4f8] sm:$0xff]  ;;  %v786_v11 = vld [vmem:[%s1822_s0 + $0x6f0] sm:$0xff] }
  0x5f   :  { %v555_v1 = vmax.f32 %v490_v56, %v847_v41  ;;  %v169_v5 = vmax.f32 %v104_v60, %v659_v55  ;;  %v849_v14 = vld [vmem:[%s1822_s0 + $0x8e8] sm:$0xff]  ;;  %v755_v16 = vld [vmem:[%s1822_s0 + $0x5f8] sm:$0xff]  ;;  %v818_v18 = vld [vmem:[%s1822_s0 + $0x7f0] sm:$0xff] }
  0x60   :  { %v491_v6 = vmax.f32 %v426_v61, %v816_v57  ;;  %v298_v8 = vmax.f32 %v233_v63, %v722_v59  ;;  %v427_v10 = vmax.f32 %v362_v3, %v785_v62  ;;  %v787_v21 = vld [vmem:[%s1822_s0 + $0x6f8] sm:$0xff]  ;;  %v850_v23 = vld [vmem:[%s1822_s0 + $0x8f0] sm:$0xff] }
  0x61   :  { %587 = vst [vmem:[%s1823_s1 + $0xd8] sm:$0xff] %v555_v1  ;;  %v234_v12 = vmax.f32 %v169_v5, %v691_v0  ;;  %v819_v26 = vld [vmem:[%s1822_s0 + $0x7f8] sm:$0xff] }
  0x62   :  { %v556_v13 = vmax.f32 %v491_v6, %v848_v2  ;;  %v363_v15 = vmax.f32 %v298_v8, %v754_v4  ;;  %v492_v17 = vmax.f32 %v427_v10, %v817_v7  ;;  %v851_v29 = vld [vmem:[%s1822_s0 + $0x8f8] sm:$0xff] }
  0x63   :  { %v299_v19 = vmax.f32 %v234_v12, %v723_v9 }
  0x64   :  { %588 = vst [vmem:[%s1823_s1 + $0xe0] sm:$0xff] %v556_v13  ;;  %v428_v20 = vmax.f32 %v363_v15, %v786_v11  ;;  %v557_v22 = vmax.f32 %v492_v17, %v849_v14 }
  0x65   :  { %v364_v24 = vmax.f32 %v299_v19, %v755_v16 }
  0x66   :  { %v493_v25 = vmax.f32 %v428_v20, %v818_v18  ;;  %589 = vst [vmem:[%s1823_s1 + $0xe8] sm:$0xff] %v557_v22 }
  0x67   :  { %v429_v27 = vmax.f32 %v364_v24, %v787_v21 }
  0x68   :  { %v558_v28 = vmax.f32 %v493_v25, %v850_v23 }
  0x69   :  { %v494_v30 = vmax.f32 %v429_v27, %v819_v26 }
  0x6a   :  { %590 = vst [vmem:[%s1823_s1 + $0xf0] sm:$0xff] %v558_v28 }
  0x6b   :  { %v559_v31 = vmax.f32 %v494_v30, %v851_v29 }
  0x6d   :  { %591 = vst [vmem:[%s1823_s1 + $0xf8] sm:$0xff] %v559_v31 }

// kernel: feature_extractor_forward.12
= control target key start
LH: loop header
LB: loop body
LE: loop exit
PB: predicated region body
PF: predicated region fallthrough
CT: control target
= control target key end

     0   :  { %v72_v0 = vlaneseq  ;;  %v1232_v1 = vmov 0.0|0.0   ;;  %v1233_v23 = vmov 1.0|1.0   ;;  %s2058_s0 = inlined_call_operand.vmem [shape: f32[128,256], index: 0, kind: input, shape index: {}]   ;;  %s2059_s1 = inlined_call_operand.vmem [shape: f32[128,256], index: 1, kind: output, shape index: {}]  }
   0x1   :  { %1013 = vmatprep.subr.bf16.mxu0 %v1232_v1  ;;  %1065 = vmatprep.subr.bf16.mxu1 %v1232_v1  ;;  %v9_v2 = vld [vmem:[%s2058_s0 + $0x8] sm:$0xff]  ;;  %v1687_v52 = vld [vmem:[%s2058_s0 + $0x98] sm:$0xff]  ;;  %v1786_v17 = vld [vmem:[%s2058_s0 + $0x40] sm:$0xff] }
   0x2   :  { %v25_v3 = vld [vmem:[%s2058_s0 + $0x88] sm:$0xff]  ;;  %v1255_v4 = vshrl.u32 %v72_v0, 7  ;;  %v1257_v5 = vand.u32 127, %v72_v0  ;;  %v41_v6 = vmul.f32 %v9_v2, %v9_v2  ;;  %v59_v55 = vmul.f32 %v1687_v52, %v1687_v52  ;;  %v1735_v0 = vld [vmem:[%s2058_s0 + $0xa0] sm:$0xff]  ;;  %v1875_v44 = vld [vmem:[%s2058_s0 + $0xf0] sm:$0xff] }
   0x3   :  { %v57_v7 = vmul.f32 %v25_v3, %v25_v3  ;;  %v1717_v58 = vld [vmem:[%s2058_s0 + $0xa8] sm:$0xff]  ;;  %v70_v46 = vmul.f32 %v1875_v44, %v1875_v44 }
   0x4   :  { %v74_v8 = vadd.s32 8, %v1255_v4  ;;  %v108_v9 = vsub.s32 %v1255_v4, %v1257_v5  ;;  %v75_v10 = vadd.s32 16, %v1255_v4  ;;  %v76_v11 = vadd.s32 24, %v1255_v4  ;;  %556 = vmatprep.mubr.f32.mxu0 %v41_v6 }
   0x5   :  { %v77_v12 = vadd.s32 32, %v1255_v4  ;;  %v78_v13 = vadd.s32 40, %v1255_v4  ;;  %v79_v14 = vadd.s32 48, %v1255_v4  ;;  %604 = vmatprep.mubr.f32.mxu1 %v57_v7  ;;  %v80_v21 = vadd.s32 56, %v1255_v4 }
   0x6   :  { %v110_v15 = vsub.s32 %v74_v8, %v1257_v5  ;;  %vm172_vm0 = vcmp.ge.s32.totalorder %v108_v9, 4294967294  ;;  %vm236_vm1 = vcmp.le.s32.totalorder %v108_v9, 2  ;;  %v112_v16 = vsub.s32 %v75_v10, %v1257_v5 }
   0x7   :  { %vm1269_vm2 = vmand %vm172_vm0, %vm236_vm1  ;;  %v114_v18 = vsub.s32 %v76_v11, %v1257_v5  ;;  %v116_v19 = vsub.s32 %v77_v12, %v1257_v5  ;;  %v118_v20 = vsub.s32 %v78_v13, %v1257_v5  ;;  %v120_v22 = vsub.s32 %v79_v14, %v1257_v5  ;;  %v1768_v11 = vld [vmem:[%s2058_s0 + $0x48] sm:$0xff] }
   0x8   :  { %vm174_vm3 = vcmp.ge.s32.totalorder %v110_v15, 4294967294  ;;  %vm238_vm4 = vcmp.le.s32.totalorder %v110_v15, 2  ;;  %vm176_vm5 = vcmp.ge.s32.totalorder %v112_v16, 4294967294  ;;  %vm240_vm6 = vcmp.le.s32.totalorder %v112_v16, 2 }
   0x9   :  { %vm302_vm7 = vmand %vm174_vm3, %vm238_vm4  ;;  %vm178_vm8 = vcmp.ge.s32.totalorder %v114_v18, 4294967294  ;;  %vm242_vm9 = vcmp.le.s32.totalorder %v114_v18, 2  ;;  %vm180_vm11 = vcmp.ge.s32.totalorder %v116_v19, 4294967294  ;;  %vm244_vm13 = vcmp.le.s32.totalorder %v116_v19, 2  ;;  %v1791_v18 = vld [vmem:[%s2058_s0 + $0xc0] sm:$0xff] }
   0xa   :  { %vm1014_vm10 = vmpackc.low %vm302_vm7, %vm1269_vm2  ;;  %v122_v25 = vsub.s32 %v80_v21, %v1257_v5  ;;  %v81_v26 = vadd.s32 64, %v1255_v4  ;;  %v82_v27 = vadd.s32 72, %v1255_v4  ;;  %vm182_vm15 = vcmp.ge.s32.totalorder %v118_v20, 4294967294 }
   0xb   :  { %1015 = vmatpush1.bf16.msk.msra.mxu0 %vm1014_vm10, %v1233_v23  ;;  %1081 = vmatpush1.bf16.msk.msra.mxu1 %vm1014_vm10, %v1233_v23  ;;  %vm1282_vm12 = vmand %vm176_vm5, %vm240_vm6  ;;  %vm246_vm0 = vcmp.le.s32.totalorder %v118_v20, 2  ;;  %v83_v28 = vadd.s32 80, %v1255_v4  ;;  %v84_v30 = vadd.s32 88, %v1255_v4  ;;  %vm184_vm3 = vcmp.ge.s32.totalorder %v120_v22, 4294967294  ;;  %v1801_v20 = vld [vmem:[%s2058_s0 + $0xd8] sm:$0xff] }
   0xc   :  { %1016 = vmatprep.subr.bf16.mxu0 %v1232_v1  ;;  %1066 = vmatprep.subr.bf16.mxu1 %v1232_v1  ;;  %vm306_vm14 = vmand %vm178_vm8, %vm242_vm9  ;;  %v124_v29 = vsub.s32 %v81_v26, %v1257_v5  ;;  %vm248_vm4 = vcmp.le.s32.totalorder %v120_v22, 2  ;;  %v126_v32 = vsub.s32 %v82_v27, %v1257_v5  ;;  %vm186_vm6 = vcmp.ge.s32.totalorder %v122_v25, 4294967294  ;;  %v1814_v26 = vld [vmem:[%s2058_s0 + $0x50] sm:$0xff] }
   0xd   :  { %vm1017_vm1 = vmpackc.low %vm306_vm14, %vm1282_vm12  ;;  %vm250_vm7 = vcmp.le.s32.totalorder %v122_v25, 2  ;;  %v85_v34 = vadd.s32 96, %v1255_v4  ;;  %v128_v35 = vsub.s32 %v83_v28, %v1257_v5  ;;  %v86_v36 = vadd.s32 104, %v1255_v4  ;;  %v1824_v28 = vld [vmem:[%s2058_s0 + $0x68] sm:$0xff] }
   0xe   :  { %vm1298_vm2 = vmand %vm180_vm11, %vm244_vm13  ;;  %vm188_vm10 = vcmp.ge.s32.totalorder %v124_v29, 4294967294  ;;  %vm252_vm11 = vcmp.le.s32.totalorder %v124_v29, 2  ;;  %v130_v38 = vsub.s32 %v84_v30, %v1257_v5  ;;  %vm190_vm13 = vcmp.ge.s32.totalorder %v126_v32, 4294967294 }
   0xf   :  { %1018 = vmatpush1.bf16.msk.msra.mxu0 %vm1017_vm1, %v1233_v23  ;;  %1082 = vmatpush1.bf16.msk.msra.mxu1 %vm1017_vm1, %v1233_v23  ;;  %vm1305_vm5 = vmand %vm182_vm15, %vm246_vm0  ;;  %vm254_vm14 = vcmp.le.s32.totalorder %v126_v32, 2  ;;  %v88_v40 = vadd.s32 120, %v1255_v4  ;;  %v1329_v41 = vadd.s32 128, %v1257_v5  ;;  %v132_v42 = vsub.s32 %v85_v34, %v1257_v5  ;;  %v1842_v34 = vld [vmem:[%s2058_s0 + $0x60] sm:$0xff] }
  0x10   :  { %1019 = vmatprep.subr.bf16.mxu0 %v1232_v1  ;;  %1067 = vmatprep.subr.bf16.mxu1 %v1232_v1  ;;  %vm1020_vm8 = vmpackc.low %vm1305_vm5, %vm1298_vm2  ;;  %v87_v43 = vadd.s32 112, %v1255_v4  ;;  %vm192_vm1 = vcmp.ge.s32.totalorder %v128_v35, 4294967294  ;;  %vm256_vm2 = vcmp.le.s32.totalorder %v128_v35, 2  ;;  %v134_v45 = vsub.s32 %v86_v36, %v1257_v5 }
  0x11   :  { %vm1318_vm9 = vmand %vm184_vm3, %vm248_vm4  ;;  %vm194_vm4 = vcmp.ge.s32.totalorder %v130_v38, 4294967294  ;;  %vm258_vm5 = vcmp.le.s32.totalorder %v130_v38, 2  ;;  %v139_v47 = vsub.s32 %v88_v40, %v1329_v41  ;;  %v89_v48 = vadd.s32 128, %v1255_v4 }
  0x12   :  { %vm1323_vm12 = vmand %vm186_vm6, %vm250_vm7  ;;  %v136_v50 = vsub.s32 %v87_v43, %v1257_v5  ;;  %v90_v51 = vadd.s32 136, %v1255_v4  ;;  %v138_v53 = vsub.s32 %v88_v40, %v1257_v5  ;;  %v91_v57 = vadd.s32 144, %v1255_v4 }
  0x13   :  { %1021 = vmatpush1.bf16.msk.msra.mxu0 %vm1020_vm8, %v1233_v23  ;;  %1083 = vmatpush1.bf16.msk.msra.mxu1 %vm1020_vm8, %v1233_v23  ;;  %vm1023_vm15 = vmpackc.low %vm1323_vm12, %vm1318_vm9  ;;  %vm196_vm8 = vcmp.ge.s32.totalorder %v132_v42, 4294967294  ;;  %vm198_vm9 = vcmp.ge.s32.totalorder %v134_v45, 4294967294  ;;  %vm262_vm12 = vcmp.le.s32.totalorder %v134_v45, 2  ;;  %v141_v56 = vsub.s32 %v89_v48, %v1329_v41 }
  0x14   :  { %1022 = vmatprep.subr.bf16.mxu0 %v1232_v1  ;;  %1068 = vmatprep.subr.bf16.mxu1 %v1232_v1  ;;  %vm1342_vm0 = vmand %vm188_vm10, %vm252_vm11  ;;  %vm260_vm10 = vcmp.le.s32.totalorder %v132_v42, 2  ;;  %v143_v59 = vsub.s32 %v90_v51, %v1329_v41  ;;  %v92_v60 = vadd.s32 152, %v1255_v4  ;;  %v140_v62 = vsub.s32 %v89_v48, %v1257_v5  ;;  %v1682_v51 = vld [vmem:[%s2058_s0 + $0x18] sm:$0xff] }
  0x15   :  { %vm1348_vm3 = vmand %vm190_vm13, %vm254_vm14  ;;  %v93_v63 = vadd.s32 160, %v1255_v4  ;;  %v145_v2 = vsub.s32 %v91_v57, %v1329_v41  ;;  %v94_v3 = vadd.s32 168, %v1255_v4  ;;  %v1235_v7 = vmov 1.0   ;;  %v1707_v57 = vld [vmem:[%s2058_s0 + $0x90] sm:$0xff] }
  0x16   :  { %vm1026_vm6 = vmpackc.low %vm1348_vm3, %vm1342_vm0  ;;  %vm202_vm3 = vcmp.ge.s32.totalorder %v138_v53, 4294967294  ;;  %v147_v6 = vsub.s32 %v92_v60, %v1329_v41  ;;  %v1236_v8 = vmov 0.0   ;;  %v2096_v10 = vmov 0 }
  0x17   :  { %1024 = vmatpush1.bf16.msk.msra.mxu0 %vm1023_vm15, %v1233_v23  ;;  %1084 = vmatpush1.bf16.msk.msra.mxu1 %vm1023_vm15, %v1233_v23  ;;  %vm1370_vm7 = vmand %vm192_vm1, %vm256_vm2  ;;  %vm1391_vm15 = vcmp.ge.s32.totalorder %v139_v47, 4294967294  ;;  %vm200_vm2 = vcmp.ge.s32.totalorder %v136_v50, 4294967294  ;;  %v1034_v9 = vpack.c.bf16 %v1235_v7, %v1236_v8  ;;  %v149_v12 = vsub.s32 %v93_v63, %v1329_v41  ;;  %v1730_v63 = vld [vmem:[%s2058_s0 + $0x20] sm:$0xff] }
  0x18   :  { %1025 = vmatprep.subr.bf16.mxu0 %v1232_v1  ;;  %1069 = vmatprep.subr.bf16.mxu1 %v1232_v1  ;;  %vm1378_vm11 = vmand %vm194_vm4, %vm258_vm5  ;;  %vm264_vm4 = vcmp.le.s32.totalorder %v136_v50, 2  ;;  %vm266_vm5 = vcmp.le.s32.totalorder %v138_v53, 2  ;;  %v95_v13 = vadd.s32 176, %v1255_v4  ;;  %v151_v15 = vsub.s32 %v94_v3, %v1329_v41  ;;  %v1675_v50 = vld [vmem:[%s2058_s0 + $0x80] sm:$0xff]  ;;  %v1745_v3 = vld [vmem:[%s2058_s0 + $0xb8] sm:$0xff] }
  0x19   :  { %vm1029_vm13 = vmpackc.low %vm1378_vm11, %vm1370_vm7  ;;  %vm273_vm7 = vcmp.le.s32.totalorder %v145_v2, 2  ;;  %v96_v16 = vadd.s32 184, %v1255_v4  ;;  %v97_v22 = vadd.s32 192, %v1255_v4  ;;  %v1041_v24 = vpack.c.bf16 %v1236_v8, %v1235_v7 }
  0x1a   :  { %vm1387_vm14 = vmand %vm196_vm8, %vm260_vm10  ;;  %v153_v19 = vsub.s32 %v95_v13, %v1329_v41  ;;  %v98_v25 = vadd.s32 200, %v1255_v4  ;;  %v99_v27 = vadd.s32 208, %v1255_v4  ;;  %v100_v29 = vadd.s32 216, %v1255_v4 }
  0x1b   :  { %1027 = vmatpush1.bf16.msk.msra.mxu0 %vm1026_vm6, %v1233_v23  ;;  %1085 = vmatpush1.bf16.msk.msra.mxu1 %vm1026_vm6, %v1233_v23  ;;  %vm1409_vm1 = vmand %vm198_vm9, %vm262_vm12  ;;  %vm1234_vm6 = vmmov 1   ;;  %vm205_vm9 = vcmp.ge.s32.totalorder %v141_v56, 4294967294  ;;  %vm269_vm12 = vcmp.le.s32.totalorder %v141_v56, 2  ;;  %v155_v21 = vsub.s32 %v96_v16, %v1329_v41  ;;  %v1702_v56 = vld [vmem:[%s2058_s0 + $0x10] sm:$0xff] }
  0x1c   :  { %1028 = vmatprep.subr.bf16.mxu0 %v1232_v1  ;;  %1070 = vmatprep.subr.bf16.mxu1 %v1232_v1  ;;  %vm1032_vm0 = vmpackc.low %vm1409_vm1, %vm1387_vm14  ;;  %vm213_vm1 = vcmp.ge.s32.totalorder %v149_v12, 4294967294  ;;  %v157_v30 = vsub.s32 %v97_v22, %v1329_v41  ;;  %v159_v31 = vsub.s32 %v98_v25, %v1329_v41  ;;  %v161_v33 = vsub.s32 %v99_v27, %v1329_v41  ;;  %v1819_v27 = vld [vmem:[%s2058_s0 + $0xd0] sm:$0xff] }
  0x1d   :  { %vm1424_vm8 = vmpackc.low %vm1391_vm15, %vm1234_vm6  ;;  %v163_v35 = vsub.s32 %v100_v29, %v1329_v41  ;;  %v101_v36 = vadd.s32 224, %v1255_v4  ;;  %v102_v37 = vadd.s32 232, %v1255_v4  ;;  %v103_v43 = vadd.s32 240, %v1255_v4  ;;  %v1829_v29 = vld [vmem:[%s2058_s0 + $0xe8] sm:$0xff] }
  0x1e   :  { %vm1430_vm10 = vmand %vm200_vm2, %vm264_vm4  ;;  %vm207_vm2 = vcmp.ge.s32.totalorder %v143_v59, 4294967294  ;;  %vm271_vm4 = vcmp.le.s32.totalorder %v143_v59, 2  ;;  %v104_v45 = vadd.s32 248, %v1255_v4  ;;  %v56_v54 = vmul.f32 %v1675_v50, %v1675_v50 }
  0x1f   :  { %1030 = vmatpush1.bf16.msk.msra.mxu0 %vm1029_vm13, %v1233_v23  ;;  %1086 = vmatpush1.bf16.msk.msra.mxu1 %vm1029_vm13, %v1233_v23  ;;  %vm1448_vm15 = vmand %vm202_vm3, %vm266_vm5  ;;  %vm1465_vm13 = vcmp.le.s32.totalorder %v140_v62, 2  ;;  %vm209_vm5 = vcmp.ge.s32.totalorder %v145_v2, 4294967294  ;;  %v165_v39 = vsub.s32 %v101_v36, %v1329_v41  ;;  %v167_v42 = vsub.s32 %v102_v37, %v1329_v41  ;;  %v1740_v2 = vld [vmem:[%s2058_s0 + $0x38] sm:$0xff] }
  0x20   :  { %1031 = vmatprep.subr.bf16.mxu0 %v1232_v1  ;;  %1071 = vmatprep.subr.bf16.mxu1 %v1232_v1  ;;  %vm1461_vm11 = vmand %vm205_vm9, %vm269_vm12  ;;  %vm211_vm12 = vcmp.ge.s32.totalorder %v147_v6, 4294967294  ;;  %v169_v47 = vsub.s32 %v103_v43, %v1329_v41  ;;  %v171_v4 = vsub.s32 %v104_v45, %v1329_v41  ;;  %v1670_v41 = vld [vmem:[%s2058_s0] sm:$0xff]  ;;  %v42_v59 = vmul.f32 %v1702_v56, %v1702_v56  ;;  %v1852_v36 = vld [vmem:[%s2058_s0 + $0x78] sm:$0xff] }
  0x21   :  { %v2097_v10 = vsel %vm1461_vm11, 4294967295, %v2096_v10  ;;  %vm1471_vm3 = vmand %vm207_vm2, %vm271_vm4  ;;  %vm275_vm2 = vcmp.le.s32.totalorder %v147_v6, 2  ;;  %vm279_vm11 = vcmp.le.s32.totalorder %v151_v15, 2  ;;  %v40_v53 = vmul.f32 %v1670_v41, %v1670_v41  ;;  %2135 = vst [vmem:[#allocation2_spill] sm:$0xff] %v1852_v36  ;;  %v1857_v37 = vld [vmem:[%s2058_s0 + $0xf8] sm:$0xff]  ;;  %v1870_v43 = vld [vmem:[%s2058_s0 + $0x70] sm:$0xff] }
  0x22   :  { %vm1500_vm4 = vmpackc.low %vm1234_vm6, %vm1465_vm13  ;;  %vm283_vm13 = vcmp.le.s32.totalorder %v155_v21, 2  ;;  %v58_v60 = vmul.f32 %v1707_v57, %v1707_v57  ;;  %v61_v62 = vmul.f32 %v1717_v58, %v1717_v58  ;;  %v44_v5 = vmul.f32 %v1730_v63, %v1730_v63  ;;  %2136 = vst [vmem:[#allocation3_spill] sm:$0xff] %v1857_v37 }
  0x23   :  { %1033 = vmatpush1.bf16.msk.msra.mxu0 %vm1032_vm0, %v1233_v23  ;;  %1087 = vmatpush1.bf16.msk.msra.mxu1 %vm1032_vm0, %v1233_v23  ;;  %vm1504_vm14 = vmand %vm209_vm5, %vm273_vm7  ;;  %vm277_vm0 = vcmp.le.s32.totalorder %v149_v12, 2  ;;  %vm2110_vm5 = vnez %v2097_v10  ;;  %v60_v6 = vmul.f32 %v1735_v0, %v1735_v0  ;;  %v47_v7 = vmul.f32 %v1740_v2, %v1740_v2  ;;  %v1763_v10 = vld [vmem:[%s2058_s0 + $0xb0] sm:$0xff]  ;;  %v1773_v12 = vld [vmem:[%s2058_s0 + $0xc8] sm:$0xff] }
  0x24   :  { %1036 = vmatprep.subr.msk.bf16.mxu0 %vm1424_vm8, %v1034_v9  ;;  %1072 = vmatprep.subr.msk.bf16.mxu1 %vm1424_vm8, %v1034_v9  ;;  %vm1509_vm9 = vmand %vm211_vm12, %vm275_vm2  ;;  %vm215_vm8 = vcmp.ge.s32.totalorder %v151_v15, 4294967294  ;;  %v63_v8 = vmul.f32 %v1745_v3, %v1745_v3  ;;  %v1758_v9 = vld [vmem:[%s2058_s0 + $0x30] sm:$0xff]  ;;  %v62_v14 = vmul.f32 %v1763_v10, %v1763_v10  ;;  %v49_v15 = vmul.f32 %v1768_v11, %v1768_v11 }
  0x25   :  { %vm2108_vm6 = vmpackc.low %vm1448_vm15, %vm1430_vm10  ;;  %v46_v13 = vmul.f32 %v1758_v9, %v1758_v9  ;;  %v65_v16 = vmul.f32 %v1773_v12, %v1773_v12  ;;  %v64_v22 = vmul.f32 %v1791_v18, %v1791_v18  ;;  %v67_v25 = vmul.f32 %v1801_v20, %v1801_v20 }
  0x26   :  { %vm2109_vm7 = vmmov %vm2108_vm6  ;;  %v53_v32 = vmul.f32 %v1824_v28, %v1824_v28  ;;  %v52_v38 = vmul.f32 %v1842_v34, %v1842_v34  ;;  %v55_v40 = vmul.f32 %v1852_v36, %v1852_v36  ;;  %v54_v45 = vmul.f32 %v1870_v43, %v1870_v43 }
  0x27   :  { %1038 = vmatpush1.bf16.msk.msra.mxu0 %vm2108_vm6, %v1233_v23  ;;  %1088 = vmatpush1.bf16.msk.msra.mxu1 %vm2109_vm7, %v1233_v23  ;;  %vm2111_vm12 = vmpackc.low %vm1471_vm3, %vm2110_vm5  ;;  %vm217_vm6 = vcmp.ge.s32.totalorder %v153_v19, 4294967294  ;;  %vm281_vm7 = vcmp.le.s32.totalorder %v153_v19, 2  ;;  %vm285_vm5 = vcmp.le.s32.totalorder %v157_v30, 2  ;;  %v1796_v19 = vld [vmem:[%s2058_s0 + $0x58] sm:$0xff] }
  0x28   :  { %1040 = vmatprep.subr.msk.bf16.mxu0 %vm2111_vm12, %v1233_v23  ;;  %vm2112_vm10 = vmmov %vm2111_vm12  ;;  %vm219_vm12 = vcmp.ge.s32.totalorder %v155_v21, 4294967294  ;;  %v48_v21 = vmul.f32 %v1786_v17, %v1786_v17 }
  0x29   :  { %1073 = vmatprep.subr.msk.bf16.mxu1 %vm2112_vm10, %v1233_v23  ;;  %vm1545_vm15 = vmand %vm213_vm1, %vm277_vm0  ;;  %vm225_vm10 = vcmp.ge.s32.totalorder %v161_v33, 4294967294 }
  0x2a   :  { %vm1550_vm2 = vmand %vm215_vm8, %vm279_vm11  ;;  %vm221_vm8 = vcmp.ge.s32.totalorder %v157_v30, 4294967294  ;;  %v50_v30 = vmul.f32 %v1814_v26, %v1814_v26 }
  0x2b   :  { %1043 = vmatpush1.bf16.msk.msra.mxu0 %vm1500_vm4, %v1041_v24  ;;  %1089 = vmatpush1.bf16.msk.msra.mxu1 %vm1500_vm4, %v1041_v24  ;;  %vm1047_vm11 = vmpackc.low %vm1550_vm2, %vm1545_vm15  ;;  %v51_v24 = vmul.f32 %v1796_v19, %v1796_v19 }
  0x2c   :  { %vm2117_vm3 = vmpackc.low %vm1509_vm9, %vm1504_vm14  ;;  %vm223_vm9 = vcmp.ge.s32.totalorder %v159_v31, 4294967294  ;;  %vm287_vm14 = vcmp.le.s32.totalorder %v159_v31, 2  ;;  %v66_v31 = vmul.f32 %v1819_v27, %v1819_v27 }
  0x2d   :  { %1045 = vmatprep.subr.msk.bf16.mxu0 %vm2117_vm3, %v1233_v23  ;;  %vm2118_vm4 = vmmov %vm2117_vm3  ;;  %vm291_vm3 = vcmp.le.s32.totalorder %v163_v35, 2 }
  0x2e   :  { %1074 = vmatprep.subr.msk.bf16.mxu1 %vm2118_vm4, %v1233_v23  ;;  %vm1577_vm1 = vmand %vm217_vm6, %vm281_vm7  ;;  %vm289_vm6 = vcmp.le.s32.totalorder %v161_v33, 2  ;;  %v69_v33 = vmul.f32 %v1829_v29, %v1829_v29 }
  0x2f   :  { %vm1582_vm0 = vmand %vm219_vm12, %vm283_vm13  ;;  %1046 = vmatpush1.bf16.msra.mxu0 %v1232_v1  ;;  %1090 = vmatpush1.bf16.msra.mxu1 %v1232_v1  ;;  %vm227_vm12 = vcmp.ge.s32.totalorder %v163_v35, 4294967294  ;;  %v1847_v35 = vld [vmem:[%s2058_s0 + $0xe0] sm:$0xff] }
  0x30   :  { %1048 = vmatprep.subr.msk.bf16.mxu0 %vm1047_vm11, %v1233_v23  ;;  %1075 = vmatprep.subr.msk.bf16.mxu1 %vm1047_vm11, %v1233_v23  ;;  %vm1050_vm13 = vmpackc.low %vm1582_vm0, %vm1577_vm1  ;;  %vm229_vm1 = vcmp.ge.s32.totalorder %v165_v39, 4294967294  ;;  %vm293_vm0 = vcmp.le.s32.totalorder %v165_v39, 2  ;;  %v68_v39 = vmul.f32 %v1847_v35, %v1847_v35 }
  0x31   :  { %vm1607_vm7 = vmand %vm221_vm8, %vm285_vm5  ;;  %vm231_vm8 = vcmp.ge.s32.totalorder %v167_v42, 4294967294  ;;  %vm295_vm5 = vcmp.le.s32.totalorder %v167_v42, 2  ;;  %v71_v42 = vmul.f32 %v1857_v37, %v1857_v37 }
  0x32   :  { %vm1612_vm4 = vmand %vm223_vm9, %vm287_vm14 }
  0x33   :  { %1049 = vmatpush1.bf16.msra.mxu0 %v1232_v1  ;;  %1091 = vmatpush1.bf16.msra.mxu1 %v1232_v1  ;;  %vm1620_vm15 = vmand %vm225_vm10, %vm289_vm6  ;;  %vm233_vm10 = vcmp.ge.s32.totalorder %v169_v47, 4294967294  ;;  %vm297_vm6 = vcmp.le.s32.totalorder %v169_v47, 2 }
  0x34   :  { %1051 = vmatprep.subr.msk.bf16.mxu0 %vm1050_vm13, %v1233_v23  ;;  %1076 = vmatprep.subr.msk.bf16.mxu1 %vm1050_vm13, %v1233_v23  ;;  %vm1627_vm2 = vmand %vm227_vm12, %vm291_vm3  ;;  %vm299_vm12 = vcmp.le.s32.totalorder %v171_v4, 2 }
  0x35   :  { %vm1053_vm11 = vmpackc.low %vm1612_vm4, %vm1607_vm7  ;;  %vm235_vm7 = vcmp.ge.s32.totalorder %v171_v4, 4294967294 }
  0x36   :  { %vm1056_vm9 = vmpackc.low %vm1627_vm2, %vm1620_vm15 }
  0x37   :  { %1052 = vmatpush1.bf16.msra.mxu0 %v1232_v1  ;;  %1092 = vmatpush1.bf16.msra.mxu1 %v1232_v1  ;;  %vm1645_vm14 = vmand %vm229_vm1, %vm293_vm0 }
  0x38   :  { %1054 = vmatprep.subr.msk.bf16.mxu0 %vm1053_vm11, %v1233_v23  ;;  %1077 = vmatprep.subr.msk.bf16.mxu1 %vm1053_vm11, %v1233_v23  ;;  %vm1649_vm13 = vmand %vm231_vm8, %vm295_vm5 }
  0x39   :  { %vm1059_vm3 = vmpackc.low %vm1649_vm13, %vm1645_vm14 }
  0x3a   :  { %vm361_vm4 = vmand %vm233_vm10, %vm297_vm6 }
  0x3b   :  { %1055 = vmatpush1.bf16.msra.mxu0 %v1232_v1  ;;  %1093 = vmatpush1.bf16.msra.mxu1 %v1232_v1  ;;  %vm363_vm15 = vmand %vm235_vm7, %vm299_vm12 }
  0x3c   :  { %1057 = vmatprep.subr.msk.bf16.mxu0 %vm1056_vm9, %v1233_v23  ;;  %1078 = vmatprep.subr.msk.bf16.mxu1 %vm1056_vm9, %v1233_v23  ;;  %vm1062_vm2 = vmpackc.low %vm363_vm15, %vm361_vm4 }
  0x3f   :  { %1058 = vmatpush1.bf16.msra.mxu0 %v1232_v1  ;;  %1094 = vmatpush1.bf16.msra.mxu1 %v1232_v1 }
  0x40   :  { %1060 = vmatprep.subr.msk.bf16.mxu0 %vm1059_vm3, %v1233_v23  ;;  %1079 = vmatprep.subr.msk.bf16.mxu1 %vm1059_vm3, %v1233_v23 }
  0x43   :  { %1061 = vmatpush1.bf16.msra.mxu0 %v1232_v1  ;;  %1095 = vmatpush1.bf16.msra.mxu1 %v1232_v1 }
  0x44   :  { %1063 = vmatprep.subr.msk.bf16.mxu0 %vm1062_vm2, %v1233_v23  ;;  %1080 = vmatprep.subr.msk.bf16.mxu1 %vm1062_vm2, %v1233_v23  ;;  %v43_v23 = vmul.f32 %v1682_v51, %v1682_v51 }
  0x47   :  { %1064 = vmatpush1.bf16.msra.mxu0 %v1232_v1  ;;  %1096 = vmatpush1.bf16.msra.mxu1 %v1232_v1  ;;  %v1712_v1 = vld [vmem:[%s2058_s0 + $0x28] sm:$0xff] }
  0x48   :  { %v45_v61 = vmul.f32 %v1712_v1, %v1712_v1 }
  0x4a   :  { %557 = vmatmul.mubr.f32.vlgmr.msra.gmra.mrb[0].mxu0 %v40_v53  ;;  %605 = vmatmul.mubr.f32.vlgmr.msra.gmra.mrb[0].mxu1 %v56_v54 }
  0x4b   :  { %562 = vmatprep.mubr.f32.mxu0 %v43_v23  ;;  %610 = vmatprep.mubr.f32.mxu1 %v59_v55 }
  0x4e   :  { %563 = vmatmul.mubr.f32.gmra.mrb[2].mxu0 %v42_v59  ;;  %611 = vmatmul.mubr.f32.gmra.mrb[2].mxu1 %v58_v60 }
  0x4f   :  { %568 = vmatprep.mubr.f32.mxu0 %v45_v61  ;;  %616 = vmatprep.mubr.f32.mxu1 %v61_v62 }
  0x52   :  { %569 = vmatmul.mubr.f32.gmra.mrb[4].mxu0 %v44_v5  ;;  %617 = vmatmul.mubr.f32.gmra.mrb[4].mxu1 %v60_v6 }
  0x53   :  { %574 = vmatprep.mubr.f32.mxu0 %v47_v7  ;;  %622 = vmatprep.mubr.f32.mxu1 %v63_v8 }
  0x56   :  { %575 = vmatmul.mubr.f32.gmra.mrb[6].mxu0 %v46_v13  ;;  %623 = vmatmul.mubr.f32.gmra.mrb[6].mxu1 %v62_v14 }
  0x57   :  { %580 = vmatprep.mubr.f32.mxu0 %v49_v15  ;;  %628 = vmatprep.mubr.f32.mxu1 %v65_v16 }
  0x5a   :  { %581 = vmatmul.mubr.f32.gmra.mrb[8].mxu0 %v48_v21  ;;  %629 = vmatmul.mubr.f32.gmra.mrb[8].mxu1 %v64_v22 }
  0x5b   :  { %586 = vmatprep.mubr.f32.mxu0 %v51_v24  ;;  %634 = vmatprep.mubr.f32.mxu1 %v67_v25 }
  0x5e   :  { %587 = vmatmul.mubr.f32.gmra.mrb[10].mxu0 %v50_v30  ;;  %635 = vmatmul.mubr.f32.gmra.mrb[10].mxu1 %v66_v31 }
  0x5f   :  { %592 = vmatprep.mubr.f32.mxu0 %v53_v32  ;;  %640 = vmatprep.mubr.f32.mxu1 %v69_v33 }
  0x62   :  { %593 = vmatmul.mubr.f32.gmra.mrb[12].mxu0 %v52_v38  ;;  %641 = vmatmul.mubr.f32.gmra.mrb[12].mxu1 %v68_v39 }
  0x63   :  { %598 = vmatprep.mubr.f32.mxu0 %v55_v40  ;;  %646 = vmatprep.mubr.f32.mxu1 %v71_v42 }
  0x66   :  { %599 = vmatmul.mubr.f32.gmra.mrb[14].mxu0 %v54_v45  ;;  %647 = vmatmul.mubr.f32.gmra.mrb[14].mxu1 %v70_v46 }
 0x11d   :  { %v558_v47 = vpop.f32.mrb[0].mxu0  ;;  %v606_v4 = vpop.f32.mrb[0].mxu1 }
 0x11e   :  { %v653_v48 = vmul.f32 2e-05, %v558_v47  ;;  %v669_v49 = vmul.f32 2e-05, %v606_v4  ;;  %v560_v53 = vpop.f32.mrb[1].mxu0  ;;  %v608_v54 = vpop.f32.mrb[1].mxu1 }
 0x11f   :  { %v654_v23 = vmul.f32 2e-05, %v560_v53  ;;  %v670_v55 = vmul.f32 2e-05, %v608_v54 }
 0x120   :  { %v685_v59 = vadd.f32 1.0, %v653_v48  ;;  %v701_v60 = vadd.f32 1.0, %v669_v49 }
 0x121   :  { %v686_v61 = vadd.f32 1.0, %v654_v23  ;;  %v702_v62 = vadd.f32 1.0, %v670_v55  ;;  %v564_v5 = vpop.f32.mrb[2].mxu0  ;;  %v612_v6 = vpop.f32.mrb[2].mxu1 }
 0x122   :  { %1102 = vlog2.f32 %v685_v59  ;;  %v655_v7 = vmul.f32 2e-05, %v564_v5  ;;  %v671_v8 = vmul.f32 2e-05, %v612_v6  ;;  %v566_v13 = vpop.f32.mrb[3].mxu0  ;;  %v614_v14 = vpop.f32.mrb[3].mxu1 }
 0x123   :  { %1104 = vlog2.f32 %v701_v60  ;;  %v656_v15 = vmul.f32 2e-05, %v566_v13  ;;  %v672_v16 = vmul.f32 2e-05, %v614_v14 }
 0x124   :  { %1106 = vlog2.f32 %v686_v61  ;;  %v687_v21 = vadd.f32 1.0, %v655_v7  ;;  %v703_v22 = vadd.f32 1.0, %v671_v8 }
 0x125   :  { %1108 = vlog2.f32 %v702_v62  ;;  %v688_v24 = vadd.f32 1.0, %v656_v15  ;;  %v704_v25 = vadd.f32 1.0, %v672_v16  ;;  %v570_v30 = vpop.f32.mrb[4].mxu0  ;;  %v618_v31 = vpop.f32.mrb[4].mxu1 }
 0x126   :  { %1110 = vlog2.f32 %v687_v21  ;;  %v657_v32 = vmul.f32 2e-05, %v570_v30  ;;  %v673_v33 = vmul.f32 2e-05, %v618_v31  ;;  %v572_v38 = vpop.f32.mrb[5].mxu0  ;;  %v620_v39 = vpop.f32.mrb[5].mxu1 }
 0x127   :  { %1112 = vlog2.f32 %v703_v22  ;;  %v658_v40 = vmul.f32 2e-05, %v572_v38  ;;  %v674_v42 = vmul.f32 2e-05, %v620_v39 }
 0x128   :  { %1114 = vlog2.f32 %v688_v24  ;;  %v689_v45 = vadd.f32 1.0, %v657_v32  ;;  %v705_v46 = vadd.f32 1.0, %v673_v33 }
 0x129   :  { %1116 = vlog2.f32 %v704_v25  ;;  %v690_v47 = vadd.f32 1.0, %v658_v40  ;;  %v706_v4 = vadd.f32 1.0, %v674_v42  ;;  %v576_v48 = vpop.f32.mrb[6].mxu0  ;;  %v624_v49 = vpop.f32.mrb[6].mxu1 }
 0x12a   :  { %1118 = vlog2.f32 %v689_v45  ;;  %v659_v53 = vmul.f32 2e-05, %v576_v48  ;;  %v675_v54 = vmul.f32 2e-05, %v624_v49  ;;  %v578_v23 = vpop.f32.mrb[7].mxu0  ;;  %v626_v55 = vpop.f32.mrb[7].mxu1 }
 0x12b   :  { %1120 = vlog2.f32 %v705_v46  ;;  %v660_v59 = vmul.f32 2e-05, %v578_v23  ;;  %v676_v60 = vmul.f32 2e-05, %v626_v55 }
 0x12c   :  { %v1103_v61 = vpop.eup %1102  ;;  %1122 = vlog2.f32 %v690_v47  ;;  %v691_v62 = vadd.f32 1.0, %v659_v53  ;;  %v707_v5 = vadd.f32 1.0, %v675_v54 }
 0x12d   :  { %v1105_v6 = vpop.eup %1104  ;;  %v718_v7 = vmul.f32 0.6931472, %v1103_v61  ;;  %1124 = vlog2.f32 %v706_v4  ;;  %v692_v8 = vadd.f32 1.0, %v660_v59  ;;  %v708_v13 = vadd.f32 1.0, %v676_v60  ;;  %v582_v14 = vpop.f32.mrb[8].mxu0 }
 0x12e   :  { %v630_v15 = vpop.f32.mrb[8].mxu1  ;;  %v1107_v16 = vpop.eup %1106  ;;  %v750_v21 = vmul.f32 0.6931472, %v1105_v6  ;;  %1126 = vlog2.f32 %v691_v62  ;;  %v661_v22 = vmul.f32 2e-05, %v582_v14 }
 0x12f   :  { %v1881_v24 = vmul.f32 2e-05, %v630_v15  ;;  %v1109_v25 = vpop.eup %1108  ;;  %v781_v30 = vmul.f32 -0.75, %v718_v7  ;;  %v720_v31 = vmul.f32 0.6931472, %v1107_v16  ;;  %1128 = vlog2.f32 %v707_v5  ;;  %v1883_v32 = vpop.f32.mrb[9].mxu0 }
 0x130   :  { %v1885_v33 = vpop.f32.mrb[9].mxu1  ;;  %v1111_v38 = vpop.eup %1110  ;;  %v797_v39 = vmul.f32 -0.75, %v750_v21  ;;  %v752_v40 = vmul.f32 0.6931472, %v1109_v25  ;;  %1130 = vlog2.f32 %v692_v8  ;;  %v693_v42 = vadd.f32 1.0, %v661_v22 }
 0x131   :  { %v1113_v45 = vpop.eup %1112  ;;  %v813_v46 = vmul.f32 1.442695, %v781_v30  ;;  %v782_v47 = vmul.f32 -0.75, %v720_v31  ;;  %v722_v4 = vmul.f32 0.6931472, %v1111_v38  ;;  %1132 = vlog2.f32 %v708_v13  ;;  %v1887_v48 = vpop.f32.mrb[10].mxu0 }
 0x132   :  { %v1115_v49 = vpop.eup %1114  ;;  %v845_v53 = vmul.f32 1.442695, %v797_v39  ;;  %v798_v54 = vmul.f32 -0.75, %v752_v40  ;;  %v754_v23 = vmul.f32 0.6931472, %v1113_v45  ;;  %1134 = vlog2.f32 %v693_v42  ;;  %v1889_v55 = vpop.f32.mrb[10].mxu1 }
 0x133   :  { %v1117_v59 = vpop.eup %1116  ;;  %1136 = vpow2.f32 %v813_v46  ;;  %v815_v60 = vmul.f32 1.442695, %v782_v47  ;;  %v783_v61 = vmul.f32 -0.75, %v722_v4  ;;  %v724_v62 = vmul.f32 0.6931472, %v1115_v49  ;;  %v1891_v5 = vpop.f32.mrb[11].mxu0 }
 0x134   :  { %v1119_v6 = vpop.eup %1118  ;;  %1138 = vpow2.f32 %v845_v53  ;;  %v847_v7 = vmul.f32 1.442695, %v798_v54  ;;  %v799_v8 = vmul.f32 -0.75, %v754_v23  ;;  %v756_v13 = vmul.f32 0.6931472, %v1117_v59  ;;  %v1893_v14 = vpop.f32.mrb[11].mxu1 }
 0x135   :  { %v1121_v15 = vpop.eup %1120  ;;  %1140 = vpow2.f32 %v815_v60  ;;  %v817_v16 = vmul.f32 1.442695, %v783_v61  ;;  %v784_v21 = vmul.f32 -0.75, %v724_v62  ;;  %v726_v22 = vmul.f32 0.6931472, %v1119_v6  ;;  %v1895_v25 = vpop.f32.mrb[12].mxu0 }
 0x136   :  { %v1123_v30 = vpop.eup %1122  ;;  %1142 = vpow2.f32 %v847_v7  ;;  %v849_v31 = vmul.f32 1.442695, %v799_v8  ;;  %v800_v38 = vmul.f32 -0.75, %v756_v13  ;;  %v758_v39 = vmul.f32 0.6931472, %v1121_v15  ;;  %v1897_v40 = vpop.f32.mrb[12].mxu1 }
 0x137   :  { %v1125_v42 = vpop.eup %1124  ;;  %1144 = vpow2.f32 %v817_v16  ;;  %v819_v45 = vmul.f32 1.442695, %v784_v21  ;;  %v785_v46 = vmul.f32 -0.75, %v726_v22  ;;  %v728_v47 = vmul.f32 0.6931472, %v1123_v30  ;;  %v1899_v4 = vpop.f32.mrb[13].mxu0 }
 0x138   :  { %v1127_v49 = vpop.eup %1126  ;;  %1146 = vpow2.f32 %v849_v31  ;;  %v851_v53 = vmul.f32 1.442695, %v800_v38  ;;  %v801_v54 = vmul.f32 -0.75, %v758_v39  ;;  %v760_v23 = vmul.f32 0.6931472, %v1125_v42  ;;  %v1901_v59 = vpop.f32.mrb[13].mxu1 }
 0x139   :  { %v1129_v60 = vpop.eup %1128  ;;  %1148 = vpow2.f32 %v819_v45  ;;  %v821_v61 = vmul.f32 1.442695, %v785_v46  ;;  %v786_v62 = vmul.f32 -0.75, %v728_v47  ;;  %v730_v6 = vmul.f32 0.6931472, %v1127_v49  ;;  %v1903_v7 = vpop.f32.mrb[14].mxu0 }
 0x13a   :  { %v1131_v8 = vpop.eup %1130  ;;  %1150 = vpow2.f32 %v851_v53  ;;  %v853_v13 = vmul.f32 1.442695, %v801_v54  ;;  %v802_v15 = vmul.f32 -0.75, %v760_v23  ;;  %v762_v16 = vmul.f32 0.6931472, %v1129_v60  ;;  %v1905_v21 = vpop.f32.mrb[14].mxu1 }
 0x13b   :  { %v1133_v22 = vpop.eup %1132  ;;  %1152 = vpow2.f32 %v821_v61  ;;  %v823_v30 = vmul.f32 1.442695, %v786_v62  ;;  %v787_v31 = vmul.f32 -0.75, %v730_v6  ;;  %v732_v38 = vmul.f32 0.6931472, %v1131_v8  ;;  %v1907_v39 = vpop.f32.mrb[15].mxu0 }
 0x13c   :  { %v1135_v42 = vpop.eup %1134  ;;  %1154 = vpow2.f32 %v853_v13  ;;  %v855_v45 = vmul.f32 1.442695, %v802_v15  ;;  %v803_v46 = vmul.f32 -0.75, %v762_v16  ;;  %v764_v47 = vmul.f32 0.6931472, %v1133_v22  ;;  %v1909_v49 = vpop.f32.mrb[15].mxu1 }
 0x13d   :  { %v1137_v53 = vpop.eup %1136  ;;  %1156 = vpow2.f32 %v823_v30  ;;  %v825_v54 = vmul.f32 1.442695, %v787_v31  ;;  %v788_v23 = vmul.f32 -0.75, %v732_v38  ;;  %v734_v60 = vmul.f32 0.6931472, %v1135_v42  ;;  %v1230_v22 = vld [vmem:[%s2058_s0 + $0x8] sm:$0xff] }
 0x13e   :  { %v1139_v37 = vpop.eup %1138  ;;  %v877_v61 = vmul.f32 %v1137_v53, %v1670_v41  ;;  %1158 = vpow2.f32 %v855_v45  ;;  %v857_v62 = vmul.f32 1.442695, %v803_v46  ;;  %v804_v6 = vmul.f32 -0.75, %v764_v47 }
 0x13f   :  { %v1141_v8 = vpop.eup %1140  ;;  %v893_v36 = vmul.f32 %v1139_v37, %v1675_v50  ;;  %1160 = vpow2.f32 %v825_v54  ;;  %v827_v13 = vmul.f32 1.442695, %v788_v23  ;;  %v789_v15 = vmul.f32 -0.75, %v734_v60  ;;  %v1231_v50 = vld [vmem:[%s2058_s0 + $0x88] sm:$0xff] }
 0x140   :  { %v1143_v16 = vpop.eup %1142  ;;  %909 = vst [vmem:[%s2059_s1] sm:$0xff] %v877_v61  ;;  %v878_v30 = vmul.f32 %v1230_v22, %v1141_v8  ;;  %1162 = vpow2.f32 %v857_v62  ;;  %v859_v41 = vmul.f32 1.442695, %v804_v6  ;;  %v709_v31 = vadd.f32 1.0, %v1881_v24 }
 0x141   :  { %v1145_v38 = vpop.eup %1144  ;;  %925 = vst [vmem:[%s2059_s1 + $0x80] sm:$0xff] %v893_v36  ;;  %v894_v37 = vmul.f32 %v1231_v50, %v1143_v16  ;;  %1164 = vpow2.f32 %v827_v13  ;;  %v829_v42 = vmul.f32 1.442695, %v789_v15  ;;  %v662_v45 = vmul.f32 2e-05, %v1883_v32 }
 0x142   :  { %v1147_v46 = vpop.eup %1146  ;;  %910 = vst [vmem:[%s2059_s1 + $0x8] sm:$0xff] %v878_v30  ;;  %v879_v24 = vmul.f32 %v1145_v38, %v1702_v56  ;;  %1166 = vpow2.f32 %v859_v41  ;;  %v678_v47 = vmul.f32 2e-05, %v1885_v33  ;;  %v663_v36 = vmul.f32 2e-05, %v1887_v48 }
 0x143   :  { %v1149_v53 = vpop.eup %1148  ;;  %926 = vst [vmem:[%s2059_s1 + $0x88] sm:$0xff] %v894_v37  ;;  %v895_v54 = vmul.f32 %v1147_v46, %v1707_v57  ;;  %1168 = vpow2.f32 %v829_v42  ;;  %v694_v32 = vadd.f32 1.0, %v662_v45  ;;  %v679_v23 = vmul.f32 2e-05, %v1889_v55 }
 0x144   :  { %v1151_v60 = vpop.eup %1150  ;;  %911 = vst [vmem:[%s2059_s1 + $0x10] sm:$0xff] %v879_v24  ;;  %v880_v56 = vmul.f32 %v1149_v53, %v1682_v51  ;;  %1170 = vlog2.f32 %v709_v31  ;;  %v710_v33 = vadd.f32 1.0, %v678_v47  ;;  %v695_v48 = vadd.f32 1.0, %v663_v36 }
 0x145   :  { %v1153_v61 = vpop.eup %1152  ;;  %927 = vst [vmem:[%s2059_s1 + $0x90] sm:$0xff] %v895_v54  ;;  %v896_v57 = vmul.f32 %v1151_v60, %v1687_v52  ;;  %1172 = vlog2.f32 %v694_v32  ;;  %v711_v62 = vadd.f32 1.0, %v679_v23  ;;  %v664_v55 = vmul.f32 2e-05, %v1891_v5 }
 0x146   :  { %v1155_v6 = vpop.eup %1154  ;;  %912 = vst [vmem:[%s2059_s1 + $0x18] sm:$0xff] %v880_v56  ;;  %v881_v51 = vmul.f32 %v1153_v61, %v1730_v63  ;;  %1174 = vlog2.f32 %v710_v33  ;;  %v680_v8 = vmul.f32 2e-05, %v1893_v14  ;;  %v665_v13 = vmul.f32 2e-05, %v1895_v25 }
 0x147   :  { %v1157_v15 = vpop.eup %1156  ;;  %928 = vst [vmem:[%s2059_s1 + $0x98] sm:$0xff] %v896_v57  ;;  %v897_v52 = vmul.f32 %v1155_v6, %v1735_v0  ;;  %1176 = vlog2.f32 %v695_v48  ;;  %v696_v5 = vadd.f32 1.0, %v664_v55  ;;  %v681_v16 = vmul.f32 2e-05, %v1897_v40 }
 0x148   :  { %v1159_v22 = vpop.eup %1158  ;;  %913 = vst [vmem:[%s2059_s1 + $0x20] sm:$0xff] %v881_v51  ;;  %v882_v63 = vmul.f32 %v1157_v15, %v1712_v1  ;;  %1178 = vlog2.f32 %v711_v62  ;;  %v712_v14 = vadd.f32 1.0, %v680_v8  ;;  %v697_v25 = vadd.f32 1.0, %v665_v13 }
 0x149   :  { %v1161_v30 = vpop.eup %1160  ;;  %929 = vst [vmem:[%s2059_s1 + $0xa0] sm:$0xff] %v897_v52  ;;  %v898_v0 = vmul.f32 %v1159_v22, %v1717_v58  ;;  %1180 = vlog2.f32 %v696_v5  ;;  %v713_v41 = vadd.f32 1.0, %v681_v16  ;;  %v666_v40 = vmul.f32 2e-05, %v1899_v4 }
 0x14a   :  { %v1163_v31 = vpop.eup %1162  ;;  %914 = vst [vmem:[%s2059_s1 + $0x28] sm:$0xff] %v882_v63  ;;  %v883_v1 = vmul.f32 %v1161_v30, %v1758_v9  ;;  %1182 = vlog2.f32 %v712_v14  ;;  %v682_v38 = vmul.f32 2e-05, %v1901_v59  ;;  %v667_v50 = vmul.f32 2e-05, %v1903_v7 }
 0x14b   :  { %v1165_v37 = vpop.eup %1164  ;;  %930 = vst [vmem:[%s2059_s1 + $0xa8] sm:$0xff] %v898_v0  ;;  %v899_v58 = vmul.f32 %v1163_v31, %v1763_v10  ;;  %1184 = vlog2.f32 %v697_v25  ;;  %v698_v4 = vadd.f32 1.0, %v666_v40  ;;  %v683_v42 = vmul.f32 2e-05, %v1905_v21 }
 0x14c   :  { %v1167_v45 = vpop.eup %1166  ;;  %915 = vst [vmem:[%s2059_s1 + $0x30] sm:$0xff] %v883_v1  ;;  %v884_v9 = vmul.f32 %v1165_v37, %v1740_v2  ;;  %1186 = vlog2.f32 %v713_v41  ;;  %v714_v59 = vadd.f32 1.0, %v682_v38  ;;  %v699_v7 = vadd.f32 1.0, %v667_v50 }
 0x14d   :  { %v1169_v46 = vpop.eup %1168  ;;  %931 = vst [vmem:[%s2059_s1 + $0xb0] sm:$0xff] %v899_v58  ;;  %v900_v10 = vmul.f32 %v1167_v45, %v1745_v3  ;;  %1188 = vlog2.f32 %v698_v4  ;;  %v715_v24 = vadd.f32 1.0, %v683_v42  ;;  %v668_v21 = vmul.f32 2e-05, %v1907_v39 }
 0x14e   :  { %v1171_v47 = vpop.eup %1170  ;;  %916 = vst [vmem:[%s2059_s1 + $0x38] sm:$0xff] %v884_v9  ;;  %v885_v2 = vmul.f32 %v1169_v46, %v1786_v17  ;;  %1190 = vlog2.f32 %v714_v59  ;;  %v684_v36 = vmul.f32 2e-05, %v1909_v49 }
 0x14f   :  { %v1173_v53 = vpop.eup %1172  ;;  %932 = vst [vmem:[%s2059_s1 + $0xb8] sm:$0xff] %v900_v10  ;;  %v766_v3 = vmul.f32 0.6931472, %v1171_v47  ;;  %1192 = vlog2.f32 %v699_v7  ;;  %v700_v54 = vadd.f32 1.0, %v668_v21 }
 0x150   :  { %v1175_v32 = vpop.eup %1174  ;;  %917 = vst [vmem:[%s2059_s1 + $0x40] sm:$0xff] %v885_v2  ;;  %v736_v39 = vmul.f32 0.6931472, %v1173_v53  ;;  %1194 = vlog2.f32 %v715_v24  ;;  %v716_v23 = vadd.f32 1.0, %v684_v36 }
 0x151   :  { %v1177_v17 = vpop.eup %1176  ;;  %v805_v60 = vmul.f32 -0.75, %v766_v3  ;;  %v768_v56 = vmul.f32 0.6931472, %v1175_v32  ;;  %1196 = vlog2.f32 %v700_v54 }
 0x152   :  { %v1179_v49 = vpop.eup %1178  ;;  %v790_v33 = vmul.f32 -0.75, %v736_v39  ;;  %v738_v48 = vmul.f32 0.6931472, %v1177_v17  ;;  %1198 = vlog2.f32 %v716_v23 }
 0x153   :  { %v1181_v61 = vpop.eup %1180  ;;  %v861_v57 = vmul.f32 1.442695, %v805_v60  ;;  %v806_v62 = vmul.f32 -0.75, %v768_v56  ;;  %v770_v55 = vmul.f32 0.6931472, %v1179_v49 }
 0x154   :  { %v1183_v6 = vpop.eup %1182  ;;  %v831_v51 = vmul.f32 1.442695, %v790_v33  ;;  %v791_v8 = vmul.f32 -0.75, %v738_v48  ;;  %v740_v13 = vmul.f32 0.6931472, %v1181_v61 }
 0x155   :  { %v1185_v15 = vpop.eup %1184  ;;  %1200 = vpow2.f32 %v861_v57  ;;  %v863_v52 = vmul.f32 1.442695, %v806_v62  ;;  %v807_v5 = vmul.f32 -0.75, %v770_v55  ;;  %v772_v16 = vmul.f32 0.6931472, %v1183_v6 }
 0x156   :  { %v1187_v22 = vpop.eup %1186  ;;  %1202 = vpow2.f32 %v831_v51  ;;  %v833_v63 = vmul.f32 1.442695, %v791_v8  ;;  %v792_v14 = vmul.f32 -0.75, %v740_v13  ;;  %v742_v25 = vmul.f32 0.6931472, %v1185_v15 }
 0x157   :  { %v1189_v30 = vpop.eup %1188  ;;  %1204 = vpow2.f32 %v863_v52  ;;  %v865_v0 = vmul.f32 1.442695, %v807_v5  ;;  %v808_v41 = vmul.f32 -0.75, %v772_v16  ;;  %v774_v40 = vmul.f32 0.6931472, %v1187_v22 }
 0x158   :  { %v1191_v31 = vpop.eup %1190  ;;  %1206 = vpow2.f32 %v833_v63  ;;  %v835_v1 = vmul.f32 1.442695, %v792_v14  ;;  %v793_v38 = vmul.f32 -0.75, %v742_v25  ;;  %v744_v50 = vmul.f32 0.6931472, %v1189_v30 }
 0x159   :  { %v1193_v37 = vpop.eup %1192  ;;  %1208 = vpow2.f32 %v865_v0  ;;  %v867_v58 = vmul.f32 1.442695, %v808_v41  ;;  %v809_v4 = vmul.f32 -0.75, %v774_v40  ;;  %v776_v42 = vmul.f32 0.6931472, %v1191_v31  ;;  %v2138_v0 = vld [vmem:[#allocation3_spill] sm:$0xff] }
 0x15a   :  { %v1195_v45 = vpop.eup %1194  ;;  %1210 = vpow2.f32 %v835_v1  ;;  %v837_v9 = vmul.f32 1.442695, %v793_v38  ;;  %v794_v59 = vmul.f32 -0.75, %v744_v50  ;;  %v746_v7 = vmul.f32 0.6931472, %v1193_v37 }
 0x15b   :  { %v1197_v46 = vpop.eup %1196  ;;  %1212 = vpow2.f32 %v867_v58  ;;  %v869_v10 = vmul.f32 1.442695, %v809_v4  ;;  %v810_v24 = vmul.f32 -0.75, %v776_v42  ;;  %v778_v21 = vmul.f32 0.6931472, %v1195_v45 }
 0x15c   :  { %v1199_v47 = vpop.eup %1198  ;;  %1214 = vpow2.f32 %v837_v9  ;;  %v839_v2 = vmul.f32 1.442695, %v794_v59  ;;  %v795_v36 = vmul.f32 -0.75, %v746_v7  ;;  %v748_v53 = vmul.f32 0.6931472, %v1197_v46 }
 0x15d   :  { %1216 = vpow2.f32 %v869_v10  ;;  %v871_v3 = vmul.f32 1.442695, %v810_v24  ;;  %v811_v54 = vmul.f32 -0.75, %v778_v21  ;;  %v780_v32 = vmul.f32 0.6931472, %v1199_v47 }
 0x15e   :  { %1218 = vpow2.f32 %v839_v2  ;;  %v841_v39 = vmul.f32 1.442695, %v795_v36  ;;  %v796_v23 = vmul.f32 -0.75, %v748_v53 }
 0x15f   :  { %v1201_v17 = vpop.eup %1200  ;;  %1220 = vpow2.f32 %v871_v3  ;;  %v873_v60 = vmul.f32 1.442695, %v811_v54  ;;  %v812_v56 = vmul.f32 -0.75, %v780_v32 }
 0x160   :  { %v1203_v49 = vpop.eup %1202  ;;  %v901_v33 = vmul.f32 %v1201_v17, %v1791_v18  ;;  %1222 = vpow2.f32 %v841_v39  ;;  %v843_v48 = vmul.f32 1.442695, %v796_v23 }
 0x161   :  { %v1205_v61 = vpop.eup %1204  ;;  %v886_v57 = vmul.f32 %v1203_v49, %v1768_v11  ;;  %1224 = vpow2.f32 %v873_v60  ;;  %v875_v62 = vmul.f32 1.442695, %v812_v56 }
 0x162   :  { %v1207_v55 = vpop.eup %1206  ;;  %933 = vst [vmem:[%s2059_s1 + $0xc0] sm:$0xff] %v901_v33  ;;  %v902_v6 = vmul.f32 %v1205_v61, %v1773_v12  ;;  %1226 = vpow2.f32 %v843_v48 }
 0x163   :  { %v1209_v51 = vpop.eup %1208  ;;  %918 = vst [vmem:[%s2059_s1 + $0x48] sm:$0xff] %v886_v57  ;;  %v887_v18 = vmul.f32 %v1207_v55, %v1814_v26  ;;  %1228 = vpow2.f32 %v875_v62 }
 0x164   :  { %v1211_v8 = vpop.eup %1210  ;;  %934 = vst [vmem:[%s2059_s1 + $0xc8] sm:$0xff] %v902_v6  ;;  %v903_v11 = vmul.f32 %v1209_v51, %v1819_v27 }
 0x165   :  { %v1213_v13 = vpop.eup %1212  ;;  %919 = vst [vmem:[%s2059_s1 + $0x50] sm:$0xff] %v887_v18  ;;  %v888_v12 = vmul.f32 %v1211_v8, %v1796_v19 }
 0x166   :  { %v1215_v15 = vpop.eup %1214  ;;  %935 = vst [vmem:[%s2059_s1 + $0xd0] sm:$0xff] %v903_v11  ;;  %v904_v26 = vmul.f32 %v1213_v13, %v1801_v20 }
 0x167   :  { %v1217_v52 = vpop.eup %1216  ;;  %920 = vst [vmem:[%s2059_s1 + $0x58] sm:$0xff] %v888_v12  ;;  %v889_v27 = vmul.f32 %v1215_v15, %v1842_v34 }
 0x168   :  { %v1219_v5 = vpop.eup %1218  ;;  %936 = vst [vmem:[%s2059_s1 + $0xd8] sm:$0xff] %v904_v26  ;;  %v905_v19 = vmul.f32 %v1217_v52, %v1847_v35 }
 0x169   :  { %v1221_v16 = vpop.eup %1220  ;;  %921 = vst [vmem:[%s2059_s1 + $0x60] sm:$0xff] %v889_v27  ;;  %v890_v20 = vmul.f32 %v1219_v5, %v1824_v28 }
 0x16a   :  { %v1223_v22 = vpop.eup %1222  ;;  %937 = vst [vmem:[%s2059_s1 + $0xe0] sm:$0xff] %v905_v19  ;;  %v906_v34 = vmul.f32 %v1221_v16, %v1829_v29  ;;  %v2137_v29 = vld [vmem:[#allocation2_spill] sm:$0xff] }
 0x16b   :  { %v1225_v63 = vpop.eup %1224  ;;  %922 = vst [vmem:[%s2059_s1 + $0x68] sm:$0xff] %v890_v20  ;;  %v891_v35 = vmul.f32 %v1223_v22, %v1870_v43 }
 0x16c   :  { %v1227_v14 = vpop.eup %1226  ;;  %938 = vst [vmem:[%s2059_s1 + $0xe8] sm:$0xff] %v906_v34  ;;  %v907_v28 = vmul.f32 %v1225_v63, %v1875_v44 }
 0x16d   :  { %v1229_v25 = vpop.eup %1228  ;;  %923 = vst [vmem:[%s2059_s1 + $0x70] sm:$0xff] %v891_v35  ;;  %v892_v30 = vmul.f32 %v1227_v14, %v2137_v29 }
 0x16e   :  { %939 = vst [vmem:[%s2059_s1 + $0xf0] sm:$0xff] %v907_v28  ;;  %v908_v43 = vmul.f32 %v1229_v25, %v2138_v0 }
 0x16f   :  { %924 = vst [vmem:[%s2059_s1 + $0x78] sm:$0xff] %v892_v30 }
 0x170   :  { %940 = vst [vmem:[%s2059_s1 + $0xf8] sm:$0xff] %v908_v43 }

// kernel: feature_extractor_forward.13
= control target key start
LH: loop header
LB: loop body
LE: loop exit
PB: predicated region body
PF: predicated region fallthrough
CT: control target
= control target key end

     0   :  { %s11596_s1 = inlined_call_operand.vmem [shape: f32[1,2304,384], index: 1, kind: input, shape index: {}]   ;;  %s11597_s0 = inlined_call_operand.vmem [shape: f32[1,128,2304], index: 0, kind: input, shape index: {}]   ;;  %s11598_s2 = inlined_call_operand.vmem [shape: f32[1,1,384], index: 2, kind: input, shape index: {}]   ;;  %s11599_s3 = inlined_call_operand.vmem [shape: f32[128,384], index: 3, kind: output, shape index: {}]  }
   0x1   :  { %v303_v0 = vld [vmem:[%s11596_s1 + $0x8] sm:$0xff]  ;;  %v306_v1 = vld [vmem:[%s11596_s1 + $0x20] sm:$0xff]  ;;  %v352_v2 = vld [vmem:[%s11596_s1 + $0x190] sm:$0xff] }
   0x2   :  { %v5045_v3 = vpack.c.bf16 %v306_v1, %v303_v0  ;;  %v355_v4 = vld [vmem:[%s11596_s1 + $0x1a8] sm:$0xff]  ;;  %v302_v5 = vld [vmem:[%s11596_s1] sm:$0xff]  ;;  %v305_v6 = vld [vmem:[%s11596_s1 + $0x18] sm:$0xff] }
   0x3   :  { %v5621_v7 = vpack.c.bf16 %v355_v4, %v352_v2  ;;  %v5047_v8 = vpack.c.bf16 %v305_v6, %v302_v5  ;;  %v304_v9 = vld [vmem:[%s11596_s1 + $0x10] sm:$0xff]  ;;  %v307_v10 = vld [vmem:[%s11596_s1 + $0x28] sm:$0xff]  ;;  %v309_v11 = vld [vmem:[%s11596_s1 + $0x38] sm:$0xff] }
   0x4   :  { %5046 = vmatprep.subr.bf16.mxu0 %v5045_v3  ;;  %v5623_v12 = vpack.c.bf16 %v307_v10, %v304_v9  ;;  %v312_v13 = vld [vmem:[%s11596_s1 + $0x50] sm:$0xff]  ;;  %v358_v14 = vld [vmem:[%s11596_s1 + $0x1c0] sm:$0xff]  ;;  %v361_v15 = vld [vmem:[%s11596_s1 + $0x1d8] sm:$0xff] }
   0x5   :  { %5622 = vmatprep.subr.bf16.mxu1 %v5621_v7  ;;  %5048 = vmatpush1.bf16.msra.mxu0 %v5047_v8  ;;  %v5049_v16 = vpack.c.bf16 %v312_v13, %v309_v11  ;;  %v5625_v17 = vpack.c.bf16 %v361_v15, %v358_v14  ;;  %v308_v18 = vld [vmem:[%s11596_s1 + $0x30] sm:$0xff]  ;;  %v311_v19 = vld [vmem:[%s11596_s1 + $0x48] sm:$0xff]  ;;  %v310_v20 = vld [vmem:[%s11596_s1 + $0x40] sm:$0xff] }
   0x6   :  { %5624 = vmatpush3.bf16.msra.mxu1 %v5623_v12  ;;  %v5051_v21 = vpack.c.bf16 %v311_v19, %v308_v18  ;;  %v313_v22 = vld [vmem:[%s11596_s1 + $0x58] sm:$0xff]  ;;  %v315_v23 = vld [vmem:[%s11596_s1 + $0x68] sm:$0xff]  ;;  %v318_v24 = vld [vmem:[%s11596_s1 + $0x80] sm:$0xff] }
   0x7   :  { %5050 = vmatprep.subr.bf16.mxu0 %v5049_v16  ;;  %5626 = vmatprep.subr.bf16.mxu1 %v5625_v17  ;;  %v5627_v25 = vpack.c.bf16 %v313_v22, %v310_v20  ;;  %v5053_v26 = vpack.c.bf16 %v318_v24, %v315_v23  ;;  %v364_v27 = vld [vmem:[%s11596_s1 + $0x1f0] sm:$0xff]  ;;  %v367_v28 = vld [vmem:[%s11596_s1 + $0x208] sm:$0xff]  ;;  %v314_v29 = vld [vmem:[%s11596_s1 + $0x60] sm:$0xff] }
   0x8   :  { %v5629_v30 = vpack.c.bf16 %v367_v28, %v364_v27  ;;  %v317_v31 = vld [vmem:[%s11596_s1 + $0x78] sm:$0xff]  ;;  %v316_v32 = vld [vmem:[%s11596_s1 + $0x70] sm:$0xff]  ;;  %v319_v33 = vld [vmem:[%s11596_s1 + $0x88] sm:$0xff] }
   0x9   :  { %5052 = vmatpush1.bf16.msra.mxu0 %v5051_v21  ;;  %v5055_v34 = vpack.c.bf16 %v317_v31, %v314_v29  ;;  %v321_v35 = vld [vmem:[%s11596_s1 + $0x98] sm:$0xff]  ;;  %v324_v36 = vld [vmem:[%s11596_s1 + $0xb0] sm:$0xff]  ;;  %v370_v37 = vld [vmem:[%s11596_s1 + $0x220] sm:$0xff]  ;;  %v5631_v38 = vpack.c.bf16 %v319_v33, %v316_v32 }
   0xa   :  { %5628 = vmatpush3.bf16.msra.mxu1 %v5627_v25  ;;  %5054 = vmatprep.subr.bf16.mxu0 %v5053_v26  ;;  %v5057_v39 = vpack.c.bf16 %v324_v36, %v321_v35  ;;  %v373_v40 = vld [vmem:[%s11596_s1 + $0x238] sm:$0xff]  ;;  %v320_v41 = vld [vmem:[%s11596_s1 + $0x90] sm:$0xff]  ;;  %v323_v42 = vld [vmem:[%s11596_s1 + $0xa8] sm:$0xff] }
   0xb   :  { %5630 = vmatprep.subr.bf16.mxu1 %v5629_v30  ;;  %v5633_v43 = vpack.c.bf16 %v373_v40, %v370_v37  ;;  %v322_v44 = vld [vmem:[%s11596_s1 + $0xa0] sm:$0xff]  ;;  %v325_v45 = vld [vmem:[%s11596_s1 + $0xb8] sm:$0xff]  ;;  %v327_v46 = vld [vmem:[%s11596_s1 + $0xc8] sm:$0xff]  ;;  %v5059_v50 = vpack.c.bf16 %v323_v42, %v320_v41 }
   0xc   :  { %v330_v47 = vld [vmem:[%s11596_s1 + $0xe0] sm:$0xff]  ;;  %v376_v48 = vld [vmem:[%s11596_s1 + $0x250] sm:$0xff]  ;;  %v379_v49 = vld [vmem:[%s11596_s1 + $0x268] sm:$0xff]  ;;  %v5635_v51 = vpack.c.bf16 %v325_v45, %v322_v44 }
   0xd   :  { %5056 = vmatpush1.bf16.msra.mxu0 %v5055_v34  ;;  %v5061_v52 = vpack.c.bf16 %v330_v47, %v327_v46  ;;  %v326_v53 = vld [vmem:[%s11596_s1 + $0xc0] sm:$0xff]  ;;  %v329_v54 = vld [vmem:[%s11596_s1 + $0xd8] sm:$0xff]  ;;  %v328_v55 = vld [vmem:[%s11596_s1 + $0xd0] sm:$0xff]  ;;  %v5637_v56 = vpack.c.bf16 %v379_v49, %v376_v48 }
   0xe   :  { %5632 = vmatpush3.bf16.msra.mxu1 %v5631_v38  ;;  %5058 = vmatprep.subr.bf16.mxu0 %v5057_v39  ;;  %v331_v57 = vld [vmem:[%s11596_s1 + $0xe8] sm:$0xff]  ;;  %v333_v58 = vld [vmem:[%s11596_s1 + $0xf8] sm:$0xff]  ;;  %v336_v59 = vld [vmem:[%s11596_s1 + $0x110] sm:$0xff]  ;;  %v5063_v62 = vpack.c.bf16 %v329_v54, %v326_v53 }
   0xf   :  { %5634 = vmatprep.subr.bf16.mxu1 %v5633_v43  ;;  %v382_v60 = vld [vmem:[%s11596_s1 + $0x280] sm:$0xff]  ;;  %v385_v61 = vld [vmem:[%s11596_s1 + $0x298] sm:$0xff]  ;;  %v5639_v63 = vpack.c.bf16 %v331_v57, %v328_v55  ;;  %v5065_v0 = vpack.c.bf16 %v336_v59, %v333_v58  ;;  %v332_v1 = vld [vmem:[%s11596_s1 + $0xf0] sm:$0xff] }
  0x10   :  { %v335_v2 = vld [vmem:[%s11596_s1 + $0x108] sm:$0xff]  ;;  %v334_v3 = vld [vmem:[%s11596_s1 + $0x100] sm:$0xff]  ;;  %v5641_v4 = vpack.c.bf16 %v385_v61, %v382_v60  ;;  %v337_v5 = vld [vmem:[%s11596_s1 + $0x118] sm:$0xff] }
  0x11   :  { %5060 = vmatpush1.bf16.msra.mxu0 %v5059_v50  ;;  %v339_v6 = vld [vmem:[%s11596_s1 + $0x128] sm:$0xff]  ;;  %v342_v7 = vld [vmem:[%s11596_s1 + $0x140] sm:$0xff]  ;;  %v388_v8 = vld [vmem:[%s11596_s1 + $0x2b0] sm:$0xff]  ;;  %v5067_v10 = vpack.c.bf16 %v335_v2, %v332_v1  ;;  %v5643_v12 = vpack.c.bf16 %v337_v5, %v334_v3 }
  0x12   :  { %5636 = vmatpush3.bf16.msra.mxu1 %v5635_v51  ;;  %5062 = vmatprep.subr.bf16.mxu0 %v5061_v52  ;;  %v391_v9 = vld [vmem:[%s11596_s1 + $0x2c8] sm:$0xff]  ;;  %v338_v11 = vld [vmem:[%s11596_s1 + $0x120] sm:$0xff]  ;;  %v5069_v13 = vpack.c.bf16 %v342_v7, %v339_v6  ;;  %v341_v14 = vld [vmem:[%s11596_s1 + $0x138] sm:$0xff] }
  0x13   :  { %5638 = vmatprep.subr.bf16.mxu1 %v5637_v56  ;;  %v340_v15 = vld [vmem:[%s11596_s1 + $0x130] sm:$0xff]  ;;  %v15_v16 = vld [vmem:[%s11597_s0 + $0x8] sm:$0xff]  ;;  %v5645_v17 = vpack.c.bf16 %v391_v9, %v388_v8  ;;  %v345_v19 = vld [vmem:[%s11596_s1 + $0x158] sm:$0xff]  ;;  %v5071_v23 = vpack.c.bf16 %v341_v14, %v338_v11 }
  0x14   :  { %v343_v18 = vld [vmem:[%s11596_s1 + $0x148] sm:$0xff]  ;;  %v348_v20 = vld [vmem:[%s11596_s1 + $0x170] sm:$0xff]  ;;  %2696 = vmatprep.mubr.f32.mxu1 %v15_v16  ;;  %v394_v21 = vld [vmem:[%s11596_s1 + $0x2e0] sm:$0xff]  ;;  %1247 = vmatprep.mubr.f32.mxu0 %v15_v16 }
  0x15   :  { %5064 = vmatpush1.bf16.msra.mxu0 %v5063_v62  ;;  %v397_v22 = vld [vmem:[%s11596_s1 + $0x2f8] sm:$0xff]  ;;  %v5647_v24 = vpack.c.bf16 %v343_v18, %v340_v15  ;;  %v5073_v25 = vpack.c.bf16 %v348_v20, %v345_v19  ;;  %v344_v26 = vld [vmem:[%s11596_s1 + $0x150] sm:$0xff]  ;;  %v347_v27 = vld [vmem:[%s11596_s1 + $0x168] sm:$0xff] }
  0x16   :  { %5640 = vmatpush3.bf16.msra.mxu1 %v5639_v63  ;;  %5066 = vmatprep.subr.bf16.mxu0 %v5065_v0  ;;  %v346_v28 = vld [vmem:[%s11596_s1 + $0x160] sm:$0xff]  ;;  %v5649_v29 = vpack.c.bf16 %v397_v22, %v394_v21  ;;  %v349_v30 = vld [vmem:[%s11596_s1 + $0x178] sm:$0xff]  ;;  %v351_v31 = vld [vmem:[%s11596_s1 + $0x188] sm:$0xff]  ;;  %v5075_v33 = vpack.c.bf16 %v347_v27, %v344_v26 }
  0x17   :  { %5642 = vmatprep.subr.bf16.mxu1 %v5641_v4  ;;  %v354_v32 = vld [vmem:[%s11596_s1 + $0x1a0] sm:$0xff]  ;;  %v5651_v34 = vpack.c.bf16 %v349_v30, %v346_v28  ;;  %v353_v37 = vld [vmem:[%s11596_s1 + $0x198] sm:$0xff]  ;;  %v360_v39 = vld [vmem:[%s11596_s1 + $0x1d0] sm:$0xff] }
  0x18   :  { %v5077_v35 = vpack.c.bf16 %v354_v32, %v351_v31  ;;  %v350_v36 = vld [vmem:[%s11596_s1 + $0x180] sm:$0xff]  ;;  %v357_v38 = vld [vmem:[%s11596_s1 + $0x1b8] sm:$0xff]  ;;  %v356_v43 = vld [vmem:[%s11596_s1 + $0x1b0] sm:$0xff] }
  0x19   :  { %5068 = vmatpush1.bf16.msra.mxu0 %v5067_v10  ;;  %v5079_v40 = vpack.c.bf16 %v353_v37, %v350_v36  ;;  %v6626_v41 = vld [vmem:[%s11597_s0] sm:$0xff]  ;;  %v5081_v42 = vpack.c.bf16 %v360_v39, %v357_v38  ;;  %v359_v44 = vld [vmem:[%s11596_s1 + $0x1c8] sm:$0xff]  ;;  %v6637_v45 = vld [vmem:[%s11597_s0 + $0x98] sm:$0xff] }
  0x1a   :  { %5644 = vmatpush3.bf16.msra.mxu1 %v5643_v12  ;;  %5070 = vmatprep.subr.bf16.mxu0 %v5069_v13  ;;  %v363_v46 = vld [vmem:[%s11596_s1 + $0x1e8] sm:$0xff]  ;;  %v366_v47 = vld [vmem:[%s11596_s1 + $0x200] sm:$0xff]  ;;  %v6648_v48 = vld [vmem:[%s11597_s0 + $0x90] sm:$0xff]  ;;  %v5083_v49 = vpack.c.bf16 %v359_v44, %v356_v43 }
  0x1b   :  { %5646 = vmatprep.subr.bf16.mxu1 %v5645_v17  ;;  %v6654_v50 = vld [vmem:[%s11597_s0 + $0x128] sm:$0xff]  ;;  %v362_v51 = vld [vmem:[%s11596_s1 + $0x1e0] sm:$0xff]  ;;  %v365_v52 = vld [vmem:[%s11596_s1 + $0x1f8] sm:$0xff]  ;;  %v5085_v53 = vpack.c.bf16 %v366_v47, %v363_v46 }
  0x1c   :  { %v369_v54 = vld [vmem:[%s11596_s1 + $0x218] sm:$0xff]  ;;  %v448_v55 = vld [vmem:[%s11596_s1 + $0x490] sm:$0xff]  ;;  %v451_v56 = vld [vmem:[%s11596_s1 + $0x4a8] sm:$0xff]  ;;  %v5087_v63 = vpack.c.bf16 %v365_v52, %v362_v51 }
  0x1d   :  { %5072 = vmatpush1.bf16.msra.mxu0 %v5071_v23  ;;  %v372_v57 = vld [vmem:[%s11596_s1 + $0x230] sm:$0xff]  ;;  %v5653_v58 = vpack.c.bf16 %v451_v56, %v448_v55  ;;  %v403_v60 = vld [vmem:[%s11596_s1 + $0x328] sm:$0xff]  ;;  %v6685_v62 = vld [vmem:[%s11597_s0 + $0x120] sm:$0xff] }
  0x1e   :  { %5648 = vmatpush3.bf16.msra.mxu1 %v5647_v24  ;;  %5074 = vmatprep.subr.bf16.mxu0 %v5073_v25  ;;  %v400_v59 = vld [vmem:[%s11596_s1 + $0x310] sm:$0xff]  ;;  %v6690_v0 = vld [vmem:[%s11597_s0 + $0x1b8] sm:$0xff]  ;;  %v5089_v1 = vpack.c.bf16 %v372_v57, %v369_v54  ;;  %v371_v3 = vld [vmem:[%s11596_s1 + $0x228] sm:$0xff] }
  0x1f   :  { %5650 = vmatprep.subr.bf16.mxu1 %v5649_v29  ;;  %v5655_v61 = vpack.c.bf16 %v403_v60, %v400_v59  ;;  %v368_v2 = vld [vmem:[%s11596_s1 + $0x210] sm:$0xff]  ;;  %v375_v4 = vld [vmem:[%s11596_s1 + $0x248] sm:$0xff]  ;;  %v378_v5 = vld [vmem:[%s11596_s1 + $0x260] sm:$0xff] }
  0x20   :  { %v454_v6 = vld [vmem:[%s11596_s1 + $0x4c0] sm:$0xff]  ;;  %v457_v7 = vld [vmem:[%s11596_s1 + $0x4d8] sm:$0xff]  ;;  %v6721_v11 = vld [vmem:[%s11597_s0 + $0x1b0] sm:$0xff]  ;;  %v5091_v12 = vpack.c.bf16 %v371_v3, %v368_v2  ;;  %v5093_v16 = vpack.c.bf16 %v378_v5, %v375_v4 }
  0x21   :  { %5076 = vmatpush1.bf16.msra.mxu0 %v5075_v33  ;;  %v5657_v8 = vpack.c.bf16 %v457_v7, %v454_v6  ;;  %v406_v9 = vld [vmem:[%s11596_s1 + $0x340] sm:$0xff]  ;;  %v409_v10 = vld [vmem:[%s11596_s1 + $0x358] sm:$0xff]  ;;  %v6726_v13 = vld [vmem:[%s11597_s0 + $0x248] sm:$0xff] }
  0x22   :  { %5652 = vmatpush3.bf16.msra.mxu1 %v5651_v34  ;;  %5078 = vmatprep.subr.bf16.mxu0 %v5077_v35  ;;  %v374_v14 = vld [vmem:[%s11596_s1 + $0x240] sm:$0xff]  ;;  %v5659_v15 = vpack.c.bf16 %v409_v10, %v406_v9  ;;  %v377_v17 = vld [vmem:[%s11596_s1 + $0x258] sm:$0xff]  ;;  %v460_v18 = vld [vmem:[%s11596_s1 + $0x4f0] sm:$0xff] }
  0x23   :  { %5654 = vmatprep.subr.bf16.mxu1 %v5653_v58  ;;  %v463_v19 = vld [vmem:[%s11596_s1 + $0x508] sm:$0xff]  ;;  %v381_v20 = vld [vmem:[%s11596_s1 + $0x278] sm:$0xff]  ;;  %v384_v21 = vld [vmem:[%s11596_s1 + $0x290] sm:$0xff]  ;;  %v5095_v26 = vpack.c.bf16 %v377_v17, %v374_v14 }
  0x24   :  { %v5661_v22 = vpack.c.bf16 %v463_v19, %v460_v18  ;;  %v412_v23 = vld [vmem:[%s11596_s1 + $0x370] sm:$0xff]  ;;  %v6753_v24 = vld [vmem:[%s11597_s0 + $0x240] sm:$0xff]  ;;  %v415_v25 = vld [vmem:[%s11596_s1 + $0x388] sm:$0xff]  ;;  %v5097_v31 = vpack.c.bf16 %v384_v21, %v381_v20 }
  0x25   :  { %2697 = vmatmul.mubr.f32.vlgmr.msra.gmra.mrb[0].mxu1 %v6626_v41  ;;  %5080 = vmatpush1.bf16.msra.mxu0 %v5079_v40  ;;  %v6762_v27 = vld [vmem:[%s11597_s0 + $0x2d8] sm:$0xff]  ;;  %v380_v28 = vld [vmem:[%s11596_s1 + $0x270] sm:$0xff]  ;;  %v5663_v29 = vpack.c.bf16 %v415_v25, %v412_v23  ;;  %v466_v30 = vld [vmem:[%s11596_s1 + $0x520] sm:$0xff] }
  0x26   :  { %2701 = vmatprep.mubr.f32.mxu1 %v6637_v45  ;;  %5082 = vmatprep.subr.bf16.mxu0 %v5081_v42  ;;  %v383_v32 = vld [vmem:[%s11596_s1 + $0x288] sm:$0xff]  ;;  %v469_v34 = vld [vmem:[%s11596_s1 + $0x538] sm:$0xff]  ;;  %v390_v35 = vld [vmem:[%s11596_s1 + $0x2c0] sm:$0xff] }
  0x27   :  { %5656 = vmatpush3.bf16.msra.mxu1 %v5655_v61  ;;  %v387_v33 = vld [vmem:[%s11596_s1 + $0x2a8] sm:$0xff]  ;;  %v5665_v36 = vpack.c.bf16 %v469_v34, %v466_v30  ;;  %v418_v37 = vld [vmem:[%s11596_s1 + $0x3a0] sm:$0xff]  ;;  %v421_v38 = vld [vmem:[%s11596_s1 + $0x3b8] sm:$0xff]  ;;  %v5099_v42 = vpack.c.bf16 %v383_v32, %v380_v28 }
  0x28   :  { %5658 = vmatprep.subr.bf16.mxu1 %v5657_v8  ;;  %v6792_v39 = vld [vmem:[%s11597_s0 + $0x2d0] sm:$0xff]  ;;  %v5667_v40 = vpack.c.bf16 %v421_v38, %v418_v37  ;;  %v386_v43 = vld [vmem:[%s11596_s1 + $0x2a0] sm:$0xff]  ;;  %v475_v46 = vld [vmem:[%s11596_s1 + $0x568] sm:$0xff]  ;;  %v5101_v47 = vpack.c.bf16 %v390_v35, %v387_v33 }
  0x29   :  { %2702 = vmatmul.mubr.f32.gmra.mrb[2].mxu1 %v6648_v48  ;;  %5084 = vmatpush1.bf16.msra.mxu0 %v5083_v49  ;;  %v472_v44 = vld [vmem:[%s11596_s1 + $0x550] sm:$0xff]  ;;  %v389_v49 = vld [vmem:[%s11596_s1 + $0x2b8] sm:$0xff]  ;;  %v427_v52 = vld [vmem:[%s11596_s1 + $0x3e8] sm:$0xff] }
  0x2a   :  { %2706 = vmatprep.mubr.f32.mxu1 %v6654_v50  ;;  %5086 = vmatprep.subr.bf16.mxu0 %v5085_v53  ;;  %v424_v51 = vld [vmem:[%s11596_s1 + $0x3d0] sm:$0xff]  ;;  %v6817_v53 = vld [vmem:[%s11597_s0 + $0x368] sm:$0xff]  ;;  %v393_v54 = vld [vmem:[%s11596_s1 + $0x2d8] sm:$0xff]  ;;  %v5669_v56 = vpack.c.bf16 %v475_v46, %v472_v44  ;;  %v5103_v61 = vpack.c.bf16 %v389_v49, %v386_v43 }
  0x2b   :  { %5660 = vmatpush3.bf16.msra.mxu1 %v5659_v15  ;;  %v396_v55 = vld [vmem:[%s11596_s1 + $0x2f0] sm:$0xff]  ;;  %v5671_v57 = vpack.c.bf16 %v427_v52, %v424_v51  ;;  %v478_v58 = vld [vmem:[%s11596_s1 + $0x580] sm:$0xff]  ;;  %v481_v59 = vld [vmem:[%s11596_s1 + $0x598] sm:$0xff] }
  0x2c   :  { %5662 = vmatprep.subr.bf16.mxu1 %v5661_v22  ;;  %v6835_v60 = vld [vmem:[%s11597_s0 + $0x360] sm:$0xff]  ;;  %v392_v2 = vld [vmem:[%s11596_s1 + $0x2d0] sm:$0xff]  ;;  %v395_v3 = vld [vmem:[%s11596_s1 + $0x2e8] sm:$0xff]  ;;  %v5673_v8 = vpack.c.bf16 %v481_v59, %v478_v58 }
  0x2d   :  { %2707 = vmatmul.mubr.f32.gmra.mrb[4].mxu1 %v6685_v62  ;;  %5088 = vmatpush1.bf16.msra.mxu0 %v5087_v63  ;;  %v430_v63 = vld [vmem:[%s11596_s1 + $0x400] sm:$0xff]  ;;  %v433_v4 = vld [vmem:[%s11596_s1 + $0x418] sm:$0xff]  ;;  %v399_v6 = vld [vmem:[%s11596_s1 + $0x308] sm:$0xff]  ;;  %v5107_v14 = vpack.c.bf16 %v395_v3, %v392_v2 }
  0x2e   :  { %2711 = vmatprep.mubr.f32.mxu1 %v6690_v0  ;;  %5090 = vmatprep.subr.bf16.mxu0 %v5089_v1  ;;  %v5105_v1 = vpack.c.bf16 %v396_v55, %v393_v54  ;;  %v6853_v5 = vld [vmem:[%s11597_s0 + $0x3f8] sm:$0xff]  ;;  %v402_v7 = vld [vmem:[%s11596_s1 + $0x320] sm:$0xff]  ;;  %v5675_v9 = vpack.c.bf16 %v433_v4, %v430_v63  ;;  %v484_v10 = vld [vmem:[%s11596_s1 + $0x5b0] sm:$0xff] }
  0x2f   :  { %5664 = vmatpush3.bf16.msra.mxu1 %v5663_v29  ;;  %v436_v15 = vld [vmem:[%s11596_s1 + $0x430] sm:$0xff]  ;;  %v5109_v18 = vpack.c.bf16 %v402_v7, %v399_v6  ;;  %v398_v19 = vld [vmem:[%s11596_s1 + $0x300] sm:$0xff]  ;;  %v401_v20 = vld [vmem:[%s11596_s1 + $0x318] sm:$0xff] }
  0x30   :  { %5666 = vmatprep.subr.bf16.mxu1 %v5665_v36  ;;  %v6878_v17 = vld [vmem:[%s11597_s0 + $0x3f0] sm:$0xff]  ;;  %v6889_v21 = vld [vmem:[%s11597_s0 + $0x488] sm:$0xff]  ;;  %v405_v22 = vld [vmem:[%s11596_s1 + $0x338] sm:$0xff]  ;;  %v5111_v30 = vpack.c.bf16 %v401_v20, %v398_v19 }
  0x31   :  { %2712 = vmatmul.mubr.f32.gmra.mrb[6].mxu1 %v6721_v11  ;;  %5092 = vmatpush1.bf16.msra.mxu0 %v5091_v12  ;;  %v487_v12 = vld [vmem:[%s11596_s1 + $0x5c8] sm:$0xff]  ;;  %v408_v25 = vld [vmem:[%s11596_s1 + $0x350] sm:$0xff]  ;;  %v490_v28 = vld [vmem:[%s11596_s1 + $0x5e0] sm:$0xff] }
  0x32   :  { %2716 = vmatprep.mubr.f32.mxu1 %v6726_v13  ;;  %5094 = vmatprep.subr.bf16.mxu0 %v5093_v16  ;;  %v439_v16 = vld [vmem:[%s11596_s1 + $0x448] sm:$0xff]  ;;  %v5677_v23 = vpack.c.bf16 %v487_v12, %v484_v10  ;;  %v493_v29 = vld [vmem:[%s11596_s1 + $0x5f8] sm:$0xff]  ;;  %v6914_v33 = vld [vmem:[%s11597_s0 + $0x480] sm:$0xff]  ;;  %v5113_v37 = vpack.c.bf16 %v408_v25, %v405_v22 }
  0x33   :  { %5668 = vmatpush3.bf16.msra.mxu1 %v5667_v40  ;;  %v445_v32 = vld [vmem:[%s11596_s1 + $0x478] sm:$0xff]  ;;  %v404_v34 = vld [vmem:[%s11596_s1 + $0x330] sm:$0xff]  ;;  %v407_v35 = vld [vmem:[%s11596_s1 + $0x348] sm:$0xff]  ;;  %v5681_v38 = vpack.c.bf16 %v493_v29, %v490_v28 }
  0x34   :  { %5670 = vmatprep.subr.bf16.mxu1 %v5669_v56  ;;  %v6925_v36 = vld [vmem:[%s11597_s0 + $0x518] sm:$0xff]  ;;  %v411_v40 = vld [vmem:[%s11596_s1 + $0x368] sm:$0xff]  ;;  %v5115_v44 = vpack.c.bf16 %v407_v35, %v404_v34  ;;  %v410_v46 = vld [vmem:[%s11596_s1 + $0x360] sm:$0xff] }
  0x35   :  { %2717 = vmatmul.mubr.f32.gmra.mrb[8].mxu1 %v6753_v24  ;;  %5096 = vmatpush1.bf16.msra.mxu0 %v5095_v26  ;;  %v5679_v26 = vpack.c.bf16 %v439_v16, %v436_v15  ;;  %v417_v51 = vld [vmem:[%s11596_s1 + $0x398] sm:$0xff]  ;;  %v420_v52 = vld [vmem:[%s11596_s1 + $0x3b0] sm:$0xff]  ;;  %v419_v56 = vld [vmem:[%s11596_s1 + $0x3a8] sm:$0xff] }
  0x36   :  { %2721 = vmatprep.mubr.f32.mxu1 %v6762_v27  ;;  %5098 = vmatprep.subr.bf16.mxu0 %v5097_v31  ;;  %v442_v31 = vld [vmem:[%s11596_s1 + $0x460] sm:$0xff]  ;;  %v416_v55 = vld [vmem:[%s11596_s1 + $0x390] sm:$0xff]  ;;  %v423_v58 = vld [vmem:[%s11596_s1 + $0x3c8] sm:$0xff] }
  0x37   :  { %5672 = vmatpush3.bf16.msra.mxu1 %v5671_v57  ;;  %v5683_v43 = vpack.c.bf16 %v445_v32, %v442_v31  ;;  %v5121_v57 = vpack.c.bf16 %v420_v52, %v417_v51  ;;  %v426_v59 = vld [vmem:[%s11596_s1 + $0x3e0] sm:$0xff]  ;;  %v429_v3 = vld [vmem:[%s11596_s1 + $0x3f8] sm:$0xff]  ;;  %v432_v4 = vld [vmem:[%s11596_s1 + $0x410] sm:$0xff] }
  0x38   :  { %5674 = vmatprep.subr.bf16.mxu1 %v5673_v8  ;;  %v422_v63 = vld [vmem:[%s11596_s1 + $0x3c0] sm:$0xff]  ;;  %v5125_v2 = vpack.c.bf16 %v426_v59, %v423_v58  ;;  %v544_v7 = vld [vmem:[%s11596_s1 + $0x790] sm:$0xff]  ;;  %v431_v10 = vld [vmem:[%s11596_s1 + $0x408] sm:$0xff] }
  0x39   :  { %2722 = vmatmul.mubr.f32.gmra.mrb[10].mxu1 %v6792_v39  ;;  %5100 = vmatpush1.bf16.msra.mxu0 %v5099_v42  ;;  %v414_v42 = vld [vmem:[%s11596_s1 + $0x380] sm:$0xff]  ;;  %v435_v15 = vld [vmem:[%s11596_s1 + $0x428] sm:$0xff]  ;;  %v437_v20 = vld [vmem:[%s11596_s1 + $0x438] sm:$0xff] }
  0x3a   :  { %2726 = vmatprep.mubr.f32.mxu1 %v6817_v53  ;;  %5102 = vmatprep.subr.bf16.mxu0 %v5101_v47  ;;  %v413_v47 = vld [vmem:[%s11596_s1 + $0x378] sm:$0xff]  ;;  %v5117_v49 = vpack.c.bf16 %v414_v42, %v411_v40  ;;  %v7024_v8 = vld [vmem:[%s11597_s0 + $0x6c0] sm:$0xff]  ;;  %v444_v25 = vld [vmem:[%s11596_s1 + $0x470] sm:$0xff] }
  0x3b   :  { %5676 = vmatpush3.bf16.msra.mxu1 %v5675_v9  ;;  %v5119_v54 = vpack.c.bf16 %v413_v47, %v410_v46  ;;  %v428_v9 = vld [vmem:[%s11596_s1 + $0x3f0] sm:$0xff]  ;;  %v438_v16 = vld [vmem:[%s11596_s1 + $0x440] sm:$0xff]  ;;  %v443_v29 = vld [vmem:[%s11596_s1 + $0x468] sm:$0xff] }
  0x3c   :  { %5678 = vmatprep.subr.bf16.mxu1 %v5677_v23  ;;  %v434_v19 = vld [vmem:[%s11596_s1 + $0x420] sm:$0xff]  ;;  %v5133_v22 = vpack.c.bf16 %v438_v16, %v435_v15  ;;  %v441_v23 = vld [vmem:[%s11596_s1 + $0x458] sm:$0xff]  ;;  %v440_v28 = vld [vmem:[%s11596_s1 + $0x450] sm:$0xff] }
  0x3d   :  { %2727 = vmatmul.mubr.f32.gmra.mrb[12].mxu1 %v6835_v60  ;;  %5104 = vmatpush1.bf16.msra.mxu0 %v5103_v61  ;;  %v5123_v61 = vpack.c.bf16 %v419_v56, %v416_v55  ;;  %v447_v31 = vld [vmem:[%s11596_s1 + $0x488] sm:$0xff]  ;;  %v450_v32 = vld [vmem:[%s11596_s1 + $0x4a0] sm:$0xff]  ;;  %v5139_v34 = vpack.c.bf16 %v443_v29, %v440_v28  ;;  %v453_v40 = vld [vmem:[%s11596_s1 + $0x4b8] sm:$0xff] }
  0x3e   :  { %2731 = vmatprep.mubr.f32.mxu1 %v6853_v5  ;;  %5106 = vmatprep.subr.bf16.mxu0 %v5105_v1  ;;  %v425_v1 = vld [vmem:[%s11596_s1 + $0x3d8] sm:$0xff]  ;;  %v446_v35 = vld [vmem:[%s11596_s1 + $0x480] sm:$0xff]  ;;  %v456_v42 = vld [vmem:[%s11596_s1 + $0x4d0] sm:$0xff] }
  0x3f   :  { %5680 = vmatpush3.bf16.msra.mxu1 %v5679_v26  ;;  %v5127_v6 = vpack.c.bf16 %v425_v1, %v422_v63  ;;  %v5135_v26 = vpack.c.bf16 %v437_v20, %v434_v19  ;;  %v553_v47 = vld [vmem:[%s11596_s1 + $0x7d8] sm:$0xff]  ;;  %v452_v51 = vld [vmem:[%s11596_s1 + $0x4b0] sm:$0xff]  ;;  %v455_v52 = vld [vmem:[%s11596_s1 + $0x4c8] sm:$0xff] }
  0x40   :  { %5682 = vmatprep.subr.bf16.mxu1 %v5681_v38  ;;  %v5141_v38 = vpack.c.bf16 %v450_v32, %v447_v31  ;;  %v459_v55 = vld [vmem:[%s11596_s1 + $0x4e8] sm:$0xff]  ;;  %v502_v59 = vld [vmem:[%s11596_s1 + $0x640] sm:$0xff]  ;;  %v5147_v63 = vpack.c.bf16 %v455_v52, %v452_v51  ;;  %v565_v16 = vld [vmem:[%s11596_s1 + $0x838] sm:$0xff] }
  0x41   :  { %2732 = vmatmul.mubr.f32.gmra.mrb[14].mxu1 %v6878_v17  ;;  %5108 = vmatpush1.bf16.msra.mxu0 %v5107_v14  ;;  %v5129_v14 = vpack.c.bf16 %v432_v4, %v429_v3  ;;  %v559_v1 = vld [vmem:[%s11596_s1 + $0x808] sm:$0xff]  ;;  %v458_v3 = vld [vmem:[%s11596_s1 + $0x4e0] sm:$0xff]  ;;  %v461_v4 = vld [vmem:[%s11596_s1 + $0x4f8] sm:$0xff] }
  0x42   :  { %2736 = vmatprep.mubr.f32.mxu1 %v6889_v21  ;;  %5110 = vmatprep.subr.bf16.mxu0 %v5109_v18  ;;  %v5131_v18 = vpack.c.bf16 %v431_v10, %v428_v9  ;;  %v468_v9 = vld [vmem:[%s11596_s1 + $0x530] sm:$0xff]  ;;  %v5151_v15 = vpack.c.bf16 %v461_v4, %v458_v3  ;;  %v467_v20 = vld [vmem:[%s11596_s1 + $0x528] sm:$0xff]  ;;  %v514_v29 = vld [vmem:[%s11596_s1 + $0x6a0] sm:$0xff] }
  0x43   :  { %5684 = vmatpush3.bf16.msra.mxu1 %v5683_v43  ;;  %v496_v43 = vld [vmem:[%s11596_s1 + $0x610] sm:$0xff]  ;;  %v571_v32 = vld [vmem:[%s11596_s1 + $0x868] sm:$0xff]  ;;  %v577_v51 = vld [vmem:[%s11596_s1 + $0x898] sm:$0xff] }
  0x44   :  { %1248 = vmatmul.mubr.f32.vlgmr.msra.gmra.mrb[0].mxu0 %v6626_v41  ;;  %v6940_v41 = vld [vmem:[%s11597_s0 + $0x510] sm:$0xff]  ;;  %v583_v3 = vld [vmem:[%s11596_s1 + $0x8c8] sm:$0xff]  ;;  %v7330_v4 = vld [vmem:[%s11597_s0 + $0x2e0] sm:$0xff] }
  0x45   :  { %2737 = vmatmul.mubr.f32.gmra.mrb[16].mxu1 %v6914_v33  ;;  %5112 = vmatpush1.bf16.msra.mxu0 %v5111_v30  ;;  %v5137_v30 = vpack.c.bf16 %v444_v25, %v441_v23  ;;  %v464_v19 = vld [vmem:[%s11596_s1 + $0x510] sm:$0xff]  ;;  %v471_v23 = vld [vmem:[%s11596_s1 + $0x548] sm:$0xff] }
  0x46   :  { %1253 = vmatprep.mubr.f32.mxu0 %v6637_v45  ;;  %2741 = vmatprep.mubr.f32.mxu1 %v6925_v36  ;;  %v6951_v45 = vld [vmem:[%s11597_s0 + $0x5a8] sm:$0xff]  ;;  %v5155_v31 = vpack.c.bf16 %v467_v20, %v464_v19  ;;  %v7292_v52 = vld [vmem:[%s11597_s0 + $0x250] sm:$0xff]  ;;  %v589_v19 = vld [vmem:[%s11596_s1 + $0x8f8] sm:$0xff] }
  0x47   :  { %5114 = vmatprep.subr.bf16.mxu0 %v5113_v37  ;;  %v449_v37 = vld [vmem:[%s11596_s1 + $0x498] sm:$0xff]  ;;  %v7368_v20 = vld [vmem:[%s11597_s0 + $0x370] sm:$0xff] }
  0x48   :  { %1254 = vmatmul.mubr.f32.gmra.mrb[2].mxu0 %v6648_v48  ;;  %v6966_v48 = vld [vmem:[%s11597_s0 + $0x5a0] sm:$0xff]  ;;  %v5143_v46 = vpack.c.bf16 %v449_v37, %v446_v35  ;;  %v473_v37 = vld [vmem:[%s11596_s1 + $0x558] sm:$0xff] }
  0x49   :  { %2742 = vmatmul.mubr.f32.gmra.mrb[18].mxu1 %v6940_v41  ;;  %5116 = vmatpush1.bf16.msra.mxu0 %v5115_v44  ;;  %v499_v44 = vld [vmem:[%s11596_s1 + $0x628] sm:$0xff]  ;;  %v470_v35 = vld [vmem:[%s11596_s1 + $0x540] sm:$0xff] }
  0x4a   :  { %1259 = vmatprep.mubr.f32.mxu0 %v6654_v50  ;;  %2746 = vmatprep.mubr.f32.mxu1 %v6951_v45  ;;  %v6977_v50 = vld [vmem:[%s11597_s0 + $0x638] sm:$0xff]  ;;  %v5687_v56 = vpack.c.bf16 %v499_v44, %v496_v43  ;;  %v480_v43 = vld [vmem:[%s11596_s1 + $0x590] sm:$0xff] }
  0x4b   :  { %5118 = vmatprep.subr.bf16.mxu0 %v5117_v49  ;;  %v7140_v49 = vld [vmem:[%s11597_s0 + $0x10] sm:$0xff] }
  0x4c   :  { %1260 = vmatmul.mubr.f32.gmra.mrb[4].mxu0 %v6685_v62  ;;  %v6992_v62 = vld [vmem:[%s11597_s0 + $0x630] sm:$0xff] }
  0x4d   :  { %2747 = vmatmul.mubr.f32.gmra.mrb[20].mxu1 %v6966_v48  ;;  %5120 = vmatpush1.bf16.msra.mxu0 %v5119_v54  ;;  %v5145_v54 = vpack.c.bf16 %v456_v42, %v453_v40  ;;  %v477_v40 = vld [vmem:[%s11596_s1 + $0x578] sm:$0xff] }
  0x4e   :  { %1265 = vmatprep.mubr.f32.mxu0 %v6690_v0  ;;  %2751 = vmatprep.mubr.f32.mxu1 %v6977_v50  ;;  %v7003_v0 = vld [vmem:[%s11597_s0 + $0x6c8] sm:$0xff] }
  0x4f   :  { %5122 = vmatprep.subr.bf16.mxu0 %v5121_v57  ;;  %v462_v57 = vld [vmem:[%s11596_s1 + $0x500] sm:$0xff] }
  0x50   :  { %1266 = vmatmul.mubr.f32.gmra.mrb[6].mxu0 %v6721_v11  ;;  %v547_v11 = vld [vmem:[%s11596_s1 + $0x7a8] sm:$0xff] }
  0x51   :  { %2752 = vmatmul.mubr.f32.gmra.mrb[22].mxu1 %v6992_v62  ;;  %5124 = vmatpush1.bf16.msra.mxu0 %v5123_v61  ;;  %v5685_v12 = vpack.c.bf16 %v547_v11, %v544_v7  ;;  %v505_v61 = vld [vmem:[%s11596_s1 + $0x658] sm:$0xff] }
  0x52   :  { %1271 = vmatprep.mubr.f32.mxu0 %v6726_v13  ;;  %2756 = vmatprep.mubr.f32.mxu1 %v7003_v0  ;;  %v7035_v13 = vld [vmem:[%s11597_s0 + $0x758] sm:$0xff]  ;;  %v5691_v11 = vpack.c.bf16 %v505_v61, %v502_v59  ;;  %v486_v59 = vld [vmem:[%s11596_s1 + $0x5c0] sm:$0xff] }
  0x53   :  { %5126 = vmatprep.subr.bf16.mxu0 %v5125_v2  ;;  %5686 = vmatprep.subr.bf16.mxu1 %v5685_v12  ;;  %v7178_v2 = vld [vmem:[%s11597_s0 + $0xa0] sm:$0xff]  ;;  %v465_v7 = vld [vmem:[%s11596_s1 + $0x518] sm:$0xff]  ;;  %v508_v12 = vld [vmem:[%s11596_s1 + $0x670] sm:$0xff] }
  0x54   :  { %1272 = vmatmul.mubr.f32.gmra.mrb[8].mxu0 %v6753_v24  ;;  %v7050_v24 = vld [vmem:[%s11597_s0 + $0x750] sm:$0xff] }
  0x55   :  { %2757 = vmatmul.mubr.f32.gmra.mrb[24].mxu1 %v7024_v8  ;;  %5128 = vmatpush1.bf16.msra.mxu0 %v5127_v6  ;;  %v5149_v6 = vpack.c.bf16 %v462_v57, %v459_v55  ;;  %v479_v55 = vld [vmem:[%s11596_s1 + $0x588] sm:$0xff] }
  0x56   :  { %1277 = vmatprep.mubr.f32.mxu0 %v6762_v27  ;;  %2761 = vmatprep.mubr.f32.mxu1 %v7035_v13  ;;  %v7061_v27 = vld [vmem:[%s11597_s0 + $0x7e8] sm:$0xff] }
  0x57   :  { %5130 = vmatprep.subr.bf16.mxu0 %v5129_v14  ;;  %v511_v14 = vld [vmem:[%s11596_s1 + $0x688] sm:$0xff] }
  0x58   :  { %1278 = vmatmul.mubr.f32.gmra.mrb[10].mxu0 %v6792_v39  ;;  %v7076_v39 = vld [vmem:[%s11597_s0 + $0x7e0] sm:$0xff]  ;;  %v5695_v25 = vpack.c.bf16 %v511_v14, %v508_v12  ;;  %v483_v57 = vld [vmem:[%s11596_s1 + $0x5a8] sm:$0xff]  ;;  %v492_v12 = vld [vmem:[%s11596_s1 + $0x5f0] sm:$0xff] }
  0x59   :  { %2762 = vmatmul.mubr.f32.gmra.mrb[26].mxu1 %v7050_v24  ;;  %5132 = vmatpush1.bf16.msra.mxu0 %v5131_v18  ;;  %v7216_v18 = vld [vmem:[%s11597_s0 + $0x130] sm:$0xff] }
  0x5a   :  { %1283 = vmatprep.mubr.f32.mxu0 %v6817_v53  ;;  %2766 = vmatprep.mubr.f32.mxu1 %v7061_v27  ;;  %v7087_v53 = vld [vmem:[%s11597_s0 + $0x878] sm:$0xff] }
  0x5b   :  { %5134 = vmatprep.subr.bf16.mxu0 %v5133_v22  ;;  %v5153_v22 = vpack.c.bf16 %v468_v9, %v465_v7  ;;  %v485_v7 = vld [vmem:[%s11596_s1 + $0x5b8] sm:$0xff] }
  0x5c   :  { %1284 = vmatmul.mubr.f32.gmra.mrb[12].mxu0 %v6835_v60  ;;  %v7102_v60 = vld [vmem:[%s11597_s0 + $0x870] sm:$0xff]  ;;  %v489_v9 = vld [vmem:[%s11596_s1 + $0x5d8] sm:$0xff] }
  0x5d   :  { %2767 = vmatmul.mubr.f32.gmra.mrb[28].mxu1 %v7076_v39  ;;  %5136 = vmatpush1.bf16.msra.mxu0 %v5135_v26  ;;  %v474_v26 = vld [vmem:[%s11596_s1 + $0x560] sm:$0xff] }
  0x5e   :  { %1289 = vmatprep.mubr.f32.mxu0 %v6853_v5  ;;  %2771 = vmatprep.mubr.f32.mxu1 %v7087_v53  ;;  %v7113_v5 = vld [vmem:[%s11597_s0 + $0x18] sm:$0xff] }
  0x5f   :  { %5138 = vmatprep.subr.bf16.mxu0 %v5137_v30  ;;  %v517_v30 = vld [vmem:[%s11596_s1 + $0x6b8] sm:$0xff] }
  0x60   :  { %1290 = vmatmul.mubr.f32.gmra.mrb[14].mxu0 %v6878_v17  ;;  %v550_v17 = vld [vmem:[%s11596_s1 + $0x7c0] sm:$0xff]  ;;  %v5699_v42 = vpack.c.bf16 %v517_v30, %v514_v29 }
  0x61   :  { %2772 = vmatmul.mubr.f32.gmra.mrb[30].mxu1 %v7102_v60  ;;  %5140 = vmatpush1.bf16.msra.mxu0 %v5139_v34  ;;  %v5689_v58 = vpack.c.bf16 %v553_v47, %v550_v17  ;;  %v7254_v34 = vld [vmem:[%s11597_s0 + $0x1c0] sm:$0xff]  ;;  %v523_v17 = vld [vmem:[%s11596_s1 + $0x6e8] sm:$0xff]  ;;  %v5159_v47 = vpack.c.bf16 %v473_v37, %v470_v35 }
  0x62   :  { %1295 = vmatprep.mubr.f32.mxu0 %v6889_v21  ;;  %2841 = vmatprep.mubr.f32.mxu1 %v7113_v5  ;;  %v7151_v21 = vld [vmem:[%s11597_s0 + $0xa8] sm:$0xff]  ;;  %v498_v29 = vld [vmem:[%s11596_s1 + $0x620] sm:$0xff] }
  0x63   :  { %5142 = vmatprep.subr.bf16.mxu0 %v5141_v38  ;;  %v5157_v38 = vpack.c.bf16 %v474_v26, %v471_v23  ;;  %v491_v23 = vld [vmem:[%s11596_s1 + $0x5e8] sm:$0xff]  ;;  %v7406_v37 = vld [vmem:[%s11597_s0 + $0x400] sm:$0xff] }
  0x64   :  { %1296 = vmatmul.mubr.f32.gmra.mrb[16].mxu0 %v6914_v33  ;;  %v556_v33 = vld [vmem:[%s11596_s1 + $0x7f0] sm:$0xff]  ;;  %v495_v26 = vld [vmem:[%s11596_s1 + $0x608] sm:$0xff] }
  0x65   :  { %2842 = vmatmul.mubr.f32.vlgmr.msra.gmra.mrb[32].mxu1 %v7140_v49  ;;  %5144 = vmatpush1.bf16.msra.mxu0 %v5143_v46  ;;  %v5693_v10 = vpack.c.bf16 %v559_v1, %v556_v33  ;;  %v520_v46 = vld [vmem:[%s11596_s1 + $0x6d0] sm:$0xff]  ;;  %v529_v33 = vld [vmem:[%s11596_s1 + $0x718] sm:$0xff]  ;;  %v643_v35 = vld [vmem:[%s11596_s1 + $0xaa8] sm:$0xff] }
  0x66   :  { %1301 = vmatprep.mubr.f32.mxu0 %v6925_v36  ;;  %2846 = vmatprep.mubr.f32.mxu1 %v7151_v21  ;;  %v7189_v36 = vld [vmem:[%s11597_s0 + $0x138] sm:$0xff] }
  0x67   :  { %5146 = vmatprep.subr.bf16.mxu0 %v5145_v54  ;;  %5688 = vmatpush3.bf16.msra.mxu1 %v5687_v56  ;;  %v476_v54 = vld [vmem:[%s11596_s1 + $0x570] sm:$0xff]  ;;  %v5161_v56 = vpack.c.bf16 %v480_v43, %v477_v40  ;;  %v497_v40 = vld [vmem:[%s11596_s1 + $0x618] sm:$0xff] }
  0x68   :  { %1302 = vmatmul.mubr.f32.gmra.mrb[18].mxu0 %v6940_v41  ;;  %5690 = vmatprep.subr.bf16.mxu1 %v5689_v58  ;;  %v562_v41 = vld [vmem:[%s11596_s1 + $0x820] sm:$0xff]  ;;  %v5703_v58 = vpack.c.bf16 %v523_v17, %v520_v46  ;;  %v5163_v1 = vpack.c.bf16 %v479_v55, %v476_v54  ;;  %v504_v46 = vld [vmem:[%s11596_s1 + $0x650] sm:$0xff]  ;;  %v507_v55 = vld [vmem:[%s11596_s1 + $0x668] sm:$0xff] }
  0x69   :  { %2847 = vmatmul.mubr.f32.gmra.mrb[34].mxu1 %v7178_v2  ;;  %5148 = vmatpush1.bf16.msra.mxu0 %v5147_v63  ;;  %v5697_v28 = vpack.c.bf16 %v565_v16, %v562_v41  ;;  %v526_v63 = vld [vmem:[%s11596_s1 + $0x700] sm:$0xff]  ;;  %v535_v41 = vld [vmem:[%s11596_s1 + $0x748] sm:$0xff] }
  0x6a   :  { %1307 = vmatprep.mubr.f32.mxu0 %v6951_v45  ;;  %2851 = vmatprep.mubr.f32.mxu1 %v7189_v36  ;;  %v7227_v45 = vld [vmem:[%s11597_s0 + $0x1c8] sm:$0xff] }
  0x6b   :  { %5150 = vmatprep.subr.bf16.mxu0 %v5149_v6  ;;  %5692 = vmatpush3.bf16.msra.mxu1 %v5691_v11  ;;  %v482_v6 = vld [vmem:[%s11596_s1 + $0x5a0] sm:$0xff]  ;;  %v5165_v11 = vpack.c.bf16 %v486_v59, %v483_v57  ;;  %v509_v59 = vld [vmem:[%s11596_s1 + $0x678] sm:$0xff] }
  0x6c   :  { %1308 = vmatmul.mubr.f32.gmra.mrb[20].mxu0 %v6966_v48  ;;  %5694 = vmatprep.subr.bf16.mxu1 %v5693_v10  ;;  %v568_v48 = vld [vmem:[%s11596_s1 + $0x850] sm:$0xff]  ;;  %v5707_v10 = vpack.c.bf16 %v529_v33, %v526_v63  ;;  %v5167_v16 = vpack.c.bf16 %v485_v7, %v482_v6  ;;  %v513_v63 = vld [vmem:[%s11596_s1 + $0x698] sm:$0xff]  ;;  %v519_v7 = vld [vmem:[%s11596_s1 + $0x6c8] sm:$0xff] }
  0x6d   :  { %2852 = vmatmul.mubr.f32.gmra.mrb[36].mxu1 %v7216_v18  ;;  %5152 = vmatpush1.bf16.msra.mxu0 %v5151_v15  ;;  %v5701_v44 = vpack.c.bf16 %v571_v32, %v568_v48  ;;  %v532_v15 = vld [vmem:[%s11596_s1 + $0x730] sm:$0xff]  ;;  %v541_v48 = vld [vmem:[%s11596_s1 + $0x778] sm:$0xff] }
  0x6e   :  { %1313 = vmatprep.mubr.f32.mxu0 %v6977_v50  ;;  %2856 = vmatprep.mubr.f32.mxu1 %v7227_v45  ;;  %v7265_v50 = vld [vmem:[%s11597_s0 + $0x258] sm:$0xff]  ;;  %v516_v33 = vld [vmem:[%s11596_s1 + $0x6b0] sm:$0xff] }
  0x6f   :  { %5154 = vmatprep.subr.bf16.mxu0 %v5153_v22  ;;  %5696 = vmatpush3.bf16.msra.mxu1 %v5695_v25  ;;  %v488_v22 = vld [vmem:[%s11596_s1 + $0x5d0] sm:$0xff]  ;;  %v5169_v25 = vpack.c.bf16 %v492_v12, %v489_v9  ;;  %v5185_v6 = vpack.c.bf16 %v516_v33, %v513_v63  ;;  %v521_v12 = vld [vmem:[%s11596_s1 + $0x6d8] sm:$0xff]  ;;  %v555_v63 = vld [vmem:[%s11596_s1 + $0x7e8] sm:$0xff] }
  0x70   :  { %1314 = vmatmul.mubr.f32.gmra.mrb[22].mxu0 %v6992_v62  ;;  %5698 = vmatprep.subr.bf16.mxu1 %v5697_v28  ;;  %v574_v62 = vld [vmem:[%s11596_s1 + $0x880] sm:$0xff]  ;;  %v5711_v28 = vpack.c.bf16 %v535_v41, %v532_v15  ;;  %v5171_v32 = vpack.c.bf16 %v491_v23, %v488_v22  ;;  %v525_v15 = vld [vmem:[%s11596_s1 + $0x6f8] sm:$0xff]  ;;  %v528_v41 = vld [vmem:[%s11596_s1 + $0x710] sm:$0xff] }
  0x71   :  { %2857 = vmatmul.mubr.f32.gmra.mrb[38].mxu1 %v7254_v34  ;;  %5156 = vmatpush1.bf16.msra.mxu0 %v5155_v31  ;;  %v5705_v61 = vpack.c.bf16 %v577_v51, %v574_v62  ;;  %v538_v31 = vld [vmem:[%s11596_s1 + $0x760] sm:$0xff]  ;;  %v500_v62 = vld [vmem:[%s11596_s1 + $0x630] sm:$0xff]  ;;  %v503_v51 = vld [vmem:[%s11596_s1 + $0x648] sm:$0xff]  ;;  %v5193_v22 = vpack.c.bf16 %v528_v41, %v525_v15 }
  0x72   :  { %1319 = vmatprep.mubr.f32.mxu0 %v7003_v0  ;;  %2861 = vmatprep.mubr.f32.mxu1 %v7265_v50  ;;  %v7303_v0 = vld [vmem:[%s11597_s0 + $0x2e8] sm:$0xff]  ;;  %v5715_v43 = vpack.c.bf16 %v541_v48, %v538_v31  ;;  %v5179_v57 = vpack.c.bf16 %v503_v51, %v500_v62  ;;  %v537_v31 = vld [vmem:[%s11596_s1 + $0x758] sm:$0xff]  ;;  %v540_v48 = vld [vmem:[%s11596_s1 + $0x770] sm:$0xff] }
  0x73   :  { %5158 = vmatprep.subr.bf16.mxu0 %v5157_v38  ;;  %5700 = vmatpush3.bf16.msra.mxu1 %v5699_v42  ;;  %v494_v38 = vld [vmem:[%s11596_s1 + $0x600] sm:$0xff]  ;;  %v5173_v42 = vpack.c.bf16 %v498_v29, %v495_v26  ;;  %v531_v23 = vld [vmem:[%s11596_s1 + $0x728] sm:$0xff]  ;;  %v533_v29 = vld [vmem:[%s11596_s1 + $0x738] sm:$0xff] }
  0x74   :  { %1320 = vmatmul.mubr.f32.gmra.mrb[24].mxu0 %v7024_v8  ;;  %5702 = vmatprep.subr.bf16.mxu1 %v5701_v44  ;;  %v580_v8 = vld [vmem:[%s11596_s1 + $0x8b0] sm:$0xff]  ;;  %v501_v44 = vld [vmem:[%s11596_s1 + $0x638] sm:$0xff] }
  0x75   :  { %2862 = vmatmul.mubr.f32.gmra.mrb[40].mxu1 %v7292_v52  ;;  %5160 = vmatpush1.bf16.msra.mxu0 %v5159_v47  ;;  %v5709_v14 = vpack.c.bf16 %v583_v3, %v580_v8  ;;  %v5175_v47 = vpack.c.bf16 %v497_v40, %v494_v38  ;;  %v5177_v54 = vpack.c.bf16 %v504_v46, %v501_v44  ;;  %v512_v8 = vld [vmem:[%s11596_s1 + $0x690] sm:$0xff]  ;;  %v515_v3 = vld [vmem:[%s11596_s1 + $0x6a8] sm:$0xff]  ;;  %v542_v44 = vld [vmem:[%s11596_s1 + $0x780] sm:$0xff] }
  0x76   :  { %1325 = vmatprep.mubr.f32.mxu0 %v7035_v13  ;;  %2866 = vmatprep.mubr.f32.mxu1 %v7303_v0  ;;  %v7341_v13 = vld [vmem:[%s11597_s0 + $0x378] sm:$0xff]  ;;  %v5187_v9 = vpack.c.bf16 %v515_v3, %v512_v8  ;;  %v5201_v38 = vpack.c.bf16 %v540_v48, %v537_v31  ;;  %v543_v40 = vld [vmem:[%s11596_s1 + $0x788] sm:$0xff]  ;;  %v552_v62 = vld [vmem:[%s11596_s1 + $0x7d0] sm:$0xff] }
  0x77   :  { %5162 = vmatprep.subr.bf16.mxu0 %v5161_v56  ;;  %5704 = vmatpush3.bf16.msra.mxu1 %v5703_v58  ;;  %v510_v56 = vld [vmem:[%s11596_s1 + $0x680] sm:$0xff]  ;;  %v545_v46 = vld [vmem:[%s11596_s1 + $0x798] sm:$0xff]  ;;  %v592_v51 = vld [vmem:[%s11596_s1 + $0x910] sm:$0xff] }
  0x78   :  { %1326 = vmatmul.mubr.f32.gmra.mrb[26].mxu0 %v7050_v24  ;;  %5706 = vmatprep.subr.bf16.mxu1 %v5705_v61  ;;  %v586_v24 = vld [vmem:[%s11596_s1 + $0x8e0] sm:$0xff]  ;;  %v5181_v61 = vpack.c.bf16 %v510_v56, %v507_v55  ;;  %v5207_v55 = vpack.c.bf16 %v545_v46, %v542_v44  ;;  %v649_v56 = vld [vmem:[%s11596_s1 + $0xad8] sm:$0xff]  ;;  %v567_v31 = vld [vmem:[%s11596_s1 + $0x848] sm:$0xff] }
  0x79   :  { %2867 = vmatmul.mubr.f32.gmra.mrb[42].mxu1 %v7330_v4  ;;  %5164 = vmatpush1.bf16.msra.mxu0 %v5163_v1  ;;  %v5713_v30 = vpack.c.bf16 %v589_v19, %v586_v24  ;;  %v506_v58 = vld [vmem:[%s11596_s1 + $0x660] sm:$0xff]  ;;  %v524_v24 = vld [vmem:[%s11596_s1 + $0x6f0] sm:$0xff]  ;;  %v527_v19 = vld [vmem:[%s11596_s1 + $0x708] sm:$0xff] }
  0x7a   :  { %1331 = vmatprep.mubr.f32.mxu0 %v7061_v27  ;;  %2871 = vmatprep.mubr.f32.mxu1 %v7341_v13  ;;  %v7379_v27 = vld [vmem:[%s11597_s0 + $0x408] sm:$0xff]  ;;  %v5183_v1 = vpack.c.bf16 %v509_v59, %v506_v58  ;;  %v5195_v26 = vpack.c.bf16 %v527_v19, %v524_v24  ;;  %v548_v58 = vld [vmem:[%s11596_s1 + $0x7b0] sm:$0xff]  ;;  %v598_v3 = vld [vmem:[%s11596_s1 + $0x940] sm:$0xff] }
  0x7b   :  { %5166 = vmatprep.subr.bf16.mxu0 %v5165_v11  ;;  %5708 = vmatpush3.bf16.msra.mxu1 %v5707_v10  ;;  %v522_v11 = vld [vmem:[%s11596_s1 + $0x6e0] sm:$0xff]  ;;  %v551_v59 = vld [vmem:[%s11596_s1 + $0x7c8] sm:$0xff]  ;;  %v561_v15 = vld [vmem:[%s11596_s1 + $0x818] sm:$0xff] }
  0x7c   :  { %1332 = vmatmul.mubr.f32.gmra.mrb[28].mxu0 %v7076_v39  ;;  %5710 = vmatprep.subr.bf16.mxu1 %v5709_v14  ;;  %v640_v39 = vld [vmem:[%s11596_s1 + $0xa90] sm:$0xff]  ;;  %v518_v10 = vld [vmem:[%s11596_s1 + $0x6c0] sm:$0xff]  ;;  %v5189_v14 = vpack.c.bf16 %v522_v11, %v519_v7  ;;  %v5211_v7 = vpack.c.bf16 %v551_v59, %v548_v58  ;;  %v655_v11 = vld [vmem:[%s11596_s1 + $0xb08] sm:$0xff] }
  0x7d   :  { %2872 = vmatmul.mubr.f32.gmra.mrb[44].mxu1 %v7368_v20  ;;  %5168 = vmatpush1.bf16.msra.mxu0 %v5167_v16  ;;  %v5717_v17 = vpack.c.bf16 %v643_v35, %v640_v39  ;;  %v5191_v16 = vpack.c.bf16 %v521_v12, %v518_v10  ;;  %v536_v39 = vld [vmem:[%s11596_s1 + $0x750] sm:$0xff]  ;;  %v539_v35 = vld [vmem:[%s11596_s1 + $0x768] sm:$0xff]  ;;  %v554_v10 = vld [vmem:[%s11596_s1 + $0x7e0] sm:$0xff] }
  0x7e   :  { %1337 = vmatprep.mubr.f32.mxu0 %v7087_v53  ;;  %2876 = vmatprep.mubr.f32.mxu1 %v7379_v27  ;;  %v7417_v53 = vld [vmem:[%s11597_s0 + $0x498] sm:$0xff]  ;;  %v604_v19 = vld [vmem:[%s11596_s1 + $0x970] sm:$0xff]  ;;  %v566_v44 = vld [vmem:[%s11596_s1 + $0x840] sm:$0xff] }
  0x7f   :  { %5170 = vmatprep.subr.bf16.mxu0 %v5169_v25  ;;  %5712 = vmatpush3.bf16.msra.mxu1 %v5711_v28  ;;  %v534_v25 = vld [vmem:[%s11596_s1 + $0x740] sm:$0xff]  ;;  %v557_v12 = vld [vmem:[%s11596_s1 + $0x7f8] sm:$0xff] }
  0x80   :  { %1338 = vmatmul.mubr.f32.gmra.mrb[30].mxu0 %v7102_v60  ;;  %5714 = vmatprep.subr.bf16.mxu1 %v5713_v30  ;;  %v7432_v60 = vld [vmem:[%s11597_s0 + $0x490] sm:$0xff]  ;;  %v530_v28 = vld [vmem:[%s11596_s1 + $0x720] sm:$0xff]  ;;  %v5197_v30 = vpack.c.bf16 %v534_v25, %v531_v23  ;;  %v5215_v23 = vpack.c.bf16 %v557_v12, %v554_v10  ;;  %v661_v25 = vld [vmem:[%s11596_s1 + $0xb38] sm:$0xff] }
  0x81   :  { %2877 = vmatmul.mubr.f32.gmra.mrb[46].mxu1 %v7406_v37  ;;  %5172 = vmatpush1.bf16.msra.mxu0 %v5171_v32  ;;  %v5199_v32 = vpack.c.bf16 %v533_v29, %v530_v28  ;;  %v560_v28 = vld [vmem:[%s11596_s1 + $0x810] sm:$0xff]  ;;  %v563_v29 = vld [vmem:[%s11596_s1 + $0x828] sm:$0xff]  ;;  %v569_v46 = vld [vmem:[%s11596_s1 + $0x858] sm:$0xff] }
  0x82   :  { %1408 = vmatprep.mubr.f32.mxu0 %v7113_v5  ;;  %2881 = vmatprep.mubr.f32.mxu1 %v7417_v53  ;;  %v7443_v5 = vld [vmem:[%s11597_s0 + $0x528] sm:$0xff]  ;;  %v673_v58 = vld [vmem:[%s11596_s1 + $0xb98] sm:$0xff]  ;;  %v7804_v59 = vld [vmem:[%s11597_s0 + $0x260] sm:$0xff] }
  0x83   :  { %5174 = vmatprep.subr.bf16.mxu0 %v5173_v42  ;;  %5716 = vmatpush3.bf16.msra.mxu1 %v5715_v43  ;;  %v546_v42 = vld [vmem:[%s11596_s1 + $0x7a0] sm:$0xff]  ;;  %v5203_v43 = vpack.c.bf16 %v539_v35, %v536_v39  ;;  %v679_v10 = vld [vmem:[%s11596_s1 + $0xbc8] sm:$0xff]  ;;  %v7842_v12 = vld [vmem:[%s11597_s0 + $0x2f0] sm:$0xff] }
  0x84   :  { %1409 = vmatmul.mubr.f32.vlgmr.msra.gmra.mrb[0].mxu0 %v7140_v49  ;;  %5718 = vmatprep.subr.bf16.mxu1 %v5717_v17  ;;  %v7458_v49 = vld [vmem:[%s11597_s0 + $0x520] sm:$0xff]  ;;  %v5205_v17 = vpack.c.bf16 %v546_v42, %v543_v40  ;;  %v5219_v40 = vpack.c.bf16 %v563_v29, %v560_v28  ;;  %v667_v42 = vld [vmem:[%s11596_s1 + $0xb68] sm:$0xff]  ;;  %v685_v28 = vld [vmem:[%s11596_s1 + $0xbf8] sm:$0xff] }
  0x85   :  { %2882 = vmatmul.mubr.f32.gmra.mrb[48].mxu1 %v7432_v60  ;;  %5176 = vmatpush1.bf16.msra.mxu0 %v5175_v47  ;;  %v549_v47 = vld [vmem:[%s11596_s1 + $0x7b8] sm:$0xff]  ;;  %v610_v35 = vld [vmem:[%s11596_s1 + $0x9a0] sm:$0xff] }
  0x86   :  { %1414 = vmatprep.mubr.f32.mxu0 %v7151_v21  ;;  %2886 = vmatprep.mubr.f32.mxu1 %v7443_v5  ;;  %v7469_v21 = vld [vmem:[%s11597_s0 + $0x5b8] sm:$0xff]  ;;  %v7880_v29 = vld [vmem:[%s11597_s0 + $0x380] sm:$0xff] }
  0x87   :  { %5178 = vmatprep.subr.bf16.mxu0 %v5177_v54  ;;  %v595_v54 = vld [vmem:[%s11596_s1 + $0x928] sm:$0xff] }
  0x88   :  { %1415 = vmatmul.mubr.f32.gmra.mrb[2].mxu0 %v7178_v2  ;;  %v7484_v2 = vld [vmem:[%s11597_s0 + $0x5b0] sm:$0xff]  ;;  %v5719_v33 = vpack.c.bf16 %v595_v54, %v592_v51 }
  0x89   :  { %2887 = vmatmul.mubr.f32.gmra.mrb[50].mxu1 %v7458_v49  ;;  %5180 = vmatpush1.bf16.msra.mxu0 %v5179_v57  ;;  %v7652_v57 = vld [vmem:[%s11597_s0 + $0x20] sm:$0xff]  ;;  %v576_v51 = vld [vmem:[%s11596_s1 + $0x890] sm:$0xff] }
  0x8a   :  { %1420 = vmatprep.mubr.f32.mxu0 %v7189_v36  ;;  %2891 = vmatprep.mubr.f32.mxu1 %v7469_v21  ;;  %v7495_v36 = vld [vmem:[%s11597_s0 + $0x648] sm:$0xff] }
  0x8b   :  { %5182 = vmatprep.subr.bf16.mxu0 %v5181_v61  ;;  %v5209_v61 = vpack.c.bf16 %v552_v62, %v549_v47  ;;  %v573_v47 = vld [vmem:[%s11596_s1 + $0x878] sm:$0xff] }
  0x8c   :  { %1421 = vmatmul.mubr.f32.gmra.mrb[4].mxu0 %v7216_v18  ;;  %v7510_v18 = vld [vmem:[%s11597_s0 + $0x640] sm:$0xff] }
  0x8d   :  { %2892 = vmatmul.mubr.f32.gmra.mrb[52].mxu1 %v7484_v2  ;;  %5184 = vmatpush1.bf16.msra.mxu0 %v5183_v1  ;;  %v558_v1 = vld [vmem:[%s11596_s1 + $0x800] sm:$0xff] }
  0x8e   :  { %1426 = vmatprep.mubr.f32.mxu0 %v7227_v45  ;;  %2896 = vmatprep.mubr.f32.mxu1 %v7495_v36  ;;  %v7521_v45 = vld [vmem:[%s11597_s0 + $0x6d8] sm:$0xff] }
  0x8f   :  { %5186 = vmatprep.subr.bf16.mxu0 %v5185_v6  ;;  %v601_v6 = vld [vmem:[%s11596_s1 + $0x958] sm:$0xff] }
  0x90   :  { %1427 = vmatmul.mubr.f32.gmra.mrb[6].mxu0 %v7254_v34  ;;  %v7536_v34 = vld [vmem:[%s11597_s0 + $0x6d0] sm:$0xff]  ;;  %v5723_v41 = vpack.c.bf16 %v601_v6, %v598_v3  ;;  %v582_v3 = vld [vmem:[%s11596_s1 + $0x8c0] sm:$0xff] }
  0x91   :  { %2897 = vmatmul.mubr.f32.gmra.mrb[54].mxu1 %v7510_v18  ;;  %5188 = vmatpush1.bf16.msra.mxu0 %v5187_v9  ;;  %v7690_v9 = vld [vmem:[%s11597_s0 + $0xb0] sm:$0xff] }
  0x92   :  { %1432 = vmatprep.mubr.f32.mxu0 %v7265_v50  ;;  %2901 = vmatprep.mubr.f32.mxu1 %v7521_v45  ;;  %v7547_v50 = vld [vmem:[%s11597_s0 + $0x768] sm:$0xff] }
  0x93   :  { %5190 = vmatprep.subr.bf16.mxu0 %v5189_v14  ;;  %v5213_v14 = vpack.c.bf16 %v558_v1, %v555_v63  ;;  %v575_v63 = vld [vmem:[%s11596_s1 + $0x888] sm:$0xff] }
  0x94   :  { %1433 = vmatmul.mubr.f32.gmra.mrb[8].mxu0 %v7292_v52  ;;  %v7562_v52 = vld [vmem:[%s11597_s0 + $0x760] sm:$0xff]  ;;  %v579_v1 = vld [vmem:[%s11596_s1 + $0x8a8] sm:$0xff] }
  0x95   :  { %2902 = vmatmul.mubr.f32.gmra.mrb[56].mxu1 %v7536_v34  ;;  %5192 = vmatpush1.bf16.msra.mxu0 %v5191_v16  ;;  %v564_v16 = vld [vmem:[%s11596_s1 + $0x830] sm:$0xff] }
  0x96   :  { %1438 = vmatprep.mubr.f32.mxu0 %v7303_v0  ;;  %2906 = vmatprep.mubr.f32.mxu1 %v7547_v50  ;;  %v7573_v0 = vld [vmem:[%s11597_s0 + $0x7f8] sm:$0xff] }
  0x97   :  { %5194 = vmatprep.subr.bf16.mxu0 %v5193_v22  ;;  %v607_v22 = vld [vmem:[%s11596_s1 + $0x988] sm:$0xff] }
  0x98   :  { %1439 = vmatmul.mubr.f32.gmra.mrb[10].mxu0 %v7330_v4  ;;  %v7588_v4 = vld [vmem:[%s11597_s0 + $0x7f0] sm:$0xff]  ;;  %v5727_v48 = vpack.c.bf16 %v607_v22, %v604_v19 }
  0x99   :  { %2907 = vmatmul.mubr.f32.gmra.mrb[58].mxu1 %v7562_v52  ;;  %5196 = vmatpush1.bf16.msra.mxu0 %v5195_v26  ;;  %v7728_v26 = vld [vmem:[%s11597_s0 + $0x140] sm:$0xff]  ;;  %v588_v19 = vld [vmem:[%s11596_s1 + $0x8f0] sm:$0xff] }
  0x9a   :  { %1444 = vmatprep.mubr.f32.mxu0 %v7341_v13  ;;  %2911 = vmatprep.mubr.f32.mxu1 %v7573_v0  ;;  %v7599_v13 = vld [vmem:[%s11597_s0 + $0x888] sm:$0xff] }
  0x9b   :  { %5198 = vmatprep.subr.bf16.mxu0 %v5197_v30  ;;  %v5217_v30 = vpack.c.bf16 %v564_v16, %v561_v15  ;;  %v581_v15 = vld [vmem:[%s11596_s1 + $0x8b8] sm:$0xff] }
  0x9c   :  { %1445 = vmatmul.mubr.f32.gmra.mrb[12].mxu0 %v7368_v20  ;;  %v7614_v20 = vld [vmem:[%s11597_s0 + $0x880] sm:$0xff]  ;;  %v585_v16 = vld [vmem:[%s11596_s1 + $0x8d8] sm:$0xff] }
  0x9d   :  { %2912 = vmatmul.mubr.f32.gmra.mrb[60].mxu1 %v7588_v4  ;;  %5200 = vmatpush1.bf16.msra.mxu0 %v5199_v32  ;;  %v570_v32 = vld [vmem:[%s11596_s1 + $0x860] sm:$0xff] }
  0x9e   :  { %1450 = vmatprep.mubr.f32.mxu0 %v7379_v27  ;;  %2916 = vmatprep.mubr.f32.mxu1 %v7599_v13  ;;  %v7625_v27 = vld [vmem:[%s11597_s0 + $0x28] sm:$0xff] }
  0x9f   :  { %5202 = vmatprep.subr.bf16.mxu0 %v5201_v38  ;;  %v613_v38 = vld [vmem:[%s11596_s1 + $0x9b8] sm:$0xff] }
  0xa0   :  { %1451 = vmatmul.mubr.f32.gmra.mrb[14].mxu0 %v7406_v37  ;;  %v646_v37 = vld [vmem:[%s11596_s1 + $0xac0] sm:$0xff]  ;;  %v5731_v62 = vpack.c.bf16 %v613_v38, %v610_v35 }
  0xa1   :  { %2917 = vmatmul.mubr.f32.gmra.mrb[62].mxu1 %v7614_v20  ;;  %5204 = vmatpush1.bf16.msra.mxu0 %v5203_v43  ;;  %v5721_v8 = vpack.c.bf16 %v649_v56, %v646_v37  ;;  %v7766_v43 = vld [vmem:[%s11597_s0 + $0x1d0] sm:$0xff]  ;;  %v619_v37 = vld [vmem:[%s11596_s1 + $0x9e8] sm:$0xff]  ;;  %v5223_v56 = vpack.c.bf16 %v569_v46, %v566_v44  ;;  %v594_v35 = vld [vmem:[%s11596_s1 + $0x920] sm:$0xff] }
  0xa2   :  { %1456 = vmatprep.mubr.f32.mxu0 %v7417_v53  ;;  %2986 = vmatprep.mubr.f32.mxu1 %v7625_v27  ;;  %v7663_v53 = vld [vmem:[%s11597_s0 + $0xb8] sm:$0xff]  ;;  %v739_v44 = vld [vmem:[%s11596_s1 + $0xda8] sm:$0xff]  ;;  %v7918_v46 = vld [vmem:[%s11597_s0 + $0x410] sm:$0xff] }
  0xa3   :  { %5206 = vmatprep.subr.bf16.mxu0 %v5205_v17  ;;  %v5221_v17 = vpack.c.bf16 %v570_v32, %v567_v31  ;;  %v587_v31 = vld [vmem:[%s11596_s1 + $0x8e8] sm:$0xff] }
  0xa4   :  { %1457 = vmatmul.mubr.f32.gmra.mrb[16].mxu0 %v7432_v60  ;;  %v652_v60 = vld [vmem:[%s11596_s1 + $0xaf0] sm:$0xff]  ;;  %v591_v32 = vld [vmem:[%s11596_s1 + $0x908] sm:$0xff] }
  0xa5   :  { %2987 = vmatmul.mubr.f32.vlgmr.msra.gmra.mrb[64].mxu1 %v7652_v57  ;;  %5208 = vmatpush1.bf16.msra.mxu0 %v5207_v55  ;;  %v5725_v24 = vpack.c.bf16 %v655_v11, %v652_v60  ;;  %v616_v55 = vld [vmem:[%s11596_s1 + $0x9d0] sm:$0xff]  ;;  %v625_v60 = vld [vmem:[%s11596_s1 + $0xa18] sm:$0xff] }
  0xa6   :  { %1462 = vmatprep.mubr.f32.mxu0 %v7443_v5  ;;  %2991 = vmatprep.mubr.f32.mxu1 %v7663_v53  ;;  %v7701_v5 = vld [vmem:[%s11597_s0 + $0x148] sm:$0xff] }
  0xa7   :  { %5210 = vmatprep.subr.bf16.mxu0 %v5209_v61  ;;  %5720 = vmatpush3.bf16.msra.mxu1 %v5719_v33  ;;  %v572_v61 = vld [vmem:[%s11596_s1 + $0x870] sm:$0xff]  ;;  %v5225_v33 = vpack.c.bf16 %v576_v51, %v573_v47  ;;  %v593_v47 = vld [vmem:[%s11596_s1 + $0x918] sm:$0xff] }
  0xa8   :  { %1463 = vmatmul.mubr.f32.gmra.mrb[18].mxu0 %v7458_v49  ;;  %5722 = vmatprep.subr.bf16.mxu1 %v5721_v8  ;;  %v658_v49 = vld [vmem:[%s11596_s1 + $0xb20] sm:$0xff]  ;;  %v5735_v8 = vpack.c.bf16 %v619_v37, %v616_v55  ;;  %v5227_v11 = vpack.c.bf16 %v575_v63, %v572_v61  ;;  %v600_v55 = vld [vmem:[%s11596_s1 + $0x950] sm:$0xff]  ;;  %v603_v63 = vld [vmem:[%s11596_s1 + $0x968] sm:$0xff] }
  0xa9   :  { %2992 = vmatmul.mubr.f32.gmra.mrb[66].mxu1 %v7690_v9  ;;  %5212 = vmatpush1.bf16.msra.mxu0 %v5211_v7  ;;  %v5729_v39 = vpack.c.bf16 %v661_v25, %v658_v49  ;;  %v622_v7 = vld [vmem:[%s11596_s1 + $0xa00] sm:$0xff]  ;;  %v631_v49 = vld [vmem:[%s11596_s1 + $0xa48] sm:$0xff] }
  0xaa   :  { %1468 = vmatprep.mubr.f32.mxu0 %v7469_v21  ;;  %2996 = vmatprep.mubr.f32.mxu1 %v7701_v5  ;;  %v7739_v21 = vld [vmem:[%s11597_s0 + $0x1d8] sm:$0xff] }
  0xab   :  { %5214 = vmatprep.subr.bf16.mxu0 %v5213_v14  ;;  %5724 = vmatpush3.bf16.msra.mxu1 %v5723_v41  ;;  %v578_v14 = vld [vmem:[%s11596_s1 + $0x8a0] sm:$0xff]  ;;  %v5229_v41 = vpack.c.bf16 %v582_v3, %v579_v1  ;;  %v605_v3 = vld [vmem:[%s11596_s1 + $0x978] sm:$0xff] }
  0xac   :  { %1469 = vmatmul.mubr.f32.gmra.mrb[20].mxu0 %v7484_v2  ;;  %5726 = vmatprep.subr.bf16.mxu1 %v5725_v24  ;;  %v664_v2 = vld [vmem:[%s11596_s1 + $0xb50] sm:$0xff]  ;;  %v5739_v24 = vpack.c.bf16 %v625_v60, %v622_v7  ;;  %v5231_v25 = vpack.c.bf16 %v581_v15, %v578_v14  ;;  %v609_v7 = vld [vmem:[%s11596_s1 + $0x998] sm:$0xff]  ;;  %v615_v15 = vld [vmem:[%s11596_s1 + $0x9c8] sm:$0xff] }
  0xad   :  { %2997 = vmatmul.mubr.f32.gmra.mrb[68].mxu1 %v7728_v26  ;;  %5216 = vmatpush1.bf16.msra.mxu0 %v5215_v23  ;;  %v5733_v54 = vpack.c.bf16 %v667_v42, %v664_v2  ;;  %v628_v23 = vld [vmem:[%s11596_s1 + $0xa30] sm:$0xff]  ;;  %v637_v2 = vld [vmem:[%s11596_s1 + $0xa78] sm:$0xff] }
  0xae   :  { %1474 = vmatprep.mubr.f32.mxu0 %v7495_v36  ;;  %3001 = vmatprep.mubr.f32.mxu1 %v7739_v21  ;;  %v7777_v36 = vld [vmem:[%s11597_s0 + $0x268] sm:$0xff]  ;;  %v612_v60 = vld [vmem:[%s11596_s1 + $0x9b0] sm:$0xff] }
  0xaf   :  { %5218 = vmatprep.subr.bf16.mxu0 %v5217_v30  ;;  %5728 = vmatpush3.bf16.msra.mxu1 %v5727_v48  ;;  %v584_v30 = vld [vmem:[%s11596_s1 + $0x8d0] sm:$0xff]  ;;  %v5233_v48 = vpack.c.bf16 %v588_v19, %v585_v16  ;;  %v5249_v14 = vpack.c.bf16 %v612_v60, %v609_v7  ;;  %v617_v19 = vld [vmem:[%s11596_s1 + $0x9d8] sm:$0xff]  ;;  %v651_v7 = vld [vmem:[%s11596_s1 + $0xae8] sm:$0xff] }
  0xb0   :  { %1475 = vmatmul.mubr.f32.gmra.mrb[22].mxu0 %v7510_v18  ;;  %5730 = vmatprep.subr.bf16.mxu1 %v5729_v39  ;;  %v670_v18 = vld [vmem:[%s11596_s1 + $0xb80] sm:$0xff]  ;;  %v5743_v39 = vpack.c.bf16 %v631_v49, %v628_v23  ;;  %v5235_v42 = vpack.c.bf16 %v587_v31, %v584_v30  ;;  %v621_v23 = vld [vmem:[%s11596_s1 + $0x9f8] sm:$0xff]  ;;  %v624_v49 = vld [vmem:[%s11596_s1 + $0xa10] sm:$0xff] }
  0xb1   :  { %3002 = vmatmul.mubr.f32.gmra.mrb[70].mxu1 %v7766_v43  ;;  %5220 = vmatpush1.bf16.msra.mxu0 %v5219_v40  ;;  %v5737_v6 = vpack.c.bf16 %v673_v58, %v670_v18  ;;  %v634_v40 = vld [vmem:[%s11596_s1 + $0xa60] sm:$0xff]  ;;  %v596_v18 = vld [vmem:[%s11596_s1 + $0x930] sm:$0xff]  ;;  %v599_v58 = vld [vmem:[%s11596_s1 + $0x948] sm:$0xff]  ;;  %v5257_v30 = vpack.c.bf16 %v624_v49, %v621_v23 }
  0xb2   :  { %1480 = vmatprep.mubr.f32.mxu0 %v7521_v45  ;;  %3006 = vmatprep.mubr.f32.mxu1 %v7777_v36  ;;  %v7815_v45 = vld [vmem:[%s11597_s0 + $0x2f8] sm:$0xff]  ;;  %v5747_v51 = vpack.c.bf16 %v637_v2, %v634_v40  ;;  %v5243_v1 = vpack.c.bf16 %v599_v58, %v596_v18  ;;  %v627_v31 = vld [vmem:[%s11596_s1 + $0xa28] sm:$0xff]  ;;  %v636_v2 = vld [vmem:[%s11596_s1 + $0xa70] sm:$0xff] }
  0xb3   :  { %5222 = vmatprep.subr.bf16.mxu0 %v5221_v17  ;;  %5732 = vmatpush3.bf16.msra.mxu1 %v5731_v62  ;;  %v590_v17 = vld [vmem:[%s11596_s1 + $0x900] sm:$0xff]  ;;  %v5237_v62 = vpack.c.bf16 %v594_v35, %v591_v32  ;;  %v629_v35 = vld [vmem:[%s11596_s1 + $0xa38] sm:$0xff]  ;;  %v648_v18 = vld [vmem:[%s11596_s1 + $0xad0] sm:$0xff] }
  0xb4   :  { %1481 = vmatmul.mubr.f32.gmra.mrb[24].mxu0 %v7536_v34  ;;  %5734 = vmatprep.subr.bf16.mxu1 %v5733_v54  ;;  %v676_v34 = vld [vmem:[%s11596_s1 + $0xbb0] sm:$0xff]  ;;  %v597_v54 = vld [vmem:[%s11596_s1 + $0x938] sm:$0xff] }
  0xb5   :  { %3007 = vmatmul.mubr.f32.gmra.mrb[72].mxu1 %v7804_v59  ;;  %5224 = vmatpush1.bf16.msra.mxu0 %v5223_v56  ;;  %v5741_v22 = vpack.c.bf16 %v679_v10, %v676_v34  ;;  %v5239_v56 = vpack.c.bf16 %v593_v47, %v590_v17  ;;  %v5241_v61 = vpack.c.bf16 %v600_v55, %v597_v54  ;;  %v608_v34 = vld [vmem:[%s11596_s1 + $0x990] sm:$0xff]  ;;  %v611_v10 = vld [vmem:[%s11596_s1 + $0x9a8] sm:$0xff]  ;;  %v633_v40 = vld [vmem:[%s11596_s1 + $0xa58] sm:$0xff] }
  0xb6   :  { %1486 = vmatprep.mubr.f32.mxu0 %v7547_v50  ;;  %3011 = vmatprep.mubr.f32.mxu1 %v7815_v45  ;;  %v7853_v50 = vld [vmem:[%s11597_s0 + $0x388] sm:$0xff]  ;;  %v5251_v16 = vpack.c.bf16 %v611_v10, %v608_v34  ;;  %v5265_v17 = vpack.c.bf16 %v636_v2, %v633_v40  ;;  %v638_v54 = vld [vmem:[%s11596_s1 + $0xa80] sm:$0xff]  ;;  %v641_v55 = vld [vmem:[%s11596_s1 + $0xa98] sm:$0xff] }
  0xb7   :  { %5226 = vmatprep.subr.bf16.mxu0 %v5225_v33  ;;  %5736 = vmatpush3.bf16.msra.mxu1 %v5735_v8  ;;  %v606_v33 = vld [vmem:[%s11596_s1 + $0x980] sm:$0xff]  ;;  %v639_v47 = vld [vmem:[%s11596_s1 + $0xa88] sm:$0xff]  ;;  %v688_v58 = vld [vmem:[%s11596_s1 + $0xc10] sm:$0xff] }
  0xb8   :  { %1487 = vmatmul.mubr.f32.gmra.mrb[26].mxu0 %v7562_v52  ;;  %5738 = vmatprep.subr.bf16.mxu1 %v5737_v6  ;;  %v682_v52 = vld [vmem:[%s11596_s1 + $0xbe0] sm:$0xff]  ;;  %v5245_v6 = vpack.c.bf16 %v606_v33, %v603_v63  ;;  %v5271_v63 = vpack.c.bf16 %v641_v55, %v638_v54  ;;  %v745_v33 = vld [vmem:[%s11596_s1 + $0xdd8] sm:$0xff]  ;;  %v663_v40 = vld [vmem:[%s11596_s1 + $0xb48] sm:$0xff] }
  0xb9   :  { %3012 = vmatmul.mubr.f32.gmra.mrb[74].mxu1 %v7842_v12  ;;  %5228 = vmatpush1.bf16.msra.mxu0 %v5227_v11  ;;  %v5745_v38 = vpack.c.bf16 %v685_v28, %v682_v52  ;;  %v602_v8 = vld [vmem:[%s11596_s1 + $0x960] sm:$0xff]  ;;  %v620_v52 = vld [vmem:[%s11596_s1 + $0x9f0] sm:$0xff]  ;;  %v623_v28 = vld [vmem:[%s11596_s1 + $0xa08] sm:$0xff] }
  0xba   :  { %1492 = vmatprep.mubr.f32.mxu0 %v7573_v0  ;;  %3016 = vmatprep.mubr.f32.mxu1 %v7853_v50  ;;  %v7891_v0 = vld [vmem:[%s11597_s0 + $0x418] sm:$0xff]  ;;  %v5247_v11 = vpack.c.bf16 %v605_v3, %v602_v8  ;;  %v5259_v32 = vpack.c.bf16 %v623_v28, %v620_v52  ;;  %v644_v8 = vld [vmem:[%s11596_s1 + $0xab0] sm:$0xff]  ;;  %v647_v3 = vld [vmem:[%s11596_s1 + $0xac8] sm:$0xff] }
  0xbb   :  { %5230 = vmatprep.subr.bf16.mxu0 %v5229_v41  ;;  %5740 = vmatpush3.bf16.msra.mxu1 %v5739_v24  ;;  %v618_v41 = vld [vmem:[%s11596_s1 + $0x9e0] sm:$0xff]  ;;  %v657_v23 = vld [vmem:[%s11596_s1 + $0xb18] sm:$0xff]  ;;  %v700_v28 = vld [vmem:[%s11596_s1 + $0xc70] sm:$0xff] }
  0xbc   :  { %1493 = vmatmul.mubr.f32.gmra.mrb[28].mxu0 %v7588_v4  ;;  %5742 = vmatprep.subr.bf16.mxu1 %v5741_v22  ;;  %v736_v4 = vld [vmem:[%s11596_s1 + $0xd90] sm:$0xff]  ;;  %v614_v24 = vld [vmem:[%s11596_s1 + $0x9c0] sm:$0xff]  ;;  %v5253_v22 = vpack.c.bf16 %v618_v41, %v615_v15  ;;  %v5275_v15 = vpack.c.bf16 %v647_v3, %v644_v8  ;;  %v751_v41 = vld [vmem:[%s11596_s1 + $0xe08] sm:$0xff] }
  0xbd   :  { %3017 = vmatmul.mubr.f32.gmra.mrb[76].mxu1 %v7880_v29  ;;  %5232 = vmatpush1.bf16.msra.mxu0 %v5231_v25  ;;  %v5749_v37 = vpack.c.bf16 %v739_v44, %v736_v4  ;;  %v5255_v25 = vpack.c.bf16 %v617_v19, %v614_v24  ;;  %v632_v4 = vld [vmem:[%s11596_s1 + $0xa50] sm:$0xff]  ;;  %v635_v44 = vld [vmem:[%s11596_s1 + $0xa68] sm:$0xff]  ;;  %v694_v10 = vld [vmem:[%s11596_s1 + $0xc40] sm:$0xff] }
  0xbe   :  { %1498 = vmatprep.mubr.f32.mxu0 %v7599_v13  ;;  %3021 = vmatprep.mubr.f32.mxu1 %v7891_v0  ;;  %v7929_v13 = vld [vmem:[%s11597_s0 + $0x4a8] sm:$0xff]  ;;  %v650_v24 = vld [vmem:[%s11596_s1 + $0xae0] sm:$0xff]  ;;  %v653_v19 = vld [vmem:[%s11596_s1 + $0xaf8] sm:$0xff] }
  0xbf   :  { %5234 = vmatprep.subr.bf16.mxu0 %v5233_v48  ;;  %5744 = vmatpush3.bf16.msra.mxu1 %v5743_v39  ;;  %v630_v48 = vld [vmem:[%s11596_s1 + $0xa40] sm:$0xff]  ;;  %v665_v55 = vld [vmem:[%s11596_s1 + $0xb58] sm:$0xff]  ;;  %v8316_v3 = vld [vmem:[%s11597_s0 + $0x270] sm:$0xff] }
  0xc0   :  { %1499 = vmatmul.mubr.f32.gmra.mrb[30].mxu0 %v7614_v20  ;;  %5746 = vmatprep.subr.bf16.mxu1 %v5745_v38  ;;  %v7944_v20 = vld [vmem:[%s11597_s0 + $0x4a0] sm:$0xff]  ;;  %v5261_v38 = vpack.c.bf16 %v630_v48, %v627_v31  ;;  %v5279_v31 = vpack.c.bf16 %v653_v19, %v650_v24  ;;  %v757_v48 = vld [vmem:[%s11596_s1 + $0xe38] sm:$0xff]  ;;  %v775_v24 = vld [vmem:[%s11596_s1 + $0xec8] sm:$0xff] }
  0xc1   :  { %3022 = vmatmul.mubr.f32.gmra.mrb[78].mxu1 %v7918_v46  ;;  %5236 = vmatpush1.bf16.msra.mxu0 %v5235_v42  ;;  %v626_v39 = vld [vmem:[%s11596_s1 + $0xa20] sm:$0xff]  ;;  %v769_v8 = vld [vmem:[%s11596_s1 + $0xe98] sm:$0xff] }
  0xc2   :  { %1569 = vmatprep.mubr.f32.mxu0 %v7625_v27  ;;  %3026 = vmatprep.mubr.f32.mxu1 %v7929_v13  ;;  %v7955_v27 = vld [vmem:[%s11597_s0 + $0x538] sm:$0xff]  ;;  %v5263_v42 = vpack.c.bf16 %v629_v35, %v626_v39  ;;  %v656_v39 = vld [vmem:[%s11596_s1 + $0xb10] sm:$0xff]  ;;  %v659_v35 = vld [vmem:[%s11596_s1 + $0xb28] sm:$0xff] }
  0xc3   :  { %5238 = vmatprep.subr.bf16.mxu0 %v5237_v62  ;;  %5748 = vmatpush3.bf16.msra.mxu1 %v5747_v51  ;;  %v642_v62 = vld [vmem:[%s11596_s1 + $0xaa0] sm:$0xff]  ;;  %v5267_v51 = vpack.c.bf16 %v635_v44, %v632_v4 }
  0xc4   :  { %1570 = vmatmul.mubr.f32.vlgmr.msra.gmra.mrb[0].mxu0 %v7652_v57  ;;  %5750 = vmatprep.subr.bf16.mxu1 %v5749_v37  ;;  %v7970_v57 = vld [vmem:[%s11597_s0 + $0x530] sm:$0xff]  ;;  %v5269_v37 = vpack.c.bf16 %v642_v62, %v639_v47  ;;  %v706_v44 = vld [vmem:[%s11596_s1 + $0xca0] sm:$0xff]  ;;  %v5283_v47 = vpack.c.bf16 %v659_v35, %v656_v39  ;;  %v763_v62 = vld [vmem:[%s11596_s1 + $0xe68] sm:$0xff] }
  0xc5   :  { %3027 = vmatmul.mubr.f32.gmra.mrb[80].mxu1 %v7944_v20  ;;  %5240 = vmatpush1.bf16.msra.mxu0 %v5239_v56  ;;  %v645_v56 = vld [vmem:[%s11596_s1 + $0xab8] sm:$0xff]  ;;  %v662_v54 = vld [vmem:[%s11596_s1 + $0xb40] sm:$0xff] }
  0xc6   :  { %1575 = vmatprep.mubr.f32.mxu0 %v7663_v53  ;;  %3031 = vmatprep.mubr.f32.mxu1 %v7955_v27  ;;  %v7981_v53 = vld [vmem:[%s11597_s0 + $0x5c8] sm:$0xff]  ;;  %v8354_v19 = vld [vmem:[%s11597_s0 + $0x300] sm:$0xff] }
  0xc7   :  { %5242 = vmatprep.subr.bf16.mxu0 %v5241_v61  ;;  %v691_v61 = vld [vmem:[%s11596_s1 + $0xc28] sm:$0xff]  ;;  %v778_v35 = vld [vmem:[%s11596_s1 + $0xee0] sm:$0xff] }
  0xc8   :  { %1576 = vmatmul.mubr.f32.gmra.mrb[2].mxu0 %v7690_v9  ;;  %v7996_v9 = vld [vmem:[%s11597_s0 + $0x5c0] sm:$0xff]  ;;  %v5751_v60 = vpack.c.bf16 %v691_v61, %v688_v58  ;;  %v672_v58 = vld [vmem:[%s11596_s1 + $0xb90] sm:$0xff] }
  0xc9   :  { %3032 = vmatmul.mubr.f32.gmra.mrb[82].mxu1 %v7970_v57  ;;  %5244 = vmatpush1.bf16.msra.mxu0 %v5243_v1  ;;  %v8164_v1 = vld [vmem:[%s11597_s0 + $0x30] sm:$0xff] }
  0xca   :  { %1581 = vmatprep.mubr.f32.mxu0 %v7701_v5  ;;  %3036 = vmatprep.mubr.f32.mxu1 %v7981_v53  ;;  %v8007_v5 = vld [vmem:[%s11597_s0 + $0x658] sm:$0xff] }
  0xcb   :  { %5246 = vmatprep.subr.bf16.mxu0 %v5245_v6  ;;  %v5273_v6 = vpack.c.bf16 %v648_v18, %v645_v56  ;;  %v669_v56 = vld [vmem:[%s11596_s1 + $0xb78] sm:$0xff] }
  0xcc   :  { %1582 = vmatmul.mubr.f32.gmra.mrb[4].mxu0 %v7728_v26  ;;  %v8022_v26 = vld [vmem:[%s11597_s0 + $0x650] sm:$0xff] }
  0xcd   :  { %3037 = vmatmul.mubr.f32.gmra.mrb[84].mxu1 %v7996_v9  ;;  %5248 = vmatpush1.bf16.msra.mxu0 %v5247_v11  ;;  %v654_v11 = vld [vmem:[%s11596_s1 + $0xb00] sm:$0xff] }
  0xce   :  { %1587 = vmatprep.mubr.f32.mxu0 %v7739_v21  ;;  %3041 = vmatprep.mubr.f32.mxu1 %v8007_v5  ;;  %v8033_v21 = vld [vmem:[%s11597_s0 + $0x6e8] sm:$0xff] }
  0xcf   :  { %5250 = vmatprep.subr.bf16.mxu0 %v5249_v14  ;;  %v697_v14 = vld [vmem:[%s11596_s1 + $0xc58] sm:$0xff] }
  0xd0   :  { %1588 = vmatmul.mubr.f32.gmra.mrb[6].mxu0 %v7766_v43  ;;  %v8048_v43 = vld [vmem:[%s11597_s0 + $0x6e0] sm:$0xff]  ;;  %v5755_v49 = vpack.c.bf16 %v697_v14, %v694_v10 }
  0xd1   :  { %3042 = vmatmul.mubr.f32.gmra.mrb[86].mxu1 %v8022_v26  ;;  %5252 = vmatpush1.bf16.msra.mxu0 %v5251_v16  ;;  %v8202_v16 = vld [vmem:[%s11597_s0 + $0xc0] sm:$0xff] }
  0xd2   :  { %1593 = vmatprep.mubr.f32.mxu0 %v7777_v36  ;;  %3046 = vmatprep.mubr.f32.mxu1 %v8033_v21  ;;  %v8059_v36 = vld [vmem:[%s11597_s0 + $0x778] sm:$0xff]  ;;  %v678_v10 = vld [vmem:[%s11596_s1 + $0xbc0] sm:$0xff] }
  0xd3   :  { %5254 = vmatprep.subr.bf16.mxu0 %v5253_v22  ;;  %v5277_v22 = vpack.c.bf16 %v654_v11, %v651_v7  ;;  %v671_v7 = vld [vmem:[%s11596_s1 + $0xb88] sm:$0xff] }
  0xd4   :  { %1594 = vmatmul.mubr.f32.gmra.mrb[8].mxu0 %v7804_v59  ;;  %v8074_v59 = vld [vmem:[%s11597_s0 + $0x770] sm:$0xff]  ;;  %v675_v11 = vld [vmem:[%s11596_s1 + $0xba8] sm:$0xff] }
  0xd5   :  { %3047 = vmatmul.mubr.f32.gmra.mrb[88].mxu1 %v8048_v43  ;;  %5256 = vmatpush1.bf16.msra.mxu0 %v5255_v25  ;;  %v660_v25 = vld [vmem:[%s11596_s1 + $0xb30] sm:$0xff] }
  0xd6   :  { %1599 = vmatprep.mubr.f32.mxu0 %v7815_v45  ;;  %3051 = vmatprep.mubr.f32.mxu1 %v8059_v36  ;;  %v8085_v45 = vld [vmem:[%s11597_s0 + $0x808] sm:$0xff] }
  0xd7   :  { %5258 = vmatprep.subr.bf16.mxu0 %v5257_v30  ;;  %v703_v30 = vld [vmem:[%s11596_s1 + $0xc88] sm:$0xff] }
  0xd8   :  { %1600 = vmatmul.mubr.f32.gmra.mrb[10].mxu0 %v7842_v12  ;;  %v8100_v12 = vld [vmem:[%s11597_s0 + $0x800] sm:$0xff]  ;;  %v5759_v2 = vpack.c.bf16 %v703_v30, %v700_v28  ;;  %v684_v28 = vld [vmem:[%s11596_s1 + $0xbf0] sm:$0xff] }
  0xd9   :  { %3052 = vmatmul.mubr.f32.gmra.mrb[90].mxu1 %v8074_v59  ;;  %5260 = vmatpush1.bf16.msra.mxu0 %v5259_v32  ;;  %v8240_v32 = vld [vmem:[%s11597_s0 + $0x150] sm:$0xff] }
  0xda   :  { %1605 = vmatprep.mubr.f32.mxu0 %v7853_v50  ;;  %3056 = vmatprep.mubr.f32.mxu1 %v8085_v45  ;;  %v8111_v50 = vld [vmem:[%s11597_s0 + $0x898] sm:$0xff] }
  0xdb   :  { %5262 = vmatprep.subr.bf16.mxu0 %v5261_v38  ;;  %v5281_v38 = vpack.c.bf16 %v660_v25, %v657_v23  ;;  %v677_v23 = vld [vmem:[%s11596_s1 + $0xbb8] sm:$0xff] }
  0xdc   :  { %1606 = vmatmul.mubr.f32.gmra.mrb[12].mxu0 %v7880_v29  ;;  %v8126_v29 = vld [vmem:[%s11597_s0 + $0x890] sm:$0xff]  ;;  %v681_v25 = vld [vmem:[%s11596_s1 + $0xbd8] sm:$0xff] }
  0xdd   :  { %3057 = vmatmul.mubr.f32.gmra.mrb[92].mxu1 %v8100_v12  ;;  %5264 = vmatpush1.bf16.msra.mxu0 %v5263_v42  ;;  %v666_v42 = vld [vmem:[%s11596_s1 + $0xb60] sm:$0xff] }
  0xde   :  { %1611 = vmatprep.mubr.f32.mxu0 %v7891_v0  ;;  %3061 = vmatprep.mubr.f32.mxu1 %v8111_v50  ;;  %v8137_v0 = vld [vmem:[%s11597_s0 + $0x38] sm:$0xff] }
  0xdf   :  { %5266 = vmatprep.subr.bf16.mxu0 %v5265_v17  ;;  %v709_v17 = vld [vmem:[%s11596_s1 + $0xcb8] sm:$0xff] }
  0xe0   :  { %1612 = vmatmul.mubr.f32.gmra.mrb[14].mxu0 %v7918_v46  ;;  %v742_v46 = vld [vmem:[%s11596_s1 + $0xdc0] sm:$0xff]  ;;  %v5763_v18 = vpack.c.bf16 %v709_v17, %v706_v44  ;;  %v5297_v44 = vpack.c.bf16 %v684_v28, %v681_v25  ;;  %v687_v17 = vld [vmem:[%s11596_s1 + $0xc08] sm:$0xff] }
  0xe1   :  { %3062 = vmatmul.mubr.f32.gmra.mrb[94].mxu1 %v8126_v29  ;;  %5268 = vmatpush1.bf16.msra.mxu0 %v5267_v51  ;;  %v5753_v34 = vpack.c.bf16 %v745_v33, %v742_v46  ;;  %v8278_v51 = vld [vmem:[%s11597_s0 + $0x1e0] sm:$0xff]  ;;  %v715_v46 = vld [vmem:[%s11596_s1 + $0xce8] sm:$0xff]  ;;  %v5287_v33 = vpack.c.bf16 %v665_v55, %v662_v54 }
  0xe2   :  { %1617 = vmatprep.mubr.f32.mxu0 %v7929_v13  ;;  %3131 = vmatprep.mubr.f32.mxu1 %v8137_v0  ;;  %v8175_v13 = vld [vmem:[%s11597_s0 + $0xc8] sm:$0xff]  ;;  %v730_v55 = vld [vmem:[%s11596_s1 + $0xd60] sm:$0xff] }
  0xe3   :  { %5270 = vmatprep.subr.bf16.mxu0 %v5269_v37  ;;  %v5285_v37 = vpack.c.bf16 %v666_v42, %v663_v40  ;;  %v8392_v40 = vld [vmem:[%s11597_s0 + $0x390] sm:$0xff]  ;;  %v683_v42 = vld [vmem:[%s11596_s1 + $0xbe8] sm:$0xff]  ;;  %v698_v25 = vld [vmem:[%s11596_s1 + $0xc60] sm:$0xff] }
  0xe4   :  { %1618 = vmatmul.mubr.f32.gmra.mrb[16].mxu0 %v7944_v20  ;;  %v748_v20 = vld [vmem:[%s11596_s1 + $0xdf0] sm:$0xff] }
  0xe5   :  { %3132 = vmatmul.mubr.f32.vlgmr.msra.gmra.mrb[96].mxu1 %v8164_v1  ;;  %5272 = vmatpush1.bf16.msra.mxu0 %v5271_v63  ;;  %v5757_v52 = vpack.c.bf16 %v751_v41, %v748_v20  ;;  %v712_v63 = vld [vmem:[%s11596_s1 + $0xcd0] sm:$0xff]  ;;  %v721_v20 = vld [vmem:[%s11596_s1 + $0xd18] sm:$0xff] }
  0xe6   :  { %1623 = vmatprep.mubr.f32.mxu0 %v7955_v27  ;;  %3136 = vmatprep.mubr.f32.mxu1 %v8175_v13  ;;  %v8213_v27 = vld [vmem:[%s11597_s0 + $0x158] sm:$0xff] }
  0xe7   :  { %5274 = vmatprep.subr.bf16.mxu0 %v5273_v6  ;;  %5752 = vmatpush3.bf16.msra.mxu1 %v5751_v60  ;;  %v668_v6 = vld [vmem:[%s11596_s1 + $0xb70] sm:$0xff]  ;;  %v5289_v60 = vpack.c.bf16 %v672_v58, %v669_v56  ;;  %v835_v58 = vld [vmem:[%s11596_s1 + $0x10a8] sm:$0xff] }
  0xe8   :  { %1624 = vmatmul.mubr.f32.gmra.mrb[18].mxu0 %v7970_v57  ;;  %5754 = vmatprep.subr.bf16.mxu1 %v5753_v34  ;;  %v754_v57 = vld [vmem:[%s11596_s1 + $0xe20] sm:$0xff]  ;;  %v5767_v34 = vpack.c.bf16 %v715_v46, %v712_v63  ;;  %v5291_v41 = vpack.c.bf16 %v671_v7, %v668_v6  ;;  %v689_v46 = vld [vmem:[%s11596_s1 + $0xc18] sm:$0xff]  ;;  %v696_v7 = vld [vmem:[%s11596_s1 + $0xc50] sm:$0xff] }
  0xe9   :  { %3137 = vmatmul.mubr.f32.gmra.mrb[98].mxu1 %v8202_v16  ;;  %5276 = vmatpush1.bf16.msra.mxu0 %v5275_v15  ;;  %v5761_v4 = vpack.c.bf16 %v757_v48, %v754_v57  ;;  %v718_v15 = vld [vmem:[%s11596_s1 + $0xd00] sm:$0xff]  ;;  %v724_v57 = vld [vmem:[%s11596_s1 + $0xd30] sm:$0xff]  ;;  %v727_v48 = vld [vmem:[%s11596_s1 + $0xd48] sm:$0xff] }
  0xea   :  { %1629 = vmatprep.mubr.f32.mxu0 %v7981_v53  ;;  %3141 = vmatprep.mubr.f32.mxu1 %v8213_v27  ;;  %v8251_v53 = vld [vmem:[%s11597_s0 + $0x1e8] sm:$0xff]  ;;  %v686_v63 = vld [vmem:[%s11596_s1 + $0xc00] sm:$0xff]  ;;  %v693_v6 = vld [vmem:[%s11596_s1 + $0xc38] sm:$0xff] }
  0xeb   :  { %5278 = vmatprep.subr.bf16.mxu0 %v5277_v22  ;;  %5756 = vmatpush3.bf16.msra.mxu1 %v5755_v49  ;;  %v674_v22 = vld [vmem:[%s11596_s1 + $0xba0] sm:$0xff]  ;;  %v5293_v49 = vpack.c.bf16 %v678_v10, %v675_v11 }
  0xec   :  { %1630 = vmatmul.mubr.f32.gmra.mrb[20].mxu0 %v7996_v9  ;;  %5758 = vmatprep.subr.bf16.mxu1 %v5757_v52  ;;  %v760_v9 = vld [vmem:[%s11596_s1 + $0xe50] sm:$0xff]  ;;  %v5771_v52 = vpack.c.bf16 %v721_v20, %v718_v15  ;;  %v5295_v39 = vpack.c.bf16 %v677_v23, %v674_v22  ;;  %v695_v15 = vld [vmem:[%s11596_s1 + $0xc48] sm:$0xff] }
  0xed   :  { %3142 = vmatmul.mubr.f32.gmra.mrb[100].mxu1 %v8240_v32  ;;  %5280 = vmatpush1.bf16.msra.mxu0 %v5279_v31  ;;  %v5765_v61 = vpack.c.bf16 %v763_v62, %v760_v9  ;;  %v690_v9 = vld [vmem:[%s11596_s1 + $0xc20] sm:$0xff] }
  0xee   :  { %1635 = vmatprep.mubr.f32.mxu0 %v8007_v5  ;;  %3146 = vmatprep.mubr.f32.mxu1 %v8251_v53  ;;  %v8289_v5 = vld [vmem:[%s11597_s0 + $0x278] sm:$0xff] }
  0xef   :  { %5282 = vmatprep.subr.bf16.mxu0 %v5281_v38  ;;  %5760 = vmatpush3.bf16.msra.mxu1 %v5759_v2  ;;  %v781_v38 = vld [vmem:[%s11596_s1 + $0xef8] sm:$0xff]  ;;  %v680_v2 = vld [vmem:[%s11596_s1 + $0xbd0] sm:$0xff] }
  0xf0   :  { %1636 = vmatmul.mubr.f32.gmra.mrb[22].mxu0 %v8022_v26  ;;  %5762 = vmatprep.subr.bf16.mxu1 %v5761_v4  ;;  %v766_v26 = vld [vmem:[%s11596_s1 + $0xe80] sm:$0xff]  ;;  %v5777_v54 = vpack.c.bf16 %v781_v38, %v778_v35  ;;  %v5299_v56 = vpack.c.bf16 %v683_v42, %v680_v2  ;;  %v704_v35 = vld [vmem:[%s11596_s1 + $0xc90] sm:$0xff]  ;;  %v707_v38 = vld [vmem:[%s11596_s1 + $0xca8] sm:$0xff] }
  0xf1   :  { %3147 = vmatmul.mubr.f32.gmra.mrb[102].mxu1 %v8278_v51  ;;  %5284 = vmatpush1.bf16.msra.mxu0 %v5283_v47  ;;  %v5769_v14 = vpack.c.bf16 %v769_v8, %v766_v26  ;;  %v5775_v47 = vpack.c.bf16 %v727_v48, %v724_v57  ;;  %v5301_v26 = vpack.c.bf16 %v690_v9, %v687_v17  ;;  %v708_v57 = vld [vmem:[%s11596_s1 + $0xcb0] sm:$0xff]  ;;  %v714_v17 = vld [vmem:[%s11596_s1 + $0xce0] sm:$0xff] }
  0xf2   :  { %1641 = vmatprep.mubr.f32.mxu0 %v8033_v21  ;;  %3151 = vmatprep.mubr.f32.mxu1 %v8289_v5  ;;  %v8327_v21 = vld [vmem:[%s11597_s0 + $0x308] sm:$0xff]  ;;  %v5315_v9 = vpack.c.bf16 %v707_v38, %v704_v35 }
  0xf3   :  { %5286 = vmatprep.subr.bf16.mxu0 %v5285_v37  ;;  %5764 = vmatpush3.bf16.msra.mxu1 %v5763_v18  ;;  %v733_v37 = vld [vmem:[%s11596_s1 + $0xd78] sm:$0xff]  ;;  %v832_v18 = vld [vmem:[%s11596_s1 + $0x1090] sm:$0xff] }
  0xf4   :  { %1642 = vmatmul.mubr.f32.gmra.mrb[24].mxu0 %v8048_v43  ;;  %5766 = vmatprep.subr.bf16.mxu1 %v5765_v61  ;;  %v772_v43 = vld [vmem:[%s11596_s1 + $0xeb0] sm:$0xff]  ;;  %v8432_v61 = vld [vmem:[%s11597_s0 + $0x420] sm:$0xff]  ;;  %v5779_v8 = vpack.c.bf16 %v733_v37, %v730_v55  ;;  %v5781_v11 = vpack.c.bf16 %v835_v58, %v832_v18  ;;  %v713_v55 = vld [vmem:[%s11596_s1 + $0xcd8] sm:$0xff] }
  0xf5   :  { %3152 = vmatmul.mubr.f32.gmra.mrb[104].mxu1 %v8316_v3  ;;  %5288 = vmatpush1.bf16.msra.mxu0 %v5287_v33  ;;  %v5773_v31 = vpack.c.bf16 %v775_v24, %v772_v43  ;;  %v699_v43 = vld [vmem:[%s11596_s1 + $0xc68] sm:$0xff]  ;;  %v702_v24 = vld [vmem:[%s11596_s1 + $0xc80] sm:$0xff]  ;;  %v720_v18 = vld [vmem:[%s11596_s1 + $0xd10] sm:$0xff] }
  0xf6   :  { %1647 = vmatprep.mubr.f32.mxu0 %v8059_v36  ;;  %3156 = vmatprep.mubr.f32.mxu1 %v8327_v21  ;;  %v8365_v36 = vld [vmem:[%s11597_s0 + $0x398] sm:$0xff] }
  0xf7   :  { %5290 = vmatprep.subr.bf16.mxu0 %v5289_v60  ;;  %5768 = vmatpush3.bf16.msra.mxu1 %v5767_v34  ;;  %v5303_v34 = vpack.c.bf16 %v689_v46, %v686_v63 }
  0xf8   :  { %1648 = vmatmul.mubr.f32.gmra.mrb[26].mxu0 %v8074_v59  ;;  %v4357_v30 = vpop.f32.mrb[0].mxu1  ;;  %5770 = vmatprep.subr.bf16.mxu1 %v5769_v14  ;;  %v692_v14 = vld [vmem:[%s11596_s1 + $0xc30] sm:$0xff] }
  0xf9   :  { %3157 = vmatmul.mubr.f32.gmra.mrb[106].mxu1 %v8354_v19  ;;  %5292 = vmatpush1.bf16.msra.mxu0 %v5291_v41  ;;  %v4358_v59 = vpop.f32.mrb[1].mxu1  ;;  %v5305_v41 = vpack.c.bf16 %v696_v7, %v693_v6  ;;  %v5307_v23 = vpack.c.bf16 %v695_v15, %v692_v14  ;;  %v722_v15 = vld [vmem:[%s11596_s1 + $0xd20] sm:$0xff] }
  0xfa   :  { %1653 = vmatprep.mubr.f32.mxu0 %v8085_v45  ;;  %3161 = vmatprep.mubr.f32.mxu1 %v8365_v36  ;;  %v8400_v4 = vadd.f32 %v4358_v59, %v4357_v30  ;;  %v8405_v45 = vld [vmem:[%s11597_s0 + $0x428] sm:$0xff]  ;;  %v5309_v30 = vpack.c.bf16 %v702_v24, %v699_v43 }
  0xfb   :  { %5294 = vmatprep.subr.bf16.mxu0 %v5293_v49  ;;  %5772 = vmatpush3.bf16.msra.mxu1 %v5771_v52  ;;  %v701_v52 = vld [vmem:[%s11596_s1 + $0xc78] sm:$0xff] }
  0xfc   :  { %1654 = vmatmul.mubr.f32.gmra.mrb[28].mxu0 %v8100_v12  ;;  %v4360_v62 = vpop.f32.mrb[2].mxu1  ;;  %5774 = vmatprep.subr.bf16.mxu1 %v5773_v31  ;;  %v705_v31 = vld [vmem:[%s11596_s1 + $0xc98] sm:$0xff] }
  0xfd   :  { %3162 = vmatmul.mubr.f32.gmra.mrb[108].mxu1 %v8392_v40  ;;  %5296 = vmatpush1.bf16.msra.mxu0 %v5295_v39  ;;  %v4361_v12 = vpop.f32.mrb[3].mxu1  ;;  %v5311_v39 = vpack.c.bf16 %v701_v52, %v698_v25  ;;  %v5313_v42 = vpack.c.bf16 %v708_v57, %v705_v31  ;;  %v731_v31 = vld [vmem:[%s11596_s1 + $0xd68] sm:$0xff] }
  0xfe   :  { %1659 = vmatprep.mubr.f32.mxu0 %v8111_v50  ;;  %3166 = vmatprep.mubr.f32.mxu1 %v8405_v45  ;;  %v8440_v33 = vadd.f32 %v4361_v12, %v4360_v62  ;;  %v8445_v50 = vld [vmem:[%s11597_s0 + $0x4b8] sm:$0xff] }
  0xff   :  { %5298 = vmatprep.subr.bf16.mxu0 %v5297_v44  ;;  %5776 = vmatpush3.bf16.msra.mxu1 %v5775_v47  ;;  %v711_v44 = vld [vmem:[%s11596_s1 + $0xcc8] sm:$0xff]  ;;  %v717_v12 = vld [vmem:[%s11596_s1 + $0xcf8] sm:$0xff] }
 0x100   :  { %1660 = vmatmul.mubr.f32.gmra.mrb[30].mxu0 %v8126_v29  ;;  %v4363_v60 = vpop.f32.mrb[4].mxu1  ;;  %5778 = vmatprep.subr.bf16.mxu1 %v5777_v54  ;;  %v8460_v29 = vld [vmem:[%s11597_s0 + $0x4b0] sm:$0xff]  ;;  %v710_v54 = vld [vmem:[%s11596_s1 + $0xcc0] sm:$0xff]  ;;  %v5321_v7 = vpack.c.bf16 %v720_v18, %v717_v12  ;;  %v787_v12 = vld [vmem:[%s11596_s1 + $0xf28] sm:$0xff] }
 0x101   :  { %3167 = vmatmul.mubr.f32.gmra.mrb[110].mxu1 %v8432_v61  ;;  %5300 = vmatpush1.bf16.msra.mxu0 %v5299_v56  ;;  %v4364_v10 = vpop.f32.mrb[5].mxu1  ;;  %v5317_v56 = vpack.c.bf16 %v714_v17, %v711_v44  ;;  %v5319_v63 = vpack.c.bf16 %v713_v55, %v710_v54  ;;  %v734_v44 = vld [vmem:[%s11596_s1 + $0xd80] sm:$0xff]  ;;  %v737_v17 = vld [vmem:[%s11596_s1 + $0xd98] sm:$0xff]  ;;  %v744_v54 = vld [vmem:[%s11596_s1 + $0xdd0] sm:$0xff] }
 0x102   :  { %1730 = vmatprep.mubr.f32.mxu0 %v8137_v0  ;;  %3171 = vmatprep.mubr.f32.mxu1 %v8445_v50  ;;  %v8468_v20 = vadd.f32 %v4364_v10, %v4363_v60  ;;  %v8473_v0 = vld [vmem:[%s11597_s0 + $0x548] sm:$0xff]  ;;  %v5335_v18 = vpack.c.bf16 %v737_v17, %v734_v44  ;;  %v796_v17 = vld [vmem:[%s11596_s1 + $0xf70] sm:$0xff] }
 0x103   :  { %5302 = vmatprep.subr.bf16.mxu0 %v5301_v26  ;;  %5780 = vmatpush3.bf16.msra.mxu1 %v5779_v8  ;;  %v716_v26 = vld [vmem:[%s11596_s1 + $0xcf0] sm:$0xff]  ;;  %v719_v8 = vld [vmem:[%s11596_s1 + $0xd08] sm:$0xff] }
 0x104   :  { %1731 = vmatmul.mubr.f32.vlgmr.msra.gmra.mrb[0].mxu0 %v8164_v1  ;;  %v4366_v22 = vpop.f32.mrb[6].mxu1  ;;  %5782 = vmatprep.subr.bf16.mxu1 %v5781_v11  ;;  %v8488_v1 = vld [vmem:[%s11597_s0 + $0x540] sm:$0xff]  ;;  %v723_v60 = vld [vmem:[%s11596_s1 + $0xd28] sm:$0xff]  ;;  %v5323_v10 = vpack.c.bf16 %v719_v8, %v716_v26  ;;  %v740_v26 = vld [vmem:[%s11596_s1 + $0xdb0] sm:$0xff] }
 0x105   :  { %3172 = vmatmul.mubr.f32.gmra.mrb[112].mxu1 %v8460_v29  ;;  %5304 = vmatpush1.bf16.msra.mxu0 %v5303_v34  ;;  %v4367_v49 = vpop.f32.mrb[7].mxu1  ;;  %v726_v11 = vld [vmem:[%s11596_s1 + $0xd40] sm:$0xff]  ;;  %v743_v8 = vld [vmem:[%s11596_s1 + $0xdc8] sm:$0xff] }
 0x106   :  { %1736 = vmatprep.mubr.f32.mxu0 %v8175_v13  ;;  %3176 = vmatprep.mubr.f32.mxu1 %v8473_v0  ;;  %v8496_v28 = vadd.f32 %v4367_v49, %v4366_v22  ;;  %v8501_v13 = vld [vmem:[%s11597_s0 + $0x5d8] sm:$0xff]  ;;  %v5325_v24 = vpack.c.bf16 %v726_v11, %v723_v60  ;;  %v747_v11 = vld [vmem:[%s11596_s1 + $0xde8] sm:$0xff] }
 0x107   :  { %5306 = vmatprep.subr.bf16.mxu0 %v5305_v41  ;;  %v725_v41 = vld [vmem:[%s11596_s1 + $0xd38] sm:$0xff] }
 0x108   :  { %1737 = vmatmul.mubr.f32.gmra.mrb[2].mxu0 %v8202_v16  ;;  %v4369_v48 = vpop.f32.mrb[8].mxu1  ;;  %v8516_v16 = vld [vmem:[%s11597_s0 + $0x5d0] sm:$0xff]  ;;  %v729_v22 = vld [vmem:[%s11596_s1 + $0xd58] sm:$0xff]  ;;  %v5327_v25 = vpack.c.bf16 %v725_v41, %v722_v15  ;;  %v790_v41 = vld [vmem:[%s11596_s1 + $0xf40] sm:$0xff] }
 0x109   :  { %3177 = vmatmul.mubr.f32.gmra.mrb[114].mxu1 %v8488_v1  ;;  %5308 = vmatpush1.bf16.msra.mxu0 %v5307_v23  ;;  %v4370_v59 = vpop.f32.mrb[9].mxu1  ;;  %v732_v23 = vld [vmem:[%s11596_s1 + $0xd70] sm:$0xff] }
 0x10a   :  { %1742 = vmatprep.mubr.f32.mxu0 %v8213_v27  ;;  %3181 = vmatprep.mubr.f32.mxu1 %v8501_v13  ;;  %v8524_v2 = vadd.f32 %v4370_v59, %v4369_v48  ;;  %v8529_v27 = vld [vmem:[%s11597_s0 + $0x668] sm:$0xff]  ;;  %v5329_v48 = vpack.c.bf16 %v732_v23, %v729_v22  ;;  %v738_v59 = vld [vmem:[%s11596_s1 + $0xda0] sm:$0xff]  ;;  %v5339_v22 = vpack.c.bf16 %v743_v8, %v740_v26 }
 0x10b   :  { %5310 = vmatprep.subr.bf16.mxu0 %v5309_v30  ;;  %v728_v30 = vld [vmem:[%s11596_s1 + $0xd50] sm:$0xff]  ;;  %v759_v26 = vld [vmem:[%s11596_s1 + $0xe48] sm:$0xff] }
 0x10c   :  { %1743 = vmatmul.mubr.f32.gmra.mrb[4].mxu0 %v8240_v32  ;;  %v4372_v47 = vpop.f32.mrb[10].mxu1  ;;  %v8544_v32 = vld [vmem:[%s11597_s0 + $0x660] sm:$0xff]  ;;  %v5331_v38 = vpack.c.bf16 %v731_v31, %v728_v30  ;;  %v749_v30 = vld [vmem:[%s11596_s1 + $0xdf8] sm:$0xff] }
 0x10d   :  { %3182 = vmatmul.mubr.f32.gmra.mrb[116].mxu1 %v8516_v16  ;;  %5312 = vmatpush1.bf16.msra.mxu0 %v5311_v39  ;;  %v4373_v62 = vpop.f32.mrb[11].mxu1  ;;  %v735_v39 = vld [vmem:[%s11596_s1 + $0xd88] sm:$0xff] }
 0x10e   :  { %1748 = vmatprep.mubr.f32.mxu0 %v8251_v53  ;;  %3186 = vmatprep.mubr.f32.mxu1 %v8529_v27  ;;  %v8552_v37 = vadd.f32 %v4373_v62, %v4372_v47  ;;  %v8557_v53 = vld [vmem:[%s11597_s0 + $0x6f8] sm:$0xff] }
 0x10f   :  { %5314 = vmatprep.subr.bf16.mxu0 %v5313_v42  ;;  %v741_v62 = vld [vmem:[%s11596_s1 + $0xdb8] sm:$0xff] }
 0x110   :  { %1749 = vmatmul.mubr.f32.gmra.mrb[6].mxu0 %v8278_v51  ;;  %v4375_v58 = vpop.f32.mrb[12].mxu1  ;;  %v8572_v51 = vld [vmem:[%s11597_s0 + $0x6f0] sm:$0xff]  ;;  %v5337_v60 = vpack.c.bf16 %v744_v54, %v741_v62  ;;  %v850_v54 = vld [vmem:[%s11596_s1 + $0x1120] sm:$0xff] }
 0x111   :  { %3187 = vmatmul.mubr.f32.gmra.mrb[118].mxu1 %v8544_v32  ;;  %5316 = vmatpush1.bf16.msra.mxu0 %v5315_v9  ;;  %v4376_v46 = vpop.f32.mrb[13].mxu1  ;;  %v5333_v9 = vpack.c.bf16 %v738_v59, %v735_v39  ;;  %v753_v59 = vld [vmem:[%s11596_s1 + $0xe18] sm:$0xff] }
 0x112   :  { %1754 = vmatprep.mubr.f32.mxu0 %v8289_v5  ;;  %3191 = vmatprep.mubr.f32.mxu1 %v8557_v53  ;;  %v8580_v6 = vadd.f32 %v4376_v46, %v4375_v58  ;;  %v8585_v5 = vld [vmem:[%s11597_s0 + $0x788] sm:$0xff]  ;;  %v8696_v46 = vld [vmem:[%s11597_s0 + $0x40] sm:$0xff] }
 0x113   :  { %5318 = vmatprep.subr.bf16.mxu0 %v5317_v56  ;;  %v784_v56 = vld [vmem:[%s11596_s1 + $0xf10] sm:$0xff] }
 0x114   :  { %1755 = vmatmul.mubr.f32.gmra.mrb[8].mxu0 %v8316_v3  ;;  %v4378_v34 = vpop.f32.mrb[14].mxu1  ;;  %v8600_v3 = vld [vmem:[%s11597_s0 + $0x780] sm:$0xff] }
 0x115   :  { %3192 = vmatmul.mubr.f32.gmra.mrb[120].mxu1 %v8572_v51  ;;  %5320 = vmatpush1.bf16.msra.mxu0 %v5319_v63  ;;  %v4379_v14 = vpop.f32.mrb[15].mxu1  ;;  %v841_v63 = vld [vmem:[%s11596_s1 + $0x10d8] sm:$0xff] }
 0x116   :  { %1760 = vmatprep.mubr.f32.mxu0 %v8327_v21  ;;  %3196 = vmatprep.mubr.f32.mxu1 %v8585_v5  ;;  %v8608_v43 = vadd.f32 %v4379_v14, %v4378_v34  ;;  %v8613_v21 = vld [vmem:[%s11597_s0 + $0x818] sm:$0xff]  ;;  %v5783_v34 = vpack.c.bf16 %v787_v12, %v784_v56  ;;  %v8776_v56 = vld [vmem:[%s11597_s0 + $0x160] sm:$0xff] }
 0x117   :  { %5322 = vmatprep.subr.bf16.mxu0 %v5321_v7 }
 0x118   :  { %1761 = vmatmul.mubr.f32.gmra.mrb[10].mxu0 %v8354_v19  ;;  %v4381_v49 = vpop.f32.mrb[16].mxu1  ;;  %v8628_v19 = vld [vmem:[%s11597_s0 + $0x810] sm:$0xff] }
 0x119   :  { %3197 = vmatmul.mubr.f32.gmra.mrb[122].mxu1 %v8600_v3  ;;  %5324 = vmatpush1.bf16.msra.mxu0 %v5323_v10  ;;  %v4382_v52 = vpop.f32.mrb[17].mxu1  ;;  %v750_v10 = vld [vmem:[%s11596_s1 + $0xe00] sm:$0xff] }
 0x11a   :  { %1766 = vmatprep.mubr.f32.mxu0 %v8365_v36  ;;  %3201 = vmatprep.mubr.f32.mxu1 %v8613_v21  ;;  %v8636_v57 = vadd.f32 %v4382_v52, %v4381_v49  ;;  %v8641_v36 = vld [vmem:[%s11597_s0 + $0x8a8] sm:$0xff]  ;;  %v746_v52 = vld [vmem:[%s11596_s1 + $0xde0] sm:$0xff]  ;;  %v5341_v39 = vpack.c.bf16 %v750_v10, %v747_v11 }
 0x11b   :  { %5326 = vmatprep.subr.bf16.mxu0 %v5325_v24  ;;  %v793_v24 = vld [vmem:[%s11596_s1 + $0xf58] sm:$0xff]  ;;  %v847_v49 = vld [vmem:[%s11596_s1 + $0x1108] sm:$0xff]  ;;  %v5343_v62 = vpack.c.bf16 %v749_v30, %v746_v52  ;;  %v762_v11 = vld [vmem:[%s11596_s1 + $0xe60] sm:$0xff] }
 0x11c   :  { %1767 = vmatmul.mubr.f32.gmra.mrb[12].mxu0 %v8392_v40  ;;  %v4384_v35 = vpop.f32.mrb[18].mxu1  ;;  %v8656_v40 = vld [vmem:[%s11597_s0 + $0x8a0] sm:$0xff]  ;;  %v5349_v30 = vpack.c.bf16 %v762_v11, %v759_v26 }
 0x11d   :  { %3202 = vmatmul.mubr.f32.gmra.mrb[124].mxu1 %v8628_v19  ;;  %5328 = vmatpush1.bf16.msra.mxu0 %v5327_v25  ;;  %v4385_v42 = vpop.f32.mrb[19].mxu1  ;;  %v8736_v25 = vld [vmem:[%s11597_s0 + $0xd0] sm:$0xff]  ;;  %v802_v10 = vld [vmem:[%s11596_s1 + $0xfa0] sm:$0xff] }
 0x11e   :  { %1772 = vmatprep.mubr.f32.mxu0 %v8405_v45  ;;  %3206 = vmatprep.mubr.f32.mxu1 %v8641_v36  ;;  %v8664_v47 = vadd.f32 %v4385_v42, %v4384_v35  ;;  %v8669_v45 = vld [vmem:[%s11597_s0 + $0x48] sm:$0xff]  ;;  %v5787_v35 = vpack.c.bf16 %v793_v24, %v790_v41  ;;  %v756_v42 = vld [vmem:[%s11596_s1 + $0xe30] sm:$0xff] }
 0x11f   :  { %5330 = vmatprep.subr.bf16.mxu0 %v5329_v48  ;;  %v1168_v48 = vlaneseq  ;;  %v856_v41 = vld [vmem:[%s11596_s1 + $0x1150] sm:$0xff]  ;;  %v859_v24 = vld [vmem:[%s11596_s1 + $0x1168] sm:$0xff] }
 0x120   :  { %1773 = vmatmul.mubr.f32.gmra.mrb[14].mxu0 %v8432_v61  ;;  %v4387_v55 = vpop.f32.mrb[20].mxu1  ;;  %v838_v61 = vld [vmem:[%s11596_s1 + $0x10c0] sm:$0xff] }
 0x121   :  { %3207 = vmatmul.mubr.f32.gmra.mrb[126].mxu1 %v8656_v40  ;;  %5332 = vmatpush1.bf16.msra.mxu0 %v5331_v38  ;;  %v4388_v58 = vpop.f32.mrb[21].mxu1  ;;  %v5785_v15 = vpack.c.bf16 %v841_v63, %v838_v61  ;;  %v8786_v61 = vshrl.u32 %v1168_v48, 7  ;;  %v5345_v63 = vpack.c.bf16 %v756_v42, %v753_v59  ;;  %v765_v48 = vld [vmem:[%s11596_s1 + $0xe78] sm:$0xff]  ;;  %v5797_v42 = vpack.c.bf16 %v859_v24, %v856_v41  ;;  %v868_v24 = vld [vmem:[%s11596_s1 + $0x11b0] sm:$0xff] }
 0x122   :  { %1778 = vmatprep.mubr.f32.mxu0 %v8445_v50  ;;  %3276 = vmatprep.mubr.f32.mxu1 %v8669_v45  ;;  %v8704_v7 = vadd.f32 %v4388_v58, %v4387_v55  ;;  %v8709_v50 = vld [vmem:[%s11597_s0 + $0xd8] sm:$0xff]  ;;  %v755_v58 = vld [vmem:[%s11596_s1 + $0xe28] sm:$0xff] }
 0x123   :  { %5334 = vmatprep.subr.bf16.mxu0 %v5333_v9  ;;  %v799_v9 = vld [vmem:[%s11596_s1 + $0xf88] sm:$0xff]  ;;  %v853_v55 = vld [vmem:[%s11596_s1 + $0x1138] sm:$0xff]  ;;  %v1178_v52 = vsub.s32 2, %v8786_v61 }
 0x124   :  { %1779 = vmatmul.mubr.f32.gmra.mrb[16].mxu0 %v8460_v29  ;;  %v4390_v14 = vpop.f32.mrb[22].mxu1  ;;  %v844_v29 = vld [vmem:[%s11596_s1 + $0x10f0] sm:$0xff]  ;;  %v5791_v8 = vpack.c.bf16 %v799_v9, %v796_v17  ;;  %v811_v17 = vld [vmem:[%s11596_s1 + $0xfe8] sm:$0xff] }
 0x125   :  { %3277 = vmatmul.mubr.f32.vlgmr.msra.gmra.mrb[128].mxu1 %v8696_v46  ;;  %5336 = vmatpush1.bf16.msra.mxu0 %v5335_v18  ;;  %v4391_v23 = vpop.f32.mrb[23].mxu1  ;;  %v5789_v44 = vpack.c.bf16 %v847_v49, %v844_v29  ;;  %v752_v18 = vld [vmem:[%s11596_s1 + $0xe10] sm:$0xff]  ;;  %v758_v29 = vld [vmem:[%s11596_s1 + $0xe40] sm:$0xff]  ;;  %v761_v49 = vld [vmem:[%s11596_s1 + $0xe58] sm:$0xff] }
 0x126   :  { %1784 = vmatprep.mubr.f32.mxu0 %v8473_v0  ;;  %3281 = vmatprep.mubr.f32.mxu1 %v8709_v50  ;;  %v8744_v31 = vadd.f32 %v4391_v23, %v4390_v14  ;;  %v8749_v0 = vld [vmem:[%s11597_s0 + $0x168] sm:$0xff]  ;;  %v805_v14 = vld [vmem:[%s11596_s1 + $0xfb8] sm:$0xff] }
 0x127   :  { %5338 = vmatprep.subr.bf16.mxu0 %v5337_v60  ;;  %5784 = vmatpush3.bf16.msra.mxu1 %v5783_v34  ;;  %v5793_v34 = vpack.c.bf16 %v853_v55, %v850_v54  ;;  %v5795_v59 = vpack.c.bf16 %v805_v14, %v802_v10  ;;  %v8862_v55 = vld [vmem:[%s11597_s0 + $0x280] sm:$0xff] }
 0x128   :  { %1785 = vmatmul.mubr.f32.gmra.mrb[18].mxu0 %v8488_v1  ;;  %v4393_v38 = vpop.f32.mrb[24].mxu1  ;;  %5786 = vmatprep.subr.bf16.mxu1 %v5785_v15  ;;  %v5347_v15 = vpack.c.bf16 %v755_v58, %v752_v18  ;;  %v764_v58 = vld [vmem:[%s11596_s1 + $0xe70] sm:$0xff]  ;;  %v814_v14 = vld [vmem:[%s11596_s1 + $0x1000] sm:$0xff] }
 0x129   :  { %3282 = vmatmul.mubr.f32.gmra.mrb[130].mxu1 %v8736_v25  ;;  %5340 = vmatpush1.bf16.msra.mxu0 %v5339_v22  ;;  %v4394_v1 = vpop.f32.mrb[25].mxu1  ;;  %v8818_v22 = vld [vmem:[%s11597_s0 + $0x1f0] sm:$0xff] }
 0x12a   :  { %1790 = vmatprep.mubr.f32.mxu0 %v8501_v13  ;;  %3286 = vmatprep.mubr.f32.mxu1 %v8749_v0  ;;  %v8778_v12 = vadd.f32 %v4394_v1, %v4393_v38  ;;  %v8791_v13 = vld [vmem:[%s11597_s0 + $0x1f8] sm:$0xff]  ;;  %v768_v38 = vld [vmem:[%s11596_s1 + $0xe90] sm:$0xff] }
 0x12b   :  { %5342 = vmatprep.subr.bf16.mxu0 %v5341_v39  ;;  %5788 = vmatpush3.bf16.msra.mxu1 %v5787_v35  ;;  %v1166_v39 = vld [vmem:[%s11598_s2] sm:$0x7]  ;;  %v865_v1 = vld [vmem:[%s11596_s1 + $0x1198] sm:$0xff]  ;;  %v5353_v26 = vpack.c.bf16 %v768_v38, %v765_v48 }
 0x12c   :  { %1791 = vmatmul.mubr.f32.gmra.mrb[20].mxu0 %v8516_v16  ;;  %v4396_v60 = vpop.f32.mrb[26].mxu1  ;;  %5790 = vmatprep.subr.bf16.mxu1 %v5789_v44  ;;  %v808_v44 = vld [vmem:[%s11596_s1 + $0xfd0] sm:$0xff]  ;;  %v8864_v18 = vrot.slane %v1166_v39, %v1178_v52  ;;  %v773_v48 = vld [vmem:[%s11596_s1 + $0xeb8] sm:$0xff] }
 0x12d   :  { %3287 = vmatmul.mubr.f32.gmra.mrb[132].mxu1 %v8776_v56  ;;  %5344 = vmatpush1.bf16.msra.mxu0 %v5343_v62  ;;  %v4397_v16 = vpop.f32.mrb[27].mxu1  ;;  %v862_v62 = vld [vmem:[%s11596_s1 + $0x1180] sm:$0xff]  ;;  %v8905_v52 = vld [vmem:[%s11597_s0 + $0x310] sm:$0xff] }
 0x12e   :  { %1796 = vmatprep.mubr.f32.mxu0 %v8529_v27  ;;  %3291 = vmatprep.mubr.f32.mxu1 %v8791_v13  ;;  %v8820_v23 = vadd.f32 %v4397_v16, %v4396_v60  ;;  %v8832_v27 = vld [vmem:[%s11597_s0 + $0x288] sm:$0xff]  ;;  %v5799_v60 = vpack.c.bf16 %v811_v17, %v808_v44  ;;  %v5801_v10 = vpack.c.bf16 %v865_v1, %v862_v62  ;;  %v820_v17 = vld [vmem:[%s11596_s1 + $0x1030] sm:$0xff]  ;;  %v874_v1 = vld [vmem:[%s11596_s1 + $0x11e0] sm:$0xff] }
 0x12f   :  { %5346 = vmatprep.subr.bf16.mxu0 %v5345_v63  ;;  %5792 = vmatpush3.bf16.msra.mxu1 %v5791_v8  ;;  %v767_v63 = vld [vmem:[%s11596_s1 + $0xe88] sm:$0xff] }
 0x130   :  { %1797 = vmatmul.mubr.f32.gmra.mrb[22].mxu0 %v8544_v32  ;;  %v4399_v35 = vpop.f32.mrb[28].mxu1  ;;  %5794 = vmatprep.subr.bf16.mxu1 %v5793_v34  ;;  %v5351_v32 = vpack.c.bf16 %v761_v49, %v758_v29  ;;  %v771_v8 = vld [vmem:[%s11596_s1 + $0xea8] sm:$0xff]  ;;  %v774_v34 = vld [vmem:[%s11596_s1 + $0xec0] sm:$0xff]  ;;  %v5355_v41 = vpack.c.bf16 %v767_v63, %v764_v58  ;;  %v2699_v58 = vadd.f32 %v8400_v4, %v8864_v18  ;;  %v8959_v4 = vld [vmem:[%s11597_s0 + $0x438] sm:$0xff] }
 0x131   :  { %3292 = vmatmul.mubr.f32.gmra.mrb[134].mxu1 %v8818_v22  ;;  %5348 = vmatpush1.bf16.msra.mxu0 %v5347_v15  ;;  %v4400_v9 = vpop.f32.mrb[29].mxu1  ;;  %v817_v15 = vld [vmem:[%s11596_s1 + $0x1018] sm:$0xff]  ;;  %v871_v29 = vld [vmem:[%s11596_s1 + $0x11c8] sm:$0xff]  ;;  %v5357_v39 = vpack.c.bf16 %v774_v34, %v771_v8  ;;  %v776_v8 = vld [vmem:[%s11596_s1 + $0xed0] sm:$0xff] }
 0x132   :  { %1802 = vmatprep.mubr.f32.mxu0 %v8557_v53  ;;  %3296 = vmatprep.mubr.f32.mxu1 %v8832_v27  ;;  %v4401_v54 = vadd.f32 %v4400_v9, %v4399_v35  ;;  %v8875_v53 = vld [vmem:[%s11597_s0 + $0x318] sm:$0xff]  ;;  %v5803_v35 = vpack.c.bf16 %v817_v15, %v814_v14  ;;  %v5805_v44 = vpack.c.bf16 %v871_v29, %v868_v24  ;;  %v823_v9 = vld [vmem:[%s11596_s1 + $0x1048] sm:$0xff]  ;;  %v786_v15 = vld [vmem:[%s11596_s1 + $0xf20] sm:$0xff] }
 0x133   :  { %5350 = vmatprep.subr.bf16.mxu0 %v5349_v30  ;;  %5796 = vmatpush3.bf16.msra.mxu1 %v5795_v59  ;;  %v770_v30 = vld [vmem:[%s11596_s1 + $0xea0] sm:$0xff]  ;;  %v777_v59 = vld [vmem:[%s11596_s1 + $0xed8] sm:$0xff]  ;;  %v5807_v34 = vpack.c.bf16 %v823_v9, %v820_v17 }
 0x134   :  { %1803 = vmatmul.mubr.f32.gmra.mrb[24].mxu0 %v8572_v51  ;;  %v4402_v11 = vpop.f32.mrb[30].mxu1  ;;  %5798 = vmatprep.subr.bf16.mxu1 %v5797_v42  ;;  %v8891_v16 = vadd.f32 %v4401_v54, %v8864_v18  ;;  %v780_v42 = vld [vmem:[%s11596_s1 + $0xef0] sm:$0xff]  ;;  %v877_v54 = vld [vmem:[%s11596_s1 + $0x11f8] sm:$0xff] }
 0x135   :  { %3297 = vmatmul.mubr.f32.gmra.mrb[136].mxu1 %v8862_v55  ;;  %5352 = vmatpush1.bf16.msra.mxu0 %v5351_v32  ;;  %v4403_v51 = vpop.f32.mrb[31].mxu1  ;;  %v829_v24 = vld [vmem:[%s11596_s1 + $0x1078] sm:$0xff] }
 0x136   :  { %v4404_v49 = vadd.f32 %v4403_v51, %v4402_v11  ;;  %1808 = vmatprep.mubr.f32.mxu0 %v8585_v5  ;;  %3301 = vmatprep.mubr.f32.mxu1 %v8875_v53  ;;  %v8916_v5 = vld [vmem:[%s11597_s0 + $0x3a8] sm:$0xff]  ;;  %v5809_v51 = vpack.c.bf16 %v877_v54, %v874_v1  ;;  %v789_v9 = vld [vmem:[%s11596_s1 + $0xf38] sm:$0xff] }
 0x137   :  { %5354 = vmatprep.subr.bf16.mxu0 %v5353_v26  ;;  %5800 = vmatpush3.bf16.msra.mxu1 %v5799_v60  ;;  %v8948_v26 = vld [vmem:[%s11597_s0 + $0x3a0] sm:$0xff]  ;;  %v779_v60 = vld [vmem:[%s11596_s1 + $0xee8] sm:$0xff] }
 0x138   :  { %v4437_v38 = vpop.f32.mrb[32].mxu1  ;;  %1809 = vmatmul.mubr.f32.gmra.mrb[26].mxu0 %v8600_v3  ;;  %5802 = vmatprep.subr.bf16.mxu1 %v5801_v10  ;;  %v8932_v32 = vadd.f32 %v4404_v49, %v8864_v18  ;;  %v5359_v3 = vpack.c.bf16 %v773_v48, %v770_v30  ;;  %v783_v11 = vld [vmem:[%s11596_s1 + $0xf08] sm:$0xff]  ;;  %v5363_v49 = vpack.c.bf16 %v779_v60, %v776_v8  ;;  %v788_v8 = vld [vmem:[%s11596_s1 + $0xf30] sm:$0xff] }
 0x139   :  { %v4438_v62 = vpop.f32.mrb[33].mxu1  ;;  %3302 = vmatmul.mubr.f32.gmra.mrb[138].mxu1 %v8905_v52  ;;  %5356 = vmatpush1.bf16.msra.mxu0 %v5355_v41  ;;  %v826_v41 = vld [vmem:[%s11596_s1 + $0x1060] sm:$0xff]  ;;  %v931_v30 = vld [vmem:[%s11596_s1 + $0x13a8] sm:$0xff]  ;;  %v2704_v48 = vadd.f32 %v8440_v33, %v8864_v18 }
 0x13a   :  { %v4439_v63 = vadd.f32 %v4438_v62, %v4437_v38  ;;  %1814 = vmatprep.mubr.f32.mxu0 %v8613_v21  ;;  %3306 = vmatprep.mubr.f32.mxu1 %v8916_v5  ;;  %v5361_v21 = vpack.c.bf16 %v780_v42, %v777_v59  ;;  %v8990_v59 = vld [vmem:[%s11597_s0 + $0x430] sm:$0xff]  ;;  %v785_v38 = vld [vmem:[%s11596_s1 + $0xf18] sm:$0xff]  ;;  %v9001_v33 = vld [vmem:[%s11597_s0 + $0x4c8] sm:$0xff]  ;;  %v5811_v42 = vpack.c.bf16 %v829_v24, %v826_v41 }
 0x13b   :  { %5358 = vmatprep.subr.bf16.mxu0 %v5357_v39  ;;  %5804 = vmatpush3.bf16.msra.mxu1 %v5803_v35  ;;  %v782_v35 = vld [vmem:[%s11596_s1 + $0xf00] sm:$0xff]  ;;  %v792_v62 = vld [vmem:[%s11596_s1 + $0xf50] sm:$0xff]  ;;  %v791_v60 = vld [vmem:[%s11596_s1 + $0xf48] sm:$0xff]  ;;  %v2714_v41 = vadd.f32 %v8496_v28, %v8864_v18 }
 0x13c   :  { %v8964_v10 = vadd.f32 %v4439_v63, %v2699_v58  ;;  %v4440_v14 = vpop.f32.mrb[34].mxu1  ;;  %1815 = vmatmul.mubr.f32.gmra.mrb[28].mxu0 %v8628_v19  ;;  %5806 = vmatprep.subr.bf16.mxu1 %v5805_v44  ;;  %v928_v19 = vld [vmem:[%s11596_s1 + $0x1390] sm:$0xff]  ;;  %v5367_v54 = vpack.c.bf16 %v785_v38, %v782_v35  ;;  %v2709_v58 = vadd.f32 %v8468_v20, %v8864_v18  ;;  %v9031_v20 = vld [vmem:[%s11597_s0 + $0x558] sm:$0xff]  ;;  %v9061_v28 = vld [vmem:[%s11597_s0 + $0x5e8] sm:$0xff] }
 0x13d   :  { %v4441_v29 = vpop.f32.mrb[35].mxu1  ;;  %3307 = vmatmul.mubr.f32.gmra.mrb[140].mxu1 %v8948_v26  ;;  %5360 = vmatpush1.bf16.msra.mxu0 %v5359_v3  ;;  %v5813_v3 = vpack.c.bf16 %v931_v30, %v928_v19 }
 0x13e   :  { %v4442_v39 = vadd.f32 %v4441_v29, %v4440_v14  ;;  %1820 = vmatprep.mubr.f32.mxu0 %v8641_v36  ;;  %3311 = vmatprep.mubr.f32.mxu1 %v8959_v4  ;;  %v5365_v36 = vpack.c.bf16 %v786_v15, %v783_v11  ;;  %v798_v14 = vld [vmem:[%s11596_s1 + $0xf80] sm:$0xff] }
 0x13f   :  { %5362 = vmatprep.subr.bf16.mxu0 %v5361_v21  ;;  %5808 = vmatpush3.bf16.msra.mxu1 %v5807_v34  ;;  %v795_v34 = vld [vmem:[%s11596_s1 + $0xf68] sm:$0xff]  ;;  %v794_v29 = vld [vmem:[%s11596_s1 + $0xf60] sm:$0xff] }
 0x140   :  { %v9003_v44 = vadd.f32 %v4442_v39, %v2704_v48  ;;  %v4443_v17 = vpop.f32.mrb[36].mxu1  ;;  %1821 = vmatmul.mubr.f32.gmra.mrb[30].mxu0 %v8656_v40  ;;  %5810 = vmatprep.subr.bf16.mxu1 %v5809_v51  ;;  %v9020_v40 = vld [vmem:[%s11597_s0 + $0x4c0] sm:$0xff]  ;;  %v5371_v51 = vpack.c.bf16 %v791_v60, %v788_v8  ;;  %v801_v48 = vld [vmem:[%s11596_s1 + $0xf98] sm:$0xff]  ;;  %v804_v39 = vld [vmem:[%s11596_s1 + $0xfb0] sm:$0xff]  ;;  %v2724_v8 = vadd.f32 %v8552_v37, %v8864_v18 }
 0x141   :  { %v4444_v1 = vpop.f32.mrb[37].mxu1  ;;  %3312 = vmatmul.mubr.f32.gmra.mrb[142].mxu1 %v8990_v59  ;;  %5364 = vmatpush1.bf16.msra.mxu0 %v5363_v49  ;;  %v797_v49 = vld [vmem:[%s11596_s1 + $0xf78] sm:$0xff]  ;;  %v9121_v37 = vld [vmem:[%s11597_s0 + $0x708] sm:$0xff] }
 0x142   :  { %v4445_v63 = vadd.f32 %v4444_v1, %v4443_v17  ;;  %1891 = vmatprep.mubr.f32.mxu0 %v8669_v45  ;;  %3316 = vmatprep.mubr.f32.mxu1 %v9001_v33  ;;  %v5369_v45 = vpack.c.bf16 %v792_v62, %v789_v9  ;;  %v5375_v38 = vpack.c.bf16 %v797_v49, %v794_v29  ;;  %v800_v17 = vld [vmem:[%s11596_s1 + $0xf90] sm:$0xff]  ;;  %v803_v9 = vld [vmem:[%s11596_s1 + $0xfa8] sm:$0xff] }
 0x143   :  { %5366 = vmatprep.subr.bf16.mxu0 %v5365_v36  ;;  %5812 = vmatpush3.bf16.msra.mxu1 %v5811_v42  ;;  %v2719_v36 = vadd.f32 %v8524_v2, %v8864_v18  ;;  %v9091_v2 = vld [vmem:[%s11597_s0 + $0x678] sm:$0xff]  ;;  %v807_v1 = vld [vmem:[%s11596_s1 + $0xfc8] sm:$0xff]  ;;  %v2729_v29 = vadd.f32 %v8580_v6, %v8864_v18 }
 0x144   :  { %v9033_v21 = vadd.f32 %v4445_v63, %v2709_v58  ;;  %v4446_v11 = vpop.f32.mrb[38].mxu1  ;;  %1892 = vmatmul.mubr.f32.vlgmr.msra.gmra.mrb[0].mxu0 %v8696_v46  ;;  %5814 = vmatprep.subr.bf16.mxu1 %v5813_v3  ;;  %v9050_v46 = vld [vmem:[%s11597_s0 + $0x550] sm:$0xff]  ;;  %v5379_v63 = vpack.c.bf16 %v803_v9, %v800_v17  ;;  %v9151_v6 = vld [vmem:[%s11597_s0 + $0x798] sm:$0xff]  ;;  %v2734_v17 = vadd.f32 %v8608_v43, %v8864_v18  ;;  %v9181_v43 = vld [vmem:[%s11597_s0 + $0x828] sm:$0xff] }
 0x145   :  { %v4447_v15 = vpop.f32.mrb[39].mxu1  ;;  %3317 = vmatmul.mubr.f32.gmra.mrb[144].mxu1 %v9020_v40  ;;  %5368 = vmatpush1.bf16.msra.mxu0 %v5367_v54  ;;  %v810_v54 = vld [vmem:[%s11596_s1 + $0xfe0] sm:$0xff] }
 0x146   :  { %v4448_v24 = vadd.f32 %v4447_v15, %v4446_v11  ;;  %1897 = vmatprep.mubr.f32.mxu0 %v8709_v50  ;;  %3321 = vmatprep.mubr.f32.mxu1 %v9031_v20  ;;  %v5373_v50 = vpack.c.bf16 %v798_v14, %v795_v34  ;;  %v809_v11 = vld [vmem:[%s11596_s1 + $0xfd8] sm:$0xff] }
 0x147   :  { %5370 = vmatprep.subr.bf16.mxu0 %v5369_v45  ;;  %v806_v45 = vld [vmem:[%s11596_s1 + $0xfc0] sm:$0xff]  ;;  %v813_v15 = vld [vmem:[%s11596_s1 + $0xff8] sm:$0xff] }
 0x148   :  { %v9063_v19 = vadd.f32 %v4448_v24, %v2714_v41  ;;  %v4449_v30 = vpop.f32.mrb[40].mxu1  ;;  %1898 = vmatmul.mubr.f32.gmra.mrb[2].mxu0 %v8736_v25  ;;  %v9080_v25 = vld [vmem:[%s11597_s0 + $0x5e0] sm:$0xff]  ;;  %v5383_v24 = vpack.c.bf16 %v809_v11, %v806_v45  ;;  %v2739_v45 = vadd.f32 %v8636_v57, %v8864_v18  ;;  %v9211_v57 = vld [vmem:[%s11597_s0 + $0x8b8] sm:$0xff] }
 0x149   :  { %v4450_v35 = vpop.f32.mrb[41].mxu1  ;;  %3322 = vmatmul.mubr.f32.gmra.mrb[146].mxu1 %v9050_v46  ;;  %5372 = vmatpush1.bf16.msra.mxu0 %v5371_v51  ;;  %v816_v51 = vld [vmem:[%s11596_s1 + $0x1010] sm:$0xff] }
 0x14a   :  { %v4451_v42 = vadd.f32 %v4450_v35, %v4449_v30  ;;  %1903 = vmatprep.mubr.f32.mxu0 %v8749_v0  ;;  %3326 = vmatprep.mubr.f32.mxu1 %v9061_v28  ;;  %v5377_v0 = vpack.c.bf16 %v804_v39, %v801_v48  ;;  %v815_v30 = vld [vmem:[%s11596_s1 + $0x1008] sm:$0xff] }
 0x14b   :  { %5374 = vmatprep.subr.bf16.mxu0 %v5373_v50  ;;  %v812_v50 = vld [vmem:[%s11596_s1 + $0xff0] sm:$0xff]  ;;  %v819_v35 = vld [vmem:[%s11596_s1 + $0x1028] sm:$0xff] }
 0x14c   :  { %v9093_v62 = vadd.f32 %v4451_v42, %v2719_v36  ;;  %v4452_v3 = vpop.f32.mrb[42].mxu1  ;;  %1904 = vmatmul.mubr.f32.gmra.mrb[4].mxu0 %v8776_v56  ;;  %v9110_v56 = vld [vmem:[%s11597_s0 + $0x670] sm:$0xff]  ;;  %v5387_v42 = vpack.c.bf16 %v815_v30, %v812_v50  ;;  %v2744_v50 = vadd.f32 %v8664_v47, %v8864_v18  ;;  %v9241_v47 = vld [vmem:[%s11597_s0 + $0x58] sm:$0xff] }
 0x14d   :  { %v4453_v58 = vpop.f32.mrb[43].mxu1  ;;  %3327 = vmatmul.mubr.f32.gmra.mrb[148].mxu1 %v9080_v25  ;;  %5376 = vmatpush1.bf16.msra.mxu0 %v5375_v38  ;;  %v822_v38 = vld [vmem:[%s11596_s1 + $0x1040] sm:$0xff] }
 0x14e   :  { %v4454_v60 = vadd.f32 %v4453_v58, %v4452_v3  ;;  %1909 = vmatprep.mubr.f32.mxu0 %v8791_v13  ;;  %3331 = vmatprep.mubr.f32.mxu1 %v9091_v2  ;;  %v5381_v13 = vpack.c.bf16 %v810_v54, %v807_v1  ;;  %v821_v3 = vld [vmem:[%s11596_s1 + $0x1038] sm:$0xff] }
 0x14f   :  { %5378 = vmatprep.subr.bf16.mxu0 %v5377_v0  ;;  %v818_v0 = vld [vmem:[%s11596_s1 + $0x1020] sm:$0xff]  ;;  %v825_v58 = vld [vmem:[%s11596_s1 + $0x1058] sm:$0xff] }
 0x150   :  { %v9123_v34 = vadd.f32 %v4454_v60, %v2724_v8  ;;  %v4455_v14 = vpop.f32.mrb[44].mxu1  ;;  %1910 = vmatmul.mubr.f32.gmra.mrb[6].mxu0 %v8818_v22  ;;  %v9140_v22 = vld [vmem:[%s11597_s0 + $0x700] sm:$0xff]  ;;  %v5391_v60 = vpack.c.bf16 %v821_v3, %v818_v0 }
 0x151   :  { %v4456_v41 = vpop.f32.mrb[45].mxu1  ;;  %3332 = vmatmul.mubr.f32.gmra.mrb[150].mxu1 %v9110_v56  ;;  %5380 = vmatpush1.bf16.msra.mxu0 %v5379_v63  ;;  %v828_v63 = vld [vmem:[%s11596_s1 + $0x1070] sm:$0xff] }
 0x152   :  { %v4457_v49 = vadd.f32 %v4456_v41, %v4455_v14  ;;  %1915 = vmatprep.mubr.f32.mxu0 %v8832_v27  ;;  %3336 = vmatprep.mubr.f32.mxu1 %v9121_v37  ;;  %v5385_v27 = vpack.c.bf16 %v816_v51, %v813_v15  ;;  %v827_v14 = vld [vmem:[%s11596_s1 + $0x1068] sm:$0xff] }
 0x153   :  { %5382 = vmatprep.subr.bf16.mxu0 %v5381_v13  ;;  %v824_v13 = vld [vmem:[%s11596_s1 + $0x1050] sm:$0xff]  ;;  %v831_v41 = vld [vmem:[%s11596_s1 + $0x1088] sm:$0xff] }
 0x154   :  { %v9153_v48 = vadd.f32 %v4457_v49, %v2729_v29  ;;  %v4458_v39 = vpop.f32.mrb[46].mxu1  ;;  %1916 = vmatmul.mubr.f32.gmra.mrb[8].mxu0 %v8862_v55  ;;  %v9170_v55 = vld [vmem:[%s11597_s0 + $0x790] sm:$0xff]  ;;  %v5395_v49 = vpack.c.bf16 %v827_v14, %v824_v13 }
 0x155   :  { %v4459_v36 = vpop.f32.mrb[47].mxu1  ;;  %3337 = vmatmul.mubr.f32.gmra.mrb[152].mxu1 %v9140_v22  ;;  %5384 = vmatpush1.bf16.msra.mxu0 %v5383_v24  ;;  %v834_v24 = vld [vmem:[%s11596_s1 + $0x10a0] sm:$0xff] }
 0x156   :  { %v4460_v9 = vadd.f32 %v4459_v36, %v4458_v39  ;;  %1921 = vmatprep.mubr.f32.mxu0 %v8875_v53  ;;  %3341 = vmatprep.mubr.f32.mxu1 %v9151_v6  ;;  %v5389_v53 = vpack.c.bf16 %v822_v38, %v819_v35  ;;  %v833_v39 = vld [vmem:[%s11596_s1 + $0x1098] sm:$0xff] }
 0x157   :  { %5386 = vmatprep.subr.bf16.mxu0 %v5385_v27  ;;  %v830_v27 = vld [vmem:[%s11596_s1 + $0x1080] sm:$0xff]  ;;  %v837_v35 = vld [vmem:[%s11596_s1 + $0x10b8] sm:$0xff] }
 0x158   :  { %v9183_v1 = vadd.f32 %v4460_v9, %v2734_v17  ;;  %v4461_v54 = vpop.f32.mrb[48].mxu1  ;;  %1922 = vmatmul.mubr.f32.gmra.mrb[10].mxu0 %v8905_v52  ;;  %v9200_v52 = vld [vmem:[%s11597_s0 + $0x820] sm:$0xff]  ;;  %v880_v17 = vld [vmem:[%s11596_s1 + $0x1210] sm:$0xff]  ;;  %v883_v9 = vld [vmem:[%s11596_s1 + $0x1228] sm:$0xff]  ;;  %v5399_v3 = vpack.c.bf16 %v833_v39, %v830_v27 }
 0x159   :  { %v4462_v8 = vpop.f32.mrb[49].mxu1  ;;  %3342 = vmatmul.mubr.f32.gmra.mrb[154].mxu1 %v9170_v55  ;;  %5388 = vmatpush1.bf16.msra.mxu0 %v5387_v42  ;;  %v840_v42 = vld [vmem:[%s11596_s1 + $0x10d0] sm:$0xff]  ;;  %v9314_v39 = vld [vmem:[%s11597_s0 + $0xe0] sm:$0xff] }
 0x15a   :  { %v4463_v11 = vadd.f32 %v4462_v8, %v4461_v54  ;;  %1927 = vmatprep.mubr.f32.mxu0 %v8916_v5  ;;  %3346 = vmatprep.mubr.f32.mxu1 %v9181_v43  ;;  %v5393_v5 = vpack.c.bf16 %v828_v63, %v825_v58  ;;  %v2749_v54 = vadd.f32 %v8704_v7, %v8864_v18  ;;  %v9272_v63 = vld [vmem:[%s11597_s0 + $0x50] sm:$0xff]  ;;  %v9283_v7 = vld [vmem:[%s11597_s0 + $0xe8] sm:$0xff] }
 0x15b   :  { %5390 = vmatprep.subr.bf16.mxu0 %v5389_v53  ;;  %v937_v53 = vld [vmem:[%s11596_s1 + $0x13d8] sm:$0xff]  ;;  %v836_v8 = vld [vmem:[%s11596_s1 + $0x10b0] sm:$0xff] }
 0x15c   :  { %v9213_v15 = vadd.f32 %v4463_v11, %v2739_v45  ;;  %v4464_v51 = vpop.f32.mrb[50].mxu1  ;;  %1928 = vmatmul.mubr.f32.gmra.mrb[12].mxu0 %v8948_v26  ;;  %v9230_v26 = vld [vmem:[%s11597_s0 + $0x8b0] sm:$0xff]  ;;  %v843_v45 = vld [vmem:[%s11596_s1 + $0x10e8] sm:$0xff]  ;;  %v5815_v11 = vpack.c.bf16 %v883_v9, %v880_v17 }
 0x15d   :  { %v4465_v29 = vpop.f32.mrb[51].mxu1  ;;  %3347 = vmatmul.mubr.f32.gmra.mrb[156].mxu1 %v9200_v52  ;;  %5392 = vmatpush1.bf16.msra.mxu0 %v5391_v60  ;;  %v839_v60 = vld [vmem:[%s11596_s1 + $0x10c8] sm:$0xff] }
 0x15e   :  { %v4466_v30 = vadd.f32 %v4465_v29, %v4464_v51  ;;  %1933 = vmatprep.mubr.f32.mxu0 %v8959_v4  ;;  %3351 = vmatprep.mubr.f32.mxu1 %v9211_v57  ;;  %v5397_v4 = vpack.c.bf16 %v834_v24, %v831_v41  ;;  %v886_v41 = vld [vmem:[%s11596_s1 + $0x1240] sm:$0xff]  ;;  %v889_v24 = vld [vmem:[%s11596_s1 + $0x1258] sm:$0xff] }
 0x15f   :  { %5394 = vmatprep.subr.bf16.mxu0 %v5393_v5  ;;  %v846_v5 = vld [vmem:[%s11596_s1 + $0x1100] sm:$0xff] }
 0x160   :  { %v9246_v38 = vadd.f32 %v4466_v30, %v2744_v50  ;;  %v4467_v36 = vpop.f32.mrb[52].mxu1  ;;  %1934 = vmatmul.mubr.f32.gmra.mrb[14].mxu0 %v8990_v59  ;;  %v934_v59 = vld [vmem:[%s11596_s1 + $0x13c0] sm:$0xff]  ;;  %v943_v50 = vld [vmem:[%s11596_s1 + $0x1408] sm:$0xff]  ;;  %v2754_v30 = vadd.f32 %v8744_v31, %v8864_v18  ;;  %v9325_v31 = vld [vmem:[%s11597_s0 + $0x178] sm:$0xff] }
 0x161   :  { %v4468_v0 = vpop.f32.mrb[53].mxu1  ;;  %3352 = vmatmul.mubr.f32.gmra.mrb[158].mxu1 %v9230_v26  ;;  %5396 = vmatpush1.bf16.msra.mxu0 %v5395_v49  ;;  %v5817_v51 = vpack.c.bf16 %v937_v53, %v934_v59  ;;  %v5403_v49 = vpack.c.bf16 %v839_v60, %v836_v8  ;;  %v892_v59 = vld [vmem:[%s11596_s1 + $0x1270] sm:$0xff]  ;;  %v895_v53 = vld [vmem:[%s11596_s1 + $0x1288] sm:$0xff]  ;;  %v949_v8 = vld [vmem:[%s11596_s1 + $0x1438] sm:$0xff]  ;;  %v2759_v60 = vadd.f32 %v8778_v12, %v8864_v18 }
 0x162   :  { %v4469_v58 = vadd.f32 %v4468_v0, %v4467_v36  ;;  %1939 = vmatprep.mubr.f32.mxu0 %v9001_v33  ;;  %3421 = vmatprep.mubr.f32.mxu1 %v9241_v47  ;;  %v5401_v33 = vpack.c.bf16 %v840_v42, %v837_v35  ;;  %v845_v35 = vld [vmem:[%s11596_s1 + $0x10f8] sm:$0xff]  ;;  %v5819_v42 = vpack.c.bf16 %v889_v24, %v886_v41  ;;  %v852_v0 = vld [vmem:[%s11596_s1 + $0x1130] sm:$0xff]  ;;  %v9367_v12 = vld [vmem:[%s11597_s0 + $0x208] sm:$0xff] }
 0x163   :  { %5398 = vmatprep.subr.bf16.mxu0 %v5397_v4  ;;  %v842_v4 = vld [vmem:[%s11596_s1 + $0x10e0] sm:$0xff]  ;;  %v849_v36 = vld [vmem:[%s11596_s1 + $0x1118] sm:$0xff] }
 0x164   :  { %v9288_v13 = vadd.f32 %v4469_v58, %v2749_v54  ;;  %v4470_v14 = vpop.f32.mrb[54].mxu1  ;;  %1940 = vmatmul.mubr.f32.gmra.mrb[16].mxu0 %v9020_v40  ;;  %v940_v40 = vld [vmem:[%s11596_s1 + $0x13f0] sm:$0xff]  ;;  %v5407_v58 = vpack.c.bf16 %v845_v35, %v842_v4  ;;  %v955_v4 = vld [vmem:[%s11596_s1 + $0x1468] sm:$0xff]  ;;  %v2764_v35 = vadd.f32 %v8820_v23, %v8864_v18  ;;  %v9409_v23 = vld [vmem:[%s11597_s0 + $0x298] sm:$0xff] }
 0x165   :  { %v4471_v29 = vpop.f32.mrb[55].mxu1  ;;  %3422 = vmatmul.mubr.f32.vlgmr.msra.gmra.mrb[160].mxu1 %v9272_v63  ;;  %5400 = vmatpush1.bf16.msra.mxu0 %v5399_v3  ;;  %v5821_v3 = vpack.c.bf16 %v943_v50, %v940_v40  ;;  %v898_v40 = vld [vmem:[%s11596_s1 + $0x12a0] sm:$0xff]  ;;  %v901_v50 = vld [vmem:[%s11596_s1 + $0x12b8] sm:$0xff] }
 0x166   :  { %v4472_v27 = vadd.f32 %v4471_v29, %v4470_v14  ;;  %1945 = vmatprep.mubr.f32.mxu0 %v9031_v20  ;;  %3426 = vmatprep.mubr.f32.mxu1 %v9283_v7  ;;  %v5405_v20 = vpack.c.bf16 %v846_v5, %v843_v45  ;;  %v9356_v45 = vld [vmem:[%s11597_s0 + $0x170] sm:$0xff]  ;;  %v851_v14 = vld [vmem:[%s11596_s1 + $0x1128] sm:$0xff]  ;;  %v858_v29 = vld [vmem:[%s11596_s1 + $0x1160] sm:$0xff] }
 0x167   :  { %5402 = vmatprep.subr.bf16.mxu0 %v5401_v33  ;;  %5816 = vmatpush3.bf16.msra.mxu1 %v5815_v11  ;;  %v848_v11 = vld [vmem:[%s11596_s1 + $0x1110] sm:$0xff]  ;;  %v855_v5 = vld [vmem:[%s11596_s1 + $0x1148] sm:$0xff] }
 0x168   :  { %v9330_v17 = vadd.f32 %v4472_v27, %v2754_v30  ;;  %v4473_v9 = vpop.f32.mrb[56].mxu1  ;;  %1946 = vmatmul.mubr.f32.gmra.mrb[18].mxu0 %v9050_v46  ;;  %5818 = vmatprep.subr.bf16.mxu1 %v5817_v51  ;;  %v946_v46 = vld [vmem:[%s11596_s1 + $0x1420] sm:$0xff]  ;;  %v5823_v51 = vpack.c.bf16 %v895_v53, %v892_v59  ;;  %v5411_v27 = vpack.c.bf16 %v851_v14, %v848_v11  ;;  %v864_v53 = vld [vmem:[%s11596_s1 + $0x1190] sm:$0xff] }
 0x169   :  { %v4474_v54 = vpop.f32.mrb[57].mxu1  ;;  %3427 = vmatmul.mubr.f32.gmra.mrb[162].mxu1 %v9314_v39  ;;  %5404 = vmatpush1.bf16.msra.mxu0 %v5403_v49  ;;  %v5825_v49 = vpack.c.bf16 %v949_v8, %v946_v46  ;;  %v5413_v18 = vpack.c.bf16 %v858_v29, %v855_v5  ;;  %v907_v46 = vld [vmem:[%s11596_s1 + $0x12e8] sm:$0xff]  ;;  %v9438_v14 = vld [vmem:[%s11597_s0 + $0x290] sm:$0xff] }
 0x16a   :  { %v4475_v33 = vadd.f32 %v4474_v54, %v4473_v9  ;;  %1951 = vmatprep.mubr.f32.mxu0 %v9061_v28  ;;  %3431 = vmatprep.mubr.f32.mxu1 %v9325_v31  ;;  %v5409_v28 = vpack.c.bf16 %v852_v0, %v849_v36  ;;  %v9398_v36 = vld [vmem:[%s11597_s0 + $0x200] sm:$0xff]  ;;  %v857_v9 = vld [vmem:[%s11596_s1 + $0x1158] sm:$0xff]  ;;  %v5827_v0 = vpack.c.bf16 %v901_v50, %v898_v40  ;;  %v863_v5 = vld [vmem:[%s11596_s1 + $0x1188] sm:$0xff] }
 0x16b   :  { %5406 = vmatprep.subr.bf16.mxu0 %v5405_v20  ;;  %5820 = vmatpush3.bf16.msra.mxu1 %v5819_v42  ;;  %v854_v42 = vld [vmem:[%s11596_s1 + $0x1140] sm:$0xff] }
 0x16c   :  { %v9372_v41 = vadd.f32 %v4475_v33, %v2759_v60  ;;  %v4476_v24 = vpop.f32.mrb[58].mxu1  ;;  %1952 = vmatmul.mubr.f32.gmra.mrb[20].mxu0 %v9080_v25  ;;  %5822 = vmatprep.subr.bf16.mxu1 %v5821_v3  ;;  %v952_v25 = vld [vmem:[%s11596_s1 + $0x1450] sm:$0xff]  ;;  %v5415_v60 = vpack.c.bf16 %v857_v9, %v854_v42  ;;  %v961_v33 = vld [vmem:[%s11596_s1 + $0x1498] sm:$0xff]  ;;  %v870_v50 = vld [vmem:[%s11596_s1 + $0x11c0] sm:$0xff] }
 0x16d   :  { %v4477_v30 = vpop.f32.mrb[59].mxu1  ;;  %3432 = vmatmul.mubr.f32.gmra.mrb[164].mxu1 %v9356_v45  ;;  %5408 = vmatpush1.bf16.msra.mxu0 %v5407_v58  ;;  %v5829_v54 = vpack.c.bf16 %v955_v4, %v952_v25  ;;  %v904_v58 = vld [vmem:[%s11596_s1 + $0x12d0] sm:$0xff]  ;;  %v913_v25 = vld [vmem:[%s11596_s1 + $0x1318] sm:$0xff]  ;;  %v9479_v42 = vld [vmem:[%s11597_s0 + $0x320] sm:$0xff] }
 0x16e   :  { %v4478_v20 = vadd.f32 %v4477_v30, %v4476_v24  ;;  %1957 = vmatprep.mubr.f32.mxu0 %v9091_v2  ;;  %3436 = vmatprep.mubr.f32.mxu1 %v9367_v12  ;;  %v861_v2 = vld [vmem:[%s11596_s1 + $0x1178] sm:$0xff]  ;;  %v867_v24 = vld [vmem:[%s11596_s1 + $0x11a8] sm:$0xff]  ;;  %v5831_v29 = vpack.c.bf16 %v907_v46, %v904_v58  ;;  %v866_v9 = vld [vmem:[%s11596_s1 + $0x11a0] sm:$0xff] }
 0x16f   :  { %5410 = vmatprep.subr.bf16.mxu0 %v5409_v28  ;;  %5824 = vmatpush3.bf16.msra.mxu1 %v5823_v51  ;;  %v860_v28 = vld [vmem:[%s11596_s1 + $0x1170] sm:$0xff]  ;;  %v5417_v51 = vpack.c.bf16 %v864_v53, %v861_v2  ;;  %v5421_v2 = vpack.c.bf16 %v870_v50, %v867_v24 }
 0x170   :  { %v9414_v3 = vadd.f32 %v4478_v20, %v2764_v35  ;;  %v4479_v59 = vpop.f32.mrb[60].mxu1  ;;  %1958 = vmatmul.mubr.f32.gmra.mrb[22].mxu0 %v9110_v56  ;;  %5826 = vmatprep.subr.bf16.mxu1 %v5825_v49  ;;  %v958_v56 = vld [vmem:[%s11596_s1 + $0x1480] sm:$0xff]  ;;  %v967_v35 = vld [vmem:[%s11596_s1 + $0x14c8] sm:$0xff]  ;;  %v876_v58 = vld [vmem:[%s11596_s1 + $0x11f0] sm:$0xff] }
 0x171   :  { %v4480_v8 = vpop.f32.mrb[61].mxu1  ;;  %3437 = vmatmul.mubr.f32.gmra.mrb[166].mxu1 %v9398_v36  ;;  %5412 = vmatpush1.bf16.msra.mxu0 %v5411_v27  ;;  %v5833_v30 = vpack.c.bf16 %v961_v33, %v958_v56  ;;  %v910_v27 = vld [vmem:[%s11596_s1 + $0x1300] sm:$0xff]  ;;  %v973_v33 = vld [vmem:[%s11596_s1 + $0x14f8] sm:$0xff] }
 0x172   :  { %v4481_v11 = vadd.f32 %v4480_v8, %v4479_v59  ;;  %1963 = vmatprep.mubr.f32.mxu0 %v9121_v37  ;;  %3441 = vmatprep.mubr.f32.mxu1 %v9409_v23  ;;  %v9449_v37 = vld [vmem:[%s11597_s0 + $0x328] sm:$0xff]  ;;  %v5835_v59 = vpack.c.bf16 %v913_v25, %v910_v27  ;;  %v916_v8 = vld [vmem:[%s11596_s1 + $0x1330] sm:$0xff]  ;;  %v882_v27 = vld [vmem:[%s11596_s1 + $0x1220] sm:$0xff] }
 0x173   :  { %5414 = vmatprep.subr.bf16.mxu0 %v5413_v18  ;;  %5828 = vmatpush3.bf16.msra.mxu1 %v5827_v0  ;;  %v869_v18 = vld [vmem:[%s11596_s1 + $0x11b8] sm:$0xff] }
 0x174   :  { %v9455_v49 = vadd.f32 %v4481_v11, %v8891_v16  ;;  %v4482_v40 = vpop.f32.mrb[62].mxu1  ;;  %1964 = vmatmul.mubr.f32.gmra.mrb[24].mxu0 %v9140_v22  ;;  %5830 = vmatprep.subr.bf16.mxu1 %v5829_v54  ;;  %v5419_v16 = vpack.c.bf16 %v863_v5, %v860_v28  ;;  %v964_v22 = vld [vmem:[%s11596_s1 + $0x14b0] sm:$0xff]  ;;  %v873_v0 = vld [vmem:[%s11596_s1 + $0x11d8] sm:$0xff] }
 0x175   :  { %v4483_v4 = vpop.f32.mrb[63].mxu1  ;;  %3442 = vmatmul.mubr.f32.gmra.mrb[168].mxu1 %v9438_v14  ;;  %5416 = vmatpush1.bf16.msra.mxu0 %v5415_v60  ;;  %v5837_v46 = vpack.c.bf16 %v967_v35, %v964_v22  ;;  %v919_v60 = vld [vmem:[%s11596_s1 + $0x1348] sm:$0xff]  ;;  %v9520_v28 = vld [vmem:[%s11597_s0 + $0x3b0] sm:$0xff]  ;;  %v5425_v24 = vpack.c.bf16 %v876_v58, %v873_v0 }
 0x176   :  { %v4484_v20 = vadd.f32 %v4483_v4, %v4482_v40  ;;  %1969 = vmatprep.mubr.f32.mxu0 %v9151_v6  ;;  %3446 = vmatprep.mubr.f32.mxu1 %v9449_v37  ;;  %v9490_v6 = vld [vmem:[%s11597_s0 + $0x3b8] sm:$0xff]  ;;  %v872_v5 = vld [vmem:[%s11596_s1 + $0x11d0] sm:$0xff]  ;;  %v5839_v40 = vpack.c.bf16 %v919_v60, %v916_v8  ;;  %v922_v4 = vld [vmem:[%s11596_s1 + $0x1360] sm:$0xff] }
 0x177   :  { %5418 = vmatprep.subr.bf16.mxu0 %v5417_v51  ;;  %5832 = vmatpush3.bf16.msra.mxu1 %v5831_v29  ;;  %v875_v51 = vld [vmem:[%s11596_s1 + $0x11e8] sm:$0xff]  ;;  %v888_v8 = vld [vmem:[%s11596_s1 + $0x1250] sm:$0xff] }
 0x178   :  { %v9496_v53 = vadd.f32 %v4484_v20, %v8932_v32  ;;  %v4517_v54 = vpop.f32.mrb[64].mxu1  ;;  %1970 = vmatmul.mubr.f32.gmra.mrb[26].mxu0 %v9170_v55  ;;  %5834 = vmatprep.subr.bf16.mxu1 %v5833_v30  ;;  %v5423_v32 = vpack.c.bf16 %v869_v18, %v866_v9  ;;  %v970_v55 = vld [vmem:[%s11596_s1 + $0x14e0] sm:$0xff]  ;;  %v879_v29 = vld [vmem:[%s11596_s1 + $0x1208] sm:$0xff] }
 0x179   :  { %v4518_v56 = vpop.f32.mrb[65].mxu1  ;;  %3447 = vmatmul.mubr.f32.gmra.mrb[170].mxu1 %v9479_v42  ;;  %5420 = vmatpush1.bf16.msra.mxu0 %v5419_v16  ;;  %v5841_v25 = vpack.c.bf16 %v973_v33, %v970_v55  ;;  %v925_v16 = vld [vmem:[%s11596_s1 + $0x1378] sm:$0xff]  ;;  %v1027_v35 = vld [vmem:[%s11596_s1 + $0x16a8] sm:$0xff]  ;;  %v9561_v9 = vld [vmem:[%s11597_s0 + $0x440] sm:$0xff]  ;;  %v5429_v0 = vpack.c.bf16 %v882_v27, %v879_v29 }
 0x17a   :  { %v4519_v11 = vadd.f32 %v4518_v56, %v4517_v54  ;;  %1975 = vmatprep.mubr.f32.mxu0 %v9181_v43  ;;  %3451 = vmatprep.mubr.f32.mxu1 %v9490_v6  ;;  %v9531_v43 = vld [vmem:[%s11597_s0 + $0x448] sm:$0xff]  ;;  %v878_v18 = vld [vmem:[%s11596_s1 + $0x1200] sm:$0xff]  ;;  %v884_v55 = vld [vmem:[%s11596_s1 + $0x1230] sm:$0xff] }
 0x17b   :  { %5422 = vmatprep.subr.bf16.mxu0 %v5421_v2  ;;  %5836 = vmatpush3.bf16.msra.mxu1 %v5835_v59  ;;  %v881_v2 = vld [vmem:[%s11596_s1 + $0x1218] sm:$0xff]  ;;  %v5843_v59 = vpack.c.bf16 %v925_v16, %v922_v4  ;;  %v887_v33 = vld [vmem:[%s11596_s1 + $0x1248] sm:$0xff]  ;;  %v894_v29 = vld [vmem:[%s11596_s1 + $0x1280] sm:$0xff] }
 0x17c   :  { %v9537_v50 = vadd.f32 %v4519_v11, %v8964_v10  ;;  %v4520_v30 = vpop.f32.mrb[66].mxu1  ;;  %1976 = vmatmul.mubr.f32.gmra.mrb[28].mxu0 %v9200_v52  ;;  %5838 = vmatprep.subr.bf16.mxu1 %v5837_v46  ;;  %v5427_v10 = vpack.c.bf16 %v875_v51, %v872_v5  ;;  %v1024_v52 = vld [vmem:[%s11596_s1 + $0x1690] sm:$0xff]  ;;  %v885_v46 = vld [vmem:[%s11596_s1 + $0x1238] sm:$0xff] }
 0x17d   :  { %v4521_v22 = vpop.f32.mrb[67].mxu1  ;;  %3452 = vmatmul.mubr.f32.gmra.mrb[172].mxu1 %v9520_v28  ;;  %5424 = vmatpush1.bf16.msra.mxu0 %v5423_v32  ;;  %v5845_v60 = vpack.c.bf16 %v1027_v35, %v1024_v52  ;;  %v5431_v32 = vpack.c.bf16 %v881_v2, %v878_v18  ;;  %v5433_v11 = vpack.c.bf16 %v888_v8, %v885_v46  ;;  %v900_v52 = vld [vmem:[%s11596_s1 + $0x12b0] sm:$0xff]  ;;  %v899_v2 = vld [vmem:[%s11596_s1 + $0x12a8] sm:$0xff]  ;;  %v906_v8 = vld [vmem:[%s11596_s1 + $0x12e0] sm:$0xff] }
 0x17e   :  { %v4522_v20 = vadd.f32 %v4521_v22, %v4520_v30  ;;  %1981 = vmatprep.mubr.f32.mxu0 %v9211_v57  ;;  %3456 = vmatprep.mubr.f32.mxu1 %v9531_v43  ;;  %v9572_v57 = vld [vmem:[%s11597_s0 + $0x4d8] sm:$0xff]  ;;  %v5435_v30 = vpack.c.bf16 %v887_v33, %v884_v55  ;;  %v903_v46 = vld [vmem:[%s11596_s1 + $0x12c8] sm:$0xff] }
 0x17f   :  { %5426 = vmatprep.subr.bf16.mxu0 %v5425_v24  ;;  %5840 = vmatpush3.bf16.msra.mxu1 %v5839_v40  ;;  %v891_v24 = vld [vmem:[%s11596_s1 + $0x1268] sm:$0xff]  ;;  %v5445_v55 = vpack.c.bf16 %v906_v8, %v903_v46  ;;  %v924_v46 = vld [vmem:[%s11596_s1 + $0x1370] sm:$0xff] }
 0x180   :  { %v9575_v54 = vadd.f32 %v4522_v20, %v9003_v44  ;;  %v4523_v58 = vpop.f32.mrb[68].mxu1  ;;  %1982 = vmatmul.mubr.f32.gmra.mrb[30].mxu0 %v9230_v26  ;;  %5842 = vmatprep.subr.bf16.mxu1 %v5841_v25  ;;  %v9590_v26 = vld [vmem:[%s11597_s0 + $0x4d0] sm:$0xff]  ;;  %v893_v25 = vld [vmem:[%s11596_s1 + $0x1278] sm:$0xff]  ;;  %v5437_v4 = vpack.c.bf16 %v894_v29, %v891_v24 }
 0x181   :  { %v4524_v56 = vpop.f32.mrb[69].mxu1  ;;  %3457 = vmatmul.mubr.f32.gmra.mrb[174].mxu1 %v9561_v9  ;;  %5428 = vmatpush1.bf16.msra.mxu0 %v5427_v10  ;;  %v897_v10 = vld [vmem:[%s11596_s1 + $0x1298] sm:$0xff]  ;;  %v912_v24 = vld [vmem:[%s11596_s1 + $0x1310] sm:$0xff] }
 0x182   :  { %v4525_v44 = vadd.f32 %v4524_v56, %v4523_v58  ;;  %2052 = vmatprep.mubr.f32.mxu0 %v9241_v47  ;;  %3461 = vmatprep.mubr.f32.mxu1 %v9572_v57  ;;  %v9601_v47 = vld [vmem:[%s11597_s0 + $0x568] sm:$0xff] }
 0x183   :  { %5430 = vmatprep.subr.bf16.mxu0 %v5429_v0  ;;  %5844 = vmatpush3.bf16.msra.mxu1 %v5843_v59  ;;  %v5441_v0 = vpack.c.bf16 %v900_v52, %v897_v10  ;;  %v918_v10 = vld [vmem:[%s11596_s1 + $0x1340] sm:$0xff] }
 0x184   :  { %v9604_v5 = vadd.f32 %v4525_v44, %v9033_v21  ;;  %v4526_v51 = vpop.f32.mrb[70].mxu1  ;;  %2053 = vmatmul.mubr.f32.vlgmr.msra.gmra.mrb[0].mxu0 %v9272_v63  ;;  %5846 = vmatprep.subr.bf16.mxu1 %v5845_v60  ;;  %v9619_v21 = vld [vmem:[%s11597_s0 + $0x560] sm:$0xff]  ;;  %v905_v44 = vld [vmem:[%s11596_s1 + $0x12d8] sm:$0xff] }
 0x185   :  { %v4527_v40 = vpop.f32.mrb[71].mxu1  ;;  %3462 = vmatmul.mubr.f32.gmra.mrb[176].mxu1 %v9590_v26  ;;  %5432 = vmatpush1.bf16.msra.mxu0 %v5431_v32  ;;  %v890_v63 = vld [vmem:[%s11596_s1 + $0x1260] sm:$0xff] }
 0x186   :  { %v4528_v27 = vadd.f32 %v4527_v40, %v4526_v51  ;;  %2058 = vmatprep.mubr.f32.mxu0 %v9283_v7  ;;  %3466 = vmatprep.mubr.f32.mxu1 %v9601_v47  ;;  %v9630_v7 = vld [vmem:[%s11597_s0 + $0x5f8] sm:$0xff]  ;;  %v5439_v20 = vpack.c.bf16 %v893_v25, %v890_v63 }
 0x187   :  { %5434 = vmatprep.subr.bf16.mxu0 %v5433_v11  ;;  %v909_v51 = vld [vmem:[%s11596_s1 + $0x12f8] sm:$0xff] }
 0x188   :  { %v9633_v16 = vadd.f32 %v4528_v27, %v9063_v19  ;;  %v4529_v22 = vpop.f32.mrb[72].mxu1  ;;  %2059 = vmatmul.mubr.f32.gmra.mrb[2].mxu0 %v9314_v39  ;;  %v9648_v19 = vld [vmem:[%s11597_s0 + $0x5f0] sm:$0xff]  ;;  %v911_v27 = vld [vmem:[%s11596_s1 + $0x1308] sm:$0xff]  ;;  %v5449_v63 = vpack.c.bf16 %v912_v24, %v909_v51  ;;  %v930_v51 = vld [vmem:[%s11596_s1 + $0x13a0] sm:$0xff] }
 0x189   :  { %v4530_v35 = vpop.f32.mrb[73].mxu1  ;;  %3467 = vmatmul.mubr.f32.gmra.mrb[178].mxu1 %v9619_v21  ;;  %5436 = vmatpush1.bf16.msra.mxu0 %v5435_v30  ;;  %v896_v39 = vld [vmem:[%s11596_s1 + $0x1290] sm:$0xff] }
 0x18a   :  { %v4531_v18 = vadd.f32 %v4530_v35, %v4529_v22  ;;  %2064 = vmatprep.mubr.f32.mxu0 %v9325_v31  ;;  %3471 = vmatprep.mubr.f32.mxu1 %v9630_v7  ;;  %v9659_v31 = vld [vmem:[%s11597_s0 + $0x688] sm:$0xff]  ;;  %v5443_v56 = vpack.c.bf16 %v899_v2, %v896_v39 }
 0x18b   :  { %5438 = vmatprep.subr.bf16.mxu0 %v5437_v4  ;;  %v915_v22 = vld [vmem:[%s11596_s1 + $0x1328] sm:$0xff] }
 0x18c   :  { %v9662_v59 = vadd.f32 %v4531_v18, %v9093_v62  ;;  %v4532_v58 = vpop.f32.mrb[74].mxu1  ;;  %2065 = vmatmul.mubr.f32.gmra.mrb[4].mxu0 %v9356_v45  ;;  %v9677_v62 = vld [vmem:[%s11597_s0 + $0x680] sm:$0xff]  ;;  %v917_v18 = vld [vmem:[%s11596_s1 + $0x1338] sm:$0xff]  ;;  %v5453_v39 = vpack.c.bf16 %v918_v10, %v915_v22  ;;  %v936_v22 = vld [vmem:[%s11596_s1 + $0x13d0] sm:$0xff] }
 0x18d   :  { %v4533_v60 = vpop.f32.mrb[75].mxu1  ;;  %3472 = vmatmul.mubr.f32.gmra.mrb[180].mxu1 %v9648_v19  ;;  %5440 = vmatpush1.bf16.msra.mxu0 %v5439_v20  ;;  %v902_v45 = vld [vmem:[%s11596_s1 + $0x12c0] sm:$0xff]  ;;  %v976_v10 = vld [vmem:[%s11596_s1 + $0x1510] sm:$0xff] }
 0x18e   :  { %v4534_v32 = vadd.f32 %v4533_v60, %v4532_v58  ;;  %2070 = vmatprep.mubr.f32.mxu0 %v9367_v12  ;;  %3476 = vmatprep.mubr.f32.mxu1 %v9659_v31  ;;  %v9688_v12 = vld [vmem:[%s11597_s0 + $0x718] sm:$0xff]  ;;  %v5447_v40 = vpack.c.bf16 %v905_v44, %v902_v45 }
 0x18f   :  { %5442 = vmatprep.subr.bf16.mxu0 %v5441_v0  ;;  %v921_v58 = vld [vmem:[%s11596_s1 + $0x1358] sm:$0xff] }
 0x190   :  { %v9691_v33 = vadd.f32 %v4534_v32, %v9123_v34  ;;  %v4535_v11 = vpop.f32.mrb[76].mxu1  ;;  %2071 = vmatmul.mubr.f32.gmra.mrb[6].mxu0 %v9398_v36  ;;  %v9706_v34 = vld [vmem:[%s11597_s0 + $0x710] sm:$0xff]  ;;  %v923_v32 = vld [vmem:[%s11596_s1 + $0x1368] sm:$0xff]  ;;  %v5457_v45 = vpack.c.bf16 %v924_v46, %v921_v58 }
 0x191   :  { %v4536_v29 = vpop.f32.mrb[77].mxu1  ;;  %3477 = vmatmul.mubr.f32.gmra.mrb[182].mxu1 %v9677_v62  ;;  %5444 = vmatpush1.bf16.msra.mxu0 %v5443_v56  ;;  %v908_v36 = vld [vmem:[%s11596_s1 + $0x12f0] sm:$0xff]  ;;  %v939_v46 = vld [vmem:[%s11596_s1 + $0x13e8] sm:$0xff] }
 0x192   :  { %v4537_v30 = vadd.f32 %v4536_v29, %v4535_v11  ;;  %2076 = vmatprep.mubr.f32.mxu0 %v9409_v23  ;;  %3481 = vmatprep.mubr.f32.mxu1 %v9688_v12  ;;  %v9717_v23 = vld [vmem:[%s11597_s0 + $0x7a8] sm:$0xff]  ;;  %v5451_v35 = vpack.c.bf16 %v911_v27, %v908_v36  ;;  %v933_v27 = vld [vmem:[%s11596_s1 + $0x13b8] sm:$0xff] }
 0x193   :  { %5446 = vmatprep.subr.bf16.mxu0 %v5445_v55  ;;  %v927_v11 = vld [vmem:[%s11596_s1 + $0x1388] sm:$0xff]  ;;  %v5465_v58 = vpack.c.bf16 %v936_v22, %v933_v27 }
 0x194   :  { %v9720_v25 = vadd.f32 %v4537_v30, %v9153_v48  ;;  %v4538_v4 = vpop.f32.mrb[78].mxu1  ;;  %2077 = vmatmul.mubr.f32.gmra.mrb[8].mxu0 %v9438_v14  ;;  %v9735_v48 = vld [vmem:[%s11597_s0 + $0x7a0] sm:$0xff]  ;;  %v929_v30 = vld [vmem:[%s11596_s1 + $0x1398] sm:$0xff]  ;;  %v5461_v36 = vpack.c.bf16 %v930_v51, %v927_v11  ;;  %v1039_v51 = vld [vmem:[%s11596_s1 + $0x1708] sm:$0xff] }
 0x195   :  { %v4539_v52 = vpop.f32.mrb[79].mxu1  ;;  %3482 = vmatmul.mubr.f32.gmra.mrb[184].mxu1 %v9706_v34  ;;  %5448 = vmatpush1.bf16.msra.mxu0 %v5447_v40  ;;  %v914_v14 = vld [vmem:[%s11596_s1 + $0x1320] sm:$0xff] }
 0x196   :  { %v4540_v20 = vadd.f32 %v4539_v52, %v4538_v4  ;;  %2082 = vmatprep.mubr.f32.mxu0 %v9449_v37  ;;  %3486 = vmatprep.mubr.f32.mxu1 %v9717_v23  ;;  %v9746_v37 = vld [vmem:[%s11597_s0 + $0x838] sm:$0xff]  ;;  %v5455_v60 = vpack.c.bf16 %v917_v18, %v914_v14  ;;  %v979_v52 = vld [vmem:[%s11596_s1 + $0x1528] sm:$0xff]  ;;  %v9834_v18 = vld [vmem:[%s11597_s0 + $0x60] sm:$0xff] }
 0x197   :  { %5450 = vmatprep.subr.bf16.mxu0 %v5449_v63 }
 0x198   :  { %v9749_v2 = vadd.f32 %v4540_v20, %v9183_v1  ;;  %v4541_v0 = vpop.f32.mrb[80].mxu1  ;;  %2083 = vmatmul.mubr.f32.gmra.mrb[10].mxu0 %v9479_v42  ;;  %v9764_v1 = vld [vmem:[%s11597_s0 + $0x830] sm:$0xff]  ;;  %v1033_v20 = vld [vmem:[%s11596_s1 + $0x16d8] sm:$0xff] }
 0x199   :  { %v4542_v8 = vpop.f32.mrb[81].mxu1  ;;  %3487 = vmatmul.mubr.f32.gmra.mrb[186].mxu1 %v9735_v48  ;;  %5452 = vmatpush1.bf16.msra.mxu0 %v5451_v35  ;;  %v920_v42 = vld [vmem:[%s11596_s1 + $0x1350] sm:$0xff] }
 0x19a   :  { %v4543_v56 = vadd.f32 %v4542_v8, %v4541_v0  ;;  %2088 = vmatprep.mubr.f32.mxu0 %v9490_v6  ;;  %3491 = vmatprep.mubr.f32.mxu1 %v9746_v37  ;;  %v9775_v6 = vld [vmem:[%s11597_s0 + $0x8c8] sm:$0xff]  ;;  %v5459_v29 = vpack.c.bf16 %v923_v32, %v920_v42  ;;  %v5847_v8 = vpack.c.bf16 %v979_v52, %v976_v10  ;;  %v942_v42 = vld [vmem:[%s11596_s1 + $0x1400] sm:$0xff]  ;;  %v948_v10 = vld [vmem:[%s11596_s1 + $0x1430] sm:$0xff] }
 0x19b   :  { %5454 = vmatprep.subr.bf16.mxu0 %v5453_v39  ;;  %v932_v39 = vld [vmem:[%s11596_s1 + $0x13b0] sm:$0xff]  ;;  %v935_v0 = vld [vmem:[%s11596_s1 + $0x13c8] sm:$0xff] }
 0x19c   :  { %v9778_v44 = vadd.f32 %v4543_v56, %v9213_v15  ;;  %v4544_v55 = vpop.f32.mrb[82].mxu1  ;;  %2089 = vmatmul.mubr.f32.gmra.mrb[12].mxu0 %v9520_v28  ;;  %v9793_v15 = vld [vmem:[%s11597_s0 + $0x8c0] sm:$0xff] }
 0x19d   :  { %v4545_v24 = vpop.f32.mrb[83].mxu1  ;;  %3492 = vmatmul.mubr.f32.gmra.mrb[188].mxu1 %v9764_v1  ;;  %5456 = vmatpush1.bf16.msra.mxu0 %v5455_v60  ;;  %v926_v28 = vld [vmem:[%s11596_s1 + $0x1380] sm:$0xff] }
 0x19e   :  { %v4546_v40 = vadd.f32 %v4545_v24, %v4544_v55  ;;  %2094 = vmatprep.mubr.f32.mxu0 %v9531_v43  ;;  %3496 = vmatprep.mubr.f32.mxu1 %v9775_v6  ;;  %v9804_v43 = vld [vmem:[%s11597_s0 + $0x68] sm:$0xff]  ;;  %v985_v55 = vld [vmem:[%s11596_s1 + $0x1558] sm:$0xff] }
 0x19f   :  { %5458 = vmatprep.subr.bf16.mxu0 %v5457_v45  ;;  %v982_v45 = vld [vmem:[%s11596_s1 + $0x1540] sm:$0xff] }
 0x1a0   :  { %v9810_v63 = vadd.f32 %v4546_v40, %v9246_v38  ;;  %v4547_v4 = vpop.f32.mrb[84].mxu1  ;;  %2095 = vmatmul.mubr.f32.gmra.mrb[14].mxu0 %v9561_v9  ;;  %v5463_v38 = vpack.c.bf16 %v929_v30, %v926_v28  ;;  %v1030_v9 = vld [vmem:[%s11596_s1 + $0x16c0] sm:$0xff]  ;;  %v941_v28 = vld [vmem:[%s11596_s1 + $0x13f8] sm:$0xff]  ;;  %v5469_v30 = vpack.c.bf16 %v942_v42, %v939_v46  ;;  %v5851_v27 = vpack.c.bf16 %v985_v55, %v982_v45 }
 0x1a1   :  { %v4548_v35 = vpop.f32.mrb[85].mxu1  ;;  %3497 = vmatmul.mubr.f32.gmra.mrb[190].mxu1 %v9793_v15  ;;  %5460 = vmatpush1.bf16.msra.mxu0 %v5459_v29  ;;  %v5849_v32 = vpack.c.bf16 %v1033_v20, %v1030_v9  ;;  %v9875_v29 = vld [vmem:[%s11597_s0 + $0xf0] sm:$0xff]  ;;  %v938_v40 = vld [vmem:[%s11596_s1 + $0x13e0] sm:$0xff]  ;;  %v1045_v20 = vld [vmem:[%s11596_s1 + $0x1738] sm:$0xff] }
 0x1a2   :  { %v4549_v14 = vadd.f32 %v4548_v35, %v4547_v4  ;;  %2100 = vmatprep.mubr.f32.mxu0 %v9572_v57  ;;  %3566 = vmatprep.mubr.f32.mxu1 %v9804_v43  ;;  %v9845_v57 = vld [vmem:[%s11597_s0 + $0xf8] sm:$0xff]  ;;  %v988_v35 = vld [vmem:[%s11596_s1 + $0x1570] sm:$0xff]  ;;  %v954_v45 = vld [vmem:[%s11596_s1 + $0x1460] sm:$0xff] }
 0x1a3   :  { %5462 = vmatprep.subr.bf16.mxu0 %v5461_v36  ;;  %v945_v36 = vld [vmem:[%s11596_s1 + $0x1418] sm:$0xff] }
 0x1a4   :  { %v9851_v60 = vadd.f32 %v4549_v14, %v9288_v13  ;;  %v4550_v56 = vpop.f32.mrb[86].mxu1  ;;  %2101 = vmatmul.mubr.f32.gmra.mrb[16].mxu0 %v9590_v26  ;;  %v5467_v13 = vpack.c.bf16 %v935_v0, %v932_v39  ;;  %v1036_v26 = vld [vmem:[%s11596_s1 + $0x16f0] sm:$0xff]  ;;  %v9916_v39 = vld [vmem:[%s11597_s0 + $0x180] sm:$0xff]  ;;  %v5473_v46 = vpack.c.bf16 %v948_v10, %v945_v36 }
 0x1a5   :  { %v4551_v11 = vpop.f32.mrb[87].mxu1  ;;  %3567 = vmatmul.mubr.f32.vlgmr.msra.gmra.mrb[192].mxu1 %v9834_v18  ;;  %5464 = vmatpush1.bf16.msra.mxu0 %v5463_v38  ;;  %v5853_v52 = vpack.c.bf16 %v1039_v51, %v1036_v26  ;;  %v991_v38 = vld [vmem:[%s11596_s1 + $0x1588] sm:$0xff]  ;;  %v944_v0 = vld [vmem:[%s11596_s1 + $0x1410] sm:$0xff] }
 0x1a6   :  { %v4552_v24 = vadd.f32 %v4551_v11, %v4550_v56  ;;  %2106 = vmatprep.mubr.f32.mxu0 %v9601_v47  ;;  %3571 = vmatprep.mubr.f32.mxu1 %v9845_v57  ;;  %v9886_v47 = vld [vmem:[%s11597_s0 + $0x188] sm:$0xff]  ;;  %v5855_v56 = vpack.c.bf16 %v991_v38, %v988_v35  ;;  %v994_v11 = vld [vmem:[%s11596_s1 + $0x15a0] sm:$0xff]  ;;  %v960_v35 = vld [vmem:[%s11596_s1 + $0x1490] sm:$0xff] }
 0x1a7   :  { %5466 = vmatprep.subr.bf16.mxu0 %v5465_v58  ;;  %5848 = vmatpush3.bf16.msra.mxu1 %v5847_v8  ;;  %v947_v58 = vld [vmem:[%s11596_s1 + $0x1428] sm:$0xff] }
 0x1a8   :  { %v9892_v4 = vadd.f32 %v4552_v24, %v9330_v17  ;;  %v4553_v22 = vpop.f32.mrb[88].mxu1  ;;  %2107 = vmatmul.mubr.f32.gmra.mrb[18].mxu0 %v9619_v21  ;;  %5850 = vmatprep.subr.bf16.mxu1 %v5849_v32  ;;  %v5471_v17 = vpack.c.bf16 %v941_v28, %v938_v40  ;;  %v1042_v21 = vld [vmem:[%s11596_s1 + $0x1720] sm:$0xff]  ;;  %v951_v8 = vld [vmem:[%s11596_s1 + $0x1448] sm:$0xff]  ;;  %v9957_v40 = vld [vmem:[%s11597_s0 + $0x210] sm:$0xff] }
 0x1a9   :  { %v4554_v9 = vpop.f32.mrb[89].mxu1  ;;  %3572 = vmatmul.mubr.f32.gmra.mrb[194].mxu1 %v9875_v29  ;;  %5468 = vmatpush1.bf16.msra.mxu0 %v5467_v13  ;;  %v5857_v55 = vpack.c.bf16 %v1045_v20, %v1042_v21  ;;  %v997_v13 = vld [vmem:[%s11596_s1 + $0x15b8] sm:$0xff]  ;;  %v1051_v51 = vld [vmem:[%s11596_s1 + $0x1768] sm:$0xff]  ;;  %v950_v28 = vld [vmem:[%s11596_s1 + $0x1440] sm:$0xff]  ;;  %v5477_v36 = vpack.c.bf16 %v954_v45, %v951_v8 }
 0x1aa   :  { %v4555_v14 = vadd.f32 %v4554_v9, %v4553_v22  ;;  %2112 = vmatprep.mubr.f32.mxu0 %v9630_v7  ;;  %3576 = vmatprep.mubr.f32.mxu1 %v9886_v47  ;;  %v9927_v7 = vld [vmem:[%s11597_s0 + $0x218] sm:$0xff]  ;;  %v5859_v22 = vpack.c.bf16 %v997_v13, %v994_v11  ;;  %v1000_v9 = vld [vmem:[%s11596_s1 + $0x15d0] sm:$0xff]  ;;  %v966_v11 = vld [vmem:[%s11596_s1 + $0x14c0] sm:$0xff] }
 0x1ab   :  { %5470 = vmatprep.subr.bf16.mxu0 %v5469_v30  ;;  %5852 = vmatpush3.bf16.msra.mxu1 %v5851_v27  ;;  %v953_v30 = vld [vmem:[%s11596_s1 + $0x1458] sm:$0xff] }
 0x1ac   :  { %v9933_v42 = vadd.f32 %v4555_v14, %v9372_v41  ;;  %v4556_v32 = vpop.f32.mrb[90].mxu1  ;;  %2113 = vmatmul.mubr.f32.gmra.mrb[20].mxu0 %v9648_v19  ;;  %5854 = vmatprep.subr.bf16.mxu1 %v5853_v52  ;;  %v5475_v41 = vpack.c.bf16 %v947_v58, %v944_v0  ;;  %v1048_v19 = vld [vmem:[%s11596_s1 + $0x1750] sm:$0xff]  ;;  %v957_v27 = vld [vmem:[%s11596_s1 + $0x1478] sm:$0xff]  ;;  %v9998_v0 = vld [vmem:[%s11597_s0 + $0x2a0] sm:$0xff] }
 0x1ad   :  { %v4557_v26 = vpop.f32.mrb[91].mxu1  ;;  %3577 = vmatmul.mubr.f32.gmra.mrb[196].mxu1 %v9916_v39  ;;  %5472 = vmatpush1.bf16.msra.mxu0 %v5471_v17  ;;  %v5861_v38 = vpack.c.bf16 %v1051_v51, %v1048_v19  ;;  %v1003_v17 = vld [vmem:[%s11596_s1 + $0x15e8] sm:$0xff]  ;;  %v1057_v20 = vld [vmem:[%s11596_s1 + $0x1798] sm:$0xff]  ;;  %v956_v58 = vld [vmem:[%s11596_s1 + $0x1470] sm:$0xff]  ;;  %v5481_v8 = vpack.c.bf16 %v960_v35, %v957_v27 }
 0x1ae   :  { %v4558_v24 = vadd.f32 %v4557_v26, %v4556_v32  ;;  %2118 = vmatprep.mubr.f32.mxu0 %v9659_v31  ;;  %3581 = vmatprep.mubr.f32.mxu1 %v9927_v7  ;;  %v9968_v31 = vld [vmem:[%s11597_s0 + $0x2a8] sm:$0xff]  ;;  %v5863_v32 = vpack.c.bf16 %v1003_v17, %v1000_v9  ;;  %v1006_v26 = vld [vmem:[%s11596_s1 + $0x1600] sm:$0xff]  ;;  %v972_v9 = vld [vmem:[%s11596_s1 + $0x14f0] sm:$0xff] }
 0x1af   :  { %5474 = vmatprep.subr.bf16.mxu0 %v5473_v46  ;;  %5856 = vmatpush3.bf16.msra.mxu1 %v5855_v56  ;;  %v959_v46 = vld [vmem:[%s11596_s1 + $0x1488] sm:$0xff] }
 0x1b0   :  { %v9974_v10 = vadd.f32 %v4558_v24, %v9414_v3  ;;  %v4559_v52 = vpop.f32.mrb[92].mxu1  ;;  %2119 = vmatmul.mubr.f32.gmra.mrb[22].mxu0 %v9677_v62  ;;  %5858 = vmatprep.subr.bf16.mxu1 %v5857_v55  ;;  %v5479_v3 = vpack.c.bf16 %v953_v30, %v950_v28  ;;  %v1054_v62 = vld [vmem:[%s11596_s1 + $0x1780] sm:$0xff]  ;;  %v963_v56 = vld [vmem:[%s11596_s1 + $0x14a8] sm:$0xff]  ;;  %v10039_v28 = vld [vmem:[%s11597_s0 + $0x330] sm:$0xff] }
 0x1b1   :  { %v4560_v21 = vpop.f32.mrb[93].mxu1  ;;  %3582 = vmatmul.mubr.f32.gmra.mrb[198].mxu1 %v9957_v40  ;;  %5476 = vmatpush1.bf16.msra.mxu0 %v5475_v41  ;;  %v5865_v13 = vpack.c.bf16 %v1057_v20, %v1054_v62  ;;  %v1009_v41 = vld [vmem:[%s11596_s1 + $0x1618] sm:$0xff]  ;;  %v1063_v51 = vld [vmem:[%s11596_s1 + $0x17c8] sm:$0xff]  ;;  %v962_v30 = vld [vmem:[%s11596_s1 + $0x14a0] sm:$0xff]  ;;  %v5485_v27 = vpack.c.bf16 %v966_v11, %v963_v56 }
 0x1b2   :  { %v4561_v14 = vadd.f32 %v4560_v21, %v4559_v52  ;;  %2124 = vmatprep.mubr.f32.mxu0 %v9688_v12  ;;  %3586 = vmatprep.mubr.f32.mxu1 %v9968_v31  ;;  %v10009_v12 = vld [vmem:[%s11597_s0 + $0x338] sm:$0xff]  ;;  %v5867_v52 = vpack.c.bf16 %v1009_v41, %v1006_v26  ;;  %v1012_v21 = vld [vmem:[%s11596_s1 + $0x1630] sm:$0xff]  ;;  %v978_v26 = vld [vmem:[%s11596_s1 + $0x1520] sm:$0xff] }
 0x1b3   :  { %5478 = vmatprep.subr.bf16.mxu0 %v5477_v36  ;;  %5860 = vmatpush3.bf16.msra.mxu1 %v5859_v22  ;;  %v965_v36 = vld [vmem:[%s11596_s1 + $0x14b8] sm:$0xff] }
 0x1b4   :  { %v10015_v45 = vadd.f32 %v4561_v14, %v9455_v49  ;;  %v4562_v55 = vpop.f32.mrb[94].mxu1  ;;  %2125 = vmatmul.mubr.f32.gmra.mrb[24].mxu0 %v9706_v34  ;;  %5862 = vmatprep.subr.bf16.mxu1 %v5861_v38  ;;  %v5483_v49 = vpack.c.bf16 %v959_v46, %v956_v58  ;;  %v1060_v34 = vld [vmem:[%s11596_s1 + $0x17b0] sm:$0xff]  ;;  %v969_v22 = vld [vmem:[%s11596_s1 + $0x14d8] sm:$0xff]  ;;  %v10080_v58 = vld [vmem:[%s11597_s0 + $0x3c0] sm:$0xff] }
 0x1b5   :  { %v4563_v19 = vpop.f32.mrb[95].mxu1  ;;  %3587 = vmatmul.mubr.f32.gmra.mrb[200].mxu1 %v9998_v0  ;;  %5480 = vmatpush1.bf16.msra.mxu0 %v5479_v3  ;;  %v5869_v17 = vpack.c.bf16 %v1063_v51, %v1060_v34  ;;  %v1015_v3 = vld [vmem:[%s11596_s1 + $0x1648] sm:$0xff]  ;;  %v1069_v20 = vld [vmem:[%s11596_s1 + $0x17f8] sm:$0xff]  ;;  %v968_v46 = vld [vmem:[%s11596_s1 + $0x14d0] sm:$0xff]  ;;  %v5489_v56 = vpack.c.bf16 %v972_v9, %v969_v22 }
 0x1b6   :  { %v4564_v24 = vadd.f32 %v4563_v19, %v4562_v55  ;;  %2130 = vmatprep.mubr.f32.mxu0 %v9717_v23  ;;  %3591 = vmatprep.mubr.f32.mxu1 %v10009_v12  ;;  %v10050_v23 = vld [vmem:[%s11597_s0 + $0x3c8] sm:$0xff]  ;;  %v5871_v55 = vpack.c.bf16 %v1015_v3, %v1012_v21  ;;  %v1018_v19 = vld [vmem:[%s11596_s1 + $0x1660] sm:$0xff]  ;;  %v984_v21 = vld [vmem:[%s11596_s1 + $0x1550] sm:$0xff] }
 0x1b7   :  { %5482 = vmatprep.subr.bf16.mxu0 %v5481_v8  ;;  %5864 = vmatpush3.bf16.msra.mxu1 %v5863_v32  ;;  %v971_v8 = vld [vmem:[%s11596_s1 + $0x14e8] sm:$0xff] }
 0x1b8   :  { %v10056_v35 = vadd.f32 %v4564_v24, %v9496_v53  ;;  %v4597_v38 = vpop.f32.mrb[96].mxu1  ;;  %2131 = vmatmul.mubr.f32.gmra.mrb[26].mxu0 %v9735_v48  ;;  %5866 = vmatprep.subr.bf16.mxu1 %v5865_v13  ;;  %v5487_v53 = vpack.c.bf16 %v965_v36, %v962_v30  ;;  %v1066_v48 = vld [vmem:[%s11596_s1 + $0x17e0] sm:$0xff]  ;;  %v975_v32 = vld [vmem:[%s11596_s1 + $0x1508] sm:$0xff]  ;;  %v10121_v30 = vld [vmem:[%s11597_s0 + $0x450] sm:$0xff] }
 0x1b9   :  { %v4598_v62 = vpop.f32.mrb[97].mxu1  ;;  %3592 = vmatmul.mubr.f32.gmra.mrb[202].mxu1 %v10039_v28  ;;  %5484 = vmatpush1.bf16.msra.mxu0 %v5483_v49  ;;  %v5873_v41 = vpack.c.bf16 %v1069_v20, %v1066_v48  ;;  %v1021_v49 = vld [vmem:[%s11596_s1 + $0x1678] sm:$0xff]  ;;  %v1123_v51 = vld [vmem:[%s11596_s1 + $0x19a8] sm:$0xff]  ;;  %v974_v36 = vld [vmem:[%s11596_s1 + $0x1500] sm:$0xff]  ;;  %v5493_v22 = vpack.c.bf16 %v978_v26, %v975_v32 }
 0x1ba   :  { %v4599_v14 = vadd.f32 %v4598_v62, %v4597_v38  ;;  %2136 = vmatprep.mubr.f32.mxu0 %v9746_v37  ;;  %3596 = vmatprep.mubr.f32.mxu1 %v10050_v23  ;;  %v10091_v37 = vld [vmem:[%s11597_s0 + $0x458] sm:$0xff]  ;;  %v980_v48 = vld [vmem:[%s11596_s1 + $0x1530] sm:$0xff]  ;;  %v983_v20 = vld [vmem:[%s11596_s1 + $0x1548] sm:$0xff] }
 0x1bb   :  { %5486 = vmatprep.subr.bf16.mxu0 %v5485_v27  ;;  %5868 = vmatpush3.bf16.msra.mxu1 %v5867_v52  ;;  %v977_v27 = vld [vmem:[%s11596_s1 + $0x1518] sm:$0xff]  ;;  %v5875_v52 = vpack.c.bf16 %v1021_v49, %v1018_v19  ;;  %v990_v32 = vld [vmem:[%s11596_s1 + $0x1580] sm:$0xff] }
 0x1bc   :  { %v10097_v11 = vadd.f32 %v4599_v14, %v9537_v50  ;;  %v4600_v13 = vpop.f32.mrb[98].mxu1  ;;  %2137 = vmatmul.mubr.f32.gmra.mrb[28].mxu0 %v9764_v1  ;;  %5870 = vmatprep.subr.bf16.mxu1 %v5869_v17  ;;  %v5491_v50 = vpack.c.bf16 %v971_v8, %v968_v46  ;;  %v1120_v1 = vld [vmem:[%s11596_s1 + $0x1990] sm:$0xff]  ;;  %v981_v17 = vld [vmem:[%s11596_s1 + $0x1538] sm:$0xff] }
 0x1bd   :  { %v4601_v34 = vpop.f32.mrb[99].mxu1  ;;  %3597 = vmatmul.mubr.f32.gmra.mrb[204].mxu1 %v10080_v58  ;;  %5488 = vmatpush1.bf16.msra.mxu0 %v5487_v53  ;;  %v5877_v3 = vpack.c.bf16 %v1123_v51, %v1120_v1  ;;  %v5495_v53 = vpack.c.bf16 %v977_v27, %v974_v36  ;;  %v5497_v14 = vpack.c.bf16 %v984_v21, %v981_v17  ;;  %v996_v1 = vld [vmem:[%s11596_s1 + $0x15b0] sm:$0xff]  ;;  %v995_v27 = vld [vmem:[%s11596_s1 + $0x15a8] sm:$0xff]  ;;  %v1002_v21 = vld [vmem:[%s11596_s1 + $0x15e0] sm:$0xff] }
 0x1be   :  { %v4602_v24 = vadd.f32 %v4601_v34, %v4600_v13  ;;  %2142 = vmatprep.mubr.f32.mxu0 %v9775_v6  ;;  %3601 = vmatprep.mubr.f32.mxu1 %v10091_v37  ;;  %v10132_v6 = vld [vmem:[%s11597_s0 + $0x4e8] sm:$0xff]  ;;  %v5499_v13 = vpack.c.bf16 %v983_v20, %v980_v48 }
 0x1bf   :  { %5490 = vmatprep.subr.bf16.mxu0 %v5489_v56  ;;  %5872 = vmatpush3.bf16.msra.mxu1 %v5871_v55  ;;  %v987_v56 = vld [vmem:[%s11596_s1 + $0x1568] sm:$0xff] }
 0x1c0   :  { %v10135_v38 = vadd.f32 %v4602_v24, %v9575_v54  ;;  %v4603_v9 = vpop.f32.mrb[100].mxu1  ;;  %2143 = vmatmul.mubr.f32.gmra.mrb[30].mxu0 %v9793_v15  ;;  %5874 = vmatprep.subr.bf16.mxu1 %v5873_v41  ;;  %v10150_v15 = vld [vmem:[%s11597_s0 + $0x4e0] sm:$0xff]  ;;  %v989_v41 = vld [vmem:[%s11596_s1 + $0x1578] sm:$0xff]  ;;  %v5501_v19 = vpack.c.bf16 %v990_v32, %v987_v56  ;;  %v999_v17 = vld [vmem:[%s11596_s1 + $0x15c8] sm:$0xff] }
 0x1c1   :  { %v4604_v62 = vpop.f32.mrb[101].mxu1  ;;  %3602 = vmatmul.mubr.f32.gmra.mrb[206].mxu1 %v10121_v30  ;;  %5492 = vmatpush1.bf16.msra.mxu0 %v5491_v50  ;;  %v993_v50 = vld [vmem:[%s11596_s1 + $0x1598] sm:$0xff]  ;;  %v5509_v48 = vpack.c.bf16 %v1002_v21, %v999_v17  ;;  %v1008_v56 = vld [vmem:[%s11596_s1 + $0x1610] sm:$0xff] }
 0x1c2   :  { %v4605_v54 = vadd.f32 %v4604_v62, %v4603_v9  ;;  %2213 = vmatprep.mubr.f32.mxu0 %v9804_v43  ;;  %3606 = vmatprep.mubr.f32.mxu1 %v10132_v6  ;;  %v10161_v43 = vld [vmem:[%s11597_s0 + $0x578] sm:$0xff]  ;;  %v1020_v17 = vld [vmem:[%s11596_s1 + $0x1670] sm:$0xff] }
 0x1c3   :  { %5494 = vmatprep.subr.bf16.mxu0 %v5493_v22  ;;  %5876 = vmatpush3.bf16.msra.mxu1 %v5875_v52  ;;  %v5505_v22 = vpack.c.bf16 %v996_v1, %v993_v50  ;;  %v1014_v50 = vld [vmem:[%s11596_s1 + $0x1640] sm:$0xff] }
 0x1c4   :  { %v10164_v46 = vadd.f32 %v4605_v54, %v9604_v5  ;;  %v4606_v8 = vpop.f32.mrb[102].mxu1  ;;  %2214 = vmatmul.mubr.f32.vlgmr.msra.gmra.mrb[0].mxu0 %v9834_v18  ;;  %5878 = vmatprep.subr.bf16.mxu1 %v5877_v3  ;;  %v10179_v5 = vld [vmem:[%s11597_s0 + $0x570] sm:$0xff]  ;;  %v986_v18 = vld [vmem:[%s11596_s1 + $0x1560] sm:$0xff]  ;;  %v1001_v54 = vld [vmem:[%s11596_s1 + $0x15d8] sm:$0xff] }
 0x1c5   :  { %v4607_v55 = vpop.f32.mrb[103].mxu1  ;;  %3607 = vmatmul.mubr.f32.gmra.mrb[208].mxu1 %v10150_v15  ;;  %5496 = vmatpush1.bf16.msra.mxu0 %v5495_v53  ;;  %v5503_v24 = vpack.c.bf16 %v989_v41, %v986_v18 }
 0x1c6   :  { %v4608_v26 = vadd.f32 %v4607_v55, %v4606_v8  ;;  %2219 = vmatprep.mubr.f32.mxu0 %v9845_v57  ;;  %3611 = vmatprep.mubr.f32.mxu1 %v10161_v43  ;;  %v10190_v57 = vld [vmem:[%s11597_s0 + $0x608] sm:$0xff]  ;;  %v1005_v8 = vld [vmem:[%s11596_s1 + $0x15f8] sm:$0xff] }
 0x1c7   :  { %5498 = vmatprep.subr.bf16.mxu0 %v5497_v14  ;;  %v5513_v18 = vpack.c.bf16 %v1008_v56, %v1005_v8  ;;  %v1026_v8 = vld [vmem:[%s11596_s1 + $0x16a0] sm:$0xff] }
 0x1c8   :  { %v10193_v49 = vadd.f32 %v4608_v26, %v9633_v16  ;;  %v4609_v34 = vpop.f32.mrb[104].mxu1  ;;  %2220 = vmatmul.mubr.f32.gmra.mrb[2].mxu0 %v9875_v29  ;;  %v10208_v16 = vld [vmem:[%s11597_s0 + $0x600] sm:$0xff]  ;;  %v992_v29 = vld [vmem:[%s11596_s1 + $0x1590] sm:$0xff]  ;;  %v1007_v26 = vld [vmem:[%s11596_s1 + $0x1608] sm:$0xff] }
 0x1c9   :  { %v4610_v51 = vpop.f32.mrb[105].mxu1  ;;  %3612 = vmatmul.mubr.f32.gmra.mrb[210].mxu1 %v10179_v5  ;;  %5500 = vmatpush1.bf16.msra.mxu0 %v5499_v13  ;;  %v5507_v62 = vpack.c.bf16 %v995_v27, %v992_v29 }
 0x1ca   :  { %v4611_v36 = vadd.f32 %v4610_v51, %v4609_v34  ;;  %2225 = vmatprep.mubr.f32.mxu0 %v9886_v47  ;;  %3616 = vmatprep.mubr.f32.mxu1 %v10190_v57  ;;  %v10219_v47 = vld [vmem:[%s11597_s0 + $0x698] sm:$0xff]  ;;  %v1011_v34 = vld [vmem:[%s11596_s1 + $0x1628] sm:$0xff] }
 0x1cb   :  { %5502 = vmatprep.subr.bf16.mxu0 %v5501_v19  ;;  %v5517_v29 = vpack.c.bf16 %v1014_v50, %v1011_v34  ;;  %v1032_v34 = vld [vmem:[%s11596_s1 + $0x16d0] sm:$0xff] }
 0x1cc   :  { %v10222_v52 = vadd.f32 %v4611_v36, %v9662_v59  ;;  %v4612_v9 = vpop.f32.mrb[106].mxu1  ;;  %2226 = vmatmul.mubr.f32.gmra.mrb[4].mxu0 %v9916_v39  ;;  %v10237_v59 = vld [vmem:[%s11597_s0 + $0x690] sm:$0xff]  ;;  %v998_v39 = vld [vmem:[%s11596_s1 + $0x15c0] sm:$0xff]  ;;  %v1013_v36 = vld [vmem:[%s11596_s1 + $0x1638] sm:$0xff] }
 0x1cd   :  { %v4613_v3 = vpop.f32.mrb[107].mxu1  ;;  %3617 = vmatmul.mubr.f32.gmra.mrb[212].mxu1 %v10208_v16  ;;  %5504 = vmatpush1.bf16.msra.mxu0 %v5503_v24  ;;  %v5511_v55 = vpack.c.bf16 %v1001_v54, %v998_v39  ;;  %v1072_v50 = vld [vmem:[%s11596_s1 + $0x1810] sm:$0xff] }
 0x1ce   :  { %v4614_v53 = vadd.f32 %v4613_v3, %v4612_v9  ;;  %2231 = vmatprep.mubr.f32.mxu0 %v9927_v7  ;;  %3621 = vmatprep.mubr.f32.mxu1 %v10219_v47  ;;  %v10248_v7 = vld [vmem:[%s11597_s0 + $0x728] sm:$0xff]  ;;  %v1017_v9 = vld [vmem:[%s11596_s1 + $0x1658] sm:$0xff] }
 0x1cf   :  { %5506 = vmatprep.subr.bf16.mxu0 %v5505_v22  ;;  %v5521_v39 = vpack.c.bf16 %v1020_v17, %v1017_v9  ;;  %v1035_v17 = vld [vmem:[%s11596_s1 + $0x16e8] sm:$0xff] }
 0x1d0   :  { %v10251_v20 = vadd.f32 %v4614_v53, %v9691_v33  ;;  %v4615_v14 = vpop.f32.mrb[108].mxu1  ;;  %2232 = vmatmul.mubr.f32.gmra.mrb[6].mxu0 %v9957_v40  ;;  %v10266_v33 = vld [vmem:[%s11597_s0 + $0x720] sm:$0xff]  ;;  %v1004_v40 = vld [vmem:[%s11596_s1 + $0x15f0] sm:$0xff]  ;;  %v1019_v53 = vld [vmem:[%s11596_s1 + $0x1668] sm:$0xff] }
 0x1d1   :  { %v4616_v32 = vpop.f32.mrb[109].mxu1  ;;  %3622 = vmatmul.mubr.f32.gmra.mrb[214].mxu1 %v10237_v59  ;;  %5508 = vmatpush1.bf16.msra.mxu0 %v5507_v62  ;;  %v5515_v51 = vpack.c.bf16 %v1007_v26, %v1004_v40  ;;  %v1029_v26 = vld [vmem:[%s11596_s1 + $0x16b8] sm:$0xff] }
 0x1d2   :  { %v4617_v13 = vadd.f32 %v4616_v32, %v4615_v14  ;;  %2237 = vmatprep.mubr.f32.mxu0 %v9968_v31  ;;  %3626 = vmatprep.mubr.f32.mxu1 %v10248_v7  ;;  %v10277_v31 = vld [vmem:[%s11597_s0 + $0x7b8] sm:$0xff]  ;;  %v1023_v14 = vld [vmem:[%s11596_s1 + $0x1688] sm:$0xff]  ;;  %v5529_v9 = vpack.c.bf16 %v1032_v34, %v1029_v26 }
 0x1d3   :  { %5510 = vmatprep.subr.bf16.mxu0 %v5509_v48  ;;  %v5525_v40 = vpack.c.bf16 %v1026_v8, %v1023_v14  ;;  %v1135_v8 = vld [vmem:[%s11596_s1 + $0x1a08] sm:$0xff] }
 0x1d4   :  { %v10280_v41 = vadd.f32 %v4617_v13, %v9720_v25  ;;  %v4618_v19 = vpop.f32.mrb[110].mxu1  ;;  %2238 = vmatmul.mubr.f32.gmra.mrb[8].mxu0 %v9998_v0  ;;  %v10295_v25 = vld [vmem:[%s11597_s0 + $0x7b0] sm:$0xff]  ;;  %v1010_v0 = vld [vmem:[%s11596_s1 + $0x1620] sm:$0xff]  ;;  %v1025_v13 = vld [vmem:[%s11596_s1 + $0x1698] sm:$0xff] }
 0x1d5   :  { %v4619_v1 = vpop.f32.mrb[111].mxu1  ;;  %3627 = vmatmul.mubr.f32.gmra.mrb[216].mxu1 %v10266_v33  ;;  %5512 = vmatpush1.bf16.msra.mxu0 %v5511_v55  ;;  %v5519_v3 = vpack.c.bf16 %v1013_v36, %v1010_v0  ;;  %v10394_v36 = vld [vmem:[%s11597_s0 + $0x70] sm:$0xff] }
 0x1d6   :  { %v4620_v24 = vadd.f32 %v4619_v1, %v4618_v19  ;;  %2243 = vmatprep.mubr.f32.mxu0 %v10009_v12  ;;  %3631 = vmatprep.mubr.f32.mxu1 %v10277_v31  ;;  %v10306_v12 = vld [vmem:[%s11597_s0 + $0x848] sm:$0xff] }
 0x1d7   :  { %5514 = vmatprep.subr.bf16.mxu0 %v5513_v18  ;;  %v1075_v1 = vld [vmem:[%s11596_s1 + $0x1828] sm:$0xff] }
 0x1d8   :  { %v10309_v27 = vadd.f32 %v4620_v24, %v9749_v2  ;;  %v4621_v22 = vpop.f32.mrb[112].mxu1  ;;  %2244 = vmatmul.mubr.f32.gmra.mrb[10].mxu0 %v10039_v28  ;;  %v10324_v2 = vld [vmem:[%s11597_s0 + $0x840] sm:$0xff]  ;;  %v1016_v28 = vld [vmem:[%s11596_s1 + $0x1650] sm:$0xff]  ;;  %v1129_v24 = vld [vmem:[%s11596_s1 + $0x19d8] sm:$0xff] }
 0x1d9   :  { %v4622_v21 = vpop.f32.mrb[113].mxu1  ;;  %3632 = vmatmul.mubr.f32.gmra.mrb[218].mxu1 %v10295_v25  ;;  %5516 = vmatpush1.bf16.msra.mxu0 %v5515_v51  ;;  %v5523_v32 = vpack.c.bf16 %v1019_v53, %v1016_v28  ;;  %v1038_v28 = vld [vmem:[%s11596_s1 + $0x1700] sm:$0xff] }
 0x1da   :  { %v4623_v62 = vadd.f32 %v4622_v21, %v4621_v22  ;;  %2249 = vmatprep.mubr.f32.mxu0 %v10050_v23  ;;  %3636 = vmatprep.mubr.f32.mxu1 %v10306_v12  ;;  %v10335_v23 = vld [vmem:[%s11597_s0 + $0x8d8] sm:$0xff]  ;;  %v1031_v22 = vld [vmem:[%s11596_s1 + $0x16c8] sm:$0xff]  ;;  %v5879_v21 = vpack.c.bf16 %v1075_v1, %v1072_v50  ;;  %v1044_v50 = vld [vmem:[%s11596_s1 + $0x1730] sm:$0xff] }
 0x1db   :  { %5518 = vmatprep.subr.bf16.mxu0 %v5517_v29  ;;  %v1028_v29 = vld [vmem:[%s11596_s1 + $0x16b0] sm:$0xff] }
 0x1dc   :  { %v10338_v54 = vadd.f32 %v4623_v62, %v9778_v44  ;;  %v4624_v48 = vpop.f32.mrb[114].mxu1  ;;  %2250 = vmatmul.mubr.f32.gmra.mrb[12].mxu0 %v10080_v58  ;;  %v10353_v44 = vld [vmem:[%s11597_s0 + $0x8d0] sm:$0xff]  ;;  %v1022_v58 = vld [vmem:[%s11596_s1 + $0x1680] sm:$0xff] }
 0x1dd   :  { %v4625_v56 = vpop.f32.mrb[115].mxu1  ;;  %3637 = vmatmul.mubr.f32.gmra.mrb[220].mxu1 %v10324_v2  ;;  %5520 = vmatpush1.bf16.msra.mxu0 %v5519_v3 }
 0x1de   :  { %v4626_v55 = vadd.f32 %v4625_v56, %v4624_v48  ;;  %2255 = vmatprep.mubr.f32.mxu0 %v10091_v37  ;;  %3641 = vmatprep.mubr.f32.mxu1 %v10335_v23  ;;  %v10364_v37 = vld [vmem:[%s11597_s0 + $0x78] sm:$0xff] }
 0x1df   :  { %5522 = vmatprep.subr.bf16.mxu0 %v5521_v39  ;;  %v1078_v39 = vld [vmem:[%s11596_s1 + $0x1840] sm:$0xff]  ;;  %v1081_v48 = vld [vmem:[%s11596_s1 + $0x1858] sm:$0xff] }
 0x1e0   :  { %v10370_v18 = vadd.f32 %v4626_v55, %v9810_v63  ;;  %v4627_v19 = vpop.f32.mrb[116].mxu1  ;;  %2256 = vmatmul.mubr.f32.gmra.mrb[14].mxu0 %v10121_v30  ;;  %v5527_v63 = vpack.c.bf16 %v1025_v13, %v1022_v58  ;;  %v1126_v30 = vld [vmem:[%s11596_s1 + $0x19c0] sm:$0xff]  ;;  %v1037_v58 = vld [vmem:[%s11596_s1 + $0x16f8] sm:$0xff]  ;;  %v5533_v13 = vpack.c.bf16 %v1038_v28, %v1035_v17  ;;  %v5883_v26 = vpack.c.bf16 %v1081_v48, %v1078_v39 }
 0x1e1   :  { %v4628_v51 = vpop.f32.mrb[117].mxu1  ;;  %3642 = vmatmul.mubr.f32.gmra.mrb[222].mxu1 %v10353_v44  ;;  %5524 = vmatpush1.bf16.msra.mxu0 %v5523_v32  ;;  %v5881_v53 = vpack.c.bf16 %v1129_v24, %v1126_v30  ;;  %v10435_v32 = vld [vmem:[%s11597_s0 + $0x100] sm:$0xff]  ;;  %v1141_v24 = vld [vmem:[%s11596_s1 + $0x1a38] sm:$0xff] }
 0x1e2   :  { %v4629_v0 = vadd.f32 %v4628_v51, %v4627_v19  ;;  %2261 = vmatprep.mubr.f32.mxu0 %v10132_v6  ;;  %3711 = vmatprep.mubr.f32.mxu1 %v10364_v37  ;;  %v10405_v6 = vld [vmem:[%s11597_s0 + $0x108] sm:$0xff]  ;;  %v1034_v55 = vld [vmem:[%s11596_s1 + $0x16e0] sm:$0xff]  ;;  %v1084_v51 = vld [vmem:[%s11596_s1 + $0x1870] sm:$0xff] }
 0x1e3   :  { %5526 = vmatprep.subr.bf16.mxu0 %v5525_v40  ;;  %v1041_v40 = vld [vmem:[%s11596_s1 + $0x1718] sm:$0xff]  ;;  %v1050_v39 = vld [vmem:[%s11596_s1 + $0x1760] sm:$0xff] }
 0x1e4   :  { %v10411_v3 = vadd.f32 %v4629_v0, %v9851_v60  ;;  %v4630_v62 = vpop.f32.mrb[118].mxu1  ;;  %2262 = vmatmul.mubr.f32.gmra.mrb[16].mxu0 %v10150_v15  ;;  %v5531_v60 = vpack.c.bf16 %v1031_v22, %v1028_v29  ;;  %v1132_v15 = vld [vmem:[%s11596_s1 + $0x19f0] sm:$0xff]  ;;  %v5537_v17 = vpack.c.bf16 %v1044_v50, %v1041_v40 }
 0x1e5   :  { %v4631_v14 = vpop.f32.mrb[119].mxu1  ;;  %3712 = vmatmul.mubr.f32.vlgmr.msra.gmra.mrb[224].mxu1 %v10394_v36  ;;  %5528 = vmatpush1.bf16.msra.mxu0 %v5527_v63  ;;  %v5885_v1 = vpack.c.bf16 %v1135_v8, %v1132_v15  ;;  %v1087_v63 = vld [vmem:[%s11596_s1 + $0x1888] sm:$0xff]  ;;  %v10476_v29 = vld [vmem:[%s11597_s0 + $0x190] sm:$0xff] }
 0x1e6   :  { %v4632_v56 = vadd.f32 %v4631_v14, %v4630_v62  ;;  %2267 = vmatprep.mubr.f32.mxu0 %v10161_v43  ;;  %3716 = vmatprep.mubr.f32.mxu1 %v10405_v6  ;;  %v10446_v43 = vld [vmem:[%s11597_s0 + $0x198] sm:$0xff]  ;;  %v1040_v22 = vld [vmem:[%s11596_s1 + $0x1710] sm:$0xff]  ;;  %v5887_v62 = vpack.c.bf16 %v1087_v63, %v1084_v51  ;;  %v1090_v14 = vld [vmem:[%s11596_s1 + $0x18a0] sm:$0xff] }
 0x1e7   :  { %5530 = vmatprep.subr.bf16.mxu0 %v5529_v9  ;;  %5880 = vmatpush3.bf16.msra.mxu1 %v5879_v21  ;;  %v1043_v9 = vld [vmem:[%s11596_s1 + $0x1728] sm:$0xff]  ;;  %v1056_v51 = vld [vmem:[%s11596_s1 + $0x1790] sm:$0xff] }
 0x1e8   :  { %v10452_v19 = vadd.f32 %v4632_v56, %v9892_v4  ;;  %v4633_v34 = vpop.f32.mrb[120].mxu1  ;;  %2268 = vmatmul.mubr.f32.gmra.mrb[18].mxu0 %v10179_v5  ;;  %5882 = vmatprep.subr.bf16.mxu1 %v5881_v53  ;;  %v5535_v4 = vpack.c.bf16 %v1037_v58, %v1034_v55  ;;  %v1138_v5 = vld [vmem:[%s11596_s1 + $0x1a20] sm:$0xff]  ;;  %v1047_v21 = vld [vmem:[%s11596_s1 + $0x1748] sm:$0xff] }
 0x1e9   :  { %v4634_v30 = vpop.f32.mrb[121].mxu1  ;;  %3717 = vmatmul.mubr.f32.gmra.mrb[226].mxu1 %v10435_v32  ;;  %5532 = vmatpush1.bf16.msra.mxu0 %v5531_v60  ;;  %v5889_v48 = vpack.c.bf16 %v1141_v24, %v1138_v5  ;;  %v1093_v60 = vld [vmem:[%s11596_s1 + $0x18b8] sm:$0xff]  ;;  %v1147_v8 = vld [vmem:[%s11596_s1 + $0x1a68] sm:$0xff]  ;;  %v10517_v55 = vld [vmem:[%s11597_s0 + $0x220] sm:$0xff]  ;;  %v5541_v40 = vpack.c.bf16 %v1050_v39, %v1047_v21 }
 0x1ea   :  { %v4635_v0 = vadd.f32 %v4634_v30, %v4633_v34  ;;  %2273 = vmatprep.mubr.f32.mxu0 %v10190_v57  ;;  %3721 = vmatprep.mubr.f32.mxu1 %v10446_v43  ;;  %v10487_v57 = vld [vmem:[%s11597_s0 + $0x228] sm:$0xff]  ;;  %v1046_v58 = vld [vmem:[%s11596_s1 + $0x1740] sm:$0xff]  ;;  %v5891_v34 = vpack.c.bf16 %v1093_v60, %v1090_v14  ;;  %v1096_v30 = vld [vmem:[%s11596_s1 + $0x18d0] sm:$0xff] }
 0x1eb   :  { %5534 = vmatprep.subr.bf16.mxu0 %v5533_v13  ;;  %5884 = vmatpush3.bf16.msra.mxu1 %v5883_v26  ;;  %v1049_v13 = vld [vmem:[%s11596_s1 + $0x1758] sm:$0xff]  ;;  %v1062_v14 = vld [vmem:[%s11596_s1 + $0x17c0] sm:$0xff] }
 0x1ec   :  { %v10493_v28 = vadd.f32 %v4635_v0, %v9933_v42  ;;  %v4636_v53 = vpop.f32.mrb[122].mxu1  ;;  %2274 = vmatmul.mubr.f32.gmra.mrb[20].mxu0 %v10208_v16  ;;  %5886 = vmatprep.subr.bf16.mxu1 %v5885_v1  ;;  %v5539_v42 = vpack.c.bf16 %v1043_v9, %v1040_v22  ;;  %v1144_v16 = vld [vmem:[%s11596_s1 + $0x1a50] sm:$0xff]  ;;  %v1053_v26 = vld [vmem:[%s11596_s1 + $0x1778] sm:$0xff] }
 0x1ed   :  { %v4637_v15 = vpop.f32.mrb[123].mxu1  ;;  %3722 = vmatmul.mubr.f32.gmra.mrb[228].mxu1 %v10476_v29  ;;  %5536 = vmatpush1.bf16.msra.mxu0 %v5535_v4  ;;  %v5893_v63 = vpack.c.bf16 %v1147_v8, %v1144_v16  ;;  %v1099_v4 = vld [vmem:[%s11596_s1 + $0x18e8] sm:$0xff]  ;;  %v1153_v24 = vld [vmem:[%s11596_s1 + $0x1a98] sm:$0xff]  ;;  %v10558_v22 = vld [vmem:[%s11597_s0 + $0x2b0] sm:$0xff]  ;;  %v5545_v21 = vpack.c.bf16 %v1056_v51, %v1053_v26 }
 0x1ee   :  { %v4638_v56 = vadd.f32 %v4637_v15, %v4636_v53  ;;  %2279 = vmatprep.mubr.f32.mxu0 %v10219_v47  ;;  %3726 = vmatprep.mubr.f32.mxu1 %v10487_v57  ;;  %v10528_v47 = vld [vmem:[%s11597_s0 + $0x2b8] sm:$0xff]  ;;  %v1052_v9 = vld [vmem:[%s11596_s1 + $0x1770] sm:$0xff]  ;;  %v5895_v53 = vpack.c.bf16 %v1099_v4, %v1096_v30  ;;  %v1102_v15 = vld [vmem:[%s11596_s1 + $0x1900] sm:$0xff] }
 0x1ef   :  { %5538 = vmatprep.subr.bf16.mxu0 %v5537_v17  ;;  %5888 = vmatpush3.bf16.msra.mxu1 %v5887_v62  ;;  %v1055_v17 = vld [vmem:[%s11596_s1 + $0x1788] sm:$0xff]  ;;  %v1068_v30 = vld [vmem:[%s11596_s1 + $0x17f0] sm:$0xff] }
 0x1f0   :  { %v10534_v50 = vadd.f32 %v4638_v56, %v9974_v10  ;;  %v4639_v1 = vpop.f32.mrb[124].mxu1  ;;  %2280 = vmatmul.mubr.f32.gmra.mrb[22].mxu0 %v10237_v59  ;;  %5890 = vmatprep.subr.bf16.mxu1 %v5889_v48  ;;  %v5543_v10 = vpack.c.bf16 %v1049_v13, %v1046_v58  ;;  %v1150_v59 = vld [vmem:[%s11596_s1 + $0x1a80] sm:$0xff]  ;;  %v1059_v62 = vld [vmem:[%s11596_s1 + $0x17a8] sm:$0xff] }
 0x1f1   :  { %v4640_v5 = vpop.f32.mrb[125].mxu1  ;;  %3727 = vmatmul.mubr.f32.gmra.mrb[230].mxu1 %v10517_v55  ;;  %5540 = vmatpush1.bf16.msra.mxu0 %v5539_v42  ;;  %v5897_v60 = vpack.c.bf16 %v1153_v24, %v1150_v59  ;;  %v1105_v42 = vld [vmem:[%s11596_s1 + $0x1918] sm:$0xff]  ;;  %v1159_v8 = vld [vmem:[%s11596_s1 + $0x1ac8] sm:$0xff]  ;;  %v10599_v58 = vld [vmem:[%s11597_s0 + $0x340] sm:$0xff]  ;;  %v5549_v26 = vpack.c.bf16 %v1062_v14, %v1059_v62 }
 0x1f2   :  { %v4641_v0 = vadd.f32 %v4640_v5, %v4639_v1  ;;  %2285 = vmatprep.mubr.f32.mxu0 %v10248_v7  ;;  %3731 = vmatprep.mubr.f32.mxu1 %v10528_v47  ;;  %v10569_v7 = vld [vmem:[%s11597_s0 + $0x348] sm:$0xff]  ;;  %v1058_v13 = vld [vmem:[%s11596_s1 + $0x17a0] sm:$0xff]  ;;  %v5899_v1 = vpack.c.bf16 %v1105_v42, %v1102_v15  ;;  %v1108_v5 = vld [vmem:[%s11596_s1 + $0x1930] sm:$0xff] }
 0x1f3   :  { %5542 = vmatprep.subr.bf16.mxu0 %v5541_v40  ;;  %5892 = vmatpush3.bf16.msra.mxu1 %v5891_v34  ;;  %v1061_v40 = vld [vmem:[%s11596_s1 + $0x17b8] sm:$0xff]  ;;  %v1074_v15 = vld [vmem:[%s11596_s1 + $0x1820] sm:$0xff] }
 0x1f4   :  { %v10575_v39 = vadd.f32 %v4641_v0, %v10015_v45  ;;  %v4642_v48 = vpop.f32.mrb[126].mxu1  ;;  %2286 = vmatmul.mubr.f32.gmra.mrb[24].mxu0 %v10266_v33  ;;  %5894 = vmatprep.subr.bf16.mxu1 %v5893_v63  ;;  %v5547_v45 = vpack.c.bf16 %v1055_v17, %v1052_v9  ;;  %v1156_v33 = vld [vmem:[%s11596_s1 + $0x1ab0] sm:$0xff]  ;;  %v1065_v34 = vld [vmem:[%s11596_s1 + $0x17d8] sm:$0xff] }
 0x1f5   :  { %v4643_v16 = vpop.f32.mrb[127].mxu1  ;;  %3732 = vmatmul.mubr.f32.gmra.mrb[232].mxu1 %v10558_v22  ;;  %5544 = vmatpush1.bf16.msra.mxu0 %v5543_v10  ;;  %v5901_v4 = vpack.c.bf16 %v1159_v8, %v1156_v33  ;;  %v1111_v10 = vld [vmem:[%s11596_s1 + $0x1948] sm:$0xff]  ;;  %v1165_v24 = vld [vmem:[%s11596_s1 + $0x1af8] sm:$0xff]  ;;  %v10640_v9 = vld [vmem:[%s11597_s0 + $0x3d0] sm:$0xff]  ;;  %v5553_v62 = vpack.c.bf16 %v1068_v30, %v1065_v34 }
 0x1f6   :  { %v4644_v56 = vadd.f32 %v4643_v16, %v4642_v48  ;;  %2291 = vmatprep.mubr.f32.mxu0 %v10277_v31  ;;  %3736 = vmatprep.mubr.f32.mxu1 %v10569_v7  ;;  %v10610_v31 = vld [vmem:[%s11597_s0 + $0x3d8] sm:$0xff]  ;;  %v1064_v17 = vld [vmem:[%s11596_s1 + $0x17d0] sm:$0xff]  ;;  %v5903_v48 = vpack.c.bf16 %v1111_v10, %v1108_v5  ;;  %v1114_v16 = vld [vmem:[%s11596_s1 + $0x1960] sm:$0xff] }
 0x1f7   :  { %5546 = vmatprep.subr.bf16.mxu0 %v5545_v21  ;;  %5896 = vmatpush3.bf16.msra.mxu1 %v5895_v53  ;;  %v1067_v21 = vld [vmem:[%s11596_s1 + $0x17e8] sm:$0xff]  ;;  %v10675_v8 = vld [vmem:[%s11597_s0 + $0x460] sm:$0xff]  ;;  %v1080_v30 = vld [vmem:[%s11596_s1 + $0x1850] sm:$0xff] }
 0x1f8   :  { %v10616_v51 = vadd.f32 %v4644_v56, %v10056_v35  ;;  %v4677_v63 = vpop.f32.mrb[128].mxu1  ;;  %2292 = vmatmul.mubr.f32.gmra.mrb[26].mxu0 %v10295_v25  ;;  %5898 = vmatprep.subr.bf16.mxu1 %v5897_v60  ;;  %v5551_v35 = vpack.c.bf16 %v1061_v40, %v1058_v13  ;;  %v1162_v25 = vld [vmem:[%s11596_s1 + $0x1ae0] sm:$0xff]  ;;  %v1071_v53 = vld [vmem:[%s11596_s1 + $0x1808] sm:$0xff]  ;;  %v1073_v13 = vld [vmem:[%s11596_s1 + $0x1818] sm:$0xff] }
 0x1f9   :  { %v4678_v59 = vpop.f32.mrb[129].mxu1  ;;  %3737 = vmatmul.mubr.f32.gmra.mrb[234].mxu1 %v10599_v58  ;;  %5548 = vmatpush1.bf16.msra.mxu0 %v5547_v45  ;;  %v5905_v42 = vpack.c.bf16 %v1165_v24, %v1162_v25  ;;  %v1117_v45 = vld [vmem:[%s11596_s1 + $0x1978] sm:$0xff]  ;;  %v1070_v56 = vld [vmem:[%s11596_s1 + $0x1800] sm:$0xff]  ;;  %v5557_v40 = vpack.c.bf16 %v1074_v15, %v1071_v53 }
 0x1fa   :  { %v4679_v0 = vadd.f32 %v4678_v59, %v4677_v63  ;;  %2297 = vmatprep.mubr.f32.mxu0 %v10306_v12  ;;  %3741 = vmatprep.mubr.f32.mxu1 %v10610_v31  ;;  %v10651_v12 = vld [vmem:[%s11597_s0 + $0x468] sm:$0xff]  ;;  %v1077_v63 = vld [vmem:[%s11596_s1 + $0x1838] sm:$0xff]  ;;  %v5559_v5 = vpack.c.bf16 %v1073_v13, %v1070_v56 }
 0x1fb   :  { %5550 = vmatprep.subr.bf16.mxu0 %v5549_v26  ;;  %5900 = vmatpush3.bf16.msra.mxu1 %v5899_v1  ;;  %v5907_v26 = vpack.c.bf16 %v1117_v45, %v1114_v16  ;;  %v1079_v59 = vld [vmem:[%s11596_s1 + $0x1848] sm:$0xff]  ;;  %v1089_v16 = vld [vmem:[%s11596_s1 + $0x1898] sm:$0xff]  ;;  %v1092_v45 = vld [vmem:[%s11596_s1 + $0x18b0] sm:$0xff] }
 0x1fc   :  { %v10657_v14 = vadd.f32 %v4679_v0, %v10097_v11  ;;  %v4680_v60 = vpop.f32.mrb[130].mxu1  ;;  %2298 = vmatmul.mubr.f32.gmra.mrb[28].mxu0 %v10324_v2  ;;  %5902 = vmatprep.subr.bf16.mxu1 %v5901_v4  ;;  %v5555_v11 = vpack.c.bf16 %v1067_v21, %v1064_v17  ;;  %v1083_v0 = vld [vmem:[%s11596_s1 + $0x1868] sm:$0xff]  ;;  %v1086_v17 = vld [vmem:[%s11596_s1 + $0x1880] sm:$0xff]  ;;  %v5569_v13 = vpack.c.bf16 %v1092_v45, %v1089_v16 }
 0x1fd   :  { %v4681_v33 = vpop.f32.mrb[131].mxu1  ;;  %3742 = vmatmul.mubr.f32.gmra.mrb[236].mxu1 %v10640_v9  ;;  %5552 = vmatpush1.bf16.msra.mxu0 %v5551_v35  ;;  %v5561_v35 = vpack.c.bf16 %v1080_v30, %v1077_v63  ;;  %v1091_v56 = vld [vmem:[%s11596_s1 + $0x18a8] sm:$0xff]  ;;  %v1098_v63 = vld [vmem:[%s11596_s1 + $0x18e0] sm:$0xff] }
 0x1fe   :  { %v4682_v2 = vadd.f32 %v4681_v33, %v4680_v60  ;;  %2303 = vmatprep.mubr.f32.mxu0 %v10335_v23  ;;  %3746 = vmatprep.mubr.f32.mxu1 %v10651_v12  ;;  %v10686_v23 = vld [vmem:[%s11597_s0 + $0x4f8] sm:$0xff]  ;;  %v5565_v60 = vpack.c.bf16 %v1086_v17, %v1083_v0  ;;  %v1104_v0 = vld [vmem:[%s11596_s1 + $0x1910] sm:$0xff]  ;;  %v1110_v16 = vld [vmem:[%s11596_s1 + $0x1940] sm:$0xff] }
 0x1ff   :  { %5554 = vmatprep.subr.bf16.mxu0 %v5553_v62  ;;  %5904 = vmatpush3.bf16.msra.mxu1 %v5903_v48  ;;  %v1085_v48 = vld [vmem:[%s11596_s1 + $0x1878] sm:$0xff] }
 0x200   :  { %v10689_v34 = vadd.f32 %v4682_v2, %v10135_v38  ;;  %v4683_v1 = vpop.f32.mrb[132].mxu1  ;;  %2304 = vmatmul.mubr.f32.gmra.mrb[30].mxu0 %v10353_v44  ;;  %5906 = vmatprep.subr.bf16.mxu1 %v5905_v42  ;;  %v10704_v38 = vld [vmem:[%s11597_s0 + $0x4f0] sm:$0xff] }
 0x201   :  { %v4684_v4 = vpop.f32.mrb[133].mxu1  ;;  %3747 = vmatmul.mubr.f32.gmra.mrb[238].mxu1 %v10675_v8  ;;  %5556 = vmatpush1.bf16.msra.mxu0 %v5555_v11  ;;  %v1076_v44 = vld [vmem:[%s11596_s1 + $0x1830] sm:$0xff] }
 0x202   :  { %v4685_v10 = vadd.f32 %v4684_v4, %v4683_v1  ;;  %2374 = vmatprep.mubr.f32.mxu0 %v10364_v37  ;;  %3751 = vmatprep.mubr.f32.mxu1 %v10686_v23  ;;  %v10715_v37 = vld [vmem:[%s11597_s0 + $0x588] sm:$0xff]  ;;  %v5563_v62 = vpack.c.bf16 %v1079_v59, %v1076_v44 }
 0x203   :  { %5558 = vmatprep.subr.bf16.mxu0 %v5557_v40  ;;  %5908 = vmatpush3.bf16.msra.mxu1 %v5907_v26  ;;  %v1095_v1 = vld [vmem:[%s11596_s1 + $0x18c8] sm:$0xff] }
 0x204   :  { %v10718_v25 = vadd.f32 %v4685_v10, %v10164_v46  ;;  %v4686_v24 = vpop.f32.mrb[134].mxu1  ;;  %2375 = vmatmul.mubr.f32.vlgmr.msra.gmra.mrb[0].mxu0 %v10394_v36  ;;  %v10733_v46 = vld [vmem:[%s11597_s0 + $0x580] sm:$0xff]  ;;  %v1097_v10 = vld [vmem:[%s11596_s1 + $0x18d8] sm:$0xff]  ;;  %v5573_v44 = vpack.c.bf16 %v1098_v63, %v1095_v1  ;;  %v1116_v1 = vld [vmem:[%s11596_s1 + $0x1970] sm:$0xff] }
 0x205   :  { %v4687_v21 = vpop.f32.mrb[135].mxu1  ;;  %3752 = vmatmul.mubr.f32.gmra.mrb[240].mxu1 %v10704_v38  ;;  %5560 = vmatpush1.bf16.msra.mxu0 %v5559_v5  ;;  %v1082_v36 = vld [vmem:[%s11596_s1 + $0x1860] sm:$0xff] }
 0x206   :  { %v4688_v53 = vadd.f32 %v4687_v21, %v4686_v24  ;;  %2380 = vmatprep.mubr.f32.mxu0 %v10405_v6  ;;  %3756 = vmatprep.mubr.f32.mxu1 %v10715_v37  ;;  %v10744_v6 = vld [vmem:[%s11597_s0 + $0x618] sm:$0xff]  ;;  %v5567_v11 = vpack.c.bf16 %v1085_v48, %v1082_v36 }
 0x207   :  { %5562 = vmatprep.subr.bf16.mxu0 %v5561_v35  ;;  %v1101_v24 = vld [vmem:[%s11596_s1 + $0x18f8] sm:$0xff] }
 0x208   :  { %v10747_v15 = vadd.f32 %v4688_v53, %v10193_v49  ;;  %v4689_v42 = vpop.f32.mrb[136].mxu1  ;;  %2381 = vmatmul.mubr.f32.gmra.mrb[2].mxu0 %v10435_v32  ;;  %v10762_v49 = vld [vmem:[%s11597_s0 + $0x610] sm:$0xff]  ;;  %v1103_v53 = vld [vmem:[%s11596_s1 + $0x1908] sm:$0xff]  ;;  %v5577_v36 = vpack.c.bf16 %v1104_v0, %v1101_v24  ;;  %v1122_v24 = vld [vmem:[%s11596_s1 + $0x19a0] sm:$0xff] }
 0x209   :  { %v4690_v33 = vpop.f32.mrb[137].mxu1  ;;  %3757 = vmatmul.mubr.f32.gmra.mrb[242].mxu1 %v10733_v46  ;;  %5564 = vmatpush1.bf16.msra.mxu0 %v5563_v62  ;;  %v1088_v32 = vld [vmem:[%s11596_s1 + $0x1890] sm:$0xff] }
 0x20a   :  { %v4691_v2 = vadd.f32 %v4690_v33, %v4689_v42  ;;  %2386 = vmatprep.mubr.f32.mxu0 %v10446_v43  ;;  %3761 = vmatprep.mubr.f32.mxu1 %v10744_v6  ;;  %v10773_v43 = vld [vmem:[%s11597_s0 + $0x6a8] sm:$0xff]  ;;  %v5571_v4 = vpack.c.bf16 %v1091_v56, %v1088_v32 }
 0x20b   :  { %5566 = vmatprep.subr.bf16.mxu0 %v5565_v60  ;;  %v1107_v42 = vld [vmem:[%s11596_s1 + $0x1928] sm:$0xff] }
 0x20c   :  { %v10776_v40 = vadd.f32 %v4691_v2, %v10222_v52  ;;  %v4692_v26 = vpop.f32.mrb[138].mxu1  ;;  %2387 = vmatmul.mubr.f32.gmra.mrb[4].mxu0 %v10476_v29  ;;  %v10791_v52 = vld [vmem:[%s11597_s0 + $0x6a0] sm:$0xff]  ;;  %v1109_v2 = vld [vmem:[%s11596_s1 + $0x1938] sm:$0xff]  ;;  %v5581_v32 = vpack.c.bf16 %v1110_v16, %v1107_v42  ;;  %v1128_v42 = vld [vmem:[%s11596_s1 + $0x19d0] sm:$0xff] }
 0x20d   :  { %v4693_v30 = vpop.f32.mrb[139].mxu1  ;;  %3762 = vmatmul.mubr.f32.gmra.mrb[244].mxu1 %v10762_v49  ;;  %5568 = vmatpush1.bf16.msra.mxu0 %v5567_v11  ;;  %v1094_v29 = vld [vmem:[%s11596_s1 + $0x18c0] sm:$0xff] }
 0x20e   :  { %v4694_v5 = vadd.f32 %v4693_v30, %v4692_v26  ;;  %2392 = vmatprep.mubr.f32.mxu0 %v10487_v57  ;;  %3766 = vmatprep.mubr.f32.mxu1 %v10773_v43  ;;  %v10802_v57 = vld [vmem:[%s11597_s0 + $0x738] sm:$0xff]  ;;  %v5575_v21 = vpack.c.bf16 %v1097_v10, %v1094_v29 }
 0x20f   :  { %5570 = vmatprep.subr.bf16.mxu0 %v5569_v13  ;;  %v1113_v26 = vld [vmem:[%s11596_s1 + $0x1958] sm:$0xff] }
 0x210   :  { %v10805_v59 = vadd.f32 %v4694_v5, %v10251_v20  ;;  %v4695_v35 = vpop.f32.mrb[140].mxu1  ;;  %2393 = vmatmul.mubr.f32.gmra.mrb[6].mxu0 %v10517_v55  ;;  %v10820_v20 = vld [vmem:[%s11597_s0 + $0x730] sm:$0xff]  ;;  %v1115_v5 = vld [vmem:[%s11596_s1 + $0x1968] sm:$0xff]  ;;  %v5585_v29 = vpack.c.bf16 %v1116_v1, %v1113_v26  ;;  %v1134_v26 = vld [vmem:[%s11596_s1 + $0x1a00] sm:$0xff] }
 0x211   :  { %v4696_v17 = vpop.f32.mrb[141].mxu1  ;;  %3767 = vmatmul.mubr.f32.gmra.mrb[246].mxu1 %v10791_v52  ;;  %5572 = vmatpush1.bf16.msra.mxu0 %v5571_v4  ;;  %v1100_v55 = vld [vmem:[%s11596_s1 + $0x18f0] sm:$0xff] }
 0x212   :  { %v4697_v62 = vadd.f32 %v4696_v17, %v4695_v35  ;;  %2398 = vmatprep.mubr.f32.mxu0 %v10528_v47  ;;  %3771 = vmatprep.mubr.f32.mxu1 %v10802_v57  ;;  %v10831_v47 = vld [vmem:[%s11597_s0 + $0x7c8] sm:$0xff]  ;;  %v5579_v33 = vpack.c.bf16 %v1103_v53, %v1100_v55 }
 0x213   :  { %5574 = vmatprep.subr.bf16.mxu0 %v5573_v44  ;;  %v1119_v35 = vld [vmem:[%s11596_s1 + $0x1988] sm:$0xff] }
 0x214   :  { %v10834_v48 = vadd.f32 %v4697_v62, %v10280_v41  ;;  %v4698_v60 = vpop.f32.mrb[142].mxu1  ;;  %2399 = vmatmul.mubr.f32.gmra.mrb[8].mxu0 %v10558_v22  ;;  %v10849_v41 = vld [vmem:[%s11597_s0 + $0x7c0] sm:$0xff]  ;;  %v1121_v62 = vld [vmem:[%s11596_s1 + $0x1998] sm:$0xff]  ;;  %v5589_v55 = vpack.c.bf16 %v1122_v24, %v1119_v35  ;;  %v1140_v35 = vld [vmem:[%s11596_s1 + $0x1a30] sm:$0xff] }
 0x215   :  { %v4699_v45 = vpop.f32.mrb[143].mxu1  ;;  %3772 = vmatmul.mubr.f32.gmra.mrb[248].mxu1 %v10820_v20  ;;  %5576 = vmatpush1.bf16.msra.mxu0 %v5575_v21  ;;  %v1106_v22 = vld [vmem:[%s11596_s1 + $0x1920] sm:$0xff] }
 0x216   :  { %v4700_v11 = vadd.f32 %v4699_v45, %v4698_v60  ;;  %2404 = vmatprep.mubr.f32.mxu0 %v10569_v7  ;;  %3776 = vmatprep.mubr.f32.mxu1 %v10831_v47  ;;  %v10860_v7 = vld [vmem:[%s11597_s0 + $0x858] sm:$0xff]  ;;  %v5583_v30 = vpack.c.bf16 %v1109_v2, %v1106_v22 }
 0x217   :  { %5578 = vmatprep.subr.bf16.mxu0 %v5577_v36  ;;  %v1125_v60 = vld [vmem:[%s11596_s1 + $0x19b8] sm:$0xff] }
 0x218   :  { %v10863_v56 = vadd.f32 %v4700_v11, %v10309_v27  ;;  %v4701_v13 = vpop.f32.mrb[144].mxu1  ;;  %2405 = vmatmul.mubr.f32.gmra.mrb[10].mxu0 %v10599_v58  ;;  %v10878_v27 = vld [vmem:[%s11597_s0 + $0x850] sm:$0xff]  ;;  %v1127_v11 = vld [vmem:[%s11596_s1 + $0x19c8] sm:$0xff]  ;;  %v5593_v22 = vpack.c.bf16 %v1128_v42, %v1125_v60  ;;  %v1146_v60 = vld [vmem:[%s11596_s1 + $0x1a60] sm:$0xff] }
 0x219   :  { %v4702_v63 = vpop.f32.mrb[145].mxu1  ;;  %3777 = vmatmul.mubr.f32.gmra.mrb[250].mxu1 %v10849_v41  ;;  %5580 = vmatpush1.bf16.msra.mxu0 %v5579_v33  ;;  %v1112_v58 = vld [vmem:[%s11596_s1 + $0x1950] sm:$0xff] }
 0x21a   :  { %v4703_v4 = vadd.f32 %v4702_v63, %v4701_v13  ;;  %2410 = vmatprep.mubr.f32.mxu0 %v10610_v31  ;;  %3781 = vmatprep.mubr.f32.mxu1 %v10860_v7  ;;  %v10889_v31 = vld [vmem:[%s11597_s0 + $0x8e8] sm:$0xff]  ;;  %v5587_v17 = vpack.c.bf16 %v1115_v5, %v1112_v58 }
 0x21b   :  { %5582 = vmatprep.subr.bf16.mxu0 %v5581_v32  ;;  %v1131_v13 = vld [vmem:[%s11596_s1 + $0x19e8] sm:$0xff] }
 0x21c   :  { %v10892_v10 = vadd.f32 %v4703_v4, %v10338_v54  ;;  %v4704_v44 = vpop.f32.mrb[146].mxu1  ;;  %2411 = vmatmul.mubr.f32.gmra.mrb[12].mxu0 %v10640_v9  ;;  %v10907_v54 = vld [vmem:[%s11597_s0 + $0x8e0] sm:$0xff]  ;;  %v1133_v4 = vld [vmem:[%s11596_s1 + $0x19f8] sm:$0xff]  ;;  %v5597_v58 = vpack.c.bf16 %v1134_v26, %v1131_v13  ;;  %v1152_v13 = vld [vmem:[%s11596_s1 + $0x1a90] sm:$0xff] }
 0x21d   :  { %v4705_v0 = vpop.f32.mrb[147].mxu1  ;;  %3782 = vmatmul.mubr.f32.gmra.mrb[252].mxu1 %v10878_v27  ;;  %5584 = vmatpush1.bf16.msra.mxu0 %v5583_v30  ;;  %v1118_v9 = vld [vmem:[%s11596_s1 + $0x1980] sm:$0xff] }
 0x21e   :  { %v4706_v21 = vadd.f32 %v4705_v0, %v4704_v44  ;;  %2416 = vmatprep.mubr.f32.mxu0 %v10651_v12  ;;  %3786 = vmatprep.mubr.f32.mxu1 %v10889_v31  ;;  %v10918_v12 = vld [vmem:[%s11597_s0 + $0x88] sm:$0xff]  ;;  %v5591_v45 = vpack.c.bf16 %v1121_v62, %v1118_v9  ;;  %v1137_v44 = vld [vmem:[%s11596_s1 + $0x1a18] sm:$0xff] }
 0x21f   :  { %5586 = vmatprep.subr.bf16.mxu0 %v5585_v29  ;;  %v5601_v9 = vpack.c.bf16 %v1140_v35, %v1137_v44  ;;  %v1158_v44 = vld [vmem:[%s11596_s1 + $0x1ac0] sm:$0xff] }
 0x220   :  { %v10921_v53 = vadd.f32 %v4706_v21, %v10370_v18  ;;  %v4707_v36 = vpop.f32.mrb[148].mxu1  ;;  %2417 = vmatmul.mubr.f32.gmra.mrb[14].mxu0 %v10675_v8  ;;  %v10936_v18 = vld [vmem:[%s11597_s0 + $0x80] sm:$0xff]  ;;  %v1124_v8 = vld [vmem:[%s11596_s1 + $0x19b0] sm:$0xff]  ;;  %v1139_v21 = vld [vmem:[%s11596_s1 + $0x1a28] sm:$0xff] }
 0x221   :  { %v4708_v16 = vpop.f32.mrb[149].mxu1  ;;  %3787 = vmatmul.mubr.f32.gmra.mrb[254].mxu1 %v10907_v54  ;;  %5588 = vmatpush1.bf16.msra.mxu0 %v5587_v17  ;;  %v5595_v63 = vpack.c.bf16 %v1127_v11, %v1124_v8 }
 0x222   :  { %v4709_v33 = vadd.f32 %v4708_v16, %v4707_v36  ;;  %2422 = vmatprep.mubr.f32.mxu0 %v10686_v23  ;;  %3856 = vmatprep.mubr.f32.mxu1 %v10918_v12  ;;  %v10947_v23 = vld [vmem:[%s11597_s0 + $0x118] sm:$0xff]  ;;  %v1143_v36 = vld [vmem:[%s11596_s1 + $0x1a48] sm:$0xff] }
 0x223   :  { %5590 = vmatprep.subr.bf16.mxu0 %v5589_v55  ;;  %v5605_v8 = vpack.c.bf16 %v1146_v60, %v1143_v36  ;;  %v1164_v36 = vld [vmem:[%s11596_s1 + $0x1af0] sm:$0xff] }
 0x224   :  { %v10950_v2 = vadd.f32 %v4709_v33, %v10411_v3  ;;  %v4710_v32 = vpop.f32.mrb[150].mxu1  ;;  %2423 = vmatmul.mubr.f32.gmra.mrb[16].mxu0 %v10704_v38  ;;  %v10965_v3 = vld [vmem:[%s11597_s0 + $0x110] sm:$0xff]  ;;  %v1130_v38 = vld [vmem:[%s11596_s1 + $0x19e0] sm:$0xff]  ;;  %v1145_v33 = vld [vmem:[%s11596_s1 + $0x1a58] sm:$0xff] }
 0x225   :  { %v4711_v1 = vpop.f32.mrb[151].mxu1  ;;  %3857 = vmatmul.mubr.f32.vlgmr.msra.gmra.mrb[0].mxu1 %v10936_v18  ;;  %5592 = vmatpush1.bf16.msra.mxu0 %v5591_v45  ;;  %v5599_v0 = vpack.c.bf16 %v1133_v4, %v1130_v38 }
 0x226   :  { %v4712_v30 = vadd.f32 %v4711_v1, %v4710_v32  ;;  %2428 = vmatprep.mubr.f32.mxu0 %v10715_v37  ;;  %3861 = vmatprep.mubr.f32.mxu1 %v10947_v23  ;;  %v10976_v37 = vld [vmem:[%s11597_s0 + $0x1a8] sm:$0xff]  ;;  %v1149_v32 = vld [vmem:[%s11596_s1 + $0x1a78] sm:$0xff] }
 0x227   :  { %5594 = vmatprep.subr.bf16.mxu0 %v5593_v22  ;;  %v5609_v38 = vpack.c.bf16 %v1152_v13, %v1149_v32 }
 0x228   :  { %v10979_v5 = vadd.f32 %v4712_v30, %v10452_v19  ;;  %v4713_v29 = vpop.f32.mrb[152].mxu1  ;;  %2429 = vmatmul.mubr.f32.gmra.mrb[18].mxu0 %v10733_v46  ;;  %v10994_v19 = vld [vmem:[%s11597_s0 + $0x1a0] sm:$0xff]  ;;  %v1136_v46 = vld [vmem:[%s11596_s1 + $0x1a10] sm:$0xff]  ;;  %v1151_v30 = vld [vmem:[%s11596_s1 + $0x1a88] sm:$0xff] }
 0x229   :  { %v4714_v24 = vpop.f32.mrb[153].mxu1  ;;  %3862 = vmatmul.mubr.f32.gmra.mrb[2].mxu1 %v10965_v3  ;;  %5596 = vmatpush1.bf16.msra.mxu0 %v5595_v63  ;;  %v5603_v16 = vpack.c.bf16 %v1139_v21, %v1136_v46 }
 0x22a   :  { %v4715_v17 = vadd.f32 %v4714_v24, %v4713_v29  ;;  %2434 = vmatprep.mubr.f32.mxu0 %v10744_v6  ;;  %3866 = vmatprep.mubr.f32.mxu1 %v10976_v37  ;;  %v11005_v6 = vld [vmem:[%s11597_s0 + $0x238] sm:$0xff]  ;;  %v1155_v29 = vld [vmem:[%s11596_s1 + $0x1aa8] sm:$0xff] }
 0x22b   :  { %5598 = vmatprep.subr.bf16.mxu0 %v5597_v58  ;;  %v5613_v46 = vpack.c.bf16 %v1158_v44, %v1155_v29 }
 0x22c   :  { %v11008_v62 = vadd.f32 %v4715_v17, %v10493_v28  ;;  %v4716_v55 = vpop.f32.mrb[154].mxu1  ;;  %2435 = vmatmul.mubr.f32.gmra.mrb[20].mxu0 %v10762_v49  ;;  %v11023_v28 = vld [vmem:[%s11597_s0 + $0x230] sm:$0xff]  ;;  %v1142_v49 = vld [vmem:[%s11596_s1 + $0x1a40] sm:$0xff]  ;;  %v1157_v17 = vld [vmem:[%s11596_s1 + $0x1ab8] sm:$0xff] }
 0x22d   :  { %v4717_v42 = vpop.f32.mrb[155].mxu1  ;;  %3867 = vmatmul.mubr.f32.gmra.mrb[4].mxu1 %v10994_v19  ;;  %5600 = vmatpush1.bf16.msra.mxu0 %v5599_v0  ;;  %v5607_v1 = vpack.c.bf16 %v1145_v33, %v1142_v49 }
 0x22e   :  { %v4718_v45 = vadd.f32 %v4717_v42, %v4716_v55  ;;  %2440 = vmatprep.mubr.f32.mxu0 %v10773_v43  ;;  %3871 = vmatprep.mubr.f32.mxu1 %v11005_v6  ;;  %v11034_v43 = vld [vmem:[%s11597_s0 + $0x2c8] sm:$0xff]  ;;  %v1161_v55 = vld [vmem:[%s11596_s1 + $0x1ad8] sm:$0xff] }
 0x22f   :  { %5602 = vmatprep.subr.bf16.mxu0 %v5601_v9  ;;  %v5617_v49 = vpack.c.bf16 %v1164_v36, %v1161_v55 }
 0x230   :  { %v11037_v11 = vadd.f32 %v4718_v45, %v10534_v50  ;;  %v4719_v22 = vpop.f32.mrb[156].mxu1  ;;  %2441 = vmatmul.mubr.f32.gmra.mrb[22].mxu0 %v10791_v52  ;;  %v11052_v50 = vld [vmem:[%s11597_s0 + $0x2c0] sm:$0xff]  ;;  %v1148_v52 = vld [vmem:[%s11596_s1 + $0x1a70] sm:$0xff]  ;;  %v1163_v45 = vld [vmem:[%s11596_s1 + $0x1ae8] sm:$0xff] }
 0x231   :  { %v4720_v26 = vpop.f32.mrb[157].mxu1  ;;  %3872 = vmatmul.mubr.f32.gmra.mrb[6].mxu1 %v11023_v28  ;;  %5604 = vmatpush1.bf16.msra.mxu0 %v5603_v16  ;;  %v5611_v24 = vpack.c.bf16 %v1151_v30, %v1148_v52  ;;  %v11150_v52 = vld [vmem:[%s11597_s0 + $0x500] sm:$0xff] }
 0x232   :  { %v4721_v63 = vadd.f32 %v4720_v26, %v4719_v22  ;;  %2446 = vmatprep.mubr.f32.mxu0 %v10802_v57  ;;  %3876 = vmatprep.mubr.f32.mxu1 %v11034_v43  ;;  %v11063_v57 = vld [vmem:[%s11597_s0 + $0x358] sm:$0xff]  ;;  %v11133_v26 = vld [vmem:[%s11597_s0 + $0x470] sm:$0xff] }
 0x233   :  { %5606 = vmatprep.subr.bf16.mxu0 %v5605_v8 }
 0x234   :  { %v11066_v4 = vadd.f32 %v4721_v63, %v10575_v39  ;;  %v4722_v58 = vpop.f32.mrb[158].mxu1  ;;  %2447 = vmatmul.mubr.f32.gmra.mrb[24].mxu0 %v10820_v20  ;;  %v11081_v39 = vld [vmem:[%s11597_s0 + $0x350] sm:$0xff]  ;;  %v1154_v20 = vld [vmem:[%s11596_s1 + $0x1aa0] sm:$0xff] }
 0x235   :  { %v4723_v35 = vpop.f32.mrb[159].mxu1  ;;  %3877 = vmatmul.mubr.f32.gmra.mrb[8].mxu1 %v11052_v50  ;;  %5608 = vmatpush1.bf16.msra.mxu0 %v5607_v1  ;;  %v5615_v42 = vpack.c.bf16 %v1157_v17, %v1154_v20  ;;  %v11201_v20 = vld [vmem:[%s11597_s0 + $0x6b0] sm:$0xff] }
 0x236   :  { %v4724_v0 = vadd.f32 %v4723_v35, %v4722_v58  ;;  %2452 = vmatprep.mubr.f32.mxu0 %v10831_v47  ;;  %3881 = vmatprep.mubr.f32.mxu1 %v11063_v57  ;;  %v11092_v47 = vld [vmem:[%s11597_s0 + $0x3e8] sm:$0xff]  ;;  %v11167_v58 = vld [vmem:[%s11597_s0 + $0x590] sm:$0xff]  ;;  %v11184_v35 = vld [vmem:[%s11597_s0 + $0x620] sm:$0xff] }
 0x237   :  { %5610 = vmatprep.subr.bf16.mxu0 %v5609_v38 }
 0x238   :  { %v11095_v21 = vadd.f32 %v4724_v0, %v10616_v51  ;;  %v4757_v9 = vpop.f32.mrb[160].mxu1  ;;  %2453 = vmatmul.mubr.f32.gmra.mrb[26].mxu0 %v10849_v41  ;;  %v11110_v51 = vld [vmem:[%s11597_s0 + $0x3e0] sm:$0xff]  ;;  %v1160_v41 = vld [vmem:[%s11596_s1 + $0x1ad0] sm:$0xff] }
 0x239   :  { %v4758_v60 = vpop.f32.mrb[161].mxu1  ;;  %3882 = vmatmul.mubr.f32.gmra.mrb[10].mxu1 %v11081_v39  ;;  %5612 = vmatpush1.bf16.msra.mxu0 %v5611_v24  ;;  %v5619_v32 = vpack.c.bf16 %v1163_v45, %v1160_v41  ;;  %v282_v41 = vld [vmem:[%s11597_s0 + $0x860] sm:$0xff]  ;;  %v301_v45 = vld [vmem:[%s11597_s0 + $0x8f8] sm:$0xff] }
 0x23a   :  { %v4759_v16 = vadd.f32 %v4758_v60, %v4757_v9  ;;  %2458 = vmatprep.mubr.f32.mxu0 %v10860_v7  ;;  %3886 = vmatprep.mubr.f32.mxu1 %v11092_v47  ;;  %v11121_v7 = vld [vmem:[%s11597_s0 + $0x478] sm:$0xff]  ;;  %v11218_v9 = vld [vmem:[%s11597_s0 + $0x740] sm:$0xff]  ;;  %v264_v60 = vld [vmem:[%s11597_s0 + $0x7d0] sm:$0xff] }
 0x23b   :  { %5614 = vmatprep.subr.bf16.mxu0 %v5613_v46 }
 0x23c   :  { %v11124_v33 = vadd.f32 %v4759_v16, %v10657_v14  ;;  %v4760_v8 = vpop.f32.mrb[162].mxu1  ;;  %2459 = vmatmul.mubr.f32.gmra.mrb[28].mxu0 %v10878_v27  ;;  %v11138_v14 = vld [vmem:[%s11597_s0 + $0x508] sm:$0xff] }
 0x23d   :  { %v4761_v22 = vpop.f32.mrb[163].mxu1  ;;  %3887 = vmatmul.mubr.f32.gmra.mrb[12].mxu1 %v11110_v51  ;;  %5616 = vmatpush1.bf16.msra.mxu0 %v5615_v42 }
 0x23e   :  { %v4762_v13 = vadd.f32 %v4761_v22, %v4760_v8  ;;  %2464 = vmatprep.mubr.f32.mxu0 %v10889_v31  ;;  %3891 = vmatprep.mubr.f32.mxu1 %v11121_v7  ;;  %v300_v8 = vld [vmem:[%s11597_s0 + $0x8f0] sm:$0xff] }
 0x23f   :  { %5618 = vmatprep.subr.bf16.mxu0 %v5617_v49 }
 0x240   :  { %v11141_v27 = vadd.f32 %v4762_v13, %v10689_v34  ;;  %v4763_v1 = vpop.f32.mrb[164].mxu1  ;;  %2465 = vmatmul.mubr.f32.gmra.mrb[30].mxu0 %v10907_v54  ;;  %v11155_v34 = vld [vmem:[%s11597_s0 + $0x598] sm:$0xff] }
 0x241   :  { %v4764_v31 = vpop.f32.mrb[165].mxu1  ;;  %3892 = vmatmul.mubr.f32.gmra.mrb[14].mxu1 %v11133_v26  ;;  %5620 = vmatpush1.bf16.msra.mxu0 %v5619_v32 }
 0x242   :  { %v4765_v63 = vadd.f32 %v4764_v31, %v4763_v1  ;;  %2535 = vmatprep.mubr.f32.mxu0 %v10918_v12  ;;  %3896 = vmatprep.mubr.f32.mxu1 %v11138_v14 }
 0x244   :  { %v11158_v54 = vadd.f32 %v4765_v63, %v10718_v25  ;;  %v4766_v30 = vpop.f32.mrb[166].mxu1  ;;  %2536 = vmatmul.mubr.f32.vlgmr.msra.gmra.mrb[0].mxu0 %v10936_v18  ;;  %v11172_v25 = vld [vmem:[%s11597_s0 + $0x628] sm:$0xff] }
 0x245   :  { %v4767_v38 = vpop.f32.mrb[167].mxu1  ;;  %3897 = vmatmul.mubr.f32.gmra.mrb[16].mxu1 %v11150_v52  ;;  %2541 = vmatprep.mubr.f32.mxu0 %v10947_v23 }
 0x246   :  { %v4768_v12 = vadd.f32 %v4767_v38, %v4766_v30  ;;  %3901 = vmatprep.mubr.f32.mxu1 %v11155_v34 }
 0x248   :  { %v11175_v18 = vadd.f32 %v4768_v12, %v10747_v15  ;;  %v4769_v29 = vpop.f32.mrb[168].mxu1  ;;  %2542 = vmatmul.mubr.f32.gmra.mrb[2].mxu0 %v10965_v3  ;;  %v11189_v15 = vld [vmem:[%s11597_s0 + $0x6b8] sm:$0xff] }
 0x249   :  { %v4770_v23 = vpop.f32.mrb[169].mxu1  ;;  %3902 = vmatmul.mubr.f32.gmra.mrb[18].mxu1 %v11167_v58  ;;  %2547 = vmatprep.mubr.f32.mxu0 %v10976_v37 }
 0x24a   :  { %v4771_v44 = vadd.f32 %v4770_v23, %v4769_v29  ;;  %3906 = vmatprep.mubr.f32.mxu1 %v11172_v25 }
 0x24c   :  { %v11192_v3 = vadd.f32 %v4771_v44, %v10776_v40  ;;  %v4772_v24 = vpop.f32.mrb[170].mxu1  ;;  %2548 = vmatmul.mubr.f32.gmra.mrb[4].mxu0 %v10994_v19  ;;  %v11206_v40 = vld [vmem:[%s11597_s0 + $0x748] sm:$0xff] }
 0x24d   :  { %v4773_v37 = vpop.f32.mrb[171].mxu1  ;;  %3907 = vmatmul.mubr.f32.gmra.mrb[20].mxu1 %v11184_v35  ;;  %2553 = vmatprep.mubr.f32.mxu0 %v11005_v6 }
 0x24e   :  { %v4774_v0 = vadd.f32 %v4773_v37, %v4772_v24  ;;  %3911 = vmatprep.mubr.f32.mxu1 %v11189_v15 }
 0x250   :  { %v11209_v19 = vadd.f32 %v4774_v0, %v10805_v59  ;;  %v4775_v17 = vpop.f32.mrb[172].mxu1  ;;  %2554 = vmatmul.mubr.f32.gmra.mrb[6].mxu0 %v11023_v28  ;;  %v11223_v59 = vld [vmem:[%s11597_s0 + $0x7d8] sm:$0xff] }
 0x251   :  { %v4776_v6 = vpop.f32.mrb[173].mxu1  ;;  %3912 = vmatmul.mubr.f32.gmra.mrb[22].mxu1 %v11201_v20  ;;  %2559 = vmatprep.mubr.f32.mxu0 %v11034_v43 }
 0x252   :  { %v4777_v46 = vadd.f32 %v4776_v6, %v4775_v17  ;;  %3916 = vmatprep.mubr.f32.mxu1 %v11206_v40 }
 0x254   :  { %v11226_v28 = vadd.f32 %v4777_v46, %v10834_v48  ;;  %v4778_v55 = vpop.f32.mrb[174].mxu1  ;;  %2560 = vmatmul.mubr.f32.gmra.mrb[8].mxu0 %v11052_v50  ;;  %v283_v48 = vld [vmem:[%s11597_s0 + $0x868] sm:$0xff] }
 0x255   :  { %v4779_v43 = vpop.f32.mrb[175].mxu1  ;;  %3917 = vmatmul.mubr.f32.gmra.mrb[24].mxu1 %v11218_v9  ;;  %2565 = vmatprep.mubr.f32.mxu0 %v11063_v57 }
 0x256   :  { %v4780_v36 = vadd.f32 %v4779_v43, %v4778_v55  ;;  %3921 = vmatprep.mubr.f32.mxu1 %v11223_v59 }
 0x258   :  { %v11239_v42 = vadd.f32 %v4780_v36, %v10863_v56  ;;  %v4781_v50 = vpop.f32.mrb[176].mxu1  ;;  %2566 = vmatmul.mubr.f32.gmra.mrb[10].mxu0 %v11081_v39 }
 0x259   :  { %v4782_v16 = vpop.f32.mrb[177].mxu1  ;;  %3922 = vmatmul.mubr.f32.gmra.mrb[26].mxu1 %v264_v60  ;;  %2571 = vmatprep.mubr.f32.mxu0 %v11092_v47 }
 0x25a   :  { %v4783_v57 = vadd.f32 %v4782_v16, %v4781_v50  ;;  %3926 = vmatprep.mubr.f32.mxu1 %v283_v48 }
 0x25c   :  { %v11250_v56 = vadd.f32 %v4783_v57, %v10892_v10  ;;  %v4784_v49 = vpop.f32.mrb[178].mxu1  ;;  %2572 = vmatmul.mubr.f32.gmra.mrb[12].mxu0 %v11110_v51 }
 0x25d   :  { %v4785_v39 = vpop.f32.mrb[179].mxu1  ;;  %3927 = vmatmul.mubr.f32.gmra.mrb[28].mxu1 %v282_v41  ;;  %2577 = vmatprep.mubr.f32.mxu0 %v11121_v7 }
 0x25e   :  { %v4786_v47 = vadd.f32 %v4785_v39, %v4784_v49  ;;  %3931 = vmatprep.mubr.f32.mxu1 %v301_v45 }
 0x260   :  { %v11258_v22 = vadd.f32 %v4786_v47, %v10921_v53  ;;  %v4787_v32 = vpop.f32.mrb[180].mxu1  ;;  %2578 = vmatmul.mubr.f32.gmra.mrb[14].mxu0 %v11133_v26 }
 0x261   :  { %v4788_v10 = vpop.f32.mrb[181].mxu1  ;;  %3932 = vmatmul.mubr.f32.gmra.mrb[30].mxu1 %v300_v8  ;;  %2583 = vmatprep.mubr.f32.mxu0 %v11138_v14 }
 0x262   :  { %v4789_v51 = vadd.f32 %v4788_v10, %v4787_v32 }
 0x264   :  { %v11263_v13 = vadd.f32 %v4789_v51, %v10950_v2  ;;  %v4790_v7 = vpop.f32.mrb[182].mxu1  ;;  %2584 = vmatmul.mubr.f32.gmra.mrb[16].mxu0 %v11150_v52 }
 0x265   :  { %v4791_v1 = vpop.f32.mrb[183].mxu1  ;;  %2589 = vmatprep.mubr.f32.mxu0 %v11155_v34 }
 0x266   :  { %v4792_v31 = vadd.f32 %v4791_v1, %v4790_v7 }
 0x268   :  { %v11268_v53 = vadd.f32 %v4792_v31, %v10979_v5  ;;  %v4793_v63 = vpop.f32.mrb[184].mxu1  ;;  %2590 = vmatmul.mubr.f32.gmra.mrb[18].mxu0 %v11167_v58 }
 0x269   :  { %v4794_v26 = vpop.f32.mrb[185].mxu1  ;;  %2595 = vmatprep.mubr.f32.mxu0 %v11172_v25 }
 0x26a   :  { %v4795_v14 = vadd.f32 %v4794_v26, %v4793_v63 }
 0x26c   :  { %v11273_v2 = vadd.f32 %v4795_v14, %v11008_v62  ;;  %v4796_v30 = vpop.f32.mrb[186].mxu1  ;;  %2596 = vmatmul.mubr.f32.gmra.mrb[20].mxu0 %v11184_v35 }
 0x26d   :  { %v4797_v52 = vpop.f32.mrb[187].mxu1  ;;  %2601 = vmatprep.mubr.f32.mxu0 %v11189_v15 }
 0x26e   :  { %v4798_v34 = vadd.f32 %v4797_v52, %v4796_v30 }
 0x270   :  { %v11278_v5 = vadd.f32 %v4798_v34, %v11037_v11  ;;  %v4799_v38 = vpop.f32.mrb[188].mxu1  ;;  %2602 = vmatmul.mubr.f32.gmra.mrb[22].mxu0 %v11201_v20 }
 0x271   :  { %v4800_v12 = vpop.f32.mrb[189].mxu1  ;;  %2607 = vmatprep.mubr.f32.mxu0 %v11206_v40 }
 0x272   :  { %v4801_v58 = vadd.f32 %v4800_v12, %v4799_v38 }
 0x274   :  { %v11283_v62 = vadd.f32 %v4801_v58, %v11066_v4  ;;  %v4802_v25 = vpop.f32.mrb[190].mxu1  ;;  %2608 = vmatmul.mubr.f32.gmra.mrb[24].mxu0 %v11218_v9 }
 0x275   :  { %v4803_v29 = vpop.f32.mrb[191].mxu1  ;;  %2613 = vmatprep.mubr.f32.mxu0 %v11223_v59 }
 0x276   :  { %v4804_v23 = vadd.f32 %v4803_v29, %v4802_v25 }
 0x278   :  { %v11288_v11 = vadd.f32 %v4804_v23, %v11095_v21  ;;  %v4837_v44 = vpop.f32.mrb[192].mxu1  ;;  %2614 = vmatmul.mubr.f32.gmra.mrb[26].mxu0 %v264_v60 }
 0x279   :  { %v4838_v35 = vpop.f32.mrb[193].mxu1  ;;  %2619 = vmatprep.mubr.f32.mxu0 %v283_v48 }
 0x27a   :  { %v4839_v15 = vadd.f32 %v4838_v35, %v4837_v44 }
 0x27c   :  { %v11291_v24 = vadd.f32 %v4839_v15, %v11124_v33  ;;  %v4840_v4 = vpop.f32.mrb[194].mxu1  ;;  %2620 = vmatmul.mubr.f32.gmra.mrb[28].mxu0 %v282_v41 }
 0x27d   :  { %v4841_v37 = vpop.f32.mrb[195].mxu1  ;;  %2625 = vmatprep.mubr.f32.mxu0 %v301_v45 }
 0x27e   :  { %v4842_v0 = vadd.f32 %v4841_v37, %v4840_v4 }
 0x280   :  { %v11294_v20 = vadd.f32 %v4842_v0, %v11141_v27  ;;  %v4843_v40 = vpop.f32.mrb[196].mxu1  ;;  %2626 = vmatmul.mubr.f32.gmra.mrb[30].mxu0 %v300_v8 }
 0x281   :  { %v4844_v21 = vpop.f32.mrb[197].mxu1 }
 0x282   :  { %v4845_v17 = vadd.f32 %v4844_v21, %v4843_v40 }
 0x284   :  { %v11297_v6 = vadd.f32 %v4845_v17, %v11158_v54  ;;  %v4846_v46 = vpop.f32.mrb[198].mxu1 }
 0x285   :  { %v4847_v9 = vpop.f32.mrb[199].mxu1 }
 0x286   :  { %v4848_v59 = vadd.f32 %v4847_v9, %v4846_v46 }
 0x288   :  { %v11300_v33 = vadd.f32 %v4848_v59, %v11175_v18  ;;  %v4849_v55 = vpop.f32.mrb[200].mxu1 }
 0x289   :  { %v4850_v43 = vpop.f32.mrb[201].mxu1 }
 0x28a   :  { %v4851_v36 = vadd.f32 %v4850_v43, %v4849_v55 }
 0x28c   :  { %v11303_v60 = vadd.f32 %v4851_v36, %v11192_v3  ;;  %v4852_v27 = vpop.f32.mrb[202].mxu1 }
 0x28d   :  { %v4853_v48 = vpop.f32.mrb[203].mxu1 }
 0x28e   :  { %v4854_v50 = vadd.f32 %v4853_v48, %v4852_v27 }
 0x290   :  { %v11306_v16 = vadd.f32 %v4854_v50, %v11209_v19  ;;  %v4855_v54 = vpop.f32.mrb[204].mxu1 }
 0x291   :  { %v4856_v57 = vpop.f32.mrb[205].mxu1 }
 0x292   :  { %v4857_v41 = vadd.f32 %v4856_v57, %v4855_v54 }
 0x294   :  { %v11309_v45 = vadd.f32 %v4857_v41, %v11226_v28  ;;  %v4858_v18 = vpop.f32.mrb[206].mxu1 }
 0x295   :  { %v4859_v49 = vpop.f32.mrb[207].mxu1 }
 0x296   :  { %v4860_v39 = vadd.f32 %v4859_v49, %v4858_v18 }
 0x298   :  { %v11312_v47 = vadd.f32 %v4860_v39, %v11239_v42  ;;  %v4861_v3 = vpop.f32.mrb[208].mxu1 }
 0x299   :  { %v4862_v8 = vpop.f32.mrb[209].mxu1 }
 0x29a   :  { %v4863_v32 = vadd.f32 %v4862_v8, %v4861_v3 }
 0x29c   :  { %v11315_v10 = vadd.f32 %v4863_v32, %v11250_v56  ;;  %v4864_v19 = vpop.f32.mrb[210].mxu1 }
 0x29d   :  { %v4865_v51 = vpop.f32.mrb[211].mxu1 }
 0x29e   :  { %v4866_v7 = vadd.f32 %v4865_v51, %v4864_v19 }
 0x2a0   :  { %v11318_v1 = vadd.f32 %v4866_v7, %v11258_v22  ;;  %v4867_v28 = vpop.f32.mrb[212].mxu1 }
 0x2a1   :  { %v4868_v31 = vpop.f32.mrb[213].mxu1 }
 0x2a2   :  { %v4869_v63 = vadd.f32 %v4868_v31, %v4867_v28 }
 0x2a4   :  { %v11321_v26 = vadd.f32 %v4869_v63, %v11263_v13  ;;  %v4870_v42 = vpop.f32.mrb[214].mxu1 }
 0x2a5   :  { %v4871_v14 = vpop.f32.mrb[215].mxu1 }
 0x2a6   :  { %v4872_v30 = vadd.f32 %v4871_v14, %v4870_v42 }
 0x2a8   :  { %v11324_v52 = vadd.f32 %v4872_v30, %v11268_v53  ;;  %v4873_v56 = vpop.f32.mrb[216].mxu1 }
 0x2a9   :  { %v4874_v34 = vpop.f32.mrb[217].mxu1 }
 0x2aa   :  { %v4875_v38 = vadd.f32 %v4874_v34, %v4873_v56 }
 0x2ac   :  { %v11327_v12 = vadd.f32 %v4875_v38, %v11273_v2  ;;  %v4876_v22 = vpop.f32.mrb[218].mxu1 }
 0x2ad   :  { %v4877_v58 = vpop.f32.mrb[219].mxu1 }
 0x2ae   :  { %v4878_v25 = vadd.f32 %v4877_v58, %v4876_v22 }
 0x2b0   :  { %v11330_v29 = vadd.f32 %v4878_v25, %v11278_v5  ;;  %v4879_v13 = vpop.f32.mrb[220].mxu1 }
 0x2b1   :  { %v4880_v23 = vpop.f32.mrb[221].mxu1 }
 0x2b2   :  { %v4881_v44 = vadd.f32 %v4880_v23, %v4879_v13 }
 0x2b4   :  { %v11333_v35 = vadd.f32 %v4881_v44, %v11283_v62  ;;  %v4882_v53 = vpop.f32.mrb[222].mxu1 }
 0x2b5   :  { %v4883_v15 = vpop.f32.mrb[223].mxu1 }
 0x2b6   :  { %v4884_v4 = vadd.f32 %v4883_v15, %v4882_v53 }
 0x2b8   :  { %v11336_v37 = vadd.f32 %v4884_v4, %v11288_v11  ;;  %v4917_v2 = vpop.f32.mrb[224].mxu1 }
 0x2b9   :  { %v4918_v0 = vpop.f32.mrb[225].mxu1 }
 0x2ba   :  { %v4919_v40 = vadd.f32 %v4918_v0, %v4917_v2 }
 0x2bc   :  { %v11339_v21 = vadd.f32 %v4919_v40, %v11291_v24  ;;  %v4920_v5 = vpop.f32.mrb[226].mxu1 }
 0x2bd   :  { %v4921_v17 = vpop.f32.mrb[227].mxu1 }
 0x2be   :  { %v4922_v46 = vadd.f32 %v4921_v17, %v4920_v5 }
 0x2c0   :  { %v11342_v9 = vadd.f32 %v4922_v46, %v11294_v20  ;;  %v4923_v62 = vpop.f32.mrb[228].mxu1 }
 0x2c1   :  { %v4924_v59 = vpop.f32.mrb[229].mxu1 }
 0x2c2   :  { %v4925_v55 = vadd.f32 %v4924_v59, %v4923_v62 }
 0x2c4   :  { %v11345_v43 = vadd.f32 %v4925_v55, %v11297_v6  ;;  %v4926_v11 = vpop.f32.mrb[230].mxu1 }
 0x2c5   :  { %v4927_v36 = vpop.f32.mrb[231].mxu1 }
 0x2c6   :  { %v4928_v27 = vadd.f32 %v4927_v36, %v4926_v11 }
 0x2c8   :  { %v11348_v48 = vadd.f32 %v4928_v27, %v11300_v33  ;;  %v4929_v24 = vpop.f32.mrb[232].mxu1 }
 0x2c9   :  { %v4930_v50 = vpop.f32.mrb[233].mxu1 }
 0x2ca   :  { %v4931_v54 = vadd.f32 %v4930_v50, %v4929_v24 }
 0x2cc   :  { %v11351_v57 = vadd.f32 %v4931_v54, %v11303_v60  ;;  %v4932_v20 = vpop.f32.mrb[234].mxu1 }
 0x2cd   :  { %v4933_v41 = vpop.f32.mrb[235].mxu1 }
 0x2ce   :  { %v4934_v18 = vadd.f32 %v4933_v41, %v4932_v20 }
 0x2d0   :  { %v11354_v49 = vadd.f32 %v4934_v18, %v11306_v16  ;;  %v4935_v6 = vpop.f32.mrb[236].mxu1 }
 0x2d1   :  { %v4936_v39 = vpop.f32.mrb[237].mxu1 }
 0x2d2   :  { %v4937_v3 = vadd.f32 %v4936_v39, %v4935_v6 }
 0x2d4   :  { %v11357_v8 = vadd.f32 %v4937_v3, %v11309_v45  ;;  %v4938_v33 = vpop.f32.mrb[238].mxu1 }
 0x2d5   :  { %v4939_v32 = vpop.f32.mrb[239].mxu1 }
 0x2d6   :  { %v4940_v19 = vadd.f32 %v4939_v32, %v4938_v33 }
 0x2d8   :  { %v11360_v51 = vadd.f32 %v4940_v19, %v11312_v47  ;;  %v4941_v60 = vpop.f32.mrb[240].mxu1 }
 0x2d9   :  { %v4942_v7 = vpop.f32.mrb[241].mxu1 }
 0x2da   :  { %v4943_v28 = vadd.f32 %v4942_v7, %v4941_v60 }
 0x2dc   :  { %v11363_v31 = vadd.f32 %v4943_v28, %v11315_v10  ;;  %v4944_v16 = vpop.f32.mrb[242].mxu1 }
 0x2dd   :  { %v4945_v63 = vpop.f32.mrb[243].mxu1 }
 0x2de   :  { %v4946_v42 = vadd.f32 %v4945_v63, %v4944_v16 }
 0x2e0   :  { %v11366_v14 = vadd.f32 %v4946_v42, %v11318_v1  ;;  %v4947_v45 = vpop.f32.mrb[244].mxu1 }
 0x2e1   :  { %v4948_v30 = vpop.f32.mrb[245].mxu1 }
 0x2e2   :  { %v4949_v56 = vadd.f32 %v4948_v30, %v4947_v45  ;;  %v1170_v30 = vsub.s32 0, %v8786_v61 }
 0x2e4   :  { %v11369_v34 = vadd.f32 %v4949_v56, %v11321_v26  ;;  %v4950_v47 = vpop.f32.mrb[246].mxu1 }
 0x2e5   :  { %v4951_v38 = vpop.f32.mrb[247].mxu1 }
 0x2e6   :  { %v4952_v22 = vadd.f32 %v4951_v38, %v4950_v47  ;;  %v1174_v47 = vsub.s32 1, %v8786_v61 }
 0x2e8   :  { %v11372_v58 = vadd.f32 %v4952_v22, %v11324_v52  ;;  %v4953_v10 = vpop.f32.mrb[248].mxu1 }
 0x2e9   :  { %v4954_v25 = vpop.f32.mrb[249].mxu1 }
 0x2ea   :  { %v4955_v13 = vadd.f32 %v4954_v25, %v4953_v10 }
 0x2ec   :  { %v11375_v23 = vadd.f32 %v4955_v13, %v11327_v12  ;;  %v4956_v1 = vpop.f32.mrb[250].mxu1 }
 0x2ed   :  { %v4957_v44 = vpop.f32.mrb[251].mxu1 }
 0x2ee   :  { %v4958_v53 = vadd.f32 %v4957_v44, %v4956_v1  ;;  %v6389_v1 = vld [vmem:[%s11598_s2] sm:$0x7] }
 0x2f0   :  { %v11378_v15 = vadd.f32 %v4958_v53, %v11330_v29  ;;  %v4959_v26 = vpop.f32.mrb[252].mxu1  ;;  %v11400_v53 = vrot.slane %v6389_v1, %v1174_v47 }
 0x2f1   :  { %v4960_v4 = vpop.f32.mrb[253].mxu1 }
 0x2f2   :  { %v4961_v2 = vadd.f32 %v4960_v4, %v4959_v26 }
 0x2f4   :  { %v11381_v0 = vadd.f32 %v4961_v2, %v11333_v35  ;;  %v4962_v52 = vpop.f32.mrb[254].mxu1 }
 0x2f5   :  { %v4963_v40 = vpop.f32.mrb[255].mxu1 }
 0x2f6   :  { %v4964_v5 = vadd.f32 %v4963_v40, %v4962_v52 }
 0x2f8   :  { %v11384_v17 = vadd.f32 %v4964_v5, %v11336_v37  ;;  %v4997_v12 = vpop.f32.mrb[0].mxu1 }
 0x2f9   :  { %v4998_v46 = vpop.f32.mrb[1].mxu1 }
 0x2fa   :  { %v4999_v62 = vadd.f32 %v4998_v46, %v4997_v12 }
 0x2fc   :  { %v3859_v59 = vadd.f32 %v4999_v62, %v11339_v21  ;;  %v5000_v55 = vpop.f32.mrb[2].mxu1 }
 0x2fd   :  { %v5001_v29 = vpop.f32.mrb[3].mxu1 }
 0x2fe   :  { %v4279_v11 = vmul.f32 -1.442695, %v3859_v59  ;;  %v5002_v36 = vadd.f32 %v5001_v29, %v5000_v55 }
 0x300   :  { %6197 = vpow2.f32 %v4279_v11  ;;  %v3864_v27 = vadd.f32 %v5002_v36, %v11342_v9  ;;  %v5003_v35 = vpop.f32.mrb[4].mxu1 }
 0x301   :  { %v5004_v24 = vpop.f32.mrb[5].mxu1 }
 0x302   :  { %v4282_v50 = vmul.f32 -1.442695, %v3864_v27  ;;  %v5005_v54 = vadd.f32 %v5004_v24, %v5003_v35 }
 0x304   :  { %6199 = vpow2.f32 %v4282_v50  ;;  %v3869_v37 = vadd.f32 %v5005_v54, %v11345_v43  ;;  %v5006_v20 = vpop.f32.mrb[6].mxu1 }
 0x305   :  { %v5007_v41 = vpop.f32.mrb[7].mxu1 }
 0x306   :  { %v4285_v18 = vmul.f32 -1.442695, %v3869_v37  ;;  %v5008_v6 = vadd.f32 %v5007_v41, %v5006_v20 }
 0x308   :  { %6201 = vpow2.f32 %v4285_v18  ;;  %v3874_v21 = vadd.f32 %v5008_v6, %v11348_v48  ;;  %v5009_v39 = vpop.f32.mrb[8].mxu1 }
 0x309   :  { %v5010_v3 = vpop.f32.mrb[9].mxu1 }
 0x30a   :  { %v6198_v33 = vpop.eup %6197  ;;  %v4288_v32 = vmul.f32 -1.442695, %v3874_v21  ;;  %v5011_v19 = vadd.f32 %v5010_v3, %v5009_v39 }
 0x30b   :  { %v4083_v9 = vadd.f32 1.0, %v6198_v33 }
 0x30c   :  { %6203 = vpow2.f32 %v4288_v32  ;;  %v3879_v60 = vadd.f32 %v5011_v19, %v11351_v57  ;;  %v5012_v7 = vpop.f32.mrb[10].mxu1 }
 0x30d   :  { %6205 = vrcp.f32 %v4083_v9  ;;  %v5013_v28 = vpop.f32.mrb[11].mxu1 }
 0x30e   :  { %v6200_v43 = vpop.eup %6199  ;;  %v4291_v16 = vmul.f32 -1.442695, %v3879_v60  ;;  %v5014_v63 = vadd.f32 %v5013_v28, %v5012_v7 }
 0x30f   :  { %v4086_v42 = vadd.f32 1.0, %v6200_v43 }
 0x310   :  { %6207 = vpow2.f32 %v4291_v16  ;;  %v3884_v45 = vadd.f32 %v5014_v63, %v11354_v49  ;;  %v5015_v48 = vpop.f32.mrb[12].mxu1  ;;  %v11398_v49 = vrot.slane %v6389_v1, %v1170_v30 }
 0x311   :  { %6209 = vrcp.f32 %v4086_v42  ;;  %v5016_v56 = vpop.f32.mrb[13].mxu1 }
 0x312   :  { %v6202_v38 = vpop.eup %6201  ;;  %v4294_v22 = vmul.f32 -1.442695, %v3884_v45  ;;  %v5017_v57 = vadd.f32 %v5016_v56, %v5015_v48 }
 0x313   :  { %v4089_v10 = vadd.f32 1.0, %v6202_v38 }
 0x314   :  { %6211 = vpow2.f32 %v4294_v22  ;;  %v3889_v25 = vadd.f32 %v5017_v57, %v11357_v8  ;;  %v5018_v13 = vpop.f32.mrb[14].mxu1 }
 0x315   :  { %6213 = vrcp.f32 %v4089_v10  ;;  %v5019_v44 = vpop.f32.mrb[15].mxu1 }
 0x316   :  { %v6204_v26 = vpop.eup %6203  ;;  %v4297_v61 = vmul.f32 -1.442695, %v3889_v25  ;;  %v5020_v4 = vadd.f32 %v5019_v44, %v5018_v13 }
 0x317   :  { %v6206_v2 = vpop.eup %6205  ;;  %v4092_v52 = vadd.f32 1.0, %v6204_v26  ;;  %v2537_v40 = vpop.f32.mrb[0].mxu0 }
 0x318   :  { %4227 = vst [vmem:[%s11599_s3 + $0x10] sm:$0xff] %v6206_v2  ;;  %6215 = vpow2.f32 %v4297_v61  ;;  %v3894_v8 = vadd.f32 %v5020_v4, %v11360_v51  ;;  %v5909_v5 = vadd.f32 %v2537_v40, %v11398_v49  ;;  %v5021_v12 = vpop.f32.mrb[16].mxu1  ;;  %v2539_v46 = vpop.f32.mrb[1].mxu0 }
 0x319   :  { %6217 = vrcp.f32 %v4092_v52  ;;  %v5910_v62 = vadd.f32 %v2539_v46, %v11400_v53  ;;  %v5022_v59 = vpop.f32.mrb[17].mxu1 }
 0x31a   :  { %v6208_v55 = vpop.eup %6207  ;;  %v4300_v29 = vmul.f32 -1.442695, %v3894_v8  ;;  %v4277_v11 = vmul.f32 -1.442695, %v5909_v5  ;;  %v5023_v36 = vadd.f32 %v5022_v59, %v5021_v12 }
 0x31b   :  { %v6210_v27 = vpop.eup %6209  ;;  %v4095_v35 = vadd.f32 1.0, %v6208_v55  ;;  %v4278_v24 = vmul.f32 -1.442695, %v5910_v62  ;;  %v2543_v50 = vpop.f32.mrb[2].mxu0 }
 0x31c   :  { %4230 = vst [vmem:[%s11599_s3 + $0x28] sm:$0xff] %v6210_v27  ;;  %6219 = vpow2.f32 %v4300_v29  ;;  %v3899_v51 = vadd.f32 %v5023_v36, %v11363_v31  ;;  %v5911_v54 = vadd.f32 %v2543_v50, %v11398_v49  ;;  %v5024_v37 = vpop.f32.mrb[18].mxu1  ;;  %v2545_v20 = vpop.f32.mrb[3].mxu0 }
 0x31d   :  { %6221 = vrcp.f32 %v4095_v35  ;;  %v5912_v41 = vadd.f32 %v2545_v20, %v11400_v53  ;;  %v5025_v18 = vpop.f32.mrb[19].mxu1 }
 0x31e   :  { %v6212_v6 = vpop.eup %6211  ;;  %6223 = vpow2.f32 %v4277_v11  ;;  %v4303_v21 = vmul.f32 -1.442695, %v3899_v51  ;;  %v4280_v39 = vmul.f32 -1.442695, %v5911_v54  ;;  %v5026_v3 = vadd.f32 %v5025_v18, %v5024_v37 }
 0x31f   :  { %v6214_v33 = vpop.eup %6213  ;;  %v4098_v32 = vadd.f32 1.0, %v6212_v6  ;;  %6225 = vpow2.f32 %v4278_v24  ;;  %v4281_v19 = vmul.f32 -1.442695, %v5912_v41  ;;  %v2549_v9 = vpop.f32.mrb[4].mxu0 }
 0x320   :  { %4233 = vst [vmem:[%s11599_s3 + $0x40] sm:$0xff] %v6214_v33  ;;  %6227 = vpow2.f32 %v4303_v21  ;;  %v3904_v31 = vadd.f32 %v5026_v3, %v11366_v14  ;;  %v5913_v60 = vadd.f32 %v2549_v9, %v11398_v49  ;;  %v5027_v7 = vpop.f32.mrb[20].mxu1  ;;  %v2551_v28 = vpop.f32.mrb[5].mxu0 }
 0x321   :  { %6229 = vrcp.f32 %v4098_v32  ;;  %v5914_v43 = vadd.f32 %v2551_v28, %v11400_v53  ;;  %v5028_v16 = vpop.f32.mrb[21].mxu1 }
 0x322   :  { %v6216_v63 = vpop.eup %6215  ;;  %6231 = vpow2.f32 %v4280_v39  ;;  %v4306_v42 = vmul.f32 -1.442695, %v3904_v31  ;;  %v4283_v45 = vmul.f32 -1.442695, %v5913_v60  ;;  %v5029_v48 = vadd.f32 %v5028_v16, %v5027_v7 }
 0x323   :  { %v6218_v30 = vpop.eup %6217  ;;  %v4101_v56 = vadd.f32 1.0, %v6216_v63  ;;  %6233 = vpow2.f32 %v4281_v19  ;;  %v4284_v47 = vmul.f32 -1.442695, %v5914_v43  ;;  %v2555_v38 = vpop.f32.mrb[6].mxu0 }
 0x324   :  { %4236 = vst [vmem:[%s11599_s3 + $0x58] sm:$0xff] %v6218_v30  ;;  %6235 = vpow2.f32 %v4306_v42  ;;  %v3909_v14 = vadd.f32 %v5029_v48, %v11369_v34  ;;  %v5915_v22 = vadd.f32 %v2555_v38, %v11398_v49  ;;  %v5030_v57 = vpop.f32.mrb[22].mxu1  ;;  %v2557_v10 = vpop.f32.mrb[7].mxu0 }
 0x325   :  { %6237 = vrcp.f32 %v4101_v56  ;;  %v5916_v25 = vadd.f32 %v2557_v10, %v11400_v53  ;;  %v5031_v13 = vpop.f32.mrb[23].mxu1 }
 0x326   :  { %v6220_v1 = vpop.eup %6219  ;;  %6239 = vpow2.f32 %v4283_v45  ;;  %v4309_v44 = vmul.f32 -1.442695, %v3909_v14  ;;  %v4286_v26 = vmul.f32 -1.442695, %v5915_v22  ;;  %v5032_v61 = vadd.f32 %v5031_v13, %v5030_v57 }
 0x327   :  { %v6222_v4 = vpop.eup %6221  ;;  %v4104_v2 = vadd.f32 1.0, %v6220_v1  ;;  %6241 = vpow2.f32 %v4284_v47  ;;  %v2561_v52 = vpop.f32.mrb[8].mxu0  ;;  %v4287_v29 = vmul.f32 -1.442695, %v5916_v25 }
 0x328   :  { %v6224_v40 = vpop.eup %6223  ;;  %4239 = vst [vmem:[%s11599_s3 + $0x70] sm:$0xff] %v6222_v4  ;;  %6243 = vpow2.f32 %v4309_v44  ;;  %v3914_v34 = vadd.f32 %v5032_v61, %v11372_v58  ;;  %v5033_v8 = vpop.f32.mrb[24].mxu1  ;;  %v5917_v37 = vadd.f32 %v2561_v52, %v11398_v49 }
 0x329   :  { %v2563_v5 = vpop.f32.mrb[9].mxu0  ;;  %v6226_v12 = vpop.eup %6225  ;;  %6245 = vrcp.f32 %v4104_v2  ;;  %v4081_v46 = vadd.f32 1.0, %v6224_v40 }
 0x32a   :  { %v5034_v62 = vpop.f32.mrb[25].mxu1  ;;  %v6228_v59 = vpop.eup %6227  ;;  %v4082_v55 = vadd.f32 1.0, %v6226_v12  ;;  %6247 = vpow2.f32 %v4286_v26  ;;  %v4312_v21 = vmul.f32 -1.442695, %v3914_v34  ;;  %v5918_v9 = vadd.f32 %v2563_v5, %v11400_v53 }
 0x32b   :  { %v6230_v11 = vpop.eup %6229  ;;  %6249 = vrcp.f32 %v4081_v46  ;;  %v4107_v36 = vadd.f32 1.0, %v6228_v59  ;;  %v5035_v27 = vadd.f32 %v5034_v62, %v5033_v8  ;;  %v2567_v35 = vpop.f32.mrb[10].mxu0  ;;  %v4289_v42 = vmul.f32 -1.442695, %v5917_v37 }
 0x32c   :  { %v6232_v24 = vpop.eup %6231  ;;  %4242 = vst [vmem:[%s11599_s3 + $0x88] sm:$0xff] %v6230_v11  ;;  %6251 = vrcp.f32 %v4082_v55  ;;  %v5036_v58 = vpop.f32.mrb[26].mxu1  ;;  %v5919_v45 = vadd.f32 %v2567_v35, %v11398_v49 }
 0x32d   :  { %v2569_v50 = vpop.f32.mrb[11].mxu0  ;;  %v6234_v51 = vpop.eup %6233  ;;  %6253 = vrcp.f32 %v4107_v36  ;;  %v4084_v54 = vadd.f32 1.0, %v6232_v24  ;;  %v3919_v20 = vadd.f32 %v5035_v27, %v11375_v23 }
 0x32e   :  { %v5037_v41 = vpop.f32.mrb[27].mxu1  ;;  %v6236_v18 = vpop.eup %6235  ;;  %v4085_v6 = vadd.f32 1.0, %v6234_v51  ;;  %6255 = vpow2.f32 %v4287_v29  ;;  %v5920_v14 = vadd.f32 %v2569_v50, %v11400_v53  ;;  %v4292_v61 = vmul.f32 -1.442695, %v5919_v45 }
 0x32f   :  { %v5038_v39 = vadd.f32 %v5037_v41, %v5036_v58  ;;  %v6238_v3 = vpop.eup %6237  ;;  %6257 = vrcp.f32 %v4084_v54  ;;  %v4110_v33 = vadd.f32 1.0, %v6236_v18  ;;  %v2573_v32 = vpop.f32.mrb[12].mxu0  ;;  %v4315_v13 = vmul.f32 -1.442695, %v3919_v20 }
 0x330   :  { %v6240_v19 = vpop.eup %6239  ;;  %4245 = vst [vmem:[%s11599_s3 + $0xa0] sm:$0xff] %v6238_v3  ;;  %6259 = vrcp.f32 %v4085_v6  ;;  %v5039_v31 = vpop.f32.mrb[28].mxu1  ;;  %v5921_v4 = vadd.f32 %v2573_v32, %v11398_v49 }
 0x331   :  { %v3924_v23 = vadd.f32 %v5038_v39, %v11378_v15  ;;  %v2575_v60 = vpop.f32.mrb[13].mxu0  ;;  %v6242_v7 = vpop.eup %6241  ;;  %6261 = vrcp.f32 %v4110_v33  ;;  %v4087_v28 = vadd.f32 1.0, %v6240_v19  ;;  %v4290_v15 = vmul.f32 -1.442695, %v5918_v9 }
 0x332   :  { %v5040_v43 = vpop.f32.mrb[29].mxu1  ;;  %v6244_v16 = vpop.eup %6243  ;;  %v4088_v63 = vadd.f32 1.0, %v6242_v7  ;;  %6263 = vpow2.f32 %v4312_v21  ;;  %v5922_v8 = vadd.f32 %v2575_v60, %v11400_v53  ;;  %v4295_v29 = vmul.f32 -1.442695, %v5921_v4 }
 0x333   :  { %v6246_v48 = vpop.eup %6245  ;;  %6265 = vrcp.f32 %v4087_v28  ;;  %v4113_v30 = vadd.f32 1.0, %v6244_v16  ;;  %v5041_v56 = vadd.f32 %v5040_v43, %v5039_v31  ;;  %v2579_v47 = vpop.f32.mrb[14].mxu0  ;;  %v4318_v59 = vmul.f32 -1.442695, %v3924_v23 }
 0x334   :  { %v6248_v38 = vpop.eup %6247  ;;  %4248 = vst [vmem:[%s11599_s3 + $0xb8] sm:$0xff] %v6246_v48  ;;  %6267 = vrcp.f32 %v4088_v63  ;;  %v5042_v22 = vpop.f32.mrb[30].mxu1  ;;  %v5923_v11 = vadd.f32 %v2579_v47, %v11398_v49  ;;  %v4296_v35 = vmul.f32 -1.442695, %v5922_v8 }
 0x335   :  { %v2581_v57 = vpop.f32.mrb[15].mxu0  ;;  %v6250_v10 = vpop.eup %6249  ;;  %6269 = vrcp.f32 %v4113_v30  ;;  %v4090_v25 = vadd.f32 1.0, %v6248_v38  ;;  %v3929_v1 = vadd.f32 %v5041_v56, %v11381_v0  ;;  %v4293_v0 = vmul.f32 -1.442695, %v5920_v14 }
 0x336   :  { %v5043_v44 = vpop.f32.mrb[31].mxu1  ;;  %v6252_v26 = vpop.eup %6251  ;;  %4225 = vst [vmem:[%s11599_s3] sm:$0xff] %v6250_v10  ;;  %6271 = vpow2.f32 %v4289_v42  ;;  %v5924_v24 = vadd.f32 %v2581_v57, %v11400_v53  ;;  %v4298_v20 = vmul.f32 -1.442695, %v5923_v11 }
 0x337   :  { %v5044_v2 = vadd.f32 %v5043_v44, %v5042_v22  ;;  %v6254_v52 = vpop.eup %6253  ;;  %4226 = vst [vmem:[%s11599_s3 + $0x8] sm:$0xff] %v6252_v26  ;;  %6273 = vrcp.f32 %v4090_v25  ;;  %v2585_v40 = vpop.f32.mrb[16].mxu0  ;;  %v4321_v54 = vmul.f32 -1.442695, %v3929_v1 }
 0x338   :  { %v6256_v34 = vpop.eup %6255  ;;  %4251 = vst [vmem:[%s11599_s3 + $0xd0] sm:$0xff] %v6254_v52  ;;  %6275 = vpow2.f32 %v4290_v15  ;;  %v11458_v12 = vpop.f32.mrb[17].mxu0  ;;  %v4299_v21 = vmul.f32 -1.442695, %v5924_v24  ;;  %v5925_v28 = vadd.f32 %v2585_v40, %v11398_v49 }
 0x339   :  { %v3934_v5 = vadd.f32 %v5044_v2, %v11384_v17  ;;  %v6258_v46 = vpop.eup %6257  ;;  %v4091_v62 = vadd.f32 1.0, %v6256_v34  ;;  %6277 = vpow2.f32 %v4315_v13  ;;  %v5926_v15 = vadd.f32 %v11458_v12, %v11400_v53 }
 0x33a   :  { %v6260_v55 = vpop.eup %6259  ;;  %4228 = vst [vmem:[%s11599_s3 + $0x18] sm:$0xff] %v6258_v46  ;;  %6279 = vpow2.f32 %v4292_v61  ;;  %v4301_v38 = vmul.f32 -1.442695, %v5925_v28 }
 0x33b   :  { %v6262_v36 = vpop.eup %6261  ;;  %4229 = vst [vmem:[%s11599_s3 + $0x20] sm:$0xff] %v6260_v55  ;;  %6281 = vrcp.f32 %v4091_v62  ;;  %v2591_v17 = vpop.f32.mrb[18].mxu0  ;;  %v4324_v7 = vmul.f32 -1.442695, %v3934_v5  ;;  %v4302_v2 = vmul.f32 -1.442695, %v5926_v15 }
 0x33c   :  { %v6264_v27 = vpop.eup %6263  ;;  %4254 = vst [vmem:[%s11599_s3 + $0xe8] sm:$0xff] %v6262_v36  ;;  %6283 = vpow2.f32 %v4293_v0  ;;  %v2593_v58 = vpop.f32.mrb[19].mxu0  ;;  %v5927_v25 = vadd.f32 %v2591_v17, %v11398_v49 }
 0x33d   :  { %v6266_v50 = vpop.eup %6265  ;;  %v4116_v51 = vadd.f32 1.0, %v6264_v27  ;;  %6285 = vpow2.f32 %v4318_v59  ;;  %v5928_v44 = vadd.f32 %v2593_v58, %v11400_v53 }
 0x33e   :  { %v6268_v37 = vpop.eup %6267  ;;  %4231 = vst [vmem:[%s11599_s3 + $0x30] sm:$0xff] %v6266_v50  ;;  %6287 = vpow2.f32 %v4295_v29  ;;  %v4304_v12 = vmul.f32 -1.442695, %v5927_v25 }
 0x33f   :  { %v6270_v41 = vpop.eup %6269  ;;  %4232 = vst [vmem:[%s11599_s3 + $0x38] sm:$0xff] %v6268_v37  ;;  %6289 = vrcp.f32 %v4116_v51  ;;  %v2597_v18 = vpop.f32.mrb[20].mxu0  ;;  %v4305_v55 = vmul.f32 -1.442695, %v5928_v44 }
 0x340   :  { %v6272_v6 = vpop.eup %6271  ;;  %4257 = vst [vmem:[%s11599_s3 + $0x100] sm:$0xff] %v6270_v41  ;;  %6291 = vpow2.f32 %v4296_v35  ;;  %v2599_v39 = vpop.f32.mrb[21].mxu0  ;;  %v5929_v52 = vadd.f32 %v2597_v18, %v11398_v49 }
 0x341   :  { %v6274_v3 = vpop.eup %6273  ;;  %v4093_v33 = vadd.f32 1.0, %v6272_v6  ;;  %6293 = vpow2.f32 %v4321_v54  ;;  %v5930_v46 = vadd.f32 %v2599_v39, %v11400_v53 }
 0x342   :  { %v6276_v32 = vpop.eup %6275  ;;  %4234 = vst [vmem:[%s11599_s3 + $0x48] sm:$0xff] %v6274_v3  ;;  %6295 = vpow2.f32 %v4298_v20  ;;  %v4307_v17 = vmul.f32 -1.442695, %v5929_v52 }
 0x343   :  { %v6278_v19 = vpop.eup %6277  ;;  %6297 = vrcp.f32 %v4093_v33  ;;  %v4094_v9 = vadd.f32 1.0, %v6276_v32  ;;  %v2603_v23 = vpop.f32.mrb[22].mxu0  ;;  %v4308_v54 = vmul.f32 -1.442695, %v5930_v46 }
 0x344   :  { %v6280_v31 = vpop.eup %6279  ;;  %v4119_v60 = vadd.f32 1.0, %v6278_v19  ;;  %6299 = vpow2.f32 %v4299_v21  ;;  %v2605_v43 = vpop.f32.mrb[23].mxu0  ;;  %v5931_v29 = vadd.f32 %v2603_v23, %v11398_v49 }
 0x345   :  { %v6282_v16 = vpop.eup %6281  ;;  %6301 = vrcp.f32 %v4094_v9  ;;  %v4096_v63 = vadd.f32 1.0, %v6280_v31  ;;  %v5932_v27 = vadd.f32 %v2605_v43, %v11400_v53 }
 0x346   :  { %v6284_v42 = vpop.eup %6283  ;;  %4235 = vst [vmem:[%s11599_s3 + $0x50] sm:$0xff] %v6282_v16  ;;  %6303 = vrcp.f32 %v4119_v60  ;;  %v4310_v18 = vmul.f32 -1.442695, %v5931_v29 }
 0x347   :  { %v6286_v45 = vpop.eup %6285  ;;  %6305 = vrcp.f32 %v4096_v63  ;;  %v4097_v48 = vadd.f32 1.0, %v6284_v42  ;;  %v2609_v30 = vpop.f32.mrb[24].mxu0  ;;  %v4311_v3 = vmul.f32 -1.442695, %v5932_v27 }
 0x348   :  { %v6288_v56 = vpop.eup %6287  ;;  %v4122_v47 = vadd.f32 1.0, %v6286_v45  ;;  %6307 = vpow2.f32 %v4324_v7  ;;  %v2611_v14 = vpop.f32.mrb[25].mxu0  ;;  %v5933_v37 = vadd.f32 %v2609_v30, %v11398_v49 }
 0x349   :  { %v6290_v22 = vpop.eup %6289  ;;  %6309 = vrcp.f32 %v4097_v48  ;;  %v4099_v57 = vadd.f32 1.0, %v6288_v56  ;;  %v5934_v6 = vadd.f32 %v2611_v14, %v11400_v53 }
 0x34a   :  { %v6292_v10 = vpop.eup %6291  ;;  %4260 = vst [vmem:[%s11599_s3 + $0x118] sm:$0xff] %v6290_v22  ;;  %6311 = vrcp.f32 %v4122_v47  ;;  %v4313_v60 = vmul.f32 -1.442695, %v5933_v37 }
 0x34b   :  { %v6294_v13 = vpop.eup %6293  ;;  %6313 = vrcp.f32 %v4099_v57  ;;  %v4100_v1 = vadd.f32 1.0, %v6292_v10  ;;  %v2615_v26 = vpop.f32.mrb[26].mxu0 }
 0x34c   :  { %v6296_v61 = vpop.eup %6295  ;;  %v4125_v4 = vadd.f32 1.0, %v6294_v13  ;;  %6315 = vpow2.f32 %v4301_v38  ;;  %v2617_v40 = vpop.f32.mrb[27].mxu0  ;;  %v5935_v33 = vadd.f32 %v2615_v26, %v11398_v49 }
 0x34d   :  { %v6298_v34 = vpop.eup %6297  ;;  %6317 = vrcp.f32 %v4100_v1  ;;  %v4102_v0 = vadd.f32 1.0, %v6296_v61  ;;  %v5936_v8 = vadd.f32 %v2617_v40, %v11400_v53 }
 0x34e   :  { %v6300_v5 = vpop.eup %6299  ;;  %4237 = vst [vmem:[%s11599_s3 + $0x60] sm:$0xff] %v6298_v34  ;;  %6319 = vrcp.f32 %v4125_v4  ;;  %v4316_v16 = vmul.f32 -1.442695, %v5935_v33 }
 0x34f   :  { %v6302_v62 = vpop.eup %6301  ;;  %6321 = vrcp.f32 %v4102_v0  ;;  %v4103_v59 = vadd.f32 1.0, %v6300_v5  ;;  %v2621_v11 = vpop.f32.mrb[28].mxu0  ;;  %v4317_v42 = vmul.f32 -1.442695, %v5936_v8 }
 0x350   :  { %v6304_v36 = vpop.eup %6303  ;;  %4238 = vst [vmem:[%s11599_s3 + $0x68] sm:$0xff] %v6302_v62  ;;  %6323 = vpow2.f32 %v4302_v2  ;;  %v5937_v35 = vadd.f32 %v2621_v11, %v11398_v49  ;;  %v2623_v24 = vpop.f32.mrb[29].mxu0 }
 0x351   :  { %v6306_v58 = vpop.eup %6305  ;;  %4263 = vst [vmem:[%s11599_s3 + $0x130] sm:$0xff] %v6304_v36  ;;  %6325 = vrcp.f32 %v4103_v59  ;;  %v11510_v50 = vadd.f32 %v2623_v24, %v11400_v53 }
 0x352   :  { %v6308_v51 = vpop.eup %6307  ;;  %4240 = vst [vmem:[%s11599_s3 + $0x78] sm:$0xff] %v6306_v58  ;;  %6327 = vpow2.f32 %v4304_v12  ;;  %v4319_v14 = vmul.f32 -1.442695, %v5937_v35 }
 0x353   :  { %v6310_v20 = vpop.eup %6309  ;;  %v4128_v41 = vadd.f32 1.0, %v6308_v51  ;;  %6329 = vpow2.f32 %v4305_v55  ;;  %v2627_v21 = vpop.f32.mrb[30].mxu0  ;;  %v4320_v26 = vmul.f32 -1.442695, %v11510_v50 }
 0x354   :  { %v6312_v39 = vpop.eup %6311  ;;  %4241 = vst [vmem:[%s11599_s3 + $0x80] sm:$0xff] %v6310_v20  ;;  %6331 = vpow2.f32 %v4307_v17  ;;  %v5939_v32 = vadd.f32 %v2627_v21, %v11398_v49  ;;  %v2629_v19 = vpop.f32.mrb[31].mxu0  ;;  %v4314_v49 = vmul.f32 -1.442695, %v5934_v6 }
 0x355   :  { %v6314_v9 = vpop.eup %6313  ;;  %4266 = vst [vmem:[%s11599_s3 + $0x148] sm:$0xff] %v6312_v39  ;;  %6333 = vrcp.f32 %v4128_v41  ;;  %v11526_v23 = vadd.f32 %v2629_v19, %v11400_v53 }
 0x356   :  { %v6316_v31 = vpop.eup %6315  ;;  %4243 = vst [vmem:[%s11599_s3 + $0x90] sm:$0xff] %v6314_v9  ;;  %6335 = vpow2.f32 %v4308_v54  ;;  %v4322_v8 = vmul.f32 -1.442695, %v5939_v32 }
 0x357   :  { %v6318_v7 = vpop.eup %6317  ;;  %v4105_v28 = vadd.f32 1.0, %v6316_v31  ;;  %6337 = vpow2.f32 %v4310_v18  ;;  %v4323_v62 = vmul.f32 -1.442695, %v11526_v23 }
 0x358   :  { %v6320_v43 = vpop.eup %6319  ;;  %4244 = vst [vmem:[%s11599_s3 + $0x98] sm:$0xff] %v6318_v7  ;;  %6339 = vpow2.f32 %v4311_v3 }
 0x359   :  { %v6322_v53 = vpop.eup %6321  ;;  %4269 = vst [vmem:[%s11599_s3 + $0x160] sm:$0xff] %v6320_v43  ;;  %6341 = vrcp.f32 %v4105_v28 }
 0x35a   :  { %v6324_v63 = vpop.eup %6323  ;;  %4246 = vst [vmem:[%s11599_s3 + $0xa8] sm:$0xff] %v6322_v53  ;;  %6343 = vpow2.f32 %v4313_v60 }
 0x35b   :  { %v6326_v45 = vpop.eup %6325  ;;  %v4106_v48 = vadd.f32 1.0, %v6324_v63  ;;  %6345 = vpow2.f32 %v4314_v49 }
 0x35c   :  { %v6328_v30 = vpop.eup %6327  ;;  %4247 = vst [vmem:[%s11599_s3 + $0xb0] sm:$0xff] %v6326_v45  ;;  %6347 = vpow2.f32 %v4316_v16 }
 0x35d   :  { %v6330_v56 = vpop.eup %6329  ;;  %6349 = vrcp.f32 %v4106_v48  ;;  %v4108_v47 = vadd.f32 1.0, %v6328_v30 }
 0x35e   :  { %v6332_v38 = vpop.eup %6331  ;;  %v4109_v15 = vadd.f32 1.0, %v6330_v56  ;;  %6351 = vpow2.f32 %v4317_v42 }
 0x35f   :  { %v6334_v22 = vpop.eup %6333  ;;  %6353 = vrcp.f32 %v4108_v47  ;;  %v4111_v57 = vadd.f32 1.0, %v6332_v38 }
 0x360   :  { %v6336_v10 = vpop.eup %6335  ;;  %4272 = vst [vmem:[%s11599_s3 + $0x178] sm:$0xff] %v6334_v22  ;;  %6355 = vrcp.f32 %v4109_v15 }
 0x361   :  { %v6338_v25 = vpop.eup %6337  ;;  %6357 = vrcp.f32 %v4111_v57  ;;  %v4112_v13 = vadd.f32 1.0, %v6336_v10 }
 0x362   :  { %v6340_v1 = vpop.eup %6339  ;;  %v4114_v44 = vadd.f32 1.0, %v6338_v25  ;;  %6359 = vpow2.f32 %v4319_v14 }
 0x363   :  { %v6342_v61 = vpop.eup %6341  ;;  %6361 = vrcp.f32 %v4112_v13  ;;  %v4115_v4 = vadd.f32 1.0, %v6340_v1 }
 0x364   :  { %v6344_v2 = vpop.eup %6343  ;;  %4249 = vst [vmem:[%s11599_s3 + $0xc0] sm:$0xff] %v6342_v61  ;;  %6363 = vrcp.f32 %v4114_v44 }
 0x365   :  { %v6346_v52 = vpop.eup %6345  ;;  %6365 = vrcp.f32 %v4115_v4  ;;  %v4117_v40 = vadd.f32 1.0, %v6344_v2 }
 0x366   :  { %v6348_v34 = vpop.eup %6347  ;;  %v4118_v0 = vadd.f32 1.0, %v6346_v52  ;;  %6367 = vpow2.f32 %v4320_v26 }
 0x367   :  { %v6350_v5 = vpop.eup %6349  ;;  %6369 = vrcp.f32 %v4117_v40  ;;  %v4120_v12 = vadd.f32 1.0, %v6348_v34 }
 0x368   :  { %v6352_v46 = vpop.eup %6351  ;;  %4250 = vst [vmem:[%s11599_s3 + $0xc8] sm:$0xff] %v6350_v5  ;;  %6371 = vrcp.f32 %v4118_v0 }
 0x369   :  { %v6354_v59 = vpop.eup %6353  ;;  %6373 = vrcp.f32 %v4120_v12  ;;  %v4121_v55 = vadd.f32 1.0, %v6352_v46 }
 0x36a   :  { %v6356_v29 = vpop.eup %6355  ;;  %4252 = vst [vmem:[%s11599_s3 + $0xd8] sm:$0xff] %v6354_v59  ;;  %6375 = vpow2.f32 %v4322_v8 }
 0x36b   :  { %v6358_v11 = vpop.eup %6357  ;;  %4253 = vst [vmem:[%s11599_s3 + $0xe0] sm:$0xff] %v6356_v29  ;;  %6377 = vrcp.f32 %v4121_v55 }
 0x36c   :  { %v6360_v36 = vpop.eup %6359  ;;  %4255 = vst [vmem:[%s11599_s3 + $0xf0] sm:$0xff] %v6358_v11  ;;  %6379 = vpow2.f32 %v4323_v62 }
 0x36d   :  { %v6362_v17 = vpop.eup %6361  ;;  %v4123_v27 = vadd.f32 1.0, %v6360_v36 }
 0x36e   :  { %v6364_v35 = vpop.eup %6363  ;;  %4256 = vst [vmem:[%s11599_s3 + $0xf8] sm:$0xff] %v6362_v17 }
 0x36f   :  { %v6366_v24 = vpop.eup %6365  ;;  %4258 = vst [vmem:[%s11599_s3 + $0x108] sm:$0xff] %v6364_v35  ;;  %6381 = vrcp.f32 %v4123_v27 }
 0x370   :  { %v6368_v58 = vpop.eup %6367  ;;  %4259 = vst [vmem:[%s11599_s3 + $0x110] sm:$0xff] %v6366_v24 }
 0x371   :  { %v6370_v50 = vpop.eup %6369  ;;  %v4124_v51 = vadd.f32 1.0, %v6368_v58 }
 0x372   :  { %v6372_v54 = vpop.eup %6371  ;;  %4261 = vst [vmem:[%s11599_s3 + $0x120] sm:$0xff] %v6370_v50 }
 0x373   :  { %v6374_v37 = vpop.eup %6373  ;;  %4262 = vst [vmem:[%s11599_s3 + $0x128] sm:$0xff] %v6372_v54  ;;  %6383 = vrcp.f32 %v4124_v51 }
 0x374   :  { %v6376_v20 = vpop.eup %6375  ;;  %4264 = vst [vmem:[%s11599_s3 + $0x138] sm:$0xff] %v6374_v37 }
 0x375   :  { %v6378_v41 = vpop.eup %6377  ;;  %v4126_v18 = vadd.f32 1.0, %v6376_v20 }
 0x376   :  { %v6380_v6 = vpop.eup %6379  ;;  %4265 = vst [vmem:[%s11599_s3 + $0x140] sm:$0xff] %v6378_v41 }
 0x377   :  { %6385 = vrcp.f32 %v4126_v18  ;;  %v4127_v21 = vadd.f32 1.0, %v6380_v6 }
 0x379   :  { %v6382_v39 = vpop.eup %6381  ;;  %6387 = vrcp.f32 %v4127_v21 }
 0x37a   :  { %4267 = vst [vmem:[%s11599_s3 + $0x150] sm:$0xff] %v6382_v39 }
 0x37d   :  { %v6384_v3 = vpop.eup %6383 }
 0x37e   :  { %4268 = vst [vmem:[%s11599_s3 + $0x158] sm:$0xff] %v6384_v3 }
 0x381   :  { %v6386_v33 = vpop.eup %6385 }
 0x382   :  { %4270 = vst [vmem:[%s11599_s3 + $0x168] sm:$0xff] %v6386_v33 }
 0x383   :  { %v6388_v32 = vpop.eup %6387 }
 0x384   :  { %4271 = vst [vmem:[%s11599_s3 + $0x170] sm:$0xff] %v6388_v32 }

</bundles_post_ra>
